<compile_context>
chip_gen: v6e
topology: v6e:2x2x1
jax: 0.10.0
libtpu: 0.0.40
codegen_flags: <defaults>
</compile_context>

<pallas_src>
import functools

import jax
import jax.numpy as jnp
from jax.experimental import pallas as pl
from jax.experimental.pallas import tpu as pltpu


# ---------------------------------------------------------------------------
# small helpers
# ---------------------------------------------------------------------------
def _round_up(v, m):
    return -(-v // m) * m


def _pad_channels(c):
    # Don't blow small channel counts up to 128 (review item): pad to a
    # multiple of 128 only when the real count is already >= 128, else to 8.
    return _round_up(c, 128) if c >= 128 else _round_up(c, 8)


def _pad_axis(a, axis, new_size):
    if a.shape[axis] == new_size:
        return a
    widths = [(0, 0)] * a.ndim
    widths[axis] = (0, new_size - a.shape[axis])
    return jnp.pad(a, widths)


def _pick_tile_rows(ho, wo, target_m=4096):
    # Row-tile = divisor of ho such that per-matmul M = rows*wo is a few
    # thousand (keeps MXU full, bounds VMEM) and the tiled output block's
    # second-minor dim (rows*wo) stays a multiple of 8.
    if ho * wo <= 2 * target_m:
        return ho
    cands = [d for d in range(1, ho + 1)
             if ho % d == 0 and (d * wo) % 8 == 0 and d * wo <= 2 * target_m]
    return max(cands) if cands else ho


def _vmem_limit_bytes():
    cap = 128 * 1024 * 1024
    try:
        info = pltpu.get_tpu_info()
        cap = int(getattr(info, "vmem_capacity_bytes", cap))
    except Exception:
        pass
    return int(min(96 * 1024 * 1024, (cap * 3) // 4))


# ---------------------------------------------------------------------------
# kernels
# ---------------------------------------------------------------------------
def _accumulate_taps(x_ref, w_ref, acc_ref, *, th, tw, rows, wo):
    """acc <- sum_t  window_t(x) @ W_t   (f32 accumulation in VMEM scratch).

    x_ref : (1, rows+th-1, wo+tw-1, Ck) bf16   halo'd row band
    w_ref : (th*tw, Ck, Cp)             bf16
    acc_ref: (rows*wo, Cp)              f32    VMEM scratch
    Accumulating through the scratch ref serializes the taps, so only one
    shifted window is live at a time (bounded live ranges).
    """
    ck = x_ref.shape[-1]
    m = rows * wo
    t = 0
    for kh in range(th):
        for kw in range(tw):
            xt = x_ref[0, kh:kh + rows, kw:kw + wo, :].reshape(m, ck)
            prod = jnp.dot(xt, w_ref[t], preferred_element_type=jnp.float32)
            if t == 0:
                acc_ref[...] = prod
            else:
                acc_ref[...] += prod
            t += 1


def _conv_act_kernel(x_ref, w_ref, b_ref, y_ref, acc_ref, *,
                     th, tw, rows, wo, alpha):
    # conv + bias + LeakyReLU (layer 1: no InstanceNorm).
    _accumulate_taps(x_ref, w_ref, acc_ref, th=th, tw=tw, rows=rows, wo=wo)
    z = acc_ref[...] + b_ref[...]
    y_ref[0] = jnp.where(z >= 0.0, z, alpha * z).astype(y_ref.dtype)


def _conv_stats_kernel(x_ref, w_ref, b_ref, y_ref, s1_ref, s2_ref, acc_ref, *,
                       th, tw, rows, wo):
    # Pass 1 of InstanceNorm layers: conv + bias, plus per-image/per-channel
    # sum and sum-of-squares accumulated across the row-tile grid axis.
    _accumulate_taps(x_ref, w_ref, acc_ref, th=th, tw=tw, rows=rows, wo=wo)
    y = acc_ref[...] + b_ref[...]                       # (rows*wo, Cp) f32
    y_ref[0] = y.astype(y_ref.dtype)

    @pl.when(pl.program_id(1) == 0)
    def _():
        s1_ref[...] = jnp.zeros_like(s1_ref)
        s2_ref[...] = jnp.zeros_like(s2_ref)

    s1_ref[0] = s1_ref[0] + jnp.sum(y, axis=0, keepdims=True)
    s2_ref[0] = s2_ref[0] + jnp.sum(y * y, axis=0, keepdims=True)


def _norm_act_kernel(y_ref, s1_ref, s2_ref, o_ref, *, inv_count, eps, alpha):
    # Pass 2: fused InstanceNorm + LeakyReLU in a single elementwise pass:
    # out = lrelu(y*scale + shift), per-channel scale/shift from the stats.
    mean = s1_ref[0] * inv_count                        # (1, Cp) f32
    var = jnp.maximum(s2_ref[0] * inv_count - mean * mean, 0.0)
    scale = jax.lax.rsqrt(var + eps)
    shift = -mean * scale
    z = y_ref[0].astype(jnp.float32) * scale + shift
    o_ref[0] = jnp.where(z >= 0.0, z, alpha * z).astype(o_ref.dtype)


def _conv_pool_kernel(x_ref, w_ref, b_ref, o_ref, acc_ref, *,
                      th, tw, rows, wo, inv_count):
    # Final layer: conv accumulated in f32; global avg-pool folded into a
    # resident (1,1,Cp) output block (one row-sum per tile), finalized with
    # *1/M + bias at the last row tile.
    _accumulate_taps(x_ref, w_ref, acc_ref, th=th, tw=tw, rows=rows, wo=wo)

    @pl.when(pl.program_id(1) == 0)
    def _():
        o_ref[...] = jnp.zeros_like(o_ref)

    o_ref[0] = o_ref[0] + jnp.sum(acc_ref[...], axis=0, keepdims=True)

    @pl.when(pl.program_id(1) == pl.num_programs(1) - 1)
    def _():
        o_ref[0] = o_ref[0] * inv_count + b_ref[...]


# ---------------------------------------------------------------------------
# layer wrapper: layout plumbing + pallas_call
# ---------------------------------------------------------------------------
def conv_block(x_nhwc, w, b, *, stride, mode):
    """One discriminator layer.  mode: 'act' | 'norm_act' | 'pool'."""
    n, h, wdt, ca = x_nhwc.shape
    k, pad = 4, 1
    cout = w.shape[3]
    cp = _pad_channels(cout)

    # Zero-pad weight Cin up to the activation channel count and Cout to the
    # padded lane width (padded channels -> exactly-zero outputs).
    w = _pad_axis(w, 2, ca)
    w = _pad_axis(w, 3, cp)
    b = _pad_axis(b, 0, cp)

    ho = (h + 2 * pad - k) // stride + 1
    wo = (wdt + 2 * pad - k) // stride + 1

    x = x_nhwc.astype(jnp.bfloat16)
    xp = jnp.pad(x, ((0, 0), (pad, pad), (pad, pad), (0, 0)))
    if stride == 2:
        # Space-to-depth: 4x4/stride-2 conv == 2x2/stride-1 conv over the 4
        # input phases stacked on channels (no 16x im2col duplication).
        # TODO(synk): fold pad / phase-stack / banding into the kernel DMA.
        phases = [xp[:, p::2, q::2, :] for p in (0, 1) for q in (0, 1)]
        xk = jnp.concatenate(phases, axis=-1)            # (n, ho+1, wo+1, 4*ca)
        wk = (w.reshape(2, 2, 2, 2, ca, cp)
                .transpose(0, 2, 1, 3, 4, 5)
                .reshape(4, 4 * ca, cp))
        th, tw = 2, 2
    else:
        xk = xp                                          # (n, ho+3, wo+3, ca)
        wk = w.reshape(k * k, ca, cp)
        th, tw = 4, 4

    ck = xk.shape[-1]
    wi = wo + tw - 1
    assert xk.shape[1] == ho + th - 1 and xk.shape[2] == wi

    rows = _pick_tile_rows(ho, wo)
    n_tiles = ho // rows
    thi = rows + th - 1
    m_tile = rows * wo
    count = ho * wo

    if n_tiles == 1:
        xb = xk                                          # (n, thi, wi, ck)
    else:
        # Halo-materialized row bands so overlapping conv windows map onto
        # plain non-overlapping BlockSpec blocks (halo = th-1 rows).
        xb = jnp.concatenate(
            [xk[:, i * rows:i * rows + thi][:, None] for i in range(n_tiles)],
            axis=1).reshape(n * n_tiles, thi, wi, ck)

    xb = xb.astype(jnp.bfloat16)
    wk = wk.astype(jnp.bfloat16)
    bk = b.reshape(1, cp).astype(jnp.float32)

    in_specs = [
        pl.BlockSpec((1, thi, wi, ck), lambda i, j: (i * n_tiles + j, 0, 0, 0)),
        pl.BlockSpec(wk.shape, lambda i, j: (0, 0, 0)),
        pl.BlockSpec((1, cp), lambda i, j: (0, 0)),
    ]
    scratch = [pltpu.VMEM((m_tile, cp), jnp.float32)]
    vmem = _vmem_limit_bytes()
    flops = 2 * n * ho * wo * th * tw * ck * cp

    if mode == "pool":
        kern = functools.partial(_conv_pool_kernel, th=th, tw=tw, rows=rows,
                                 wo=wo, inv_count=1.0 / count)
        out = pl.pallas_call(
            kern,
            out_shape=jax.ShapeDtypeStruct((n, 1, cp), jnp.float32),
            grid=(n, n_tiles),
            in_specs=in_specs,
            out_specs=pl.BlockSpec((1, 1, cp), lambda i, j: (i, 0, 0)),
            scratch_shapes=scratch,
            compiler_params=pltpu.CompilerParams(
                dimension_semantics=("parallel", "arbitrary"),
                vmem_limit_bytes=vmem),
            cost_estimate=pl.CostEstimate(
                flops=flops, transcendentals=0,
                bytes_accessed=xb.size * 2 + wk.size * 2 + n * cp * 4),
        )(xb, wk, bk)
        return out[:, 0, :cout]                          # (n, cout) f32

    if mode == "act":
        kern = functools.partial(_conv_act_kernel, th=th, tw=tw, rows=rows,
                                 wo=wo, alpha=0.2)
        y = pl.pallas_call(
            kern,
            out_shape=jax.ShapeDtypeStruct((n, ho * wo, cp), jnp.bfloat16),
            grid=(n, n_tiles),
            in_specs=in_specs,
            out_specs=pl.BlockSpec((1, m_tile, cp), lambda i, j: (i, j, 0)),
            scratch_shapes=scratch,
            compiler_params=pltpu.CompilerParams(
                dimension_semantics=("parallel", "parallel"),
                vmem_limit_bytes=vmem),
            cost_estimate=pl.CostEstimate(
                flops=flops, transcendentals=0,
                bytes_accessed=xb.size * 2 + wk.size * 2 + n * ho * wo * cp * 2),
        )(xb, wk, bk)
        return y.reshape(n, ho, wo, cp)

    # mode == "norm_act": pass 1 conv+bias+stats, pass 2 fused IN + LeakyReLU.
    kern = functools.partial(_conv_stats_kernel, th=th, tw=tw, rows=rows, wo=wo)
    y, s1, s2 = pl.pallas_call(
        kern,
        out_shape=(jax.ShapeDtypeStruct((n, ho * wo, cp), jnp.bfloat16),
                   jax.ShapeDtypeStruct((n, 1, cp), jnp.float32),
                   jax.ShapeDtypeStruct((n, 1, cp), jnp.float32)),
        grid=(n, n_tiles),
        in_specs=in_specs,
        out_specs=(pl.BlockSpec((1, m_tile, cp), lambda i, j: (i, j, 0)),
                   pl.BlockSpec((1, 1, cp), lambda i, j: (i, 0, 0)),
                   pl.BlockSpec((1, 1, cp), lambda i, j: (i, 0, 0))),
        scratch_shapes=scratch,
        compiler_params=pltpu.CompilerParams(
            dimension_semantics=("parallel", "arbitrary"),
            vmem_limit_bytes=vmem),
        cost_estimate=pl.CostEstimate(
            flops=flops, transcendentals=0,
            bytes_accessed=xb.size * 2 + wk.size * 2 + n * ho * wo * cp * 2),
    )(xb, wk, bk)

    nkern = functools.partial(_norm_act_kernel, inv_count=1.0 / count,
                              eps=1e-5, alpha=0.2)
    out = pl.pallas_call(
        nkern,
        out_shape=jax.ShapeDtypeStruct((n, ho * wo, cp), jnp.bfloat16),
        grid=(n, n_tiles),
        in_specs=[pl.BlockSpec((1, m_tile, cp), lambda i, j: (i, j, 0)),
                  pl.BlockSpec((1, 1, cp), lambda i, j: (i, 0, 0)),
                  pl.BlockSpec((1, 1, cp), lambda i, j: (i, 0, 0))],
        out_specs=pl.BlockSpec((1, m_tile, cp), lambda i, j: (i, j, 0)),
        compiler_params=pltpu.CompilerParams(
            dimension_semantics=("parallel", "parallel"),
            vmem_limit_bytes=vmem),
        cost_estimate=pl.CostEstimate(
            flops=4 * n * ho * wo * cp, transcendentals=n * cp,
            bytes_accessed=2 * n * ho * wo * cp * 2),
    )(y, s1, s2)
    return out.reshape(n, ho, wo, cp)


# ---------------------------------------------------------------------------
# full discriminator forward
# ---------------------------------------------------------------------------
def cyclegan_discriminator(x_nchw, params):
    x = jnp.transpose(x_nchw, (0, 2, 3, 1))                 # NCHW -> NHWC
    x = conv_block(x, params["w1"], params["b1"], stride=2, mode="act")
    x = conv_block(x, params["w2"], params["b2"], stride=2, mode="norm_act")
    x = conv_block(x, params["w3"], params["b3"], stride=2, mode="norm_act")
    x = conv_block(x, params["w4"], params["b4"], stride=1, mode="norm_act")
    y = conv_block(x, params["w5"], params["b5"], stride=1, mode="pool")
    return y                                                # (N, output_nc)


def init_params(key, scale=8, output_nc=1, k=4):
    # Weights stored in (kh, kw, Cin, Cout) layout (== PyTorch
    # (Cout, Cin, kh, kw).transpose(2, 3, 1, 0)).
    dims = [(3, scale), (scale, 2 * scale), (2 * scale, 4 * scale),
            (4 * scale, 8 * scale), (8 * scale, output_nc)]
    params = {}
    for idx, (cin, cout) in enumerate(dims, start=1):
        key, kw_, kb_ = jax.random.split(key, 3)
        fan_in = cin * k * k
        bound = 1.0 / float(fan_in) ** 0.5
        params[f"w{idx}"] = jax.random.uniform(
            kw_, (k, k, cin, cout), jnp.float32, -bound, bound)
        params[f"b{idx}"] = jax.random.uniform(
            kb_, (cout,), jnp.float32, -bound, bound)
    return params


if __name__ == "__main__":
    key = jax.random.PRNGKey(0)
    k_x, k_p = jax.random.split(key)

    scale = 8          # small stand-in for the default scale=64
    output_nc = 1
    x = jax.random.normal(k_x, (2, 3, 32, 32), jnp.float32)   # NCHW input
    params = init_params(k_p, scale=scale, output_nc=output_nc)

    fwd = jax.jit(cyclegan_discriminator)
    out = jax.block_until_ready(fwd(x, params))
    assert out.shape == (2, output_nc), out.shape
    assert bool(jnp.all(jnp.isfinite(out)))
    print("KERNEL_OK")
</pallas_src>

<mosaic_0001>
module attributes {stable_mosaic.version = 11 : i64} {
  func.func @_conv_act_kernel(%arg0: i32, %arg1: i32, %arg2: memref<1x17x17x12xbf16, #tpu.memory_space<vmem>>, %arg3: memref<4x12x8xbf16, #tpu.memory_space<vmem>>, %arg4: memref<1x8xf32, #tpu.memory_space<vmem>>, %arg5: memref<1x256x8xbf16, #tpu.memory_space<vmem>>, %arg6: memref<256x8xf32, #tpu.memory_space<vmem>>) attributes {dimension_semantics = [#tpu.dimension_semantics<parallel>, #tpu.dimension_semantics<parallel>], iteration_bounds = array<i64: 2, 1>, scalar_prefetch = 0 : i64, scratch_operands = 1 : i64, tpu.core_type = #tpu.core_type<tc>, window_params = [{transform_indices = @transform_0, window_bounds = array<i64: 1, 17, 17, 12>}, {pipeline_mode = #tpu.pipeline_mode<synchronous>, transform_indices = @transform_1, window_bounds = array<i64: 4, 12, 8>}, {pipeline_mode = #tpu.pipeline_mode<synchronous>, transform_indices = @transform_2, window_bounds = array<i64: 1, 8>}, {transform_indices = @transform_3, window_bounds = array<i64: 1, 256, 8>}]} {
    %c0 = arith.constant 0 : index
    %c0_0 = arith.constant 0 : index
    %c0_1 = arith.constant 0 : index
    %c0_2 = arith.constant 0 : index
    %0 = vector.load %arg2[%c0, %c0_0, %c0_1, %c0_2] : memref<1x17x17x12xbf16, #tpu.memory_space<vmem>>, vector<1x16x16x12xbf16>
    %1 = vector.shape_cast %0 : vector<1x16x16x12xbf16> to vector<16x16x12xbf16>
    %2 = vector.shape_cast %1 : vector<16x16x12xbf16> to vector<256x12xbf16>
    %c0_3 = arith.constant 0 : index
    %c0_4 = arith.constant 0 : index
    %c0_5 = arith.constant 0 : index
    %3 = vector.load %arg3[%c0_3, %c0_4, %c0_5] : memref<4x12x8xbf16, #tpu.memory_space<vmem>>, vector<1x12x8xbf16>
    %4 = vector.shape_cast %3 : vector<1x12x8xbf16> to vector<12x8xbf16>
    %cst = arith.constant dense<0.000000e+00> : vector<256x8xf32>
    %5 = tpu.matmul %2, %4, %cst {dimension_numbers = #tpu.dot_dimension_numbers<[1], [0], [0], [1], [0, 0, 1, 1], [], []>} : vector<256x12xbf16>, vector<12x8xbf16>, vector<256x8xf32> -> vector<256x8xf32>
    %c0_6 = arith.constant 0 : index
    %c0_7 = arith.constant 0 : index
    %6 = vector.load %arg6[%c0_6, %c0_7] : memref<256x8xf32, #tpu.memory_space<vmem>>, vector<256x8xf32>
    tpu.vector_store %arg6[%c0_6, %c0_7], %5 {strides = array<i32>} : memref<256x8xf32, #tpu.memory_space<vmem>>, vector<256x8xf32>,
    %c0_8 = arith.constant 0 : index
    %c0_9 = arith.constant 0 : index
    %c1 = arith.constant 1 : index
    %c0_10 = arith.constant 0 : index
    %7 = vector.load %arg2[%c0_8, %c0_9, %c1, %c0_10] : memref<1x17x17x12xbf16, #tpu.memory_space<vmem>>, vector<1x16x16x12xbf16>
    %8 = vector.shape_cast %7 : vector<1x16x16x12xbf16> to vector<16x16x12xbf16>
    %9 = vector.shape_cast %8 : vector<16x16x12xbf16> to vector<256x12xbf16>
    %c1_11 = arith.constant 1 : index
    %c0_12 = arith.constant 0 : index
    %c0_13 = arith.constant 0 : index
    %10 = vector.load %arg3[%c1_11, %c0_12, %c0_13] : memref<4x12x8xbf16, #tpu.memory_space<vmem>>, vector<1x12x8xbf16>
    %11 = vector.shape_cast %10 : vector<1x12x8xbf16> to vector<12x8xbf16>
    %cst_14 = arith.constant dense<0.000000e+00> : vector<256x8xf32>
    %12 = tpu.matmul %9, %11, %cst_14 {dimension_numbers = #tpu.dot_dimension_numbers<[1], [0], [0], [1], [0, 0, 1, 1], [], []>} : vector<256x12xbf16>, vector<12x8xbf16>, vector<256x8xf32> -> vector<256x8xf32>
    %c0_15 = arith.constant 0 : index
    %c0_16 = arith.constant 0 : index
    %13 = vector.load %arg6[%c0_15, %c0_16] : memref<256x8xf32, #tpu.memory_space<vmem>>, vector<256x8xf32>
    %14 = arith.addf %13, %12 : vector<256x8xf32>
    %c0_17 = arith.constant 0 : index
    %c0_18 = arith.constant 0 : index
    %15 = vector.load %arg6[%c0_17, %c0_18] : memref<256x8xf32, #tpu.memory_space<vmem>>, vector<256x8xf32>
    tpu.vector_store %arg6[%c0_17, %c0_18], %14 {strides = array<i32>} : memref<256x8xf32, #tpu.memory_space<vmem>>, vector<256x8xf32>,
    %c0_19 = arith.constant 0 : index
    %c1_20 = arith.constant 1 : index
    %c0_21 = arith.constant 0 : index
    %c0_22 = arith.constant 0 : index
    %16 = vector.load %arg2[%c0_19, %c1_20, %c0_21, %c0_22] : memref<1x17x17x12xbf16, #tpu.memory_space<vmem>>, vector<1x16x16x12xbf16>
    %17 = vector.shape_cast %16 : vector<1x16x16x12xbf16> to vector<16x16x12xbf16>
    %18 = vector.shape_cast %17 : vector<16x16x12xbf16> to vector<256x12xbf16>
    %c2 = arith.constant 2 : index
    %c0_23 = arith.constant 0 : index
    %c0_24 = arith.constant 0 : index
    %19 = vector.load %arg3[%c2, %c0_23, %c0_24] : memref<4x12x8xbf16, #tpu.memory_space<vmem>>, vector<1x12x8xbf16>
    %20 = vector.shape_cast %19 : vector<1x12x8xbf16> to vector<12x8xbf16>
    %cst_25 = arith.constant dense<0.000000e+00> : vector<256x8xf32>
    %21 = tpu.matmul %18, %20, %cst_25 {dimension_numbers = #tpu.dot_dimension_numbers<[1], [0], [0], [1], [0, 0, 1, 1], [], []>} : vector<256x12xbf16>, vector<12x8xbf16>, vector<256x8xf32> -> vector<256x8xf32>
    %c0_26 = arith.constant 0 : index
    %c0_27 = arith.constant 0 : index
    %22 = vector.load %arg6[%c0_26, %c0_27] : memref<256x8xf32, #tpu.memory_space<vmem>>, vector<256x8xf32>
    %23 = arith.addf %22, %21 : vector<256x8xf32>
    %c0_28 = arith.constant 0 : index
    %c0_29 = arith.constant 0 : index
    %24 = vector.load %arg6[%c0_28, %c0_29] : memref<256x8xf32, #tpu.memory_space<vmem>>, vector<256x8xf32>
    tpu.vector_store %arg6[%c0_28, %c0_29], %23 {strides = array<i32>} : memref<256x8xf32, #tpu.memory_space<vmem>>, vector<256x8xf32>,
    %c0_30 = arith.constant 0 : index
    %c1_31 = arith.constant 1 : index
    %c1_32 = arith.constant 1 : index
    %c0_33 = arith.constant 0 : index
    %25 = vector.load %arg2[%c0_30, %c1_31, %c1_32, %c0_33] : memref<1x17x17x12xbf16, #tpu.memory_space<vmem>>, vector<1x16x16x12xbf16>
    %26 = vector.shape_cast %25 : vector<1x16x16x12xbf16> to vector<16x16x12xbf16>
    %27 = vector.shape_cast %26 : vector<16x16x12xbf16> to vector<256x12xbf16>
    %c3 = arith.constant 3 : index
    %c0_34 = arith.constant 0 : index
    %c0_35 = arith.constant 0 : index
    %28 = vector.load %arg3[%c3, %c0_34, %c0_35] : memref<4x12x8xbf16, #tpu.memory_space<vmem>>, vector<1x12x8xbf16>
    %29 = vector.shape_cast %28 : vector<1x12x8xbf16> to vector<12x8xbf16>
    %cst_36 = arith.constant dense<0.000000e+00> : vector<256x8xf32>
    %30 = tpu.matmul %27, %29, %cst_36 {dimension_numbers = #tpu.dot_dimension_numbers<[1], [0], [0], [1], [0, 0, 1, 1], [], []>} : vector<256x12xbf16>, vector<12x8xbf16>, vector<256x8xf32> -> vector<256x8xf32>
    %c0_37 = arith.constant 0 : index
    %c0_38 = arith.constant 0 : index
    %31 = vector.load %arg6[%c0_37, %c0_38] : memref<256x8xf32, #tpu.memory_space<vmem>>, vector<256x8xf32>
    %32 = arith.addf %31, %30 : vector<256x8xf32>
    %c0_39 = arith.constant 0 : index
    %c0_40 = arith.constant 0 : index
    %33 = vector.load %arg6[%c0_39, %c0_40] : memref<256x8xf32, #tpu.memory_space<vmem>>, vector<256x8xf32>
    tpu.vector_store %arg6[%c0_39, %c0_40], %32 {strides = array<i32>} : memref<256x8xf32, #tpu.memory_space<vmem>>, vector<256x8xf32>,
    %c0_41 = arith.constant 0 : index
    %c0_42 = arith.constant 0 : index
    %34 = vector.load %arg6[%c0_41, %c0_42] : memref<256x8xf32, #tpu.memory_space<vmem>>, vector<256x8xf32>
    %c0_43 = arith.constant 0 : index
    %c0_44 = arith.constant 0 : index
    %35 = vector.load %arg4[%c0_43, %c0_44] : memref<1x8xf32, #tpu.memory_space<vmem>>, vector<1x8xf32>
    %36 = vector.broadcast %35 : vector<1x8xf32> to vector<256x8xf32>
    %37 = arith.addf %34, %36 : vector<256x8xf32>
    %cst_45 = arith.constant 0.000000e+00 : f32
    %38 = vector.broadcast %cst_45 : f32 to vector<256x8xf32>
    %39 = arith.cmpf oge, %37, %38 : vector<256x8xf32>
    %cst_46 = arith.constant 2.000000e-01 : f32
    %40 = vector.broadcast %cst_46 : f32 to vector<256x8xf32>
    %41 = arith.mulf %40, %37 : vector<256x8xf32>
    %42 = arith.select %39, %37, %41 : vector<256x8xi1>, vector<256x8xf32>
    %43 = arith.truncf %42 : vector<256x8xf32> to vector<256x8xbf16>
    %c0_47 = arith.constant 0 : index
    %c0_48 = arith.constant 0 : index
    %c0_49 = arith.constant 0 : index
    %44 = vector.load %arg5[%c0_47, %c0_48, %c0_49] : memref<1x256x8xbf16, #tpu.memory_space<vmem>>, vector<1x256x8xbf16>
    %45 = vector.shape_cast %44 : vector<1x256x8xbf16> to vector<256x8xbf16>
    %46 = vector.shape_cast %43 : vector<256x8xbf16> to vector<1x256x8xbf16>
    tpu.vector_store %arg5[%c0_47, %c0_48, %c0_49], %46 {strides = array<i32>} : memref<1x256x8xbf16, #tpu.memory_space<vmem>>, vector<1x256x8xbf16>,
    return
  }
  func.func @transform_0(%arg0: i32, %arg1: i32) -> (i32, i32, i32, i32) {
    %c1_i32 = arith.constant 1 : i32
    %0 = arith.muli %arg0, %c1_i32 : i32
    %1 = arith.addi %0, %arg1 : i32
    %c0_i32 = arith.constant 0 : i32
    %c0_i32_0 = arith.constant 0 : i32
    %c0_i32_1 = arith.constant 0 : i32
    %c0_i32_2 = arith.constant 0 : i32
    return %1, %c0_i32, %c0_i32_0, %c0_i32_1 : i32, i32, i32, i32
  }
  func.func @transform_1(%arg0: i32, %arg1: i32) -> (i32, i32, i32) {
    %c0_i32 = arith.constant 0 : i32
    %c0_i32_0 = arith.constant 0 : i32
    %c0_i32_1 = arith.constant 0 : i32
    %c0_i32_2 = arith.constant 0 : i32
    return %c0_i32, %c0_i32_0, %c0_i32_1 : i32, i32, i32
  }
  func.func @transform_2(%arg0: i32, %arg1: i32) -> (i32, i32) {
    %c0_i32 = arith.constant 0 : i32
    %c0_i32_0 = arith.constant 0 : i32
    %c0_i32_1 = arith.constant 0 : i32
    return %c0_i32, %c0_i32_0 : i32, i32
  }
  func.func @transform_3(%arg0: i32, %arg1: i32) -> (i32, i32, i32) {
    %c0_i32 = arith.constant 0 : i32
    %c0_i32_0 = arith.constant 0 : i32
    return %arg0, %arg1, %c0_i32 : i32, i32, i32
  }
}

module attributes {stable_mosaic.version = 11 : i64} {
  func.func @_conv_stats_kernel(%arg0: i32, %arg1: i32, %arg2: memref<1x9x9x32xbf16, #tpu.memory_space<vmem>>, %arg3: memref<4x32x16xbf16, #tpu.memory_space<vmem>>, %arg4: memref<1x16xf32, #tpu.memory_space<vmem>>, %arg5: memref<1x64x16xbf16, #tpu.memory_space<vmem>>, %arg6: memref<1x1x16xf32, #tpu.memory_space<vmem>>, %arg7: memref<1x1x16xf32, #tpu.memory_space<vmem>>, %arg8: memref<64x16xf32, #tpu.memory_space<vmem>>) attributes {dimension_semantics = [#tpu.dimension_semantics<parallel>, #tpu.dimension_semantics<arbitrary>], iteration_bounds = array<i64: 2, 1>, scalar_prefetch = 0 : i64, scratch_operands = 1 : i64, tpu.core_type = #tpu.core_type<tc>, window_params = [{transform_indices = @transform_0, window_bounds = array<i64: 1, 9, 9, 32>}, {pipeline_mode = #tpu.pipeline_mode<synchronous>, transform_indices = @transform_1, window_bounds = array<i64: 4, 32, 16>}, {pipeline_mode = #tpu.pipeline_mode<synchronous>, transform_indices = @transform_2, window_bounds = array<i64: 1, 16>}, {transform_indices = @transform_3, window_bounds = array<i64: 1, 64, 16>}, {transform_indices = @transform_4, window_bounds = array<i64: 1, 1, 16>}, {transform_indices = @transform_5, window_bounds = array<i64: 1, 1, 16>}]} {
    %c0 = arith.constant 0 : index
    %c0_0 = arith.constant 0 : index
    %c0_1 = arith.constant 0 : index
    %c0_2 = arith.constant 0 : index
    %0 = vector.load %arg2[%c0, %c0_0, %c0_1, %c0_2] : memref<1x9x9x32xbf16, #tpu.memory_space<vmem>>, vector<1x8x8x32xbf16>
    %1 = vector.shape_cast %0 : vector<1x8x8x32xbf16> to vector<8x8x32xbf16>
    %2 = vector.shape_cast %1 : vector<8x8x32xbf16> to vector<64x32xbf16>
    %c0_3 = arith.constant 0 : index
    %c0_4 = arith.constant 0 : index
    %c0_5 = arith.constant 0 : index
    %3 = vector.load %arg3[%c0_3, %c0_4, %c0_5] : memref<4x32x16xbf16, #tpu.memory_space<vmem>>, vector<1x32x16xbf16>
    %4 = vector.shape_cast %3 : vector<1x32x16xbf16> to vector<32x16xbf16>
    %cst = arith.constant dense<0.000000e+00> : vector<64x16xf32>
    %5 = tpu.matmul %2, %4, %cst {dimension_numbers = #tpu.dot_dimension_numbers<[1], [0], [0], [1], [0, 0, 1, 1], [], []>} : vector<64x32xbf16>, vector<32x16xbf16>, vector<64x16xf32> -> vector<64x16xf32>
    %c0_6 = arith.constant 0 : index
    %c0_7 = arith.constant 0 : index
    %6 = vector.load %arg8[%c0_6, %c0_7] : memref<64x16xf32, #tpu.memory_space<vmem>>, vector<64x16xf32>
    tpu.vector_store %arg8[%c0_6, %c0_7], %5 {strides = array<i32>} : memref<64x16xf32, #tpu.memory_space<vmem>>, vector<64x16xf32>,
    %c0_8 = arith.constant 0 : index
    %c0_9 = arith.constant 0 : index
    %c1 = arith.constant 1 : index
    %c0_10 = arith.constant 0 : index
    %7 = vector.load %arg2[%c0_8, %c0_9, %c1, %c0_10] : memref<1x9x9x32xbf16, #tpu.memory_space<vmem>>, vector<1x8x8x32xbf16>
    %8 = vector.shape_cast %7 : vector<1x8x8x32xbf16> to vector<8x8x32xbf16>
    %9 = vector.shape_cast %8 : vector<8x8x32xbf16> to vector<64x32xbf16>
    %c1_11 = arith.constant 1 : index
    %c0_12 = arith.constant 0 : index
    %c0_13 = arith.constant 0 : index
    %10 = vector.load %arg3[%c1_11, %c0_12, %c0_13] : memref<4x32x16xbf16, #tpu.memory_space<vmem>>, vector<1x32x16xbf16>
    %11 = vector.shape_cast %10 : vector<1x32x16xbf16> to vector<32x16xbf16>
    %cst_14 = arith.constant dense<0.000000e+00> : vector<64x16xf32>
    %12 = tpu.matmul %9, %11, %cst_14 {dimension_numbers = #tpu.dot_dimension_numbers<[1], [0], [0], [1], [0, 0, 1, 1], [], []>} : vector<64x32xbf16>, vector<32x16xbf16>, vector<64x16xf32> -> vector<64x16xf32>
    %c0_15 = arith.constant 0 : index
    %c0_16 = arith.constant 0 : index
    %13 = vector.load %arg8[%c0_15, %c0_16] : memref<64x16xf32, #tpu.memory_space<vmem>>, vector<64x16xf32>
    %14 = arith.addf %13, %12 : vector<64x16xf32>
    %c0_17 = arith.constant 0 : index
    %c0_18 = arith.constant 0 : index
    %15 = vector.load %arg8[%c0_17, %c0_18] : memref<64x16xf32, #tpu.memory_space<vmem>>, vector<64x16xf32>
    tpu.vector_store %arg8[%c0_17, %c0_18], %14 {strides = array<i32>} : memref<64x16xf32, #tpu.memory_space<vmem>>, vector<64x16xf32>,
    %c0_19 = arith.constant 0 : index
    %c1_20 = arith.constant 1 : index
    %c0_21 = arith.constant 0 : index
    %c0_22 = arith.constant 0 : index
    %16 = vector.load %arg2[%c0_19, %c1_20, %c0_21, %c0_22] : memref<1x9x9x32xbf16, #tpu.memory_space<vmem>>, vector<1x8x8x32xbf16>
    %17 = vector.shape_cast %16 : vector<1x8x8x32xbf16> to vector<8x8x32xbf16>
    %18 = vector.shape_cast %17 : vector<8x8x32xbf16> to vector<64x32xbf16>
    %c2 = arith.constant 2 : index
    %c0_23 = arith.constant 0 : index
    %c0_24 = arith.constant 0 : index
    %19 = vector.load %arg3[%c2, %c0_23, %c0_24] : memref<4x32x16xbf16, #tpu.memory_space<vmem>>, vector<1x32x16xbf16>
    %20 = vector.shape_cast %19 : vector<1x32x16xbf16> to vector<32x16xbf16>
    %cst_25 = arith.constant dense<0.000000e+00> : vector<64x16xf32>
    %21 = tpu.matmul %18, %20, %cst_25 {dimension_numbers = #tpu.dot_dimension_numbers<[1], [0], [0], [1], [0, 0, 1, 1], [], []>} : vector<64x32xbf16>, vector<32x16xbf16>, vector<64x16xf32> -> vector<64x16xf32>
    %c0_26 = arith.constant 0 : index
    %c0_27 = arith.constant 0 : index
    %22 = vector.load %arg8[%c0_26, %c0_27] : memref<64x16xf32, #tpu.memory_space<vmem>>, vector<64x16xf32>
    %23 = arith.addf %22, %21 : vector<64x16xf32>
    %c0_28 = arith.constant 0 : index
    %c0_29 = arith.constant 0 : index
    %24 = vector.load %arg8[%c0_28, %c0_29] : memref<64x16xf32, #tpu.memory_space<vmem>>, vector<64x16xf32>
    tpu.vector_store %arg8[%c0_28, %c0_29], %23 {strides = array<i32>} : memref<64x16xf32, #tpu.memory_space<vmem>>, vector<64x16xf32>,
    %c0_30 = arith.constant 0 : index
    %c1_31 = arith.constant 1 : index
    %c1_32 = arith.constant 1 : index
    %c0_33 = arith.constant 0 : index
    %25 = vector.load %arg2[%c0_30, %c1_31, %c1_32, %c0_33] : memref<1x9x9x32xbf16, #tpu.memory_space<vmem>>, vector<1x8x8x32xbf16>
    %26 = vector.shape_cast %25 : vector<1x8x8x32xbf16> to vector<8x8x32xbf16>
    %27 = vector.shape_cast %26 : vector<8x8x32xbf16> to vector<64x32xbf16>
    %c3 = arith.constant 3 : index
    %c0_34 = arith.constant 0 : index
    %c0_35 = arith.constant 0 : index
    %28 = vector.load %arg3[%c3, %c0_34, %c0_35] : memref<4x32x16xbf16, #tpu.memory_space<vmem>>, vector<1x32x16xbf16>
    %29 = vector.shape_cast %28 : vector<1x32x16xbf16> to vector<32x16xbf16>
    %cst_36 = arith.constant dense<0.000000e+00> : vector<64x16xf32>
    %30 = tpu.matmul %27, %29, %cst_36 {dimension_numbers = #tpu.dot_dimension_numbers<[1], [0], [0], [1], [0, 0, 1, 1], [], []>} : vector<64x32xbf16>, vector<32x16xbf16>, vector<64x16xf32> -> vector<64x16xf32>
    %c0_37 = arith.constant 0 : index
    %c0_38 = arith.constant 0 : index
    %31 = vector.load %arg8[%c0_37, %c0_38] : memref<64x16xf32, #tpu.memory_space<vmem>>, vector<64x16xf32>
    %32 = arith.addf %31, %30 : vector<64x16xf32>
    %c0_39 = arith.constant 0 : index
    %c0_40 = arith.constant 0 : index
    %33 = vector.load %arg8[%c0_39, %c0_40] : memref<64x16xf32, #tpu.memory_space<vmem>>, vector<64x16xf32>
    tpu.vector_store %arg8[%c0_39, %c0_40], %32 {strides = array<i32>} : memref<64x16xf32, #tpu.memory_space<vmem>>, vector<64x16xf32>,
    %c0_41 = arith.constant 0 : index
    %c0_42 = arith.constant 0 : index
    %34 = vector.load %arg8[%c0_41, %c0_42] : memref<64x16xf32, #tpu.memory_space<vmem>>, vector<64x16xf32>
    %c0_43 = arith.constant 0 : index
    %c0_44 = arith.constant 0 : index
    %35 = vector.load %arg4[%c0_43, %c0_44] : memref<1x16xf32, #tpu.memory_space<vmem>>, vector<1x16xf32>
    %36 = vector.broadcast %35 : vector<1x16xf32> to vector<64x16xf32>
    %37 = arith.addf %34, %36 : vector<64x16xf32>
    %38 = arith.truncf %37 : vector<64x16xf32> to vector<64x16xbf16>
    %c0_45 = arith.constant 0 : index
    %c0_46 = arith.constant 0 : index
    %c0_47 = arith.constant 0 : index
    %39 = vector.load %arg5[%c0_45, %c0_46, %c0_47] : memref<1x64x16xbf16, #tpu.memory_space<vmem>>, vector<1x64x16xbf16>
    %40 = vector.shape_cast %39 : vector<1x64x16xbf16> to vector<64x16xbf16>
    %41 = vector.shape_cast %38 : vector<64x16xbf16> to vector<1x64x16xbf16>
    tpu.vector_store %arg5[%c0_45, %c0_46, %c0_47], %41 {strides = array<i32>} : memref<1x64x16xbf16, #tpu.memory_space<vmem>>, vector<1x64x16xbf16>,
    %c0_i32 = arith.constant 0 : i32
    %42 = arith.cmpi eq, %arg1, %c0_i32 : i32
    %43 = arith.extui %42 : i1 to i32
    %c0_i32_48 = arith.constant 0 : i32
    %44 = arith.cmpi ne, %43, %c0_i32_48 : i32
    scf.if %44 {
      %cst_63 = arith.constant 0.000000e+00 : f32
      %62 = vector.broadcast %cst_63 : f32 to vector<1x1x16xf32>
      %c0_64 = arith.constant 0 : index
      %c0_65 = arith.constant 0 : index
      %c0_66 = arith.constant 0 : index
      %63 = vector.load %arg6[%c0_64, %c0_65, %c0_66] : memref<1x1x16xf32, #tpu.memory_space<vmem>>, vector<1x1x16xf32>
      tpu.vector_store %arg6[%c0_64, %c0_65, %c0_66], %62 {strides = array<i32>} : memref<1x1x16xf32, #tpu.memory_space<vmem>>, vector<1x1x16xf32>,
      %cst_67 = arith.constant 0.000000e+00 : f32
      %64 = vector.broadcast %cst_67 : f32 to vector<1x1x16xf32>
      %c0_68 = arith.constant 0 : index
      %c0_69 = arith.constant 0 : index
      %c0_70 = arith.constant 0 : index
      %65 = vector.load %arg7[%c0_68, %c0_69, %c0_70] : memref<1x1x16xf32, #tpu.memory_space<vmem>>, vector<1x1x16xf32>
      tpu.vector_store %arg7[%c0_68, %c0_69, %c0_70], %64 {strides = array<i32>} : memref<1x1x16xf32, #tpu.memory_space<vmem>>, vector<1x1x16xf32>,
    } else {
    }
    %c0_49 = arith.constant 0 : index
    %c0_50 = arith.constant 0 : index
    %c0_51 = arith.constant 0 : index
    %45 = vector.load %arg6[%c0_49, %c0_50, %c0_51] : memref<1x1x16xf32, #tpu.memory_space<vmem>>, vector<1x1x16xf32>
    %46 = vector.shape_cast %45 : vector<1x1x16xf32> to vector<1x16xf32>
    %cst_52 = arith.constant dense<0.000000e+00> : vector<16xf32>
    %47 = vector.multi_reduction <add>, %37, %cst_52 [0] : vector<64x16xf32> to vector<16xf32>
    %48 = vector.shape_cast %47 : vector<16xf32> to vector<1x16xf32>
    %49 = arith.addf %46, %48 : vector<1x16xf32>
    %c0_53 = arith.constant 0 : index
    %c0_54 = arith.constant 0 : index
    %c0_55 = arith.constant 0 : index
    %50 = vector.load %arg6[%c0_53, %c0_54, %c0_55] : memref<1x1x16xf32, #tpu.memory_space<vmem>>, vector<1x1x16xf32>
    %51 = vector.shape_cast %50 : vector<1x1x16xf32> to vector<1x16xf32>
    %52 = vector.shape_cast %49 : vector<1x16xf32> to vector<1x1x16xf32>
    tpu.vector_store %arg6[%c0_53, %c0_54, %c0_55], %52 {strides = array<i32>} : memref<1x1x16xf32, #tpu.memory_space<vmem>>, vector<1x1x16xf32>,
    %c0_56 = arith.constant 0 : index
    %c0_57 = arith.constant 0 : index
    %c0_58 = arith.constant 0 : index
    %53 = vector.load %arg7[%c0_56, %c0_57, %c0_58] : memref<1x1x16xf32, #tpu.memory_space<vmem>>, vector<1x1x16xf32>
    %54 = vector.shape_cast %53 : vector<1x1x16xf32> to vector<1x16xf32>
    %55 = arith.mulf %37, %37 : vector<64x16xf32>
    %cst_59 = arith.constant dense<0.000000e+00> : vector<16xf32>
    %56 = vector.multi_reduction <add>, %55, %cst_59 [0] : vector<64x16xf32> to vector<16xf32>
    %57 = vector.shape_cast %56 : vector<16xf32> to vector<1x16xf32>
    %58 = arith.addf %54, %57 : vector<1x16xf32>
    %c0_60 = arith.constant 0 : index
    %c0_61 = arith.constant 0 : index
    %c0_62 = arith.constant 0 : index
    %59 = vector.load %arg7[%c0_60, %c0_61, %c0_62] : memref<1x1x16xf32, #tpu.memory_space<vmem>>, vector<1x1x16xf32>
    %60 = vector.shape_cast %59 : vector<1x1x16xf32> to vector<1x16xf32>
    %61 = vector.shape_cast %58 : vector<1x16xf32> to vector<1x1x16xf32>
    tpu.vector_store %arg7[%c0_60, %c0_61, %c0_62], %61 {strides = array<i32>} : memref<1x1x16xf32, #tpu.memory_space<vmem>>, vector<1x1x16xf32>,
    return
  }
  func.func @transform_0(%arg0: i32, %arg1: i32) -> (i32, i32, i32, i32) {
    %c1_i32 = arith.constant 1 : i32
    %0 = arith.muli %arg0, %c1_i32 : i32
    %1 = arith.addi %0, %arg1 : i32
    %c0_i32 = arith.constant 0 : i32
    %c0_i32_0 = arith.constant 0 : i32
    %c0_i32_1 = arith.constant 0 : i32
    %c0_i32_2 = arith.constant 0 : i32
    return %1, %c0_i32, %c0_i32_0, %c0_i32_1 : i32, i32, i32, i32
  }
  func.func @transform_1(%arg0: i32, %arg1: i32) -> (i32, i32, i32) {
    %c0_i32 = arith.constant 0 : i32
    %c0_i32_0 = arith.constant 0 : i32
    %c0_i32_1 = arith.constant 0 : i32
    %c0_i32_2 = arith.constant 0 : i32
    return %c0_i32, %c0_i32_0, %c0_i32_1 : i32, i32, i32
  }
  func.func @transform_2(%arg0: i32, %arg1: i32) -> (i32, i32) {
    %c0_i32 = arith.constant 0 : i32
    %c0_i32_0 = arith.constant 0 : i32
    %c0_i32_1 = arith.constant 0 : i32
    return %c0_i32, %c0_i32_0 : i32, i32
  }
  func.func @transform_3(%arg0: i32, %arg1: i32) -> (i32, i32, i32) {
    %c0_i32 = arith.constant 0 : i32
    %c0_i32_0 = arith.constant 0 : i32
    return %arg0, %arg1, %c0_i32 : i32, i32, i32
  }
  func.func @transform_4(%arg0: i32, %arg1: i32) -> (i32, i32, i32) {
    %c0_i32 = arith.constant 0 : i32
    %c0_i32_0 = arith.constant 0 : i32
    %c0_i32_1 = arith.constant 0 : i32
    return %arg0, %c0_i32, %c0_i32_0 : i32, i32, i32
  }
  func.func @transform_5(%arg0: i32, %arg1: i32) -> (i32, i32, i32) {
    %c0_i32 = arith.constant 0 : i32
    %c0_i32_0 = arith.constant 0 : i32
    %c0_i32_1 = arith.constant 0 : i32
    return %arg0, %c0_i32, %c0_i32_0 : i32, i32, i32
  }
}

module attributes {stable_mosaic.version = 11 : i64} {
  func.func @_norm_act_kernel(%arg0: i32, %arg1: i32, %arg2: memref<1x64x16xbf16, #tpu.memory_space<vmem>>, %arg3: memref<1x1x16xf32, #tpu.memory_space<vmem>>, %arg4: memref<1x1x16xf32, #tpu.memory_space<vmem>>, %arg5: memref<1x64x16xbf16, #tpu.memory_space<vmem>>) attributes {dimension_semantics = [#tpu.dimension_semantics<parallel>, #tpu.dimension_semantics<parallel>], iteration_bounds = array<i64: 2, 1>, scalar_prefetch = 0 : i64, scratch_operands = 0 : i64, tpu.core_type = #tpu.core_type<tc>, window_params = [{transform_indices = @transform_0, window_bounds = array<i64: 1, 64, 16>}, {transform_indices = @transform_1, window_bounds = array<i64: 1, 1, 16>}, {transform_indices = @transform_2, window_bounds = array<i64: 1, 1, 16>}, {transform_indices = @transform_3, window_bounds = array<i64: 1, 64, 16>}]} {
    %c0 = arith.constant 0 : index
    %c0_0 = arith.constant 0 : index
    %c0_1 = arith.constant 0 : index
    %0 = vector.load %arg3[%c0, %c0_0, %c0_1] : memref<1x1x16xf32, #tpu.memory_space<vmem>>, vector<1x1x16xf32>
    %1 = vector.shape_cast %0 : vector<1x1x16xf32> to vector<1x16xf32>
    %cst = arith.constant 1.562500e-02 : f32
    %2 = vector.broadcast %cst : f32 to vector<1x16xf32>
    %3 = arith.mulf %1, %2 : vector<1x16xf32>
    %c0_2 = arith.constant 0 : index
    %c0_3 = arith.constant 0 : index
    %c0_4 = arith.constant 0 : index
    %4 = vector.load %arg4[%c0_2, %c0_3, %c0_4] : memref<1x1x16xf32, #tpu.memory_space<vmem>>, vector<1x1x16xf32>
    %5 = vector.shape_cast %4 : vector<1x1x16xf32> to vector<1x16xf32>
    %cst_5 = arith.constant 1.562500e-02 : f32
    %6 = vector.broadcast %cst_5 : f32 to vector<1x16xf32>
    %7 = arith.mulf %5, %6 : vector<1x16xf32>
    %8 = arith.mulf %3, %3 : vector<1x16xf32>
    %9 = arith.subf %7, %8 : vector<1x16xf32>
    %cst_6 = arith.constant 0.000000e+00 : f32
    %10 = vector.broadcast %cst_6 : f32 to vector<1x16xf32>
    %11 = arith.maximumf %9, %10 : vector<1x16xf32>
    %cst_7 = arith.constant 9.99999974E-6 : f32
    %12 = vector.broadcast %cst_7 : f32 to vector<1x16xf32>
    %13 = arith.addf %11, %12 : vector<1x16xf32>
    %14 = math.rsqrt %13 : vector<1x16xf32>
    %cst_8 = arith.constant 0.000000e+00 : f32
    %15 = vector.broadcast %cst_8 : f32 to vector<1x16xf32>
    %16 = arith.subf %15, %3 : vector<1x16xf32>
    %17 = arith.mulf %16, %14 : vector<1x16xf32>
    %c0_9 = arith.constant 0 : index
    %c0_10 = arith.constant 0 : index
    %c0_11 = arith.constant 0 : index
    %18 = vector.load %arg2[%c0_9, %c0_10, %c0_11] : memref<1x64x16xbf16, #tpu.memory_space<vmem>>, vector<1x64x16xbf16>
    %19 = vector.shape_cast %18 : vector<1x64x16xbf16> to vector<64x16xbf16>
    %20 = arith.extf %19 : vector<64x16xbf16> to vector<64x16xf32>
    %21 = vector.broadcast %14 : vector<1x16xf32> to vector<64x16xf32>
    %22 = arith.mulf %20, %21 : vector<64x16xf32>
    %23 = vector.broadcast %17 : vector<1x16xf32> to vector<64x16xf32>
    %24 = arith.addf %22, %23 : vector<64x16xf32>
    %cst_12 = arith.constant 0.000000e+00 : f32
    %25 = vector.broadcast %cst_12 : f32 to vector<64x16xf32>
    %26 = arith.cmpf oge, %24, %25 : vector<64x16xf32>
    %cst_13 = arith.constant 2.000000e-01 : f32
    %27 = vector.broadcast %cst_13 : f32 to vector<64x16xf32>
    %28 = arith.mulf %27, %24 : vector<64x16xf32>
    %29 = arith.select %26, %24, %28 : vector<64x16xi1>, vector<64x16xf32>
    %30 = arith.truncf %29 : vector<64x16xf32> to vector<64x16xbf16>
    %c0_14 = arith.constant 0 : index
    %c0_15 = arith.constant 0 : index
    %c0_16 = arith.constant 0 : index
    %31 = vector.load %arg5[%c0_14, %c0_15, %c0_16] : memref<1x64x16xbf16, #tpu.memory_space<vmem>>, vector<1x64x16xbf16>
    %32 = vector.shape_cast %31 : vector<1x64x16xbf16> to vector<64x16xbf16>
    %33 = vector.shape_cast %30 : vector<64x16xbf16> to vector<1x64x16xbf16>
    tpu.vector_store %arg5[%c0_14, %c0_15, %c0_16], %33 {strides = array<i32>} : memref<1x64x16xbf16, #tpu.memory_space<vmem>>, vector<1x64x16xbf16>,
    return
  }
  func.func @transform_0(%arg0: i32, %arg1: i32) -> (i32, i32, i32) {
    %c0_i32 = arith.constant 0 : i32
    %c0_i32_0 = arith.constant 0 : i32
    return %arg0, %arg1, %c0_i32 : i32, i32, i32
  }
  func.func @transform_1(%arg0: i32, %arg1: i32) -> (i32, i32, i32) {
    %c0_i32 = arith.constant 0 : i32
    %c0_i32_0 = arith.constant 0 : i32
    %c0_i32_1 = arith.constant 0 : i32
    return %arg0, %c0_i32, %c0_i32_0 : i32, i32, i32
  }
  func.func @transform_2(%arg0: i32, %arg1: i32) -> (i32, i32, i32) {
    %c0_i32 = arith.constant 0 : i32
    %c0_i32_0 = arith.constant 0 : i32
    %c0_i32_1 = arith.constant 0 : i32
    return %arg0, %c0_i32, %c0_i32_0 : i32, i32, i32
  }
  func.func @transform_3(%arg0: i32, %arg1: i32) -> (i32, i32, i32) {
    %c0_i32 = arith.constant 0 : i32
    %c0_i32_0 = arith.constant 0 : i32
    return %arg0, %arg1, %c0_i32 : i32, i32, i32
  }
}

module attributes {stable_mosaic.version = 11 : i64} {
  func.func @_norm_act_kernel(%arg0: i32, %arg1: i32, %arg2: memref<1x16x32xbf16, #tpu.memory_space<vmem>>, %arg3: memref<1x1x32xf32, #tpu.memory_space<vmem>>, %arg4: memref<1x1x32xf32, #tpu.memory_space<vmem>>, %arg5: memref<1x16x32xbf16, #tpu.memory_space<vmem>>) attributes {dimension_semantics = [#tpu.dimension_semantics<parallel>, #tpu.dimension_semantics<parallel>], iteration_bounds = array<i64: 2, 1>, scalar_prefetch = 0 : i64, scratch_operands = 0 : i64, tpu.core_type = #tpu.core_type<tc>, window_params = [{transform_indices = @transform_0, window_bounds = array<i64: 1, 16, 32>}, {transform_indices = @transform_1, window_bounds = array<i64: 1, 1, 32>}, {transform_indices = @transform_2, window_bounds = array<i64: 1, 1, 32>}, {transform_indices = @transform_3, window_bounds = array<i64: 1, 16, 32>}]} {
    %c0 = arith.constant 0 : index
    %c0_0 = arith.constant 0 : index
    %c0_1 = arith.constant 0 : index
    %0 = vector.load %arg3[%c0, %c0_0, %c0_1] : memref<1x1x32xf32, #tpu.memory_space<vmem>>, vector<1x1x32xf32>
    %1 = vector.shape_cast %0 : vector<1x1x32xf32> to vector<1x32xf32>
    %cst = arith.constant 6.250000e-02 : f32
    %2 = vector.broadcast %cst : f32 to vector<1x32xf32>
    %3 = arith.mulf %1, %2 : vector<1x32xf32>
    %c0_2 = arith.constant 0 : index
    %c0_3 = arith.constant 0 : index
    %c0_4 = arith.constant 0 : index
    %4 = vector.load %arg4[%c0_2, %c0_3, %c0_4] : memref<1x1x32xf32, #tpu.memory_space<vmem>>, vector<1x1x32xf32>
    %5 = vector.shape_cast %4 : vector<1x1x32xf32> to vector<1x32xf32>
    %cst_5 = arith.constant 6.250000e-02 : f32
    %6 = vector.broadcast %cst_5 : f32 to vector<1x32xf32>
    %7 = arith.mulf %5, %6 : vector<1x32xf32>
    %8 = arith.mulf %3, %3 : vector<1x32xf32>
    %9 = arith.subf %7, %8 : vector<1x32xf32>
    %cst_6 = arith.constant 0.000000e+00 : f32
    %10 = vector.broadcast %cst_6 : f32 to vector<1x32xf32>
    %11 = arith.maximumf %9, %10 : vector<1x32xf32>
    %cst_7 = arith.constant 9.99999974E-6 : f32
    %12 = vector.broadcast %cst_7 : f32 to vector<1x32xf32>
    %13 = arith.addf %11, %12 : vector<1x32xf32>
    %14 = math.rsqrt %13 : vector<1x32xf32>
    %cst_8 = arith.constant 0.000000e+00 : f32
    %15 = vector.broadcast %cst_8 : f32 to vector<1x32xf32>
    %16 = arith.subf %15, %3 : vector<1x32xf32>
    %17 = arith.mulf %16, %14 : vector<1x32xf32>
    %c0_9 = arith.constant 0 : index
    %c0_10 = arith.constant 0 : index
    %c0_11 = arith.constant 0 : index
    %18 = vector.load %arg2[%c0_9, %c0_10, %c0_11] : memref<1x16x32xbf16, #tpu.memory_space<vmem>>, vector<1x16x32xbf16>
    %19 = vector.shape_cast %18 : vector<1x16x32xbf16> to vector<16x32xbf16>
    %20 = arith.extf %19 : vector<16x32xbf16> to vector<16x32xf32>
    %21 = vector.broadcast %14 : vector<1x32xf32> to vector<16x32xf32>
    %22 = arith.mulf %20, %21 : vector<16x32xf32>
    %23 = vector.broadcast %17 : vector<1x32xf32> to vector<16x32xf32>
    %24 = arith.addf %22, %23 : vector<16x32xf32>
    %cst_12 = arith.constant 0.000000e+00 : f32
    %25 = vector.broadcast %cst_12 : f32 to vector<16x32xf32>
    %26 = arith.cmpf oge, %24, %25 : vector<16x32xf32>
    %cst_13 = arith.constant 2.000000e-01 : f32
    %27 = vector.broadcast %cst_13 : f32 to vector<16x32xf32>
    %28 = arith.mulf %27, %24 : vector<16x32xf32>
    %29 = arith.select %26, %24, %28 : vector<16x32xi1>, vector<16x32xf32>
    %30 = arith.truncf %29 : vector<16x32xf32> to vector<16x32xbf16>
    %c0_14 = arith.constant 0 : index
    %c0_15 = arith.constant 0 : index
    %c0_16 = arith.constant 0 : index
    %31 = vector.load %arg5[%c0_14, %c0_15, %c0_16] : memref<1x16x32xbf16, #tpu.memory_space<vmem>>, vector<1x16x32xbf16>
    %32 = vector.shape_cast %31 : vector<1x16x32xbf16> to vector<16x32xbf16>
    %33 = vector.shape_cast %30 : vector<16x32xbf16> to vector<1x16x32xbf16>
    tpu.vector_store %arg5[%c0_14, %c0_15, %c0_16], %33 {strides = array<i32>} : memref<1x16x32xbf16, #tpu.memory_space<vmem>>, vector<1x16x32xbf16>,
    return
  }
  func.func @transform_0(%arg0: i32, %arg1: i32) -> (i32, i32, i32) {
    %c0_i32 = arith.constant 0 : i32
    %c0_i32_0 = arith.constant 0 : i32
    return %arg0, %arg1, %c0_i32 : i32, i32, i32
  }
  func.func @transform_1(%arg0: i32, %arg1: i32) -> (i32, i32, i32) {
    %c0_i32 = arith.constant 0 : i32
    %c0_i32_0 = arith.constant 0 : i32
    %c0_i32_1 = arith.constant 0 : i32
    return %arg0, %c0_i32, %c0_i32_0 : i32, i32, i32
  }
  func.func @transform_2(%arg0: i32, %arg1: i32) -> (i32, i32, i32) {
    %c0_i32 = arith.constant 0 : i32
    %c0_i32_0 = arith.constant 0 : i32
    %c0_i32_1 = arith.constant 0 : i32
    return %arg0, %c0_i32, %c0_i32_0 : i32, i32, i32
  }
  func.func @transform_3(%arg0: i32, %arg1: i32) -> (i32, i32, i32) {
    %c0_i32 = arith.constant 0 : i32
    %c0_i32_0 = arith.constant 0 : i32
    return %arg0, %arg1, %c0_i32 : i32, i32, i32
  }
}

module attributes {stable_mosaic.version = 11 : i64} {
  func.func @_conv_stats_kernel(%arg0: i32, %arg1: i32, %arg2: memref<1x5x5x64xbf16, #tpu.memory_space<vmem>>, %arg3: memref<4x64x32xbf16, #tpu.memory_space<vmem>>, %arg4: memref<1x32xf32, #tpu.memory_space<vmem>>, %arg5: memref<1x16x32xbf16, #tpu.memory_space<vmem>>, %arg6: memref<1x1x32xf32, #tpu.memory_space<vmem>>, %arg7: memref<1x1x32xf32, #tpu.memory_space<vmem>>, %arg8: memref<16x32xf32, #tpu.memory_space<vmem>>) attributes {dimension_semantics = [#tpu.dimension_semantics<parallel>, #tpu.dimension_semantics<arbitrary>], iteration_bounds = array<i64: 2, 1>, scalar_prefetch = 0 : i64, scratch_operands = 1 : i64, tpu.core_type = #tpu.core_type<tc>, window_params = [{transform_indices = @transform_0, window_bounds = array<i64: 1, 5, 5, 64>}, {pipeline_mode = #tpu.pipeline_mode<synchronous>, transform_indices = @transform_1, window_bounds = array<i64: 4, 64, 32>}, {pipeline_mode = #tpu.pipeline_mode<synchronous>, transform_indices = @transform_2, window_bounds = array<i64: 1, 32>}, {transform_indices = @transform_3, window_bounds = array<i64: 1, 16, 32>}, {transform_indices = @transform_4, window_bounds = array<i64: 1, 1, 32>}, {transform_indices = @transform_5, window_bounds = array<i64: 1, 1, 32>}]} {
    %c0 = arith.constant 0 : index
    %c0_0 = arith.constant 0 : index
    %c0_1 = arith.constant 0 : index
    %c0_2 = arith.constant 0 : index
    %0 = vector.load %arg2[%c0, %c0_0, %c0_1, %c0_2] : memref<1x5x5x64xbf16, #tpu.memory_space<vmem>>, vector<1x4x4x64xbf16>
    %1 = vector.shape_cast %0 : vector<1x4x4x64xbf16> to vector<4x4x64xbf16>
    %2 = vector.shape_cast %1 : vector<4x4x64xbf16> to vector<16x64xbf16>
    %c0_3 = arith.constant 0 : index
    %c0_4 = arith.constant 0 : index
    %c0_5 = arith.constant 0 : index
    %3 = vector.load %arg3[%c0_3, %c0_4, %c0_5] : memref<4x64x32xbf16, #tpu.memory_space<vmem>>, vector<1x64x32xbf16>
    %4 = vector.shape_cast %3 : vector<1x64x32xbf16> to vector<64x32xbf16>
    %cst = arith.constant dense<0.000000e+00> : vector<16x32xf32>
    %5 = tpu.matmul %2, %4, %cst {dimension_numbers = #tpu.dot_dimension_numbers<[1], [0], [0], [1], [0, 0, 1, 1], [], []>} : vector<16x64xbf16>, vector<64x32xbf16>, vector<16x32xf32> -> vector<16x32xf32>
    %c0_6 = arith.constant 0 : index
    %c0_7 = arith.constant 0 : index
    %6 = vector.load %arg8[%c0_6, %c0_7] : memref<16x32xf32, #tpu.memory_space<vmem>>, vector<16x32xf32>
    tpu.vector_store %arg8[%c0_6, %c0_7], %5 {strides = array<i32>} : memref<16x32xf32, #tpu.memory_space<vmem>>, vector<16x32xf32>,
    %c0_8 = arith.constant 0 : index
    %c0_9 = arith.constant 0 : index
    %c1 = arith.constant 1 : index
    %c0_10 = arith.constant 0 : index
    %7 = vector.load %arg2[%c0_8, %c0_9, %c1, %c0_10] : memref<1x5x5x64xbf16, #tpu.memory_space<vmem>>, vector<1x4x4x64xbf16>
    %8 = vector.shape_cast %7 : vector<1x4x4x64xbf16> to vector<4x4x64xbf16>
    %9 = vector.shape_cast %8 : vector<4x4x64xbf16> to vector<16x64xbf16>
    %c1_11 = arith.constant 1 : index
    %c0_12 = arith.constant 0 : index
    %c0_13 = arith.constant 0 : index
    %10 = vector.load %arg3[%c1_11, %c0_12, %c0_13] : memref<4x64x32xbf16, #tpu.memory_space<vmem>>, vector<1x64x32xbf16>
    %11 = vector.shape_cast %10 : vector<1x64x32xbf16> to vector<64x32xbf16>
    %cst_14 = arith.constant dense<0.000000e+00> : vector<16x32xf32>
    %12 = tpu.matmul %9, %11, %cst_14 {dimension_numbers = #tpu.dot_dimension_numbers<[1], [0], [0], [1], [0, 0, 1, 1], [], []>} : vector<16x64xbf16>, vector<64x32xbf16>, vector<16x32xf32> -> vector<16x32xf32>
    %c0_15 = arith.constant 0 : index
    %c0_16 = arith.constant 0 : index
    %13 = vector.load %arg8[%c0_15, %c0_16] : memref<16x32xf32, #tpu.memory_space<vmem>>, vector<16x32xf32>
    %14 = arith.addf %13, %12 : vector<16x32xf32>
    %c0_17 = arith.constant 0 : index
    %c0_18 = arith.constant 0 : index
    %15 = vector.load %arg8[%c0_17, %c0_18] : memref<16x32xf32, #tpu.memory_space<vmem>>, vector<16x32xf32>
    tpu.vector_store %arg8[%c0_17, %c0_18], %14 {strides = array<i32>} : memref<16x32xf32, #tpu.memory_space<vmem>>, vector<16x32xf32>,
    %c0_19 = arith.constant 0 : index
    %c1_20 = arith.constant 1 : index
    %c0_21 = arith.constant 0 : index
    %c0_22 = arith.constant 0 : index
    %16 = vector.load %arg2[%c0_19, %c1_20, %c0_21, %c0_22] : memref<1x5x5x64xbf16, #tpu.memory_space<vmem>>, vector<1x4x4x64xbf16>
    %17 = vector.shape_cast %16 : vector<1x4x4x64xbf16> to vector<4x4x64xbf16>
    %18 = vector.shape_cast %17 : vector<4x4x64xbf16> to vector<16x64xbf16>
    %c2 = arith.constant 2 : index
    %c0_23 = arith.constant 0 : index
    %c0_24 = arith.constant 0 : index
    %19 = vector.load %arg3[%c2, %c0_23, %c0_24] : memref<4x64x32xbf16, #tpu.memory_space<vmem>>, vector<1x64x32xbf16>
    %20 = vector.shape_cast %19 : vector<1x64x32xbf16> to vector<64x32xbf16>
    %cst_25 = arith.constant dense<0.000000e+00> : vector<16x32xf32>
    %21 = tpu.matmul %18, %20, %cst_25 {dimension_numbers = #tpu.dot_dimension_numbers<[1], [0], [0], [1], [0, 0, 1, 1], [], []>} : vector<16x64xbf16>, vector<64x32xbf16>, vector<16x32xf32> -> vector<16x32xf32>
    %c0_26 = arith.constant 0 : index
    %c0_27 = arith.constant 0 : index
    %22 = vector.load %arg8[%c0_26, %c0_27] : memref<16x32xf32, #tpu.memory_space<vmem>>, vector<16x32xf32>
    %23 = arith.addf %22, %21 : vector<16x32xf32>
    %c0_28 = arith.constant 0 : index
    %c0_29 = arith.constant 0 : index
    %24 = vector.load %arg8[%c0_28, %c0_29] : memref<16x32xf32, #tpu.memory_space<vmem>>, vector<16x32xf32>
    tpu.vector_store %arg8[%c0_28, %c0_29], %23 {strides = array<i32>} : memref<16x32xf32, #tpu.memory_space<vmem>>, vector<16x32xf32>,
    %c0_30 = arith.constant 0 : index
    %c1_31 = arith.constant 1 : index
    %c1_32 = arith.constant 1 : index
    %c0_33 = arith.constant 0 : index
    %25 = vector.load %arg2[%c0_30, %c1_31, %c1_32, %c0_33] : memref<1x5x5x64xbf16, #tpu.memory_space<vmem>>, vector<1x4x4x64xbf16>
    %26 = vector.shape_cast %25 : vector<1x4x4x64xbf16> to vector<4x4x64xbf16>
    %27 = vector.shape_cast %26 : vector<4x4x64xbf16> to vector<16x64xbf16>
    %c3 = arith.constant 3 : index
    %c0_34 = arith.constant 0 : index
    %c0_35 = arith.constant 0 : index
    %28 = vector.load %arg3[%c3, %c0_34, %c0_35] : memref<4x64x32xbf16, #tpu.memory_space<vmem>>, vector<1x64x32xbf16>
    %29 = vector.shape_cast %28 : vector<1x64x32xbf16> to vector<64x32xbf16>
    %cst_36 = arith.constant dense<0.000000e+00> : vector<16x32xf32>
    %30 = tpu.matmul %27, %29, %cst_36 {dimension_numbers = #tpu.dot_dimension_numbers<[1], [0], [0], [1], [0, 0, 1, 1], [], []>} : vector<16x64xbf16>, vector<64x32xbf16>, vector<16x32xf32> -> vector<16x32xf32>
    %c0_37 = arith.constant 0 : index
    %c0_38 = arith.constant 0 : index
    %31 = vector.load %arg8[%c0_37, %c0_38] : memref<16x32xf32, #tpu.memory_space<vmem>>, vector<16x32xf32>
    %32 = arith.addf %31, %30 : vector<16x32xf32>
    %c0_39 = arith.constant 0 : index
    %c0_40 = arith.constant 0 : index
    %33 = vector.load %arg8[%c0_39, %c0_40] : memref<16x32xf32, #tpu.memory_space<vmem>>, vector<16x32xf32>
    tpu.vector_store %arg8[%c0_39, %c0_40], %32 {strides = array<i32>} : memref<16x32xf32, #tpu.memory_space<vmem>>, vector<16x32xf32>,
    %c0_41 = arith.constant 0 : index
    %c0_42 = arith.constant 0 : index
    %34 = vector.load %arg8[%c0_41, %c0_42] : memref<16x32xf32, #tpu.memory_space<vmem>>, vector<16x32xf32>
    %c0_43 = arith.constant 0 : index
    %c0_44 = arith.constant 0 : index
    %35 = vector.load %arg4[%c0_43, %c0_44] : memref<1x32xf32, #tpu.memory_space<vmem>>, vector<1x32xf32>
    %36 = vector.broadcast %35 : vector<1x32xf32> to vector<16x32xf32>
    %37 = arith.addf %34, %36 : vector<16x32xf32>
    %38 = arith.truncf %37 : vector<16x32xf32> to vector<16x32xbf16>
    %c0_45 = arith.constant 0 : index
    %c0_46 = arith.constant 0 : index
    %c0_47 = arith.constant 0 : index
    %39 = vector.load %arg5[%c0_45, %c0_46, %c0_47] : memref<1x16x32xbf16, #tpu.memory_space<vmem>>, vector<1x16x32xbf16>
    %40 = vector.shape_cast %39 : vector<1x16x32xbf16> to vector<16x32xbf16>
    %41 = vector.shape_cast %38 : vector<16x32xbf16> to vector<1x16x32xbf16>
    tpu.vector_store %arg5[%c0_45, %c0_46, %c0_47], %41 {strides = array<i32>} : memref<1x16x32xbf16, #tpu.memory_space<vmem>>, vector<1x16x32xbf16>,
    %c0_i32 = arith.constant 0 : i32
    %42 = arith.cmpi eq, %arg1, %c0_i32 : i32
    %43 = arith.extui %42 : i1 to i32
    %c0_i32_48 = arith.constant 0 : i32
    %44 = arith.cmpi ne, %43, %c0_i32_48 : i32
    scf.if %44 {
      %cst_63 = arith.constant 0.000000e+00 : f32
      %62 = vector.broadcast %cst_63 : f32 to vector<1x1x32xf32>
      %c0_64 = arith.constant 0 : index
      %c0_65 = arith.constant 0 : index
      %c0_66 = arith.constant 0 : index
      %63 = vector.load %arg6[%c0_64, %c0_65, %c0_66] : memref<1x1x32xf32, #tpu.memory_space<vmem>>, vector<1x1x32xf32>
      tpu.vector_store %arg6[%c0_64, %c0_65, %c0_66], %62 {strides = array<i32>} : memref<1x1x32xf32, #tpu.memory_space<vmem>>, vector<1x1x32xf32>,
      %cst_67 = arith.constant 0.000000e+00 : f32
      %64 = vector.broadcast %cst_67 : f32 to vector<1x1x32xf32>
      %c0_68 = arith.constant 0 : index
      %c0_69 = arith.constant 0 : index
      %c0_70 = arith.constant 0 : index
      %65 = vector.load %arg7[%c0_68, %c0_69, %c0_70] : memref<1x1x32xf32, #tpu.memory_space<vmem>>, vector<1x1x32xf32>
      tpu.vector_store %arg7[%c0_68, %c0_69, %c0_70], %64 {strides = array<i32>} : memref<1x1x32xf32, #tpu.memory_space<vmem>>, vector<1x1x32xf32>,
    } else {
    }
    %c0_49 = arith.constant 0 : index
    %c0_50 = arith.constant 0 : index
    %c0_51 = arith.constant 0 : index
    %45 = vector.load %arg6[%c0_49, %c0_50, %c0_51] : memref<1x1x32xf32, #tpu.memory_space<vmem>>, vector<1x1x32xf32>
    %46 = vector.shape_cast %45 : vector<1x1x32xf32> to vector<1x32xf32>
    %cst_52 = arith.constant dense<0.000000e+00> : vector<32xf32>
    %47 = vector.multi_reduction <add>, %37, %cst_52 [0] : vector<16x32xf32> to vector<32xf32>
    %48 = vector.shape_cast %47 : vector<32xf32> to vector<1x32xf32>
    %49 = arith.addf %46, %48 : vector<1x32xf32>
    %c0_53 = arith.constant 0 : index
    %c0_54 = arith.constant 0 : index
    %c0_55 = arith.constant 0 : index
    %50 = vector.load %arg6[%c0_53, %c0_54, %c0_55] : memref<1x1x32xf32, #tpu.memory_space<vmem>>, vector<1x1x32xf32>
    %51 = vector.shape_cast %50 : vector<1x1x32xf32> to vector<1x32xf32>
    %52 = vector.shape_cast %49 : vector<1x32xf32> to vector<1x1x32xf32>
    tpu.vector_store %arg6[%c0_53, %c0_54, %c0_55], %52 {strides = array<i32>} : memref<1x1x32xf32, #tpu.memory_space<vmem>>, vector<1x1x32xf32>,
    %c0_56 = arith.constant 0 : index
    %c0_57 = arith.constant 0 : index
    %c0_58 = arith.constant 0 : index
    %53 = vector.load %arg7[%c0_56, %c0_57, %c0_58] : memref<1x1x32xf32, #tpu.memory_space<vmem>>, vector<1x1x32xf32>
    %54 = vector.shape_cast %53 : vector<1x1x32xf32> to vector<1x32xf32>
    %55 = arith.mulf %37, %37 : vector<16x32xf32>
    %cst_59 = arith.constant dense<0.000000e+00> : vector<32xf32>
    %56 = vector.multi_reduction <add>, %55, %cst_59 [0] : vector<16x32xf32> to vector<32xf32>
    %57 = vector.shape_cast %56 : vector<32xf32> to vector<1x32xf32>
    %58 = arith.addf %54, %57 : vector<1x32xf32>
    %c0_60 = arith.constant 0 : index
    %c0_61 = arith.constant 0 : index
    %c0_62 = arith.constant 0 : index
    %59 = vector.load %arg7[%c0_60, %c0_61, %c0_62] : memref<1x1x32xf32, #tpu.memory_space<vmem>>, vector<1x1x32xf32>
    %60 = vector.shape_cast %59 : vector<1x1x32xf32> to vector<1x32xf32>
    %61 = vector.shape_cast %58 : vector<1x32xf32> to vector<1x1x32xf32>
    tpu.vector_store %arg7[%c0_60, %c0_61, %c0_62], %61 {strides = array<i32>} : memref<1x1x32xf32, #tpu.memory_space<vmem>>, vector<1x1x32xf32>,
    return
  }
  func.func @transform_0(%arg0: i32, %arg1: i32) -> (i32, i32, i32, i32) {
    %c1_i32 = arith.constant 1 : i32
    %0 = arith.muli %arg0, %c1_i32 : i32
    %1 = arith.addi %0, %arg1 : i32
    %c0_i32 = arith.constant 0 : i32
    %c0_i32_0 = arith.constant 0 : i32
    %c0_i32_1 = arith.constant 0 : i32
    %c0_i32_2 = arith.constant 0 : i32
    return %1, %c0_i32, %c0_i32_0, %c0_i32_1 : i32, i32, i32, i32
  }
  func.func @transform_1(%arg0: i32, %arg1: i32) -> (i32, i32, i32) {
    %c0_i32 = arith.constant 0 : i32
    %c0_i32_0 = arith.constant 0 : i32
    %c0_i32_1 = arith.constant 0 : i32
    %c0_i32_2 = arith.constant 0 : i32
    return %c0_i32, %c0_i32_0, %c0_i32_1 : i32, i32, i32
  }
  func.func @transform_2(%arg0: i32, %arg1: i32) -> (i32, i32) {
    %c0_i32 = arith.constant 0 : i32
    %c0_i32_0 = arith.constant 0 : i32
    %c0_i32_1 = arith.constant 0 : i32
    return %c0_i32, %c0_i32_0 : i32, i32
  }
  func.func @transform_3(%arg0: i32, %arg1: i32) -> (i32, i32, i32) {
    %c0_i32 = arith.constant 0 : i32
    %c0_i32_0 = arith.constant 0 : i32
    return %arg0, %arg1, %c0_i32 : i32, i32, i32
  }
  func.func @transform_4(%arg0: i32, %arg1: i32) -> (i32, i32, i32) {
    %c0_i32 = arith.constant 0 : i32
    %c0_i32_0 = arith.constant 0 : i32
    %c0_i32_1 = arith.constant 0 : i32
    return %arg0, %c0_i32, %c0_i32_0 : i32, i32, i32
  }
  func.func @transform_5(%arg0: i32, %arg1: i32) -> (i32, i32, i32) {
    %c0_i32 = arith.constant 0 : i32
    %c0_i32_0 = arith.constant 0 : i32
    %c0_i32_1 = arith.constant 0 : i32
    return %arg0, %c0_i32, %c0_i32_0 : i32, i32, i32
  }
}

module attributes {stable_mosaic.version = 11 : i64} {
  func.func @_norm_act_kernel(%arg0: i32, %arg1: i32, %arg2: memref<1x9x64xbf16, #tpu.memory_space<vmem>>, %arg3: memref<1x1x64xf32, #tpu.memory_space<vmem>>, %arg4: memref<1x1x64xf32, #tpu.memory_space<vmem>>, %arg5: memref<1x9x64xbf16, #tpu.memory_space<vmem>>) attributes {dimension_semantics = [#tpu.dimension_semantics<parallel>, #tpu.dimension_semantics<parallel>], iteration_bounds = array<i64: 2, 1>, scalar_prefetch = 0 : i64, scratch_operands = 0 : i64, tpu.core_type = #tpu.core_type<tc>, window_params = [{transform_indices = @transform_0, window_bounds = array<i64: 1, 9, 64>}, {transform_indices = @transform_1, window_bounds = array<i64: 1, 1, 64>}, {transform_indices = @transform_2, window_bounds = array<i64: 1, 1, 64>}, {transform_indices = @transform_3, window_bounds = array<i64: 1, 9, 64>}]} {
    %c0 = arith.constant 0 : index
    %c0_0 = arith.constant 0 : index
    %c0_1 = arith.constant 0 : index
    %0 = vector.load %arg3[%c0, %c0_0, %c0_1] : memref<1x1x64xf32, #tpu.memory_space<vmem>>, vector<1x1x64xf32>
    %1 = vector.shape_cast %0 : vector<1x1x64xf32> to vector<1x64xf32>
    %cst = arith.constant 0.111111112 : f32
    %2 = vector.broadcast %cst : f32 to vector<1x64xf32>
    %3 = arith.mulf %1, %2 : vector<1x64xf32>
    %c0_2 = arith.constant 0 : index
    %c0_3 = arith.constant 0 : index
    %c0_4 = arith.constant 0 : index
    %4 = vector.load %arg4[%c0_2, %c0_3, %c0_4] : memref<1x1x64xf32, #tpu.memory_space<vmem>>, vector<1x1x64xf32>
    %5 = vector.shape_cast %4 : vector<1x1x64xf32> to vector<1x64xf32>
    %cst_5 = arith.constant 0.111111112 : f32
    %6 = vector.broadcast %cst_5 : f32 to vector<1x64xf32>
    %7 = arith.mulf %5, %6 : vector<1x64xf32>
    %8 = arith.mulf %3, %3 : vector<1x64xf32>
    %9 = arith.subf %7, %8 : vector<1x64xf32>
    %cst_6 = arith.constant 0.000000e+00 : f32
    %10 = vector.broadcast %cst_6 : f32 to vector<1x64xf32>
    %11 = arith.maximumf %9, %10 : vector<1x64xf32>
    %cst_7 = arith.constant 9.99999974E-6 : f32
    %12 = vector.broadcast %cst_7 : f32 to vector<1x64xf32>
    %13 = arith.addf %11, %12 : vector<1x64xf32>
    %14 = math.rsqrt %13 : vector<1x64xf32>
    %cst_8 = arith.constant 0.000000e+00 : f32
    %15 = vector.broadcast %cst_8 : f32 to vector<1x64xf32>
    %16 = arith.subf %15, %3 : vector<1x64xf32>
    %17 = arith.mulf %16, %14 : vector<1x64xf32>
    %c0_9 = arith.constant 0 : index
    %c0_10 = arith.constant 0 : index
    %c0_11 = arith.constant 0 : index
    %18 = vector.load %arg2[%c0_9, %c0_10, %c0_11] : memref<1x9x64xbf16, #tpu.memory_space<vmem>>, vector<1x9x64xbf16>
    %19 = vector.shape_cast %18 : vector<1x9x64xbf16> to vector<9x64xbf16>
    %20 = arith.extf %19 : vector<9x64xbf16> to vector<9x64xf32>
    %21 = vector.broadcast %14 : vector<1x64xf32> to vector<9x64xf32>
    %22 = arith.mulf %20, %21 : vector<9x64xf32>
    %23 = vector.broadcast %17 : vector<1x64xf32> to vector<9x64xf32>
    %24 = arith.addf %22, %23 : vector<9x64xf32>
    %cst_12 = arith.constant 0.000000e+00 : f32
    %25 = vector.broadcast %cst_12 : f32 to vector<9x64xf32>
    %26 = arith.cmpf oge, %24, %25 : vector<9x64xf32>
    %cst_13 = arith.constant 2.000000e-01 : f32
    %27 = vector.broadcast %cst_13 : f32 to vector<9x64xf32>
    %28 = arith.mulf %27, %24 : vector<9x64xf32>
    %29 = arith.select %26, %24, %28 : vector<9x64xi1>, vector<9x64xf32>
    %30 = arith.truncf %29 : vector<9x64xf32> to vector<9x64xbf16>
    %c0_14 = arith.constant 0 : index
    %c0_15 = arith.constant 0 : index
    %c0_16 = arith.constant 0 : index
    %31 = vector.load %arg5[%c0_14, %c0_15, %c0_16] : memref<1x9x64xbf16, #tpu.memory_space<vmem>>, vector<1x9x64xbf16>
    %32 = vector.shape_cast %31 : vector<1x9x64xbf16> to vector<9x64xbf16>
    %33 = vector.shape_cast %30 : vector<9x64xbf16> to vector<1x9x64xbf16>
    tpu.vector_store %arg5[%c0_14, %c0_15, %c0_16], %33 {strides = array<i32>} : memref<1x9x64xbf16, #tpu.memory_space<vmem>>, vector<1x9x64xbf16>,
    return
  }
  func.func @transform_0(%arg0: i32, %arg1: i32) -> (i32, i32, i32) {
    %c0_i32 = arith.constant 0 : i32
    %c0_i32_0 = arith.constant 0 : i32
    return %arg0, %arg1, %c0_i32 : i32, i32, i32
  }
  func.func @transform_1(%arg0: i32, %arg1: i32) -> (i32, i32, i32) {
    %c0_i32 = arith.constant 0 : i32
    %c0_i32_0 = arith.constant 0 : i32
    %c0_i32_1 = arith.constant 0 : i32
    return %arg0, %c0_i32, %c0_i32_0 : i32, i32, i32
  }
  func.func @transform_2(%arg0: i32, %arg1: i32) -> (i32, i32, i32) {
    %c0_i32 = arith.constant 0 : i32
    %c0_i32_0 = arith.constant 0 : i32
    %c0_i32_1 = arith.constant 0 : i32
    return %arg0, %c0_i32, %c0_i32_0 : i32, i32, i32
  }
  func.func @transform_3(%arg0: i32, %arg1: i32) -> (i32, i32, i32) {
    %c0_i32 = arith.constant 0 : i32
    %c0_i32_0 = arith.constant 0 : i32
    return %arg0, %arg1, %c0_i32 : i32, i32, i32
  }
}

module attributes {stable_mosaic.version = 11 : i64} {
  func.func @_conv_stats_kernel(%arg0: i32, %arg1: i32, %arg2: memref<1x6x6x32xbf16, #tpu.memory_space<vmem>>, %arg3: memref<16x32x64xbf16, #tpu.memory_space<vmem>>, %arg4: memref<1x64xf32, #tpu.memory_space<vmem>>, %arg5: memref<1x9x64xbf16, #tpu.memory_space<vmem>>, %arg6: memref<1x1x64xf32, #tpu.memory_space<vmem>>, %arg7: memref<1x1x64xf32, #tpu.memory_space<vmem>>, %arg8: memref<9x64xf32, #tpu.memory_space<vmem>>) attributes {dimension_semantics = [#tpu.dimension_semantics<parallel>, #tpu.dimension_semantics<arbitrary>], iteration_bounds = array<i64: 2, 1>, scalar_prefetch = 0 : i64, scratch_operands = 1 : i64, tpu.core_type = #tpu.core_type<tc>, window_params = [{transform_indices = @transform_0, window_bounds = array<i64: 1, 6, 6, 32>}, {pipeline_mode = #tpu.pipeline_mode<synchronous>, transform_indices = @transform_1, window_bounds = array<i64: 16, 32, 64>}, {pipeline_mode = #tpu.pipeline_mode<synchronous>, transform_indices = @transform_2, window_bounds = array<i64: 1, 64>}, {transform_indices = @transform_3, window_bounds = array<i64: 1, 9, 64>}, {transform_indices = @transform_4, window_bounds = array<i64: 1, 1, 64>}, {transform_indices = @transform_5, window_bounds = array<i64: 1, 1, 64>}]} {
    %c0 = arith.constant 0 : index
    %c0_0 = arith.constant 0 : index
    %c0_1 = arith.constant 0 : index
    %c0_2 = arith.constant 0 : index
    %0 = vector.load %arg2[%c0, %c0_0, %c0_1, %c0_2] : memref<1x6x6x32xbf16, #tpu.memory_space<vmem>>, vector<1x3x3x32xbf16>
    %1 = vector.shape_cast %0 : vector<1x3x3x32xbf16> to vector<3x3x32xbf16>
    %2 = vector.shape_cast %1 : vector<3x3x32xbf16> to vector<9x32xbf16>
    %c0_3 = arith.constant 0 : index
    %c0_4 = arith.constant 0 : index
    %c0_5 = arith.constant 0 : index
    %3 = vector.load %arg3[%c0_3, %c0_4, %c0_5] : memref<16x32x64xbf16, #tpu.memory_space<vmem>>, vector<1x32x64xbf16>
    %4 = vector.shape_cast %3 : vector<1x32x64xbf16> to vector<32x64xbf16>
    %cst = arith.constant dense<0.000000e+00> : vector<9x64xf32>
    %5 = tpu.matmul %2, %4, %cst {dimension_numbers = #tpu.dot_dimension_numbers<[1], [0], [0], [1], [0, 0, 1, 1], [], []>} : vector<9x32xbf16>, vector<32x64xbf16>, vector<9x64xf32> -> vector<9x64xf32>
    %c0_6 = arith.constant 0 : index
    %c0_7 = arith.constant 0 : index
    %6 = vector.load %arg8[%c0_6, %c0_7] : memref<9x64xf32, #tpu.memory_space<vmem>>, vector<9x64xf32>
    tpu.vector_store %arg8[%c0_6, %c0_7], %5 {strides = array<i32>} : memref<9x64xf32, #tpu.memory_space<vmem>>, vector<9x64xf32>,
    %c0_8 = arith.constant 0 : index
    %c0_9 = arith.constant 0 : index
    %c1 = arith.constant 1 : index
    %c0_10 = arith.constant 0 : index
    %7 = vector.load %arg2[%c0_8, %c0_9, %c1, %c0_10] : memref<1x6x6x32xbf16, #tpu.memory_space<vmem>>, vector<1x3x3x32xbf16>
    %8 = vector.shape_cast %7 : vector<1x3x3x32xbf16> to vector<3x3x32xbf16>
    %9 = vector.shape_cast %8 : vector<3x3x32xbf16> to vector<9x32xbf16>
    %c1_11 = arith.constant 1 : index
    %c0_12 = arith.constant 0 : index
    %c0_13 = arith.constant 0 : index
    %10 = vector.load %arg3[%c1_11, %c0_12, %c0_13] : memref<16x32x64xbf16, #tpu.memory_space<vmem>>, vector<1x32x64xbf16>
    %11 = vector.shape_cast %10 : vector<1x32x64xbf16> to vector<32x64xbf16>
    %cst_14 = arith.constant dense<0.000000e+00> : vector<9x64xf32>
    %12 = tpu.matmul %9, %11, %cst_14 {dimension_numbers = #tpu.dot_dimension_numbers<[1], [0], [0], [1], [0, 0, 1, 1], [], []>} : vector<9x32xbf16>, vector<32x64xbf16>, vector<9x64xf32> -> vector<9x64xf32>
    %c0_15 = arith.constant 0 : index
    %c0_16 = arith.constant 0 : index
    %13 = vector.load %arg8[%c0_15, %c0_16] : memref<9x64xf32, #tpu.memory_space<vmem>>, vector<9x64xf32>
    %14 = arith.addf %13, %12 : vector<9x64xf32>
    %c0_17 = arith.constant 0 : index
    %c0_18 = arith.constant 0 : index
    %15 = vector.load %arg8[%c0_17, %c0_18] : memref<9x64xf32, #tpu.memory_space<vmem>>, vector<9x64xf32>
    tpu.vector_store %arg8[%c0_17, %c0_18], %14 {strides = array<i32>} : memref<9x64xf32, #tpu.memory_space<vmem>>, vector<9x64xf32>,
    %c0_19 = arith.constant 0 : index
    %c0_20 = arith.constant 0 : index
    %c2 = arith.constant 2 : index
    %c0_21 = arith.constant 0 : index
    %16 = vector.load %arg2[%c0_19, %c0_20, %c2, %c0_21] : memref<1x6x6x32xbf16, #tpu.memory_space<vmem>>, vector<1x3x3x32xbf16>
    %17 = vector.shape_cast %16 : vector<1x3x3x32xbf16> to vector<3x3x32xbf16>
    %18 = vector.shape_cast %17 : vector<3x3x32xbf16> to vector<9x32xbf16>
    %c2_22 = arith.constant 2 : index
    %c0_23 = arith.constant 0 : index
    %c0_24 = arith.constant 0 : index
    %19 = vector.load %arg3[%c2_22, %c0_23, %c0_24] : memref<16x32x64xbf16, #tpu.memory_space<vmem>>, vector<1x32x64xbf16>
    %20 = vector.shape_cast %19 : vector<1x32x64xbf16> to vector<32x64xbf16>
    %cst_25 = arith.constant dense<0.000000e+00> : vector<9x64xf32>
    %21 = tpu.matmul %18, %20, %cst_25 {dimension_numbers = #tpu.dot_dimension_numbers<[1], [0], [0], [1], [0, 0, 1, 1], [], []>} : vector<9x32xbf16>, vector<32x64xbf16>, vector<9x64xf32> -> vector<9x64xf32>
    %c0_26 = arith.constant 0 : index
    %c0_27 = arith.constant 0 : index
    %22 = vector.load %arg8[%c0_26, %c0_27] : memref<9x64xf32, #tpu.memory_space<vmem>>, vector<9x64xf32>
    %23 = arith.addf %22, %21 : vector<9x64xf32>
    %c0_28 = arith.constant 0 : index
    %c0_29 = arith.constant 0 : index
    %24 = vector.load %arg8[%c0_28, %c0_29] : memref<9x64xf32, #tpu.memory_space<vmem>>, vector<9x64xf32>
    tpu.vector_store %arg8[%c0_28, %c0_29], %23 {strides = array<i32>} : memref<9x64xf32, #tpu.memory_space<vmem>>, vector<9x64xf32>,
    %c0_30 = arith.constant 0 : index
    %c0_31 = arith.constant 0 : index
    %c3 = arith.constant 3 : index
    %c0_32 = arith.constant 0 : index
    %25 = vector.load %arg2[%c0_30, %c0_31, %c3, %c0_32] : memref<1x6x6x32xbf16, #tpu.memory_space<vmem>>, vector<1x3x3x32xbf16>
    %26 = vector.shape_cast %25 : vector<1x3x3x32xbf16> to vector<3x3x32xbf16>
    %27 = vector.shape_cast %26 : vector<3x3x32xbf16> to vector<9x32xbf16>
    %c3_33 = arith.constant 3 : index
    %c0_34 = arith.constant 0 : index
    %c0_35 = arith.constant 0 : index
    %28 = vector.load %arg3[%c3_33, %c0_34, %c0_35] : memref<16x32x64xbf16, #tpu.memory_space<vmem>>, vector<1x32x64xbf16>
    %29 = vector.shape_cast %28 : vector<1x32x64xbf16> to vector<32x64xbf16>
    %cst_36 = arith.constant dense<0.000000e+00> : vector<9x64xf32>
    %30 = tpu.matmul %27, %29, %cst_36 {dimension_numbers = #tpu.dot_dimension_numbers<[1], [0], [0], [1], [0, 0, 1, 1], [], []>} : vector<9x32xbf16>, vector<32x64xbf16>, vector<9x64xf32> -> vector<9x64xf32>
    %c0_37 = arith.constant 0 : index
    %c0_38 = arith.constant 0 : index
    %31 = vector.load %arg8[%c0_37, %c0_38] : memref<9x64xf32, #tpu.memory_space<vmem>>, vector<9x64xf32>
    %32 = arith.addf %31, %30 : vector<9x64xf32>
    %c0_39 = arith.constant 0 : index
    %c0_40 = arith.constant 0 : index
    %33 = vector.load %arg8[%c0_39, %c0_40] : memref<9x64xf32, #tpu.memory_space<vmem>>, vector<9x64xf32>
    tpu.vector_store %arg8[%c0_39, %c0_40], %32 {strides = array<i32>} : memref<9x64xf32, #tpu.memory_space<vmem>>, vector<9x64xf32>,
    %c0_41 = arith.constant 0 : index
    %c1_42 = arith.constant 1 : index
    %c0_43 = arith.constant 0 : index
    %c0_44 = arith.constant 0 : index
    %34 = vector.load %arg2[%c0_41, %c1_42, %c0_43, %c0_44] : memref<1x6x6x32xbf16, #tpu.memory_space<vmem>>, vector<1x3x3x32xbf16>
    %35 = vector.shape_cast %34 : vector<1x3x3x32xbf16> to vector<3x3x32xbf16>
    %36 = vector.shape_cast %35 : vector<3x3x32xbf16> to vector<9x32xbf16>
    %c4 = arith.constant 4 : index
    %c0_45 = arith.constant 0 : index
    %c0_46 = arith.constant 0 : index
    %37 = vector.load %arg3[%c4, %c0_45, %c0_46] : memref<16x32x64xbf16, #tpu.memory_space<vmem>>, vector<1x32x64xbf16>
    %38 = vector.shape_cast %37 : vector<1x32x64xbf16> to vector<32x64xbf16>
    %cst_47 = arith.constant dense<0.000000e+00> : vector<9x64xf32>
    %39 = tpu.matmul %36, %38, %cst_47 {dimension_numbers = #tpu.dot_dimension_numbers<[1], [0], [0], [1], [0, 0, 1, 1], [], []>} : vector<9x32xbf16>, vector<32x64xbf16>, vector<9x64xf32> -> vector<9x64xf32>
    %c0_48 = arith.constant 0 : index
    %c0_49 = arith.constant 0 : index
    %40 = vector.load %arg8[%c0_48, %c0_49] : memref<9x64xf32, #tpu.memory_space<vmem>>, vector<9x64xf32>
    %41 = arith.addf %40, %39 : vector<9x64xf32>
    %c0_50 = arith.constant 0 : index
    %c0_51 = arith.constant 0 : index
    %42 = vector.load %arg8[%c0_50, %c0_51] : memref<9x64xf32, #tpu.memory_space<vmem>>, vector<9x64xf32>
    tpu.vector_store %arg8[%c0_50, %c0_51], %41 {strides = array<i32>} : memref<9x64xf32, #tpu.memory_space<vmem>>, vector<9x64xf32>,
    %c0_52 = arith.constant 0 : index
    %c1_53 = arith.constant 1 : index
    %c1_54 = arith.constant 1 : index
    %c0_55 = arith.constant 0 : index
    %43 = vector.load %arg2[%c0_52, %c1_53, %c1_54, %c0_55] : memref<1x6x6x32xbf16, #tpu.memory_space<vmem>>, vector<1x3x3x32xbf16>
    %44 = vector.shape_cast %43 : vector<1x3x3x32xbf16> to vector<3x3x32xbf16>
    %45 = vector.shape_cast %44 : vector<3x3x32xbf16> to vector<9x32xbf16>
    %c5 = arith.constant 5 : index
    %c0_56 = arith.constant 0 : index
    %c0_57 = arith.constant 0 : index
    %46 = vector.load %arg3[%c5, %c0_56, %c0_57] : memref<16x32x64xbf16, #tpu.memory_space<vmem>>, vector<1x32x64xbf16>
    %47 = vector.shape_cast %46 : vector<1x32x64xbf16> to vector<32x64xbf16>
    %cst_58 = arith.constant dense<0.000000e+00> : vector<9x64xf32>
    %48 = tpu.matmul %45, %47, %cst_58 {dimension_numbers = #tpu.dot_dimension_numbers<[1], [0], [0], [1], [0, 0, 1, 1], [], []>} : vector<9x32xbf16>, vector<32x64xbf16>, vector<9x64xf32> -> vector<9x64xf32>
    %c0_59 = arith.constant 0 : index
    %c0_60 = arith.constant 0 : index
    %49 = vector.load %arg8[%c0_59, %c0_60] : memref<9x64xf32, #tpu.memory_space<vmem>>, vector<9x64xf32>
    %50 = arith.addf %49, %48 : vector<9x64xf32>
    %c0_61 = arith.constant 0 : index
    %c0_62 = arith.constant 0 : index
    %51 = vector.load %arg8[%c0_61, %c0_62] : memref<9x64xf32, #tpu.memory_space<vmem>>, vector<9x64xf32>
    tpu.vector_store %arg8[%c0_61, %c0_62], %50 {strides = array<i32>} : memref<9x64xf32, #tpu.memory_space<vmem>>, vector<9x64xf32>,
    %c0_63 = arith.constant 0 : index
    %c1_64 = arith.constant 1 : index
    %c2_65 = arith.constant 2 : index
    %c0_66 = arith.constant 0 : index
    %52 = vector.load %arg2[%c0_63, %c1_64, %c2_65, %c0_66] : memref<1x6x6x32xbf16, #tpu.memory_space<vmem>>, vector<1x3x3x32xbf16>
    %53 = vector.shape_cast %52 : vector<1x3x3x32xbf16> to vector<3x3x32xbf16>
    %54 = vector.shape_cast %53 : vector<3x3x32xbf16> to vector<9x32xbf16>
    %c6 = arith.constant 6 : index
    %c0_67 = arith.constant 0 : index
    %c0_68 = arith.constant 0 : index
    %55 = vector.load %arg3[%c6, %c0_67, %c0_68] : memref<16x32x64xbf16, #tpu.memory_space<vmem>>, vector<1x32x64xbf16>
    %56 = vector.shape_cast %55 : vector<1x32x64xbf16> to vector<32x64xbf16>
    %cst_69 = arith.constant dense<0.000000e+00> : vector<9x64xf32>
    %57 = tpu.matmul %54, %56, %cst_69 {dimension_numbers = #tpu.dot_dimension_numbers<[1], [0], [0], [1], [0, 0, 1, 1], [], []>} : vector<9x32xbf16>, vector<32x64xbf16>, vector<9x64xf32> -> vector<9x64xf32>
    %c0_70 = arith.constant 0 : index
    %c0_71 = arith.constant 0 : index
    %58 = vector.load %arg8[%c0_70, %c0_71] : memref<9x64xf32, #tpu.memory_space<vmem>>, vector<9x64xf32>
    %59 = arith.addf %58, %57 : vector<9x64xf32>
    %c0_72 = arith.constant 0 : index
    %c0_73 = arith.constant 0 : index
    %60 = vector.load %arg8[%c0_72, %c0_73] : memref<9x64xf32, #tpu.memory_space<vmem>>, vector<9x64xf32>
    tpu.vector_store %arg8[%c0_72, %c0_73], %59 {strides = array<i32>} : memref<9x64xf32, #tpu.memory_space<vmem>>, vector<9x64xf32>,
    %c0_74 = arith.constant 0 : index
    %c1_75 = arith.constant 1 : index
    %c3_76 = arith.constant 3 : index
    %c0_77 = arith.constant 0 : index
    %61 = vector.load %arg2[%c0_74, %c1_75, %c3_76, %c0_77] : memref<1x6x6x32xbf16, #tpu.memory_space<vmem>>, vector<1x3x3x32xbf16>
    %62 = vector.shape_cast %61 : vector<1x3x3x32xbf16> to vector<3x3x32xbf16>
    %63 = vector.shape_cast %62 : vector<3x3x32xbf16> to vector<9x32xbf16>
    %c7 = arith.constant 7 : index
    %c0_78 = arith.constant 0 : index
    %c0_79 = arith.constant 0 : index
    %64 = vector.load %arg3[%c7, %c0_78, %c0_79] : memref<16x32x64xbf16, #tpu.memory_space<vmem>>, vector<1x32x64xbf16>
    %65 = vector.shape_cast %64 : vector<1x32x64xbf16> to vector<32x64xbf16>
    %cst_80 = arith.constant dense<0.000000e+00> : vector<9x64xf32>
    %66 = tpu.matmul %63, %65, %cst_80 {dimension_numbers = #tpu.dot_dimension_numbers<[1], [0], [0], [1], [0, 0, 1, 1], [], []>} : vector<9x32xbf16>, vector<32x64xbf16>, vector<9x64xf32> -> vector<9x64xf32>
    %c0_81 = arith.constant 0 : index
    %c0_82 = arith.constant 0 : index
    %67 = vector.load %arg8[%c0_81, %c0_82] : memref<9x64xf32, #tpu.memory_space<vmem>>, vector<9x64xf32>
    %68 = arith.addf %67, %66 : vector<9x64xf32>
    %c0_83 = arith.constant 0 : index
    %c0_84 = arith.constant 0 : index
    %69 = vector.load %arg8[%c0_83, %c0_84] : memref<9x64xf32, #tpu.memory_space<vmem>>, vector<9x64xf32>
    tpu.vector_store %arg8[%c0_83, %c0_84], %68 {strides = array<i32>} : memref<9x64xf32, #tpu.memory_space<vmem>>, vector<9x64xf32>,
    %c0_85 = arith.constant 0 : index
    %c2_86 = arith.constant 2 : index
    %c0_87 = arith.constant 0 : index
    %c0_88 = arith.constant 0 : index
    %70 = vector.load %arg2[%c0_85, %c2_86, %c0_87, %c0_88] : memref<1x6x6x32xbf16, #tpu.memory_space<vmem>>, vector<1x3x3x32xbf16>
    %71 = vector.shape_cast %70 : vector<1x3x3x32xbf16> to vector<3x3x32xbf16>
    %72 = vector.shape_cast %71 : vector<3x3x32xbf16> to vector<9x32xbf16>
    %c8 = arith.constant 8 : index
    %c0_89 = arith.constant 0 : index
    %c0_90 = arith.constant 0 : index
    %73 = vector.load %arg3[%c8, %c0_89, %c0_90] : memref<16x32x64xbf16, #tpu.memory_space<vmem>>, vector<1x32x64xbf16>
    %74 = vector.shape_cast %73 : vector<1x32x64xbf16> to vector<32x64xbf16>
    %cst_91 = arith.constant dense<0.000000e+00> : vector<9x64xf32>
    %75 = tpu.matmul %72, %74, %cst_91 {dimension_numbers = #tpu.dot_dimension_numbers<[1], [0], [0], [1], [0, 0, 1, 1], [], []>} : vector<9x32xbf16>, vector<32x64xbf16>, vector<9x64xf32> -> vector<9x64xf32>
    %c0_92 = arith.constant 0 : index
    %c0_93 = arith.constant 0 : index
    %76 = vector.load %arg8[%c0_92, %c0_93] : memref<9x64xf32, #tpu.memory_space<vmem>>, vector<9x64xf32>
    %77 = arith.addf %76, %75 : vector<9x64xf32>
    %c0_94 = arith.constant 0 : index
    %c0_95 = arith.constant 0 : index
    %78 = vector.load %arg8[%c0_94, %c0_95] : memref<9x64xf32, #tpu.memory_space<vmem>>, vector<9x64xf32>
    tpu.vector_store %arg8[%c0_94, %c0_95], %77 {strides = array<i32>} : memref<9x64xf32, #tpu.memory_space<vmem>>, vector<9x64xf32>,
    %c0_96 = arith.constant 0 : index
    %c2_97 = arith.constant 2 : index
    %c1_98 = arith.constant 1 : index
    %c0_99 = arith.constant 0 : index
    %79 = vector.load %arg2[%c0_96, %c2_97, %c1_98, %c0_99] : memref<1x6x6x32xbf16, #tpu.memory_space<vmem>>, vector<1x3x3x32xbf16>
    %80 = vector.shape_cast %79 : vector<1x3x3x32xbf16> to vector<3x3x32xbf16>
    %81 = vector.shape_cast %80 : vector<3x3x32xbf16> to vector<9x32xbf16>
    %c9 = arith.constant 9 : index
    %c0_100 = arith.constant 0 : index
    %c0_101 = arith.constant 0 : index
    %82 = vector.load %arg3[%c9, %c0_100, %c0_101] : memref<16x32x64xbf16, #tpu.memory_space<vmem>>, vector<1x32x64xbf16>
    %83 = vector.shape_cast %82 : vector<1x32x64xbf16> to vector<32x64xbf16>
    %cst_102 = arith.constant dense<0.000000e+00> : vector<9x64xf32>
    %84 = tpu.matmul %81, %83, %cst_102 {dimension_numbers = #tpu.dot_dimension_numbers<[1], [0], [0], [1], [0, 0, 1, 1], [], []>} : vector<9x32xbf16>, vector<32x64xbf16>, vector<9x64xf32> -> vector<9x64xf32>
    %c0_103 = arith.constant 0 : index
    %c0_104 = arith.constant 0 : index
    %85 = vector.load %arg8[%c0_103, %c0_104] : memref<9x64xf32, #tpu.memory_space<vmem>>, vector<9x64xf32>
    %86 = arith.addf %85, %84 : vector<9x64xf32>
    %c0_105 = arith.constant 0 : index
    %c0_106 = arith.constant 0 : index
    %87 = vector.load %arg8[%c0_105, %c0_106] : memref<9x64xf32, #tpu.memory_space<vmem>>, vector<9x64xf32>
    tpu.vector_store %arg8[%c0_105, %c0_106], %86 {strides = array<i32>} : memref<9x64xf32, #tpu.memory_space<vmem>>, vector<9x64xf32>,
    %c0_107 = arith.constant 0 : index
    %c2_108 = arith.constant 2 : index
    %c2_109 = arith.constant 2 : index
    %c0_110 = arith.constant 0 : index
    %88 = vector.load %arg2[%c0_107, %c2_108, %c2_109, %c0_110] : memref<1x6x6x32xbf16, #tpu.memory_space<vmem>>, vector<1x3x3x32xbf16>
    %89 = vector.shape_cast %88 : vector<1x3x3x32xbf16> to vector<3x3x32xbf16>
    %90 = vector.shape_cast %89 : vector<3x3x32xbf16> to vector<9x32xbf16>
    %c10 = arith.constant 10 : index
    %c0_111 = arith.constant 0 : index
    %c0_112 = arith.constant 0 : index
    %91 = vector.load %arg3[%c10, %c0_111, %c0_112] : memref<16x32x64xbf16, #tpu.memory_space<vmem>>, vector<1x32x64xbf16>
    %92 = vector.shape_cast %91 : vector<1x32x64xbf16> to vector<32x64xbf16>
    %cst_113 = arith.constant dense<0.000000e+00> : vector<9x64xf32>
    %93 = tpu.matmul %90, %92, %cst_113 {dimension_numbers = #tpu.dot_dimension_numbers<[1], [0], [0], [1], [0, 0, 1, 1], [], []>} : vector<9x32xbf16>, vector<32x64xbf16>, vector<9x64xf32> -> vector<9x64xf32>
    %c0_114 = arith.constant 0 : index
    %c0_115 = arith.constant 0 : index
    %94 = vector.load %arg8[%c0_114, %c0_115] : memref<9x64xf32, #tpu.memory_space<vmem>>, vector<9x64xf32>
    %95 = arith.addf %94, %93 : vector<9x64xf32>
    %c0_116 = arith.constant 0 : index
    %c0_117 = arith.constant 0 : index
    %96 = vector.load %arg8[%c0_116, %c0_117] : memref<9x64xf32, #tpu.memory_space<vmem>>, vector<9x64xf32>
    tpu.vector_store %arg8[%c0_116, %c0_117], %95 {strides = array<i32>} : memref<9x64xf32, #tpu.memory_space<vmem>>, vector<9x64xf32>,
    %c0_118 = arith.constant 0 : index
    %c2_119 = arith.constant 2 : index
    %c3_120 = arith.constant 3 : index
    %c0_121 = arith.constant 0 : index
    %97 = vector.load %arg2[%c0_118, %c2_119, %c3_120, %c0_121] : memref<1x6x6x32xbf16, #tpu.memory_space<vmem>>, vector<1x3x3x32xbf16>
    %98 = vector.shape_cast %97 : vector<1x3x3x32xbf16> to vector<3x3x32xbf16>
    %99 = vector.shape_cast %98 : vector<3x3x32xbf16> to vector<9x32xbf16>
    %c11 = arith.constant 11 : index
    %c0_122 = arith.constant 0 : index
    %c0_123 = arith.constant 0 : index
    %100 = vector.load %arg3[%c11, %c0_122, %c0_123] : memref<16x32x64xbf16, #tpu.memory_space<vmem>>, vector<1x32x64xbf16>
    %101 = vector.shape_cast %100 : vector<1x32x64xbf16> to vector<32x64xbf16>
    %cst_124 = arith.constant dense<0.000000e+00> : vector<9x64xf32>
    %102 = tpu.matmul %99, %101, %cst_124 {dimension_numbers = #tpu.dot_dimension_numbers<[1], [0], [0], [1], [0, 0, 1, 1], [], []>} : vector<9x32xbf16>, vector<32x64xbf16>, vector<9x64xf32> -> vector<9x64xf32>
    %c0_125 = arith.constant 0 : index
    %c0_126 = arith.constant 0 : index
    %103 = vector.load %arg8[%c0_125, %c0_126] : memref<9x64xf32, #tpu.memory_space<vmem>>, vector<9x64xf32>
    %104 = arith.addf %103, %102 : vector<9x64xf32>
    %c0_127 = arith.constant 0 : index
    %c0_128 = arith.constant 0 : index
    %105 = vector.load %arg8[%c0_127, %c0_128] : memref<9x64xf32, #tpu.memory_space<vmem>>, vector<9x64xf32>
    tpu.vector_store %arg8[%c0_127, %c0_128], %104 {strides = array<i32>} : memref<9x64xf32, #tpu.memory_space<vmem>>, vector<9x64xf32>,
    %c0_129 = arith.constant 0 : index
    %c3_130 = arith.constant 3 : index
    %c0_131 = arith.constant 0 : index
    %c0_132 = arith.constant 0 : index
    %106 = vector.load %arg2[%c0_129, %c3_130, %c0_131, %c0_132] : memref<1x6x6x32xbf16, #tpu.memory_space<vmem>>, vector<1x3x3x32xbf16>
    %107 = vector.shape_cast %106 : vector<1x3x3x32xbf16> to vector<3x3x32xbf16>
    %108 = vector.shape_cast %107 : vector<3x3x32xbf16> to vector<9x32xbf16>
    %c12 = arith.constant 12 : index
    %c0_133 = arith.constant 0 : index
    %c0_134 = arith.constant 0 : index
    %109 = vector.load %arg3[%c12, %c0_133, %c0_134] : memref<16x32x64xbf16, #tpu.memory_space<vmem>>, vector<1x32x64xbf16>
    %110 = vector.shape_cast %109 : vector<1x32x64xbf16> to vector<32x64xbf16>
    %cst_135 = arith.constant dense<0.000000e+00> : vector<9x64xf32>
    %111 = tpu.matmul %108, %110, %cst_135 {dimension_numbers = #tpu.dot_dimension_numbers<[1], [0], [0], [1], [0, 0, 1, 1], [], []>} : vector<9x32xbf16>, vector<32x64xbf16>, vector<9x64xf32> -> vector<9x64xf32>
    %c0_136 = arith.constant 0 : index
    %c0_137 = arith.constant 0 : index
    %112 = vector.load %arg8[%c0_136, %c0_137] : memref<9x64xf32, #tpu.memory_space<vmem>>, vector<9x64xf32>
    %113 = arith.addf %112, %111 : vector<9x64xf32>
    %c0_138 = arith.constant 0 : index
    %c0_139 = arith.constant 0 : index
    %114 = vector.load %arg8[%c0_138, %c0_139] : memref<9x64xf32, #tpu.memory_space<vmem>>, vector<9x64xf32>
    tpu.vector_store %arg8[%c0_138, %c0_139], %113 {strides = array<i32>} : memref<9x64xf32, #tpu.memory_space<vmem>>, vector<9x64xf32>,
    %c0_140 = arith.constant 0 : index
    %c3_141 = arith.constant 3 : index
    %c1_142 = arith.constant 1 : index
    %c0_143 = arith.constant 0 : index
    %115 = vector.load %arg2[%c0_140, %c3_141, %c1_142, %c0_143] : memref<1x6x6x32xbf16, #tpu.memory_space<vmem>>, vector<1x3x3x32xbf16>
    %116 = vector.shape_cast %115 : vector<1x3x3x32xbf16> to vector<3x3x32xbf16>
    %117 = vector.shape_cast %116 : vector<3x3x32xbf16> to vector<9x32xbf16>
    %c13 = arith.constant 13 : index
    %c0_144 = arith.constant 0 : index
    %c0_145 = arith.constant 0 : index
    %118 = vector.load %arg3[%c13, %c0_144, %c0_145] : memref<16x32x64xbf16, #tpu.memory_space<vmem>>, vector<1x32x64xbf16>
    %119 = vector.shape_cast %118 : vector<1x32x64xbf16> to vector<32x64xbf16>
    %cst_146 = arith.constant dense<0.000000e+00> : vector<9x64xf32>
    %120 = tpu.matmul %117, %119, %cst_146 {dimension_numbers = #tpu.dot_dimension_numbers<[1], [0], [0], [1], [0, 0, 1, 1], [], []>} : vector<9x32xbf16>, vector<32x64xbf16>, vector<9x64xf32> -> vector<9x64xf32>
    %c0_147 = arith.constant 0 : index
    %c0_148 = arith.constant 0 : index
    %121 = vector.load %arg8[%c0_147, %c0_148] : memref<9x64xf32, #tpu.memory_space<vmem>>, vector<9x64xf32>
    %122 = arith.addf %121, %120 : vector<9x64xf32>
    %c0_149 = arith.constant 0 : index
    %c0_150 = arith.constant 0 : index
    %123 = vector.load %arg8[%c0_149, %c0_150] : memref<9x64xf32, #tpu.memory_space<vmem>>, vector<9x64xf32>
    tpu.vector_store %arg8[%c0_149, %c0_150], %122 {strides = array<i32>} : memref<9x64xf32, #tpu.memory_space<vmem>>, vector<9x64xf32>,
    %c0_151 = arith.constant 0 : index
    %c3_152 = arith.constant 3 : index
    %c2_153 = arith.constant 2 : index
    %c0_154 = arith.constant 0 : index
    %124 = vector.load %arg2[%c0_151, %c3_152, %c2_153, %c0_154] : memref<1x6x6x32xbf16, #tpu.memory_space<vmem>>, vector<1x3x3x32xbf16>
    %125 = vector.shape_cast %124 : vector<1x3x3x32xbf16> to vector<3x3x32xbf16>
    %126 = vector.shape_cast %125 : vector<3x3x32xbf16> to vector<9x32xbf16>
    %c14 = arith.constant 14 : index
    %c0_155 = arith.constant 0 : index
    %c0_156 = arith.constant 0 : index
    %127 = vector.load %arg3[%c14, %c0_155, %c0_156] : memref<16x32x64xbf16, #tpu.memory_space<vmem>>, vector<1x32x64xbf16>
    %128 = vector.shape_cast %127 : vector<1x32x64xbf16> to vector<32x64xbf16>
    %cst_157 = arith.constant dense<0.000000e+00> : vector<9x64xf32>
    %129 = tpu.matmul %126, %128, %cst_157 {dimension_numbers = #tpu.dot_dimension_numbers<[1], [0], [0], [1], [0, 0, 1, 1], [], []>} : vector<9x32xbf16>, vector<32x64xbf16>, vector<9x64xf32> -> vector<9x64xf32>
    %c0_158 = arith.constant 0 : index
    %c0_159 = arith.constant 0 : index
    %130 = vector.load %arg8[%c0_158, %c0_159] : memref<9x64xf32, #tpu.memory_space<vmem>>, vector<9x64xf32>
    %131 = arith.addf %130, %129 : vector<9x64xf32>
    %c0_160 = arith.constant 0 : index
    %c0_161 = arith.constant 0 : index
    %132 = vector.load %arg8[%c0_160, %c0_161] : memref<9x64xf32, #tpu.memory_space<vmem>>, vector<9x64xf32>
    tpu.vector_store %arg8[%c0_160, %c0_161], %131 {strides = array<i32>} : memref<9x64xf32, #tpu.memory_space<vmem>>, vector<9x64xf32>,
    %c0_162 = arith.constant 0 : index
    %c3_163 = arith.constant 3 : index
    %c3_164 = arith.constant 3 : index
    %c0_165 = arith.constant 0 : index
    %133 = vector.load %arg2[%c0_162, %c3_163, %c3_164, %c0_165] : memref<1x6x6x32xbf16, #tpu.memory_space<vmem>>, vector<1x3x3x32xbf16>
    %134 = vector.shape_cast %133 : vector<1x3x3x32xbf16> to vector<3x3x32xbf16>
    %135 = vector.shape_cast %134 : vector<3x3x32xbf16> to vector<9x32xbf16>
    %c15 = arith.constant 15 : index
    %c0_166 = arith.constant 0 : index
    %c0_167 = arith.constant 0 : index
    %136 = vector.load %arg3[%c15, %c0_166, %c0_167] : memref<16x32x64xbf16, #tpu.memory_space<vmem>>, vector<1x32x64xbf16>
    %137 = vector.shape_cast %136 : vector<1x32x64xbf16> to vector<32x64xbf16>
    %cst_168 = arith.constant dense<0.000000e+00> : vector<9x64xf32>
    %138 = tpu.matmul %135, %137, %cst_168 {dimension_numbers = #tpu.dot_dimension_numbers<[1], [0], [0], [1], [0, 0, 1, 1], [], []>} : vector<9x32xbf16>, vector<32x64xbf16>, vector<9x64xf32> -> vector<9x64xf32>
    %c0_169 = arith.constant 0 : index
    %c0_170 = arith.constant 0 : index
    %139 = vector.load %arg8[%c0_169, %c0_170] : memref<9x64xf32, #tpu.memory_space<vmem>>, vector<9x64xf32>
    %140 = arith.addf %139, %138 : vector<9x64xf32>
    %c0_171 = arith.constant 0 : index
    %c0_172 = arith.constant 0 : index
    %141 = vector.load %arg8[%c0_171, %c0_172] : memref<9x64xf32, #tpu.memory_space<vmem>>, vector<9x64xf32>
    tpu.vector_store %arg8[%c0_171, %c0_172], %140 {strides = array<i32>} : memref<9x64xf32, #tpu.memory_space<vmem>>, vector<9x64xf32>,
    %c0_173 = arith.constant 0 : index
    %c0_174 = arith.constant 0 : index
    %142 = vector.load %arg8[%c0_173, %c0_174] : memref<9x64xf32, #tpu.memory_space<vmem>>, vector<9x64xf32>
    %c0_175 = arith.constant 0 : index
    %c0_176 = arith.constant 0 : index
    %143 = vector.load %arg4[%c0_175, %c0_176] : memref<1x64xf32, #tpu.memory_space<vmem>>, vector<1x64xf32>
    %144 = vector.broadcast %143 : vector<1x64xf32> to vector<9x64xf32>
    %145 = arith.addf %142, %144 : vector<9x64xf32>
    %146 = arith.truncf %145 : vector<9x64xf32> to vector<9x64xbf16>
    %c0_177 = arith.constant 0 : index
    %c0_178 = arith.constant 0 : index
    %c0_179 = arith.constant 0 : index
    %147 = vector.load %arg5[%c0_177, %c0_178, %c0_179] : memref<1x9x64xbf16, #tpu.memory_space<vmem>>, vector<1x9x64xbf16>
    %148 = vector.shape_cast %147 : vector<1x9x64xbf16> to vector<9x64xbf16>
    %149 = vector.shape_cast %146 : vector<9x64xbf16> to vector<1x9x64xbf16>
    tpu.vector_store %arg5[%c0_177, %c0_178, %c0_179], %149 {strides = array<i32>} : memref<1x9x64xbf16, #tpu.memory_space<vmem>>, vector<1x9x64xbf16>,
    %c0_i32 = arith.constant 0 : i32
    %150 = arith.cmpi eq, %arg1, %c0_i32 : i32
    %151 = arith.extui %150 : i1 to i32
    %c0_i32_180 = arith.constant 0 : i32
    %152 = arith.cmpi ne, %151, %c0_i32_180 : i32
    scf.if %152 {
      %cst_195 = arith.constant 0.000000e+00 : f32
      %170 = vector.broadcast %cst_195 : f32 to vector<1x1x64xf32>
      %c0_196 = arith.constant 0 : index
      %c0_197 = arith.constant 0 : index
      %c0_198 = arith.constant 0 : index
      %171 = vector.load %arg6[%c0_196, %c0_197, %c0_198] : memref<1x1x64xf32, #tpu.memory_space<vmem>>, vector<1x1x64xf32>
      tpu.vector_store %arg6[%c0_196, %c0_197, %c0_198], %170 {strides = array<i32>} : memref<1x1x64xf32, #tpu.memory_space<vmem>>, vector<1x1x64xf32>,
      %cst_199 = arith.constant 0.000000e+00 : f32
      %172 = vector.broadcast %cst_199 : f32 to vector<1x1x64xf32>
      %c0_200 = arith.constant 0 : index
      %c0_201 = arith.constant 0 : index
      %c0_202 = arith.constant 0 : index
      %173 = vector.load %arg7[%c0_200, %c0_201, %c0_202] : memref<1x1x64xf32, #tpu.memory_space<vmem>>, vector<1x1x64xf32>
      tpu.vector_store %arg7[%c0_200, %c0_201, %c0_202], %172 {strides = array<i32>} : memref<1x1x64xf32, #tpu.memory_space<vmem>>, vector<1x1x64xf32>,
    } else {
    }
    %c0_181 = arith.constant 0 : index
    %c0_182 = arith.constant 0 : index
    %c0_183 = arith.constant 0 : index
    %153 = vector.load %arg6[%c0_181, %c0_182, %c0_183] : memref<1x1x64xf32, #tpu.memory_space<vmem>>, vector<1x1x64xf32>
    %154 = vector.shape_cast %153 : vector<1x1x64xf32> to vector<1x64xf32>
    %cst_184 = arith.constant dense<0.000000e+00> : vector<64xf32>
    %155 = vector.multi_reduction <add>, %145, %cst_184 [0] : vector<9x64xf32> to vector<64xf32>
    %156 = vector.shape_cast %155 : vector<64xf32> to vector<1x64xf32>
    %157 = arith.addf %154, %156 : vector<1x64xf32>
    %c0_185 = arith.constant 0 : index
    %c0_186 = arith.constant 0 : index
    %c0_187 = arith.constant 0 : index
    %158 = vector.load %arg6[%c0_185, %c0_186, %c0_187] : memref<1x1x64xf32, #tpu.memory_space<vmem>>, vector<1x1x64xf32>
    %159 = vector.shape_cast %158 : vector<1x1x64xf32> to vector<1x64xf32>
    %160 = vector.shape_cast %157 : vector<1x64xf32> to vector<1x1x64xf32>
    tpu.vector_store %arg6[%c0_185, %c0_186, %c0_187], %160 {strides = array<i32>} : memref<1x1x64xf32, #tpu.memory_space<vmem>>, vector<1x1x64xf32>,
    %c0_188 = arith.constant 0 : index
    %c0_189 = arith.constant 0 : index
    %c0_190 = arith.constant 0 : index
    %161 = vector.load %arg7[%c0_188, %c0_189, %c0_190] : memref<1x1x64xf32, #tpu.memory_space<vmem>>, vector<1x1x64xf32>
    %162 = vector.shape_cast %161 : vector<1x1x64xf32> to vector<1x64xf32>
    %163 = arith.mulf %145, %145 : vector<9x64xf32>
    %cst_191 = arith.constant dense<0.000000e+00> : vector<64xf32>
    %164 = vector.multi_reduction <add>, %163, %cst_191 [0] : vector<9x64xf32> to vector<64xf32>
    %165 = vector.shape_cast %164 : vector<64xf32> to vector<1x64xf32>
    %166 = arith.addf %162, %165 : vector<1x64xf32>
    %c0_192 = arith.constant 0 : index
    %c0_193 = arith.constant 0 : index
    %c0_194 = arith.constant 0 : index
    %167 = vector.load %arg7[%c0_192, %c0_193, %c0_194] : memref<1x1x64xf32, #tpu.memory_space<vmem>>, vector<1x1x64xf32>
    %168 = vector.shape_cast %167 : vector<1x1x64xf32> to vector<1x64xf32>
    %169 = vector.shape_cast %166 : vector<1x64xf32> to vector<1x1x64xf32>
    tpu.vector_store %arg7[%c0_192, %c0_193, %c0_194], %169 {strides = array<i32>} : memref<1x1x64xf32, #tpu.memory_space<vmem>>, vector<1x1x64xf32>,
    return
  }
  func.func @transform_0(%arg0: i32, %arg1: i32) -> (i32, i32, i32, i32) {
    %c1_i32 = arith.constant 1 : i32
    %0 = arith.muli %arg0, %c1_i32 : i32
    %1 = arith.addi %0, %arg1 : i32
    %c0_i32 = arith.constant 0 : i32
    %c0_i32_0 = arith.constant 0 : i32
    %c0_i32_1 = arith.constant 0 : i32
    %c0_i32_2 = arith.constant 0 : i32
    return %1, %c0_i32, %c0_i32_0, %c0_i32_1 : i32, i32, i32, i32
  }
  func.func @transform_1(%arg0: i32, %arg1: i32) -> (i32, i32, i32) {
    %c0_i32 = arith.constant 0 : i32
    %c0_i32_0 = arith.constant 0 : i32
    %c0_i32_1 = arith.constant 0 : i32
    %c0_i32_2 = arith.constant 0 : i32
    return %c0_i32, %c0_i32_0, %c0_i32_1 : i32, i32, i32
  }
  func.func @transform_2(%arg0: i32, %arg1: i32) -> (i32, i32) {
    %c0_i32 = arith.constant 0 : i32
    %c0_i32_0 = arith.constant 0 : i32
    %c0_i32_1 = arith.constant 0 : i32
    return %c0_i32, %c0_i32_0 : i32, i32
  }
  func.func @transform_3(%arg0: i32, %arg1: i32) -> (i32, i32, i32) {
    %c0_i32 = arith.constant 0 : i32
    %c0_i32_0 = arith.constant 0 : i32
    return %arg0, %arg1, %c0_i32 : i32, i32, i32
  }
  func.func @transform_4(%arg0: i32, %arg1: i32) -> (i32, i32, i32) {
    %c0_i32 = arith.constant 0 : i32
    %c0_i32_0 = arith.constant 0 : i32
    %c0_i32_1 = arith.constant 0 : i32
    return %arg0, %c0_i32, %c0_i32_0 : i32, i32, i32
  }
  func.func @transform_5(%arg0: i32, %arg1: i32) -> (i32, i32, i32) {
    %c0_i32 = arith.constant 0 : i32
    %c0_i32_0 = arith.constant 0 : i32
    %c0_i32_1 = arith.constant 0 : i32
    return %arg0, %c0_i32, %c0_i32_0 : i32, i32, i32
  }
}

module attributes {stable_mosaic.version = 11 : i64} {
  func.func @_conv_pool_kernel(%arg0: i32, %arg1: i32, %arg2: memref<1x5x5x64xbf16, #tpu.memory_space<vmem>>, %arg3: memref<16x64x8xbf16, #tpu.memory_space<vmem>>, %arg4: memref<1x8xf32, #tpu.memory_space<vmem>>, %arg5: memref<1x1x8xf32, #tpu.memory_space<vmem>>, %arg6: memref<4x8xf32, #tpu.memory_space<vmem>>) attributes {dimension_semantics = [#tpu.dimension_semantics<parallel>, #tpu.dimension_semantics<arbitrary>], iteration_bounds = array<i64: 2, 1>, scalar_prefetch = 0 : i64, scratch_operands = 1 : i64, tpu.core_type = #tpu.core_type<tc>, window_params = [{transform_indices = @transform_0, window_bounds = array<i64: 1, 5, 5, 64>}, {pipeline_mode = #tpu.pipeline_mode<synchronous>, transform_indices = @transform_1, window_bounds = array<i64: 16, 64, 8>}, {pipeline_mode = #tpu.pipeline_mode<synchronous>, transform_indices = @transform_2, window_bounds = array<i64: 1, 8>}, {transform_indices = @transform_3, window_bounds = array<i64: 1, 1, 8>}]} {
    %c0 = arith.constant 0 : index
    %c0_0 = arith.constant 0 : index
    %c0_1 = arith.constant 0 : index
    %c0_2 = arith.constant 0 : index
    %0 = vector.load %arg2[%c0, %c0_0, %c0_1, %c0_2] : memref<1x5x5x64xbf16, #tpu.memory_space<vmem>>, vector<1x2x2x64xbf16>
    %1 = vector.shape_cast %0 : vector<1x2x2x64xbf16> to vector<2x2x64xbf16>
    %2 = vector.shape_cast %1 : vector<2x2x64xbf16> to vector<4x64xbf16>
    %c0_3 = arith.constant 0 : index
    %c0_4 = arith.constant 0 : index
    %c0_5 = arith.constant 0 : index
    %3 = vector.load %arg3[%c0_3, %c0_4, %c0_5] : memref<16x64x8xbf16, #tpu.memory_space<vmem>>, vector<1x64x8xbf16>
    %4 = vector.shape_cast %3 : vector<1x64x8xbf16> to vector<64x8xbf16>
    %cst = arith.constant dense<0.000000e+00> : vector<4x8xf32>
    %5 = tpu.matmul %2, %4, %cst {dimension_numbers = #tpu.dot_dimension_numbers<[1], [0], [0], [1], [0, 0, 1, 1], [], []>} : vector<4x64xbf16>, vector<64x8xbf16>, vector<4x8xf32> -> vector<4x8xf32>
    %c0_6 = arith.constant 0 : index
    %c0_7 = arith.constant 0 : index
    %6 = vector.load %arg6[%c0_6, %c0_7] : memref<4x8xf32, #tpu.memory_space<vmem>>, vector<4x8xf32>
    tpu.vector_store %arg6[%c0_6, %c0_7], %5 {strides = array<i32>} : memref<4x8xf32, #tpu.memory_space<vmem>>, vector<4x8xf32>,
    %c0_8 = arith.constant 0 : index
    %c0_9 = arith.constant 0 : index
    %c1 = arith.constant 1 : index
    %c0_10 = arith.constant 0 : index
    %7 = vector.load %arg2[%c0_8, %c0_9, %c1, %c0_10] : memref<1x5x5x64xbf16, #tpu.memory_space<vmem>>, vector<1x2x2x64xbf16>
    %8 = vector.shape_cast %7 : vector<1x2x2x64xbf16> to vector<2x2x64xbf16>
    %9 = vector.shape_cast %8 : vector<2x2x64xbf16> to vector<4x64xbf16>
    %c1_11 = arith.constant 1 : index
    %c0_12 = arith.constant 0 : index
    %c0_13 = arith.constant 0 : index
    %10 = vector.load %arg3[%c1_11, %c0_12, %c0_13] : memref<16x64x8xbf16, #tpu.memory_space<vmem>>, vector<1x64x8xbf16>
    %11 = vector.shape_cast %10 : vector<1x64x8xbf16> to vector<64x8xbf16>
    %cst_14 = arith.constant dense<0.000000e+00> : vector<4x8xf32>
    %12 = tpu.matmul %9, %11, %cst_14 {dimension_numbers = #tpu.dot_dimension_numbers<[1], [0], [0], [1], [0, 0, 1, 1], [], []>} : vector<4x64xbf16>, vector<64x8xbf16>, vector<4x8xf32> -> vector<4x8xf32>
    %c0_15 = arith.constant 0 : index
    %c0_16 = arith.constant 0 : index
    %13 = vector.load %arg6[%c0_15, %c0_16] : memref<4x8xf32, #tpu.memory_space<vmem>>, vector<4x8xf32>
    %14 = arith.addf %13, %12 : vector<4x8xf32>
    %c0_17 = arith.constant 0 : index
    %c0_18 = arith.constant 0 : index
    %15 = vector.load %arg6[%c0_17, %c0_18] : memref<4x8xf32, #tpu.memory_space<vmem>>, vector<4x8xf32>
    tpu.vector_store %arg6[%c0_17, %c0_18], %14 {strides = array<i32>} : memref<4x8xf32, #tpu.memory_space<vmem>>, vector<4x8xf32>,
    %c0_19 = arith.constant 0 : index
    %c0_20 = arith.constant 0 : index
    %c2 = arith.constant 2 : index
    %c0_21 = arith.constant 0 : index
    %16 = vector.load %arg2[%c0_19, %c0_20, %c2, %c0_21] : memref<1x5x5x64xbf16, #tpu.memory_space<vmem>>, vector<1x2x2x64xbf16>
    %17 = vector.shape_cast %16 : vector<1x2x2x64xbf16> to vector<2x2x64xbf16>
    %18 = vector.shape_cast %17 : vector<2x2x64xbf16> to vector<4x64xbf16>
    %c2_22 = arith.constant 2 : index
    %c0_23 = arith.constant 0 : index
    %c0_24 = arith.constant 0 : index
    %19 = vector.load %arg3[%c2_22, %c0_23, %c0_24] : memref<16x64x8xbf16, #tpu.memory_space<vmem>>, vector<1x64x8xbf16>
    %20 = vector.shape_cast %19 : vector<1x64x8xbf16> to vector<64x8xbf16>
    %cst_25 = arith.constant dense<0.000000e+00> : vector<4x8xf32>
    %21 = tpu.matmul %18, %20, %cst_25 {dimension_numbers = #tpu.dot_dimension_numbers<[1], [0], [0], [1], [0, 0, 1, 1], [], []>} : vector<4x64xbf16>, vector<64x8xbf16>, vector<4x8xf32> -> vector<4x8xf32>
    %c0_26 = arith.constant 0 : index
    %c0_27 = arith.constant 0 : index
    %22 = vector.load %arg6[%c0_26, %c0_27] : memref<4x8xf32, #tpu.memory_space<vmem>>, vector<4x8xf32>
    %23 = arith.addf %22, %21 : vector<4x8xf32>
    %c0_28 = arith.constant 0 : index
    %c0_29 = arith.constant 0 : index
    %24 = vector.load %arg6[%c0_28, %c0_29] : memref<4x8xf32, #tpu.memory_space<vmem>>, vector<4x8xf32>
    tpu.vector_store %arg6[%c0_28, %c0_29], %23 {strides = array<i32>} : memref<4x8xf32, #tpu.memory_space<vmem>>, vector<4x8xf32>,
    %c0_30 = arith.constant 0 : index
    %c0_31 = arith.constant 0 : index
    %c3 = arith.constant 3 : index
    %c0_32 = arith.constant 0 : index
    %25 = vector.load %arg2[%c0_30, %c0_31, %c3, %c0_32] : memref<1x5x5x64xbf16, #tpu.memory_space<vmem>>, vector<1x2x2x64xbf16>
    %26 = vector.shape_cast %25 : vector<1x2x2x64xbf16> to vector<2x2x64xbf16>
    %27 = vector.shape_cast %26 : vector<2x2x64xbf16> to vector<4x64xbf16>
    %c3_33 = arith.constant 3 : index
    %c0_34 = arith.constant 0 : index
    %c0_35 = arith.constant 0 : index
    %28 = vector.load %arg3[%c3_33, %c0_34, %c0_35] : memref<16x64x8xbf16, #tpu.memory_space<vmem>>, vector<1x64x8xbf16>
    %29 = vector.shape_cast %28 : vector<1x64x8xbf16> to vector<64x8xbf16>
    %cst_36 = arith.constant dense<0.000000e+00> : vector<4x8xf32>
    %30 = tpu.matmul %27, %29, %cst_36 {dimension_numbers = #tpu.dot_dimension_numbers<[1], [0], [0], [1], [0, 0, 1, 1], [], []>} : vector<4x64xbf16>, vector<64x8xbf16>, vector<4x8xf32> -> vector<4x8xf32>
    %c0_37 = arith.constant 0 : index
    %c0_38 = arith.constant 0 : index
    %31 = vector.load %arg6[%c0_37, %c0_38] : memref<4x8xf32, #tpu.memory_space<vmem>>, vector<4x8xf32>
    %32 = arith.addf %31, %30 : vector<4x8xf32>
    %c0_39 = arith.constant 0 : index
    %c0_40 = arith.constant 0 : index
    %33 = vector.load %arg6[%c0_39, %c0_40] : memref<4x8xf32, #tpu.memory_space<vmem>>, vector<4x8xf32>
    tpu.vector_store %arg6[%c0_39, %c0_40], %32 {strides = array<i32>} : memref<4x8xf32, #tpu.memory_space<vmem>>, vector<4x8xf32>,
    %c0_41 = arith.constant 0 : index
    %c1_42 = arith.constant 1 : index
    %c0_43 = arith.constant 0 : index
    %c0_44 = arith.constant 0 : index
    %34 = vector.load %arg2[%c0_41, %c1_42, %c0_43, %c0_44] : memref<1x5x5x64xbf16, #tpu.memory_space<vmem>>, vector<1x2x2x64xbf16>
    %35 = vector.shape_cast %34 : vector<1x2x2x64xbf16> to vector<2x2x64xbf16>
    %36 = vector.shape_cast %35 : vector<2x2x64xbf16> to vector<4x64xbf16>
    %c4 = arith.constant 4 : index
    %c0_45 = arith.constant 0 : index
    %c0_46 = arith.constant 0 : index
    %37 = vector.load %arg3[%c4, %c0_45, %c0_46] : memref<16x64x8xbf16, #tpu.memory_space<vmem>>, vector<1x64x8xbf16>
    %38 = vector.shape_cast %37 : vector<1x64x8xbf16> to vector<64x8xbf16>
    %cst_47 = arith.constant dense<0.000000e+00> : vector<4x8xf32>
    %39 = tpu.matmul %36, %38, %cst_47 {dimension_numbers = #tpu.dot_dimension_numbers<[1], [0], [0], [1], [0, 0, 1, 1], [], []>} : vector<4x64xbf16>, vector<64x8xbf16>, vector<4x8xf32> -> vector<4x8xf32>
    %c0_48 = arith.constant 0 : index
    %c0_49 = arith.constant 0 : index
    %40 = vector.load %arg6[%c0_48, %c0_49] : memref<4x8xf32, #tpu.memory_space<vmem>>, vector<4x8xf32>
    %41 = arith.addf %40, %39 : vector<4x8xf32>
    %c0_50 = arith.constant 0 : index
    %c0_51 = arith.constant 0 : index
    %42 = vector.load %arg6[%c0_50, %c0_51] : memref<4x8xf32, #tpu.memory_space<vmem>>, vector<4x8xf32>
    tpu.vector_store %arg6[%c0_50, %c0_51], %41 {strides = array<i32>} : memref<4x8xf32, #tpu.memory_space<vmem>>, vector<4x8xf32>,
    %c0_52 = arith.constant 0 : index
    %c1_53 = arith.constant 1 : index
    %c1_54 = arith.constant 1 : index
    %c0_55 = arith.constant 0 : index
    %43 = vector.load %arg2[%c0_52, %c1_53, %c1_54, %c0_55] : memref<1x5x5x64xbf16, #tpu.memory_space<vmem>>, vector<1x2x2x64xbf16>
    %44 = vector.shape_cast %43 : vector<1x2x2x64xbf16> to vector<2x2x64xbf16>
    %45 = vector.shape_cast %44 : vector<2x2x64xbf16> to vector<4x64xbf16>
    %c5 = arith.constant 5 : index
    %c0_56 = arith.constant 0 : index
    %c0_57 = arith.constant 0 : index
    %46 = vector.load %arg3[%c5, %c0_56, %c0_57] : memref<16x64x8xbf16, #tpu.memory_space<vmem>>, vector<1x64x8xbf16>
    %47 = vector.shape_cast %46 : vector<1x64x8xbf16> to vector<64x8xbf16>
    %cst_58 = arith.constant dense<0.000000e+00> : vector<4x8xf32>
    %48 = tpu.matmul %45, %47, %cst_58 {dimension_numbers = #tpu.dot_dimension_numbers<[1], [0], [0], [1], [0, 0, 1, 1], [], []>} : vector<4x64xbf16>, vector<64x8xbf16>, vector<4x8xf32> -> vector<4x8xf32>
    %c0_59 = arith.constant 0 : index
    %c0_60 = arith.constant 0 : index
    %49 = vector.load %arg6[%c0_59, %c0_60] : memref<4x8xf32, #tpu.memory_space<vmem>>, vector<4x8xf32>
    %50 = arith.addf %49, %48 : vector<4x8xf32>
    %c0_61 = arith.constant 0 : index
    %c0_62 = arith.constant 0 : index
    %51 = vector.load %arg6[%c0_61, %c0_62] : memref<4x8xf32, #tpu.memory_space<vmem>>, vector<4x8xf32>
    tpu.vector_store %arg6[%c0_61, %c0_62], %50 {strides = array<i32>} : memref<4x8xf32, #tpu.memory_space<vmem>>, vector<4x8xf32>,
    %c0_63 = arith.constant 0 : index
    %c1_64 = arith.constant 1 : index
    %c2_65 = arith.constant 2 : index
    %c0_66 = arith.constant 0 : index
    %52 = vector.load %arg2[%c0_63, %c1_64, %c2_65, %c0_66] : memref<1x5x5x64xbf16, #tpu.memory_space<vmem>>, vector<1x2x2x64xbf16>
    %53 = vector.shape_cast %52 : vector<1x2x2x64xbf16> to vector<2x2x64xbf16>
    %54 = vector.shape_cast %53 : vector<2x2x64xbf16> to vector<4x64xbf16>
    %c6 = arith.constant 6 : index
    %c0_67 = arith.constant 0 : index
    %c0_68 = arith.constant 0 : index
    %55 = vector.load %arg3[%c6, %c0_67, %c0_68] : memref<16x64x8xbf16, #tpu.memory_space<vmem>>, vector<1x64x8xbf16>
    %56 = vector.shape_cast %55 : vector<1x64x8xbf16> to vector<64x8xbf16>
    %cst_69 = arith.constant dense<0.000000e+00> : vector<4x8xf32>
    %57 = tpu.matmul %54, %56, %cst_69 {dimension_numbers = #tpu.dot_dimension_numbers<[1], [0], [0], [1], [0, 0, 1, 1], [], []>} : vector<4x64xbf16>, vector<64x8xbf16>, vector<4x8xf32> -> vector<4x8xf32>
    %c0_70 = arith.constant 0 : index
    %c0_71 = arith.constant 0 : index
    %58 = vector.load %arg6[%c0_70, %c0_71] : memref<4x8xf32, #tpu.memory_space<vmem>>, vector<4x8xf32>
    %59 = arith.addf %58, %57 : vector<4x8xf32>
    %c0_72 = arith.constant 0 : index
    %c0_73 = arith.constant 0 : index
    %60 = vector.load %arg6[%c0_72, %c0_73] : memref<4x8xf32, #tpu.memory_space<vmem>>, vector<4x8xf32>
    tpu.vector_store %arg6[%c0_72, %c0_73], %59 {strides = array<i32>} : memref<4x8xf32, #tpu.memory_space<vmem>>, vector<4x8xf32>,
    %c0_74 = arith.constant 0 : index
    %c1_75 = arith.constant 1 : index
    %c3_76 = arith.constant 3 : index
    %c0_77 = arith.constant 0 : index
    %61 = vector.load %arg2[%c0_74, %c1_75, %c3_76, %c0_77] : memref<1x5x5x64xbf16, #tpu.memory_space<vmem>>, vector<1x2x2x64xbf16>
    %62 = vector.shape_cast %61 : vector<1x2x2x64xbf16> to vector<2x2x64xbf16>
    %63 = vector.shape_cast %62 : vector<2x2x64xbf16> to vector<4x64xbf16>
    %c7 = arith.constant 7 : index
    %c0_78 = arith.constant 0 : index
    %c0_79 = arith.constant 0 : index
    %64 = vector.load %arg3[%c7, %c0_78, %c0_79] : memref<16x64x8xbf16, #tpu.memory_space<vmem>>, vector<1x64x8xbf16>
    %65 = vector.shape_cast %64 : vector<1x64x8xbf16> to vector<64x8xbf16>
    %cst_80 = arith.constant dense<0.000000e+00> : vector<4x8xf32>
    %66 = tpu.matmul %63, %65, %cst_80 {dimension_numbers = #tpu.dot_dimension_numbers<[1], [0], [0], [1], [0, 0, 1, 1], [], []>} : vector<4x64xbf16>, vector<64x8xbf16>, vector<4x8xf32> -> vector<4x8xf32>
    %c0_81 = arith.constant 0 : index
    %c0_82 = arith.constant 0 : index
    %67 = vector.load %arg6[%c0_81, %c0_82] : memref<4x8xf32, #tpu.memory_space<vmem>>, vector<4x8xf32>
    %68 = arith.addf %67, %66 : vector<4x8xf32>
    %c0_83 = arith.constant 0 : index
    %c0_84 = arith.constant 0 : index
    %69 = vector.load %arg6[%c0_83, %c0_84] : memref<4x8xf32, #tpu.memory_space<vmem>>, vector<4x8xf32>
    tpu.vector_store %arg6[%c0_83, %c0_84], %68 {strides = array<i32>} : memref<4x8xf32, #tpu.memory_space<vmem>>, vector<4x8xf32>,
    %c0_85 = arith.constant 0 : index
    %c2_86 = arith.constant 2 : index
    %c0_87 = arith.constant 0 : index
    %c0_88 = arith.constant 0 : index
    %70 = vector.load %arg2[%c0_85, %c2_86, %c0_87, %c0_88] : memref<1x5x5x64xbf16, #tpu.memory_space<vmem>>, vector<1x2x2x64xbf16>
    %71 = vector.shape_cast %70 : vector<1x2x2x64xbf16> to vector<2x2x64xbf16>
    %72 = vector.shape_cast %71 : vector<2x2x64xbf16> to vector<4x64xbf16>
    %c8 = arith.constant 8 : index
    %c0_89 = arith.constant 0 : index
    %c0_90 = arith.constant 0 : index
    %73 = vector.load %arg3[%c8, %c0_89, %c0_90] : memref<16x64x8xbf16, #tpu.memory_space<vmem>>, vector<1x64x8xbf16>
    %74 = vector.shape_cast %73 : vector<1x64x8xbf16> to vector<64x8xbf16>
    %cst_91 = arith.constant dense<0.000000e+00> : vector<4x8xf32>
    %75 = tpu.matmul %72, %74, %cst_91 {dimension_numbers = #tpu.dot_dimension_numbers<[1], [0], [0], [1], [0, 0, 1, 1], [], []>} : vector<4x64xbf16>, vector<64x8xbf16>, vector<4x8xf32> -> vector<4x8xf32>
    %c0_92 = arith.constant 0 : index
    %c0_93 = arith.constant 0 : index
    %76 = vector.load %arg6[%c0_92, %c0_93] : memref<4x8xf32, #tpu.memory_space<vmem>>, vector<4x8xf32>
    %77 = arith.addf %76, %75 : vector<4x8xf32>
    %c0_94 = arith.constant 0 : index
    %c0_95 = arith.constant 0 : index
    %78 = vector.load %arg6[%c0_94, %c0_95] : memref<4x8xf32, #tpu.memory_space<vmem>>, vector<4x8xf32>
    tpu.vector_store %arg6[%c0_94, %c0_95], %77 {strides = array<i32>} : memref<4x8xf32, #tpu.memory_space<vmem>>, vector<4x8xf32>,
    %c0_96 = arith.constant 0 : index
    %c2_97 = arith.constant 2 : index
    %c1_98 = arith.constant 1 : index
    %c0_99 = arith.constant 0 : index
    %79 = vector.load %arg2[%c0_96, %c2_97, %c1_98, %c0_99] : memref<1x5x5x64xbf16, #tpu.memory_space<vmem>>, vector<1x2x2x64xbf16>
    %80 = vector.shape_cast %79 : vector<1x2x2x64xbf16> to vector<2x2x64xbf16>
    %81 = vector.shape_cast %80 : vector<2x2x64xbf16> to vector<4x64xbf16>
    %c9 = arith.constant 9 : index
    %c0_100 = arith.constant 0 : index
    %c0_101 = arith.constant 0 : index
    %82 = vector.load %arg3[%c9, %c0_100, %c0_101] : memref<16x64x8xbf16, #tpu.memory_space<vmem>>, vector<1x64x8xbf16>
    %83 = vector.shape_cast %82 : vector<1x64x8xbf16> to vector<64x8xbf16>
    %cst_102 = arith.constant dense<0.000000e+00> : vector<4x8xf32>
    %84 = tpu.matmul %81, %83, %cst_102 {dimension_numbers = #tpu.dot_dimension_numbers<[1], [0], [0], [1], [0, 0, 1, 1], [], []>} : vector<4x64xbf16>, vector<64x8xbf16>, vector<4x8xf32> -> vector<4x8xf32>
    %c0_103 = arith.constant 0 : index
    %c0_104 = arith.constant 0 : index
    %85 = vector.load %arg6[%c0_103, %c0_104] : memref<4x8xf32, #tpu.memory_space<vmem>>, vector<4x8xf32>
    %86 = arith.addf %85, %84 : vector<4x8xf32>
    %c0_105 = arith.constant 0 : index
    %c0_106 = arith.constant 0 : index
    %87 = vector.load %arg6[%c0_105, %c0_106] : memref<4x8xf32, #tpu.memory_space<vmem>>, vector<4x8xf32>
    tpu.vector_store %arg6[%c0_105, %c0_106], %86 {strides = array<i32>} : memref<4x8xf32, #tpu.memory_space<vmem>>, vector<4x8xf32>,
    %c0_107 = arith.constant 0 : index
    %c2_108 = arith.constant 2 : index
    %c2_109 = arith.constant 2 : index
    %c0_110 = arith.constant 0 : index
    %88 = vector.load %arg2[%c0_107, %c2_108, %c2_109, %c0_110] : memref<1x5x5x64xbf16, #tpu.memory_space<vmem>>, vector<1x2x2x64xbf16>
    %89 = vector.shape_cast %88 : vector<1x2x2x64xbf16> to vector<2x2x64xbf16>
    %90 = vector.shape_cast %89 : vector<2x2x64xbf16> to vector<4x64xbf16>
    %c10 = arith.constant 10 : index
    %c0_111 = arith.constant 0 : index
    %c0_112 = arith.constant 0 : index
    %91 = vector.load %arg3[%c10, %c0_111, %c0_112] : memref<16x64x8xbf16, #tpu.memory_space<vmem>>, vector<1x64x8xbf16>
    %92 = vector.shape_cast %91 : vector<1x64x8xbf16> to vector<64x8xbf16>
    %cst_113 = arith.constant dense<0.000000e+00> : vector<4x8xf32>
    %93 = tpu.matmul %90, %92, %cst_113 {dimension_numbers = #tpu.dot_dimension_numbers<[1], [0], [0], [1], [0, 0, 1, 1], [], []>} : vector<4x64xbf16>, vector<64x8xbf16>, vector<4x8xf32> -> vector<4x8xf32>
    %c0_114 = arith.constant 0 : index
    %c0_115 = arith.constant 0 : index
    %94 = vector.load %arg6[%c0_114, %c0_115] : memref<4x8xf32, #tpu.memory_space<vmem>>, vector<4x8xf32>
    %95 = arith.addf %94, %93 : vector<4x8xf32>
    %c0_116 = arith.constant 0 : index
    %c0_117 = arith.constant 0 : index
    %96 = vector.load %arg6[%c0_116, %c0_117] : memref<4x8xf32, #tpu.memory_space<vmem>>, vector<4x8xf32>
    tpu.vector_store %arg6[%c0_116, %c0_117], %95 {strides = array<i32>} : memref<4x8xf32, #tpu.memory_space<vmem>>, vector<4x8xf32>,
    %c0_118 = arith.constant 0 : index
    %c2_119 = arith.constant 2 : index
    %c3_120 = arith.constant 3 : index
    %c0_121 = arith.constant 0 : index
    %97 = vector.load %arg2[%c0_118, %c2_119, %c3_120, %c0_121] : memref<1x5x5x64xbf16, #tpu.memory_space<vmem>>, vector<1x2x2x64xbf16>
    %98 = vector.shape_cast %97 : vector<1x2x2x64xbf16> to vector<2x2x64xbf16>
    %99 = vector.shape_cast %98 : vector<2x2x64xbf16> to vector<4x64xbf16>
    %c11 = arith.constant 11 : index
    %c0_122 = arith.constant 0 : index
    %c0_123 = arith.constant 0 : index
    %100 = vector.load %arg3[%c11, %c0_122, %c0_123] : memref<16x64x8xbf16, #tpu.memory_space<vmem>>, vector<1x64x8xbf16>
    %101 = vector.shape_cast %100 : vector<1x64x8xbf16> to vector<64x8xbf16>
    %cst_124 = arith.constant dense<0.000000e+00> : vector<4x8xf32>
    %102 = tpu.matmul %99, %101, %cst_124 {dimension_numbers = #tpu.dot_dimension_numbers<[1], [0], [0], [1], [0, 0, 1, 1], [], []>} : vector<4x64xbf16>, vector<64x8xbf16>, vector<4x8xf32> -> vector<4x8xf32>
    %c0_125 = arith.constant 0 : index
    %c0_126 = arith.constant 0 : index
    %103 = vector.load %arg6[%c0_125, %c0_126] : memref<4x8xf32, #tpu.memory_space<vmem>>, vector<4x8xf32>
    %104 = arith.addf %103, %102 : vector<4x8xf32>
    %c0_127 = arith.constant 0 : index
    %c0_128 = arith.constant 0 : index
    %105 = vector.load %arg6[%c0_127, %c0_128] : memref<4x8xf32, #tpu.memory_space<vmem>>, vector<4x8xf32>
    tpu.vector_store %arg6[%c0_127, %c0_128], %104 {strides = array<i32>} : memref<4x8xf32, #tpu.memory_space<vmem>>, vector<4x8xf32>,
    %c0_129 = arith.constant 0 : index
    %c3_130 = arith.constant 3 : index
    %c0_131 = arith.constant 0 : index
    %c0_132 = arith.constant 0 : index
    %106 = vector.load %arg2[%c0_129, %c3_130, %c0_131, %c0_132] : memref<1x5x5x64xbf16, #tpu.memory_space<vmem>>, vector<1x2x2x64xbf16>
    %107 = vector.shape_cast %106 : vector<1x2x2x64xbf16> to vector<2x2x64xbf16>
    %108 = vector.shape_cast %107 : vector<2x2x64xbf16> to vector<4x64xbf16>
    %c12 = arith.constant 12 : index
    %c0_133 = arith.constant 0 : index
    %c0_134 = arith.constant 0 : index
    %109 = vector.load %arg3[%c12, %c0_133, %c0_134] : memref<16x64x8xbf16, #tpu.memory_space<vmem>>, vector<1x64x8xbf16>
    %110 = vector.shape_cast %109 : vector<1x64x8xbf16> to vector<64x8xbf16>
    %cst_135 = arith.constant dense<0.000000e+00> : vector<4x8xf32>
    %111 = tpu.matmul %108, %110, %cst_135 {dimension_numbers = #tpu.dot_dimension_numbers<[1], [0], [0], [1], [0, 0, 1, 1], [], []>} : vector<4x64xbf16>, vector<64x8xbf16>, vector<4x8xf32> -> vector<4x8xf32>
    %c0_136 = arith.constant 0 : index
    %c0_137 = arith.constant 0 : index
    %112 = vector.load %arg6[%c0_136, %c0_137] : memref<4x8xf32, #tpu.memory_space<vmem>>, vector<4x8xf32>
    %113 = arith.addf %112, %111 : vector<4x8xf32>
    %c0_138 = arith.constant 0 : index
    %c0_139 = arith.constant 0 : index
    %114 = vector.load %arg6[%c0_138, %c0_139] : memref<4x8xf32, #tpu.memory_space<vmem>>, vector<4x8xf32>
    tpu.vector_store %arg6[%c0_138, %c0_139], %113 {strides = array<i32>} : memref<4x8xf32, #tpu.memory_space<vmem>>, vector<4x8xf32>,
    %c0_140 = arith.constant 0 : index
    %c3_141 = arith.constant 3 : index
    %c1_142 = arith.constant 1 : index
    %c0_143 = arith.constant 0 : index
    %115 = vector.load %arg2[%c0_140, %c3_141, %c1_142, %c0_143] : memref<1x5x5x64xbf16, #tpu.memory_space<vmem>>, vector<1x2x2x64xbf16>
    %116 = vector.shape_cast %115 : vector<1x2x2x64xbf16> to vector<2x2x64xbf16>
    %117 = vector.shape_cast %116 : vector<2x2x64xbf16> to vector<4x64xbf16>
    %c13 = arith.constant 13 : index
    %c0_144 = arith.constant 0 : index
    %c0_145 = arith.constant 0 : index
    %118 = vector.load %arg3[%c13, %c0_144, %c0_145] : memref<16x64x8xbf16, #tpu.memory_space<vmem>>, vector<1x64x8xbf16>
    %119 = vector.shape_cast %118 : vector<1x64x8xbf16> to vector<64x8xbf16>
    %cst_146 = arith.constant dense<0.000000e+00> : vector<4x8xf32>
    %120 = tpu.matmul %117, %119, %cst_146 {dimension_numbers = #tpu.dot_dimension_numbers<[1], [0], [0], [1], [0, 0, 1, 1], [], []>} : vector<4x64xbf16>, vector<64x8xbf16>, vector<4x8xf32> -> vector<4x8xf32>
    %c0_147 = arith.constant 0 : index
    %c0_148 = arith.constant 0 : index
    %121 = vector.load %arg6[%c0_147, %c0_148] : memref<4x8xf32, #tpu.memory_space<vmem>>, vector<4x8xf32>
    %122 = arith.addf %121, %120 : vector<4x8xf32>
    %c0_149 = arith.constant 0 : index
    %c0_150 = arith.constant 0 : index
    %123 = vector.load %arg6[%c0_149, %c0_150] : memref<4x8xf32, #tpu.memory_space<vmem>>, vector<4x8xf32>
    tpu.vector_store %arg6[%c0_149, %c0_150], %122 {strides = array<i32>} : memref<4x8xf32, #tpu.memory_space<vmem>>, vector<4x8xf32>,
    %c0_151 = arith.constant 0 : index
    %c3_152 = arith.constant 3 : index
    %c2_153 = arith.constant 2 : index
    %c0_154 = arith.constant 0 : index
    %124 = vector.load %arg2[%c0_151, %c3_152, %c2_153, %c0_154] : memref<1x5x5x64xbf16, #tpu.memory_space<vmem>>, vector<1x2x2x64xbf16>
    %125 = vector.shape_cast %124 : vector<1x2x2x64xbf16> to vector<2x2x64xbf16>
    %126 = vector.shape_cast %125 : vector<2x2x64xbf16> to vector<4x64xbf16>
    %c14 = arith.constant 14 : index
    %c0_155 = arith.constant 0 : index
    %c0_156 = arith.constant 0 : index
    %127 = vector.load %arg3[%c14, %c0_155, %c0_156] : memref<16x64x8xbf16, #tpu.memory_space<vmem>>, vector<1x64x8xbf16>
    %128 = vector.shape_cast %127 : vector<1x64x8xbf16> to vector<64x8xbf16>
    %cst_157 = arith.constant dense<0.000000e+00> : vector<4x8xf32>
    %129 = tpu.matmul %126, %128, %cst_157 {dimension_numbers = #tpu.dot_dimension_numbers<[1], [0], [0], [1], [0, 0, 1, 1], [], []>} : vector<4x64xbf16>, vector<64x8xbf16>, vector<4x8xf32> -> vector<4x8xf32>
    %c0_158 = arith.constant 0 : index
    %c0_159 = arith.constant 0 : index
    %130 = vector.load %arg6[%c0_158, %c0_159] : memref<4x8xf32, #tpu.memory_space<vmem>>, vector<4x8xf32>
    %131 = arith.addf %130, %129 : vector<4x8xf32>
    %c0_160 = arith.constant 0 : index
    %c0_161 = arith.constant 0 : index
    %132 = vector.load %arg6[%c0_160, %c0_161] : memref<4x8xf32, #tpu.memory_space<vmem>>, vector<4x8xf32>
    tpu.vector_store %arg6[%c0_160, %c0_161], %131 {strides = array<i32>} : memref<4x8xf32, #tpu.memory_space<vmem>>, vector<4x8xf32>,
    %c0_162 = arith.constant 0 : index
    %c3_163 = arith.constant 3 : index
    %c3_164 = arith.constant 3 : index
    %c0_165 = arith.constant 0 : index
    %133 = vector.load %arg2[%c0_162, %c3_163, %c3_164, %c0_165] : memref<1x5x5x64xbf16, #tpu.memory_space<vmem>>, vector<1x2x2x64xbf16>
    %134 = vector.shape_cast %133 : vector<1x2x2x64xbf16> to vector<2x2x64xbf16>
    %135 = vector.shape_cast %134 : vector<2x2x64xbf16> to vector<4x64xbf16>
    %c15 = arith.constant 15 : index
    %c0_166 = arith.constant 0 : index
    %c0_167 = arith.constant 0 : index
    %136 = vector.load %arg3[%c15, %c0_166, %c0_167] : memref<16x64x8xbf16, #tpu.memory_space<vmem>>, vector<1x64x8xbf16>
    %137 = vector.shape_cast %136 : vector<1x64x8xbf16> to vector<64x8xbf16>
    %cst_168 = arith.constant dense<0.000000e+00> : vector<4x8xf32>
    %138 = tpu.matmul %135, %137, %cst_168 {dimension_numbers = #tpu.dot_dimension_numbers<[1], [0], [0], [1], [0, 0, 1, 1], [], []>} : vector<4x64xbf16>, vector<64x8xbf16>, vector<4x8xf32> -> vector<4x8xf32>
    %c0_169 = arith.constant 0 : index
    %c0_170 = arith.constant 0 : index
    %139 = vector.load %arg6[%c0_169, %c0_170] : memref<4x8xf32, #tpu.memory_space<vmem>>, vector<4x8xf32>
    %140 = arith.addf %139, %138 : vector<4x8xf32>
    %c0_171 = arith.constant 0 : index
    %c0_172 = arith.constant 0 : index
    %141 = vector.load %arg6[%c0_171, %c0_172] : memref<4x8xf32, #tpu.memory_space<vmem>>, vector<4x8xf32>
    tpu.vector_store %arg6[%c0_171, %c0_172], %140 {strides = array<i32>} : memref<4x8xf32, #tpu.memory_space<vmem>>, vector<4x8xf32>,
    %c0_i32 = arith.constant 0 : i32
    %142 = arith.cmpi eq, %arg1, %c0_i32 : i32
    %143 = arith.extui %142 : i1 to i32
    %c0_i32_173 = arith.constant 0 : i32
    %144 = arith.cmpi ne, %143, %c0_i32_173 : i32
    scf.if %144 {
      %cst_185 = arith.constant 0.000000e+00 : f32
      %157 = vector.broadcast %cst_185 : f32 to vector<1x1x8xf32>
      %c0_186 = arith.constant 0 : index
      %c0_187 = arith.constant 0 : index
      %c0_188 = arith.constant 0 : index
      %158 = vector.load %arg5[%c0_186, %c0_187, %c0_188] : memref<1x1x8xf32, #tpu.memory_space<vmem>>, vector<1x1x8xf32>
      tpu.vector_store %arg5[%c0_186, %c0_187, %c0_188], %157 {strides = array<i32>} : memref<1x1x8xf32, #tpu.memory_space<vmem>>, vector<1x1x8xf32>,
    } else {
    }
    %c0_174 = arith.constant 0 : index
    %c0_175 = arith.constant 0 : index
    %c0_176 = arith.constant 0 : index
    %145 = vector.load %arg5[%c0_174, %c0_175, %c0_176] : memref<1x1x8xf32, #tpu.memory_space<vmem>>, vector<1x1x8xf32>
    %146 = vector.shape_cast %145 : vector<1x1x8xf32> to vector<1x8xf32>
    %c0_177 = arith.constant 0 : index
    %c0_178 = arith.constant 0 : index
    %147 = vector.load %arg6[%c0_177, %c0_178] : memref<4x8xf32, #tpu.memory_space<vmem>>, vector<4x8xf32>
    %cst_179 = arith.constant dense<0.000000e+00> : vector<8xf32>
    %148 = vector.multi_reduction <add>, %147, %cst_179 [0] : vector<4x8xf32> to vector<8xf32>
    %149 = vector.shape_cast %148 : vector<8xf32> to vector<1x8xf32>
    %150 = arith.addf %146, %149 : vector<1x8xf32>
    %c0_180 = arith.constant 0 : index
    %c0_181 = arith.constant 0 : index
    %c0_182 = arith.constant 0 : index
    %151 = vector.load %arg5[%c0_180, %c0_181, %c0_182] : memref<1x1x8xf32, #tpu.memory_space<vmem>>, vector<1x1x8xf32>
    %152 = vector.shape_cast %151 : vector<1x1x8xf32> to vector<1x8xf32>
    %153 = vector.shape_cast %150 : vector<1x8xf32> to vector<1x1x8xf32>
    tpu.vector_store %arg5[%c0_180, %c0_181, %c0_182], %153 {strides = array<i32>} : memref<1x1x8xf32, #tpu.memory_space<vmem>>, vector<1x1x8xf32>,
    %c0_i32_183 = arith.constant 0 : i32
    %154 = arith.cmpi eq, %arg1, %c0_i32_183 : i32
    %155 = arith.extui %154 : i1 to i32
    %c0_i32_184 = arith.constant 0 : i32
    %156 = arith.cmpi ne, %155, %c0_i32_184 : i32
    scf.if %156 {
      %c0_185 = arith.constant 0 : index
      %c0_186 = arith.constant 0 : index
      %c0_187 = arith.constant 0 : index
      %157 = vector.load %arg5[%c0_185, %c0_186, %c0_187] : memref<1x1x8xf32, #tpu.memory_space<vmem>>, vector<1x1x8xf32>
      %158 = vector.shape_cast %157 : vector<1x1x8xf32> to vector<1x8xf32>
      %cst_188 = arith.constant 2.500000e-01 : f32
      %159 = vector.broadcast %cst_188 : f32 to vector<1x8xf32>
      %160 = arith.mulf %158, %159 : vector<1x8xf32>
      %c0_189 = arith.constant 0 : index
      %c0_190 = arith.constant 0 : index
      %161 = vector.load %arg4[%c0_189, %c0_190] : memref<1x8xf32, #tpu.memory_space<vmem>>, vector<1x8xf32>
      %162 = arith.addf %160, %161 : vector<1x8xf32>
      %c0_191 = arith.constant 0 : index
      %c0_192 = arith.constant 0 : index
      %c0_193 = arith.constant 0 : index
      %163 = vector.load %arg5[%c0_191, %c0_192, %c0_193] : memref<1x1x8xf32, #tpu.memory_space<vmem>>, vector<1x1x8xf32>
      %164 = vector.shape_cast %163 : vector<1x1x8xf32> to vector<1x8xf32>
      %165 = vector.shape_cast %162 : vector<1x8xf32> to vector<1x1x8xf32>
      tpu.vector_store %arg5[%c0_191, %c0_192, %c0_193], %165 {strides = array<i32>} : memref<1x1x8xf32, #tpu.memory_space<vmem>>, vector<1x1x8xf32>,
    } else {
    }
    return
  }
  func.func @transform_0(%arg0: i32, %arg1: i32) -> (i32, i32, i32, i32) {
    %c1_i32 = arith.constant 1 : i32
    %0 = arith.muli %arg0, %c1_i32 : i32
    %1 = arith.addi %0, %arg1 : i32
    %c0_i32 = arith.constant 0 : i32
    %c0_i32_0 = arith.constant 0 : i32
    %c0_i32_1 = arith.constant 0 : i32
    %c0_i32_2 = arith.constant 0 : i32
    return %1, %c0_i32, %c0_i32_0, %c0_i32_1 : i32, i32, i32, i32
  }
  func.func @transform_1(%arg0: i32, %arg1: i32) -> (i32, i32, i32) {
    %c0_i32 = arith.constant 0 : i32
    %c0_i32_0 = arith.constant 0 : i32
    %c0_i32_1 = arith.constant 0 : i32
    %c0_i32_2 = arith.constant 0 : i32
    return %c0_i32, %c0_i32_0, %c0_i32_1 : i32, i32, i32
  }
  func.func @transform_2(%arg0: i32, %arg1: i32) -> (i32, i32) {
    %c0_i32 = arith.constant 0 : i32
    %c0_i32_0 = arith.constant 0 : i32
    %c0_i32_1 = arith.constant 0 : i32
    return %c0_i32, %c0_i32_0 : i32, i32
  }
  func.func @transform_3(%arg0: i32, %arg1: i32) -> (i32, i32, i32) {
    %c0_i32 = arith.constant 0 : i32
    %c0_i32_0 = arith.constant 0 : i32
    %c0_i32_1 = arith.constant 0 : i32
    return %arg0, %c0_i32, %c0_i32_0 : i32, i32, i32
  }
}

</mosaic_0001>

<bundles_post_ra>
// kernel: cyclegan_discriminator.8
= control target key start
LH: loop header
LB: loop body
LE: loop exit
PB: predicated region body
PF: predicated region fallthrough
CT: control target
= control target key end

     0   :  { %s3608_s12 = smov 0   ;;  %s3610_s13 = smov 0   ;;  %s4228_s0 = inlined_call_operand.vmem [shape: bf16[2,17,17,12], index: 0, kind: input, shape index: {}]   ;;  %s4229_s1 = inlined_call_operand.vmem [shape: bf16[4,12,8], index: 1, kind: input, shape index: {}]   ;;  %s4230_s2 = inlined_call_operand.vmem [shape: f32[1,8], index: 2, kind: input, shape index: {}]   ;;  %s4231_s3 = inlined_call_operand.vmem [shape: bf16[2,256,8], index: 3, kind: output, shape index: {}]  }
   0x1   :  { %s3612_s14 = smov 0  }
   0x2 LB: > { %s25_s15 = sadd.s32 1, %s3582_s13  ;;  %p3005_p0 = scmp.ge.s32.totalorder %s3586_s14, 1  ;;  %s3586_s14 = sphi %s3612_s14, %s13_s14   ;;  %s3582_s13 = sphi %s3610_s13, %s4235_s13   ;;  %s3578_s12 = sphi %s3608_s12, %s4234_s12  }
   0x3   : > { %p27_p1 = scmp.ge.s32.totalorder %s25_s15, 2  ;;  %p155_p2 = scmp.lt.s32.totalorder %s3586_s14, 3 }
   0x5   : > { %s4237_s15 = smov (%p27_p1, %s25_s15), 0  ;;  %p156_p3 = pnand %p3005_p0, %p155_p2 }
   0x6   : > { %p185_p4 = scmp.lt.s32.totalorder (!%p156_p3), %s3578_s12, 1 }
   0x7   : > { %159 = sbr.rel (%p156_p3) target bundleno = 378 (0x17a), region = 32 }
   0xc   : > { %v3528_v0 = vld [vmem:[%s4229_s1] sm:$0x3f]   ;;  %vm370_vm0 = vcmask 1045504   ;;  %v3530_v2 = vld [vmem:[%s4229_s1 + $0x10] sm:$0x3f]   ;;  %s4239_s12 = smov (!%p185_p4, %s3578_s12), 1 }
   0xd   : > { %3499 = vmatprep.subr.msk.bf16.mxu0 %vm370_vm0, %v3528_v0  ;;  %v372_v1 = vsel %vm370_vm0, %v3528_v0, 0  ;;  %v3532_v3 = vld [vmem:[%s4229_s1 + $0x8] sm:$0x3f]   ;;  %s3503_s22 = smul.u32 204, %s4239_s12  ;;  %v3535_v5 = vld [vmem:[%s4229_s1 + $0x18] sm:$0x3f]  }
   0xe   : > { %3364 = vmatpush3.bf16.msra.mxu0 %v372_v1  ;;  %3500 = vmatprep.subr.msk.bf16.mxu1 %vm370_vm0, %v3532_v3  ;;  %v1108_v4 = vsel %vm370_vm0, %v3532_v3, 0  ;;  %vm321_vm1 = vcmask 97280   ;;  %vm616_vm2 = vsmask.f32 3328  ;;  %vm617_vm3 = vsmask.f32 7440 }
   0xf   : > { %3501 = vmatprep.subr.msk.bf16.mxu0 %vm370_vm0, %v3530_v2  ;;  %s3649_s27 = scalar_lea.vmem %s4228_s0, %s3503_s22  ;;  %3398 = vmatpush3.bf16.msra.mxu1 %v1108_v4  ;;  %v1537_v8 = vsel %vm370_vm0, %v3530_v2, 0  ;;  %v3659_v10 = vsel %vm370_vm0, %v3535_v5, 0  ;;  %vm3672_vm4 = vmor %vm616_vm2, %vm617_vm3  ;;  %vm535_vm5 = vcmask 64512   ;;  %s3262_s30 = sshll.u32 %s4239_s12, 7  ;;  %vm2887_vm7 = vcmask 60416  }
  0x10   : > { %v3529_v6 = vld [vmem:[%s3649_s27] sm:$0xff]   ;;  %3502 = vmatprep.subr.msk.bf16.mxu1 %vm370_vm0, %v3535_v5  ;;  %v3531_v7 = vld [vmem:[%s3649_s27 + $0xc] sm:$0xff]   ;;  %v3533_v9 = vld [vmem:[%s3649_s27 + $0x18] sm:$0xff]   ;;  %s4081_s6 = scalar_lea.vmem %s4231_s3, %s3262_s30 }
  0x11   : > { %3365 = vmatprep.mubr.msk.bf16.mxu0 %vm321_vm1, %v3529_v6  ;;  %v568_v11 = vld [vmem:[%s3649_s27] sm:$0xf]  ;;  %v569_v12 = vld [vmem:[%s3649_s27 + $0x4] sm:$0xf]  ;;  %v570_v13 = vld [vmem:[%s3649_s27 + $0x8] sm:$0x1] }
  0x12   : > { %3366 = vmatmul.mubr.msk.bf16.vlgmr.msra.gmra.mxu0 %vm321_vm1, %v3531_v7  ;;  %v3534_v14 = vld [vmem:[%s3649_s27 + $0x24] sm:$0xff]   ;;  %v620_v15 = vshrl.u32 %v568_v11, 16  ;;  %v623_v16 = vshll.u32 %v568_v11, 16  ;;  %v629_v17 = vshll.u32 %v569_v12, 16  ;;  %v633_v18 = vshrl.u32 %v569_v12, 16  ;;  %v3536_v36 = vld [vmem:[%s3649_s27 + $0x30] sm:$0xff]  }
  0x13   : > { %3432 = vmatpush3.bf16.msra.mxu0 %v1537_v8  ;;  %3369 = vmatprep.mubr.msk.bf16.mxu0 %vm321_vm1, %v3533_v9  ;;  %v571_v19 = vld [vmem:[%s3649_s27 + $0xc] sm:$0xf]  ;;  %v639_v20 = vshll.u32 %v570_v13, 16  ;;  %v572_v21 = vld [vmem:[%s3649_s27 + $0x10] sm:$0xf]  ;;  %v3537_v54 = vld [vmem:[%s3649_s27 + $0x3c] sm:$0xff]  }
  0x14   : > { %v573_v22 = vld [vmem:[%s3649_s27 + $0x14] sm:$0x1]  ;;  %v644_v23 = vshrl.u32 %v571_v19, 16  ;;  %v622_v24 = vrot.slane %v620_v15, 4  ;;  %v625_v25 = vrot.slane %v623_v16, 5  ;;  %v631_v26 = vrot.slane %v629_v17, 5 }
  0x15   : > { %v635_v27 = vrot.slane %v633_v18, 4  ;;  %v641_v28 = vrot.slane %v639_v20, 5  ;;  %v647_v30 = vshll.u32 %v571_v19, 16  ;;  %v653_v31 = vshll.u32 %v572_v21, 16  ;;  %v574_v40 = vld [vmem:[%s3649_s27 + $0x18] sm:$0xf] }
  0x16   : > { %v646_v29 = vrot.slane %v644_v23, 4  ;;  %v626_v32 = vor.u32 %v625_v25, %v622_v24  ;;  %v657_v34 = vshrl.u32 %v572_v21, 16  ;;  %v663_v35 = vshll.u32 %v573_v22, 16  ;;  %v575_v45 = vld [vmem:[%s3649_s27 + $0x1c] sm:$0xf]  ;;  %v3538_v63 = vld [vmem:[%s3649_s27 + $0x48] sm:$0xff]  }
  0x17   : > { %v636_v33 = vor.u32 %v635_v27, %v631_v26  ;;  %v649_v38 = vrot.slane %v647_v30, 5  ;;  %v655_v39 = vrot.slane %v653_v31, 5  ;;  %v576_v47 = vld [vmem:[%s3649_s27 + $0x20] sm:$0x1]  ;;  %v668_v48 = vshrl.u32 %v574_v40, 16 }
  0x18   : > { %v627_v41 = vrot.slane %v626_v32, 4  ;;  %v659_v43 = vrot.slane %v657_v34, 4  ;;  %v665_v44 = vrot.slane %v663_v35, 5  ;;  %v671_v49 = vshll.u32 %v574_v40, 16  ;;  %v577_v56 = vld [vmem:[%s3649_s27 + $0x24] sm:$0xf] }
  0x19   : > { %v637_v42 = vrot.slane %v636_v33, 4  ;;  %v650_v46 = vor.u32 %v649_v38, %v646_v29  ;;  %v677_v50 = vshll.u32 %v575_v45, 16  ;;  %v681_v55 = vshrl.u32 %v575_v45, 16  ;;  %v578_v57 = vld [vmem:[%s3649_s27 + $0x28] sm:$0xf] }
  0x1a   : > { %3370 = vmatmul.mubr.msk.bf16.gmra.mxu0 %vm321_vm1, %v3534_v14  ;;  %v632_v51 = vsel %vm3672_vm4, %v627_v41, %v631_v26  ;;  %v660_v53 = vor.u32 %v659_v43, %v655_v39  ;;  %v670_v60 = vrot.slane %v668_v48, 4  ;;  %v673_v61 = vrot.slane %v671_v49, 5  ;;  %v579_v62 = vld [vmem:[%s3649_s27 + $0x2c] sm:$0x1]  ;;  %v580_v13 = vld [vmem:[%s3649_s27 + $0x30] sm:$0xf] }
  0x1b   : > { %3373 = vmatprep.mubr.msk.bf16.mxu0 %vm321_vm1, %v3536_v36  ;;  %v642_v52 = vsel %vm3672_vm4, %v637_v42, %v641_v28  ;;  %v651_v59 = vrot.slane %v650_v46, 4  ;;  %v679_v1 = vrot.slane %v677_v50, 5  ;;  %v683_v2 = vrot.slane %v681_v55, 4  ;;  %v581_v18 = vld [vmem:[%s3649_s27 + $0x34] sm:$0xf] }
  0x1c   : > { %v3044_v58 = vcombine.low %v632_v51, %v642_v52  ;;  %v661_v0 = vrot.slane %v660_v53, 4  ;;  %v687_v3 = vshll.u32 %v576_v47, 16  ;;  %v674_v5 = vor.u32 %v673_v61, %v670_v60  ;;  %v582_v25 = vld [vmem:[%s3649_s27 + $0x38] sm:$0x1]  ;;  %v583_v28 = vld [vmem:[%s3649_s27 + $0x3c] sm:$0xf] }
  0x1d   : > { %v656_v4 = vsel %vm3672_vm4, %v651_v59, %v655_v39  ;;  %v692_v6 = vshrl.u32 %v577_v56, 16  ;;  %v695_v7 = vshll.u32 %v577_v56, 16  ;;  %v684_v9 = vor.u32 %v683_v2, %v679_v1  ;;  %v584_v33 = vld [vmem:[%s3649_s27 + $0x40] sm:$0xf]  ;;  %v3539_v36 = vld [vmem:[%s3649_s27 + $0x54] sm:$0xff]  }
  0x1e   : > { %3399 = vmatprep.mubr.msk.bf16.mxu1 %vm321_vm1, %v3044_v58  ;;  %v666_v8 = vsel %vm3672_vm4, %v661_v0, %v665_v44  ;;  %v689_v11 = vrot.slane %v687_v3, 5  ;;  %v701_v12 = vshll.u32 %v578_v57, 16  ;;  %v675_v15 = vrot.slane %v674_v5, 4  ;;  %v585_v40 = vld [vmem:[%s3649_s27 + $0x44] sm:$0x1] }
  0x1f   : > { %v3045_v14 = vcombine.low %v656_v4, %v666_v8  ;;  %v694_v16 = vrot.slane %v692_v6, 4  ;;  %v697_v17 = vrot.slane %v695_v7, 5  ;;  %v685_v19 = vrot.slane %v684_v9, 4  ;;  %v588_v3 = vld [vmem:[%s3649_s27 + $0x50] sm:$0x1] }
  0x20   : > { %v703_v20 = vrot.slane %v701_v12, 5  ;;  %v705_v21 = vshrl.u32 %v578_v57, 16  ;;  %v711_v22 = vshll.u32 %v579_v62, 16  ;;  %v680_v23 = vsel %vm3672_vm4, %v675_v15, %v679_v1  ;;  %v586_v57 = vld [vmem:[%s3649_s27 + $0x48] sm:$0xf] }
  0x21   : > { %3400 = vmatmul.mubr.msk.bf16.vlgmr.msra.gmra.mxu1 %vm321_vm1, %v3045_v14  ;;  %v698_v24 = vor.u32 %v697_v17, %v694_v16  ;;  %v716_v26 = vshrl.u32 %v580_v13, 16  ;;  %v719_v27 = vshll.u32 %v580_v13, 16  ;;  %v690_v29 = vsel %vm3672_vm4, %v685_v19, %v689_v11  ;;  %v587_v62 = vld [vmem:[%s3649_s27 + $0x4c] sm:$0xf]  ;;  %v589_v4 = vld [vmem:[%s3649_s27 + $0x54] sm:$0xf] }
  0x22   : > { %3374 = vmatmul.mubr.msk.bf16.gmra.mxu0 %vm321_vm1, %v3537_v54  ;;  %3466 = vmatpush3.bf16.msra.mxu1 %v3659_v10  ;;  %v707_v30 = vrot.slane %v705_v21, 4  ;;  %v713_v31 = vrot.slane %v711_v22, 5  ;;  %v725_v32 = vshll.u32 %v581_v18, 16  ;;  %v3046_v34 = vcombine.low %v680_v23, %v690_v29  ;;  %v3540_v10 = vld [vmem:[%s3649_s27 + $0x60] sm:$0xff]   ;;  %v590_v9 = vld [vmem:[%s3649_s27 + $0x58] sm:$0xf] }
  0x23   : > { %3377 = vmatprep.mubr.msk.bf16.mxu0 %vm321_vm1, %v3538_v63  ;;  %v699_v35 = vrot.slane %v698_v24, 4  ;;  %v718_v38 = vrot.slane %v716_v26, 4  ;;  %v721_v39 = vrot.slane %v719_v27, 5  ;;  %v729_v43 = vshrl.u32 %v581_v18, 16  ;;  %v3541_v16 = vld [vmem:[%s3649_s27 + $0x6c] sm:$0xff]   ;;  %v3542_v24 = vld [vmem:[%s3649_s27 + $0x78] sm:$0xff]  }
  0x24   : > { %v708_v41 = vor.u32 %v707_v30, %v703_v20  ;;  %v727_v42 = vrot.slane %v725_v32, 5  ;;  %v735_v44 = vshll.u32 %v582_v25, 16  ;;  %3403 = vmatprep.mubr.msk.bf16.mxu1 %vm321_vm1, %v3046_v34  ;;  %v740_v47 = vshrl.u32 %v583_v28, 16  ;;  %v592_v34 = vld [vmem:[%s3649_s27 + $0x60] sm:$0xf] }
  0x25   : > { %v704_v45 = vsel %vm3672_vm4, %v699_v35, %v703_v20  ;;  %v722_v46 = vor.u32 %v721_v39, %v718_v38  ;;  %v743_v48 = vshll.u32 %v583_v28, 16  ;;  %v731_v50 = vrot.slane %v729_v43, 4  ;;  %v591_v28 = vld [vmem:[%s3649_s27 + $0x5c] sm:$0x1] }
  0x26   : > { %v709_v49 = vrot.slane %v708_v41, 4  ;;  %v737_v51 = vrot.slane %v735_v44, 5  ;;  %v749_v52 = vshll.u32 %v584_v33, 16  ;;  %v742_v54 = vrot.slane %v740_v47, 4 }
  0x27   : > { %v723_v53 = vrot.slane %v722_v46, 4  ;;  %v745_v55 = vrot.slane %v743_v48, 5  ;;  %v753_v56 = vshrl.u32 %v584_v33, 16  ;;  %v732_v59 = vor.u32 %v731_v50, %v727_v42  ;;  %v596_v50 = vld [vmem:[%s3649_s27 + $0x70] sm:$0xf] }
  0x28   : > { %v714_v58 = vsel %vm3672_vm4, %v709_v49, %v713_v31  ;;  %v751_v60 = vrot.slane %v749_v52, 5  ;;  %v759_v61 = vshll.u32 %v585_v40, 16  ;;  %v764_v7 = vshrl.u32 %v586_v57, 16  ;;  %v593_v40 = vld [vmem:[%s3649_s27 + $0x64] sm:$0xf] }
  0x29   : > { %v3047_v63 = vcombine.low %v704_v45, %v714_v58  ;;  %v728_v0 = vsel %vm3672_vm4, %v723_v53, %v727_v42  ;;  %v746_v1 = vor.u32 %v745_v55, %v742_v54  ;;  %v755_v2 = vrot.slane %v753_v56, 4  ;;  %v595_v45 = vld [vmem:[%s3649_s27 + $0x6c] sm:$0xf]  ;;  %v3543_v56 = vld [vmem:[%s3649_s27 + $0x84] sm:$0xff]  }
  0x2a   : > { %3378 = vmatmul.mubr.msk.bf16.gmra.mxu0 %vm321_vm1, %v3539_v36  ;;  %v733_v5 = vrot.slane %v732_v59, 4  ;;  %v761_v6 = vrot.slane %v759_v61, 5  ;;  %v767_v8 = vshll.u32 %v586_v57, 16  ;;  %v773_v13 = vshll.u32 %v587_v62, 16 }
  0x2b   : > { %3381 = vmatprep.mubr.msk.bf16.mxu0 %vm321_vm1, %v3540_v10  ;;  %3404 = vmatmul.mubr.msk.bf16.gmra.mxu1 %vm321_vm1, %v3047_v63  ;;  %v747_v11 = vrot.slane %v746_v1, 4  ;;  %v756_v12 = vor.u32 %v755_v2, %v751_v60  ;;  %v777_v14 = vshrl.u32 %v587_v62, 16  ;;  %v766_v17 = vrot.slane %v764_v7, 4  ;;  %v594_v10 = vld [vmem:[%s3649_s27 + $0x68] sm:$0x1] }
  0x2c   : > { %v738_v15 = vsel %vm3672_vm4, %v733_v5, %v737_v51  ;;  %v769_v18 = vrot.slane %v767_v8, 5  ;;  %v783_v19 = vshll.u32 %v588_v3, 16  ;;  %v775_v23 = vrot.slane %v773_v13, 5  ;;  %v597_v7 = vld [vmem:[%s3649_s27 + $0x74] sm:$0x1] }
  0x2d   : > { %v3048_v20 = vcombine.low %v728_v0, %v738_v15  ;;  %v752_v21 = vsel %vm3672_vm4, %v747_v11, %v751_v60  ;;  %v757_v22 = vrot.slane %v756_v12, 4  ;;  %v779_v26 = vrot.slane %v777_v14, 4  ;;  %v3544_v0 = vld [vmem:[%s3649_s27 + $0x90] sm:$0xff]   ;;  %v598_v11 = vld [vmem:[%s3649_s27 + $0x78] sm:$0xf] }
  0x2e   : > { %v770_v25 = vor.u32 %v769_v18, %v766_v17  ;;  %v785_v27 = vrot.slane %v783_v19, 5  ;;  %v788_v29 = vshrl.u32 %v589_v4, 16  ;;  %v791_v31 = vshll.u32 %v589_v4, 16 }
  0x2f   : > { %3407 = vmatprep.mubr.msk.bf16.mxu1 %vm321_vm1, %v3048_v20  ;;  %v762_v30 = vsel %vm3672_vm4, %v757_v22, %v761_v6  ;;  %v797_v32 = vshll.u32 %v590_v9, 16  ;;  %v801_v33 = vshrl.u32 %v590_v9, 16  ;;  %v780_v38 = vor.u32 %v779_v26, %v775_v23  ;;  %v601_v22 = vld [vmem:[%s3649_s27 + $0x84] sm:$0xf] }
  0x30   : > { %v3049_v35 = vcombine.low %v752_v21, %v762_v30  ;;  %v771_v36 = vrot.slane %v770_v25, 4  ;;  %v790_v39 = vrot.slane %v788_v29, 4  ;;  %v793_v41 = vrot.slane %v791_v31, 5  ;;  %v600_v21 = vld [vmem:[%s3649_s27 + $0x80] sm:$0x1] }
  0x31   : > { %v799_v42 = vrot.slane %v797_v32, 5  ;;  %v803_v43 = vrot.slane %v801_v33, 4  ;;  %v807_v44 = vshll.u32 %v591_v28, 16  ;;  %v781_v47 = vrot.slane %v780_v38, 4  ;;  %v3545_v33 = vld [vmem:[%s3649_s27 + $0x9c] sm:$0xff]  }
  0x32   : > { %3382 = vmatmul.mubr.msk.bf16.gmra.mxu0 %vm321_vm1, %v3541_v16  ;;  %v776_v46 = vsel %vm3672_vm4, %v771_v36, %v775_v23  ;;  %v812_v48 = vshrl.u32 %v592_v34, 16  ;;  %v815_v49 = vshll.u32 %v592_v34, 16  ;;  %v794_v51 = vor.u32 %v793_v41, %v790_v39  ;;  %v599_v16 = vld [vmem:[%s3649_s27 + $0x7c] sm:$0xf]  ;;  %v602_v41 = vld [vmem:[%s3649_s27 + $0x88] sm:$0xf] }
  0x33   : > { %3385 = vmatprep.mubr.msk.bf16.mxu0 %vm321_vm1, %v3542_v24  ;;  %3408 = vmatmul.mubr.msk.bf16.gmra.mxu1 %vm321_vm1, %v3049_v35  ;;  %v804_v52 = vor.u32 %v803_v43, %v799_v42  ;;  %v809_v53 = vrot.slane %v807_v44, 5  ;;  %v821_v54 = vshll.u32 %v593_v40, 16  ;;  %v786_v55 = vsel %vm3672_vm4, %v781_v47, %v785_v27 }
  0x34   : > { %v814_v57 = vrot.slane %v812_v48, 4  ;;  %v817_v58 = vrot.slane %v815_v49, 5  ;;  %v825_v59 = vshrl.u32 %v593_v40, 16  ;;  %v3050_v60 = vcombine.low %v776_v46, %v786_v55  ;;  %v603_v49 = vld [vmem:[%s3649_s27 + $0x8c] sm:$0x1] }
  0x35   : > { %v795_v61 = vrot.slane %v794_v51, 4  ;;  %v805_v62 = vrot.slane %v804_v52, 4  ;;  %v823_v63 = vrot.slane %v821_v54, 5  ;;  %v831_v3 = vshll.u32 %v594_v10, 16  ;;  %v604_v51 = vld [vmem:[%s3649_s27 + $0x90] sm:$0xf] }
  0x36   : > { %v818_v1 = vor.u32 %v817_v58, %v814_v57  ;;  %v827_v2 = vrot.slane %v825_v59, 4  ;;  %v836_v4 = vshrl.u32 %v595_v45, 16  ;;  %3411 = vmatprep.mubr.msk.bf16.mxu1 %vm321_vm1, %v3050_v60  ;;  %v839_v8 = vshll.u32 %v595_v45, 16 }
  0x37   : > { %v800_v5 = vsel %vm3672_vm4, %v795_v61, %v799_v42  ;;  %v810_v6 = vsel %vm3672_vm4, %v805_v62, %v809_v53  ;;  %v845_v9 = vshll.u32 %v596_v50, 16  ;;  %v833_v15 = vrot.slane %v831_v3, 5  ;;  %v3546_v42 = vld [vmem:[%s3649_s27 + $0xa8] sm:$0xff]  }
  0x38   : > { %v3051_v12 = vcombine.low %v800_v5, %v810_v6  ;;  %v819_v13 = vrot.slane %v818_v1, 4  ;;  %v828_v14 = vor.u32 %v827_v2, %v823_v63  ;;  %v838_v17 = vrot.slane %v836_v4, 4  ;;  %v3547_v1 = vld [vmem:[%s3649_s27 + $0xb4] sm:$0xff]  }
  0x39   : > { %v841_v18 = vrot.slane %v839_v8, 5  ;;  %v847_v19 = vrot.slane %v845_v9, 5  ;;  %v849_v20 = vshrl.u32 %v596_v50, 16  ;;  %v855_v25 = vshll.u32 %v597_v7, 16  ;;  %v606_v5 = vld [vmem:[%s3649_s27 + $0x98] sm:$0x1] }
  0x3a   : > { %3386 = vmatmul.mubr.msk.bf16.gmra.mxu0 %vm321_vm1, %v3543_v56  ;;  %v824_v23 = vsel %vm3672_vm4, %v819_v13, %v823_v63  ;;  %v829_v24 = vrot.slane %v828_v14, 4  ;;  %v860_v26 = vshrl.u32 %v598_v11, 16  ;;  %v863_v29 = vshll.u32 %v598_v11, 16  ;;  %v605_v56 = vld [vmem:[%s3649_s27 + $0x94] sm:$0xf]  ;;  %v3548_v14 = vld [vmem:[%s3649_s27 + $0xc] sm:$0xff]  }
  0x3b   : > { %3389 = vmatprep.mubr.msk.bf16.mxu0 %vm321_vm1, %v3544_v0  ;;  %3412 = vmatmul.mubr.msk.bf16.gmra.mxu1 %vm321_vm1, %v3051_v12  ;;  %v842_v27 = vor.u32 %v841_v18, %v838_v17  ;;  %v851_v28 = vrot.slane %v849_v20, 4  ;;  %v869_v30 = vshll.u32 %v599_v16, 16  ;;  %v857_v32 = vrot.slane %v855_v25, 5  ;;  %v607_v7 = vld [vmem:[%s3649_s27 + $0x9c] sm:$0xf] }
  0x3c   : > { %v834_v31 = vsel %vm3672_vm4, %v829_v24, %v833_v15  ;;  %v862_v34 = vrot.slane %v860_v26, 4  ;;  %v873_v35 = vshrl.u32 %v599_v16, 16  ;;  %v865_v40 = vrot.slane %v863_v29, 5  ;;  %v608_v13 = vld [vmem:[%s3649_s27 + $0xa0] sm:$0xf] }
  0x3d   : > { %v3052_v36 = vcombine.low %v824_v23, %v834_v31  ;;  %v843_v38 = vrot.slane %v842_v27, 4  ;;  %v852_v39 = vor.u32 %v851_v28, %v847_v19  ;;  %v871_v43 = vrot.slane %v869_v30, 5  ;;  %v609_v23 = vld [vmem:[%s3649_s27 + $0xa4] sm:$0x1]  ;;  %v610_v28 = vld [vmem:[%s3649_s27 + $0xa8] sm:$0xf] }
  0x3e   : > { %v875_v44 = vrot.slane %v873_v35, 4  ;;  %v879_v10 = vshll.u32 %v600_v21, 16  ;;  %v884_v45 = vshrl.u32 %v601_v22, 16  ;;  %v866_v48 = vor.u32 %v865_v40, %v862_v34 }
  0x3f   : > { %3415 = vmatprep.mubr.msk.bf16.mxu1 %vm321_vm1, %v3052_v36  ;;  %v848_v46 = vsel %vm3672_vm4, %v843_v38, %v847_v19  ;;  %v853_v47 = vrot.slane %v852_v39, 4  ;;  %v887_v50 = vshll.u32 %v601_v22, 16  ;;  %v893_v55 = vshll.u32 %v602_v41, 16 }
  0x40   : > { %v876_v52 = vor.u32 %v875_v44, %v871_v43  ;;  %v881_v53 = vrot.slane %v879_v10, 5  ;;  %v886_v54 = vrot.slane %v884_v45, 4  ;;  %v867_v58 = vrot.slane %v866_v48, 4  ;;  %v612_v48 = vld [vmem:[%s3649_s27 + $0xb0] sm:$0x1] }
  0x41   : > { %v858_v57 = vsel %vm3672_vm4, %v853_v47, %v857_v32  ;;  %v889_v59 = vrot.slane %v887_v50, 5  ;;  %v897_v60 = vshrl.u32 %v602_v41, 16  ;;  %v895_v63 = vrot.slane %v893_v55, 5 }
  0x42   : > { %3390 = vmatmul.mubr.msk.bf16.gmra.mxu0 %vm321_vm1, %v3545_v33  ;;  %v3053_v61 = vcombine.low %v848_v46, %v858_v57  ;;  %v877_v62 = vrot.slane %v876_v52, 4  ;;  %v903_v0 = vshll.u32 %v603_v49, 16  ;;  %v872_v2 = vsel %vm3672_vm4, %v867_v58, %v871_v43  ;;  %v611_v33 = vld [vmem:[%s3649_s27 + $0xac] sm:$0xf]  ;;  %v3550_v57 = vld [vmem:[%s3649_s27 + $0x24] sm:$0xff]  }
  0x43   : > { %3393 = vmatprep.mubr.msk.bf16.mxu0 %vm321_vm1, %v3546_v42  ;;  %v890_v3 = vor.u32 %v889_v59, %v886_v54  ;;  %v899_v4 = vrot.slane %v897_v60, 4  ;;  %v908_v6 = vshrl.u32 %v604_v51, 16  ;;  %v911_v11 = vshll.u32 %v604_v51, 16  ;;  %v3549_v51 = vld [vmem:[%s3649_s27 + $0x18] sm:$0xff]  }
  0x44   : > { %3416 = vmatmul.mubr.msk.bf16.gmra.mxu1 %vm321_vm1, %v3053_v61  ;;  %v882_v8 = vsel %vm3672_vm4, %v877_v62, %v881_v53  ;;  %v905_v9 = vrot.slane %v903_v0, 5  ;;  %v917_v12 = vshll.u32 %v605_v56, 16  ;;  %v921_v21 = vshrl.u32 %v605_v56, 16  ;;  %v613_v56 = vld [vmem:[%s3649_s27 + $0xb4] sm:$0xf] }
  0x45   : > { %v3054_v15 = vcombine.low %v872_v2, %v882_v8  ;;  %v891_v16 = vrot.slane %v890_v3, 4  ;;  %v900_v17 = vor.u32 %v899_v4, %v895_v63  ;;  %v910_v18 = vrot.slane %v908_v6, 4  ;;  %v614_v62 = vld [vmem:[%s3649_s27 + $0xb8] sm:$0xf]  ;;  %v615_v3 = vld [vmem:[%s3649_s27 + $0xbc] sm:$0x1] }
  0x46   : > { %v913_v19 = vrot.slane %v911_v11, 5  ;;  %v919_v20 = vrot.slane %v917_v12, 5  ;;  %v927_v22 = vshll.u32 %v606_v5, 16  ;;  %v932_v26 = vshrl.u32 %v607_v7, 16  ;;  %v3144_v4 = vld [vmem:[%s3649_s27 + $0xc] sm:$0xf] }
  0x47   : > { %3419 = vmatprep.mubr.msk.bf16.mxu1 %vm321_vm1, %v3054_v15  ;;  %v896_v24 = vsel %vm3672_vm4, %v891_v16, %v895_v63  ;;  %v901_v25 = vrot.slane %v900_v17, 4  ;;  %v935_v27 = vshll.u32 %v607_v7, 16  ;;  %v923_v30 = vrot.slane %v921_v21, 4 }
  0x48   : > { %v914_v29 = vor.u32 %v913_v19, %v910_v18  ;;  %v929_v31 = vrot.slane %v927_v22, 5  ;;  %v941_v32 = vshll.u32 %v608_v13, 16  ;;  %v934_v35 = vrot.slane %v932_v26, 4 }
  0x49   : > { %v906_v34 = vsel %vm3672_vm4, %v901_v25, %v905_v9  ;;  %v937_v36 = vrot.slane %v935_v27, 5  ;;  %v945_v38 = vshrl.u32 %v608_v13, 16  ;;  %v924_v41 = vor.u32 %v923_v30, %v919_v20  ;;  %v3145_v9 = vld [vmem:[%s3649_s27 + $0x10] sm:$0xf] }
  0x4a   : > { %3394 = vmatmul.mubr.msk.bf16.gmra.mxu0 %vm321_vm1, %v3547_v1  ;;  %v3055_v39 = vcombine.low %v896_v24, %v906_v34  ;;  %v915_v40 = vrot.slane %v914_v29, 4  ;;  %v943_v42 = vrot.slane %v941_v32, 5  ;;  %v951_v10 = vshll.u32 %v609_v23, 16  ;;  %v3551_v25 = vld [vmem:[%s3649_s27 + $0x30] sm:$0xff]   ;;  %v3147_v34 = vld [vmem:[%s3649_s27 + $0x18] sm:$0xf] }
  0x4b   : > { %3433 = vmatprep.mubr.msk.bf16.mxu0 %vm321_vm1, %v3548_v14  ;;  %v938_v43 = vor.u32 %v937_v36, %v934_v35  ;;  %v947_v44 = vrot.slane %v945_v38, 4  ;;  %v956_v45 = vshrl.u32 %v610_v28, 16  ;;  %v925_v47 = vrot.slane %v924_v41, 4  ;;  %v3146_v32 = vld [vmem:[%s3649_s27 + $0x14] sm:$0x1] }
  0x4c   : > { %3420 = vmatmul.mubr.msk.bf16.gmra.mxu1 %vm321_vm1, %v3055_v39  ;;  %v920_v46 = vsel %vm3672_vm4, %v915_v40, %v919_v20  ;;  %v959_v49 = vshll.u32 %v610_v28, 16  ;;  %v965_v50 = vshll.u32 %v611_v33, 16  ;;  %v953_v54 = vrot.slane %v951_v10, 5  ;;  %v3552_v28 = vld [vmem:[%s3649_s27 + $0x3c] sm:$0xff]  }
  0x4d   : > { %v939_v52 = vrot.slane %v938_v43, 4  ;;  %v948_v53 = vor.u32 %v947_v44, %v943_v42  ;;  %v958_v55 = vrot.slane %v956_v45, 4  ;;  %v930_v58 = vsel %vm3672_vm4, %v925_v47, %v929_v31  ;;  %v3148_v40 = vld [vmem:[%s3649_s27 + $0x1c] sm:$0xf]  ;;  %v3149_v10 = vld [vmem:[%s3649_s27 + $0x20] sm:$0x1] }
  0x4e   : > { %v961_v59 = vrot.slane %v959_v49, 5  ;;  %v967_v60 = vrot.slane %v965_v50, 5  ;;  %v969_v61 = vshrl.u32 %v611_v33, 16  ;;  %v3056_v63 = vcombine.low %v920_v46, %v930_v58  ;;  %v3150_v45 = vld [vmem:[%s3649_s27 + $0x24] sm:$0xf] }
  0x4f   : > { %v944_v0 = vsel %vm3672_vm4, %v939_v52, %v943_v42  ;;  %v949_v1 = vrot.slane %v948_v53, 4  ;;  %v975_v2 = vshll.u32 %v612_v48, 16  ;;  %v980_v7 = vshrl.u32 %v613_v56, 16  ;;  %v3151_v50 = vld [vmem:[%s3649_s27 + $0x28] sm:$0xf] }
  0x50   : > { %v962_v5 = vor.u32 %v961_v59, %v958_v55  ;;  %v971_v6 = vrot.slane %v969_v61, 4  ;;  %v983_v8 = vshll.u32 %v613_v56, 16  ;;  %3423 = vmatprep.mubr.msk.bf16.mxu1 %vm321_vm1, %v3056_v63  ;;  %v989_v13 = vshll.u32 %v614_v62, 16 }
  0x51   : > { %v954_v11 = vsel %vm3672_vm4, %v949_v1, %v953_v54  ;;  %v977_v12 = vrot.slane %v975_v2, 5  ;;  %v993_v14 = vshrl.u32 %v614_v62, 16  ;;  %v982_v18 = vrot.slane %v980_v7, 4  ;;  %v3553_v2 = vld [vmem:[%s3649_s27 + $0x48] sm:$0xff]  }
  0x52   : > { %3434 = vmatmul.mubr.msk.bf16.vlgmr.msra.gmra.mxu0 %vm321_vm1, %v3549_v51  ;;  %v3057_v15 = vcombine.low %v944_v0, %v954_v11  ;;  %v963_v16 = vrot.slane %v962_v5, 4  ;;  %v972_v17 = vor.u32 %v971_v6, %v967_v60  ;;  %v985_v19 = vrot.slane %v983_v8, 5  ;;  %v3554_v11 = vld [vmem:[%s3649_s27 + $0x54] sm:$0xff]  }
  0x53   : > { %3437 = vmatprep.mubr.msk.bf16.mxu0 %vm321_vm1, %v3550_v57  ;;  %v991_v20 = vrot.slane %v989_v13, 5  ;;  %v995_v21 = vrot.slane %v993_v14, 4  ;;  %v999_v22 = vshll.u32 %v615_v3, 16  ;;  %v1845_v26 = vshrl.u32 %v3144_v4, 16  ;;  %v3152_v3 = vld [vmem:[%s3649_s27 + $0x2c] sm:$0x1] }
  0x54   : > { %3424 = vmatmul.mubr.msk.bf16.gmra.mxu1 %vm321_vm1, %v3057_v15  ;;  %v968_v23 = vsel %vm3672_vm4, %v963_v16, %v967_v60  ;;  %v973_v24 = vrot.slane %v972_v17, 4  ;;  %v1848_v27 = vshll.u32 %v3144_v4, 16  ;;  %v986_v29 = vor.u32 %v985_v19, %v982_v18 }
  0x55   : > { %v996_v30 = vor.u32 %v995_v21, %v991_v20  ;;  %v1001_v31 = vrot.slane %v999_v22, 5  ;;  %v1854_v33 = vshll.u32 %v3145_v9, 16  ;;  %v1847_v36 = vrot.slane %v1845_v26, 4  ;;  %v3155_v21 = vld [vmem:[%s3649_s27 + $0x38] sm:$0x1] }
  0x56   : > { %v978_v35 = vsel %vm3672_vm4, %v973_v24, %v977_v12  ;;  %v1850_v38 = vrot.slane %v1848_v27, 5  ;;  %v1858_v39 = vshrl.u32 %v3145_v9, 16  ;;  %v987_v42 = vrot.slane %v986_v29, 4  ;;  %v3153_v9 = vld [vmem:[%s3649_s27 + $0x30] sm:$0xf] }
  0x57   : > { %v3058_v41 = vcombine.low %v968_v23, %v978_v35  ;;  %v997_v43 = vrot.slane %v996_v30, 4  ;;  %v1856_v44 = vrot.slane %v1854_v33, 5  ;;  %v1864_v48 = vshll.u32 %v3146_v32, 16  ;;  %v3156_v26 = vld [vmem:[%s3649_s27 + $0x3c] sm:$0xf] }
  0x58   : > { %v1851_v46 = vor.u32 %v1850_v38, %v1847_v36  ;;  %v1860_v47 = vrot.slane %v1858_v39, 4  ;;  %v1869_v49 = vshrl.u32 %v3147_v34, 16  ;;  %v992_v51 = vsel %vm3672_vm4, %v987_v42, %v991_v20  ;;  %v3154_v20 = vld [vmem:[%s3649_s27 + $0x34] sm:$0xf] }
  0x59   : > { %3427 = vmatprep.mubr.msk.bf16.mxu1 %vm321_vm1, %v3058_v41  ;;  %v1002_v52 = vsel %vm3672_vm4, %v997_v43, %v1001_v31  ;;  %v1872_v53 = vshll.u32 %v3147_v34, 16  ;;  %v1878_v54 = vshll.u32 %v3148_v40, 16  ;;  %v1866_v58 = vrot.slane %v1864_v48, 5  ;;  %v3158_v48 = vld [vmem:[%s3649_s27 + $0x44] sm:$0x1] }
  0x5a   : > { %3438 = vmatmul.mubr.msk.bf16.gmra.mxu0 %vm321_vm1, %v3551_v25  ;;  %v3059_v55 = vcombine.low %v992_v51, %v1002_v52  ;;  %v1852_v56 = vrot.slane %v1851_v46, 4  ;;  %v1861_v57 = vor.u32 %v1860_v47, %v1856_v44  ;;  %v1871_v59 = vrot.slane %v1869_v49, 4 }
  0x5b   : > { %3441 = vmatprep.mubr.msk.bf16.mxu0 %vm321_vm1, %v3552_v28  ;;  %v1874_v60 = vrot.slane %v1872_v53, 5  ;;  %v1880_v61 = vrot.slane %v1878_v54, 5  ;;  %v1882_v62 = vshrl.u32 %v3148_v40, 16  ;;  %v1888_v1 = vshll.u32 %v3149_v10, 16  ;;  %v3157_v40 = vld [vmem:[%s3649_s27 + $0x40] sm:$0xf] }
  0x5c   : > { %3428 = vmatmul.mubr.msk.bf16.gmra.mxu1 %vm321_vm1, %v3059_v55  ;;  %v1857_v63 = vsel %vm3672_vm4, %v1852_v56, %v1856_v44  ;;  %v1862_v0 = vrot.slane %v1861_v57, 4  ;;  %v1893_v4 = vshrl.u32 %v3150_v45, 16  ;;  %v1896_v7 = vshll.u32 %v3150_v45, 16  ;;  %v3555_v10 = vld [vmem:[%s3649_s27 + $0x60] sm:$0xff]   ;;  %v3159_v55 = vld [vmem:[%s3649_s27 + $0x48] sm:$0xf] }
  0x5d   : > { %v1875_v5 = vor.u32 %v1874_v60, %v1871_v59  ;;  %v1884_v6 = vrot.slane %v1882_v62, 4  ;;  %v1902_v8 = vshll.u32 %v3151_v50, 16  ;;  %v1890_v13 = vrot.slane %v1888_v1, 5  ;;  %v3160_v60 = vld [vmem:[%s3649_s27 + $0x4c] sm:$0xf] }
  0x5e   : > { %v1867_v12 = vsel %vm3672_vm4, %v1862_v0, %v1866_v58  ;;  %v1895_v14 = vrot.slane %v1893_v4, 4  ;;  %v1906_v15 = vshrl.u32 %v3151_v50, 16  ;;  %v1898_v19 = vrot.slane %v1896_v7, 5  ;;  %v3556_v50 = vld [vmem:[%s3649_s27 + $0x6c] sm:$0xff]  }
  0x5f   : > { %v3194_v16 = vcombine.low %v1857_v63, %v1867_v12  ;;  %v1876_v17 = vrot.slane %v1875_v5, 4  ;;  %v1885_v18 = vor.u32 %v1884_v6, %v1880_v61  ;;  %v1904_v22 = vrot.slane %v1902_v8, 5  ;;  %v3161_v1 = vld [vmem:[%s3649_s27 + $0x50] sm:$0x1] }
  0x60   : > { %v1908_v23 = vrot.slane %v1906_v15, 4  ;;  %v1912_v24 = vshll.u32 %v3152_v3, 16  ;;  %v1917_v25 = vshrl.u32 %v3153_v9, 16  ;;  %v1899_v29 = vor.u32 %v1898_v19, %v1895_v14 }
  0x61   : > { %3467 = vmatprep.mubr.msk.bf16.mxu1 %vm321_vm1, %v3194_v16  ;;  %v1881_v27 = vsel %vm3672_vm4, %v1876_v17, %v1880_v61  ;;  %v1886_v28 = vrot.slane %v1885_v18, 4  ;;  %v1920_v30 = vshll.u32 %v3153_v9, 16  ;;  %v1926_v34 = vshll.u32 %v3154_v20, 16  ;;  %v3163_v16 = vld [vmem:[%s3649_s27 + $0x58] sm:$0xf] }
  0x62   : > { %3442 = vmatmul.mubr.msk.bf16.gmra.mxu0 %vm321_vm1, %v3553_v2  ;;  %v1909_v31 = vor.u32 %v1908_v23, %v1904_v22  ;;  %v1914_v32 = vrot.slane %v1912_v24, 5  ;;  %v1919_v33 = vrot.slane %v1917_v25, 4  ;;  %v1900_v36 = vrot.slane %v1899_v29, 4  ;;  %v3162_v2 = vld [vmem:[%s3649_s27 + $0x54] sm:$0xf] }
  0x63   : > { %3445 = vmatprep.mubr.msk.bf16.mxu0 %vm321_vm1, %v3554_v11  ;;  %v1891_v35 = vsel %vm3672_vm4, %v1886_v28, %v1890_v13  ;;  %v1922_v38 = vrot.slane %v1920_v30, 5  ;;  %v1930_v39 = vshrl.u32 %v3154_v20, 16  ;;  %v1928_v43 = vrot.slane %v1926_v34, 5  ;;  %v3164_v25 = vld [vmem:[%s3649_s27 + $0x5c] sm:$0x1] }
  0x64   : > { %v3195_v41 = vcombine.low %v1881_v27, %v1891_v35  ;;  %v1910_v42 = vrot.slane %v1909_v31, 4  ;;  %v1936_v44 = vshll.u32 %v3155_v21, 16  ;;  %v1905_v45 = vsel %vm3672_vm4, %v1900_v36, %v1904_v22  ;;  %v3557_v21 = vld [vmem:[%s3649_s27 + $0x78] sm:$0xff]   ;;  %v3558_v27 = vld [vmem:[%s3649_s27 + $0x84] sm:$0xff]  }
  0x65   : > { %v1923_v46 = vor.u32 %v1922_v38, %v1919_v33  ;;  %v1932_v47 = vrot.slane %v1930_v39, 4  ;;  %v1941_v49 = vshrl.u32 %v3156_v26, 16  ;;  %v1944_v53 = vshll.u32 %v3156_v26, 16  ;;  %v3166_v38 = vld [vmem:[%s3649_s27 + $0x64] sm:$0xf] }
  0x66   : > { %3468 = vmatmul.mubr.msk.bf16.vlgmr.msra.gmra.mxu1 %vm321_vm1, %v3195_v41  ;;  %v1915_v51 = vsel %vm3672_vm4, %v1910_v42, %v1914_v32  ;;  %v1938_v52 = vrot.slane %v1936_v44, 5  ;;  %v1950_v54 = vshll.u32 %v3157_v40, 16  ;;  %v1954_v63 = vshrl.u32 %v3157_v40, 16  ;;  %v3165_v32 = vld [vmem:[%s3649_s27 + $0x60] sm:$0xf] }
  0x67   : > { %v3196_v56 = vcombine.low %v1905_v45, %v1915_v51  ;;  %v1924_v57 = vrot.slane %v1923_v46, 4  ;;  %v1933_v58 = vor.u32 %v1932_v47, %v1928_v43  ;;  %v1943_v59 = vrot.slane %v1941_v49, 4 }
  0x68   : > { %v1946_v61 = vrot.slane %v1944_v53, 5  ;;  %v1952_v62 = vrot.slane %v1950_v54, 5  ;;  %v1960_v0 = vshll.u32 %v3158_v48, 16  ;;  %v1965_v5 = vshrl.u32 %v3159_v55, 16 }
  0x69   : > { %3471 = vmatprep.mubr.msk.bf16.mxu1 %vm321_vm1, %v3196_v56  ;;  %v1929_v3 = vsel %vm3672_vm4, %v1924_v57, %v1928_v43  ;;  %v1934_v4 = vrot.slane %v1933_v58, 4  ;;  %v1968_v6 = vshll.u32 %v3159_v55, 16  ;;  %v1956_v8 = vrot.slane %v1954_v63, 4  ;;  %v3167_v43 = vld [vmem:[%s3649_s27 + $0x68] sm:$0x1] }
  0x6a   : > { %3446 = vmatmul.mubr.msk.bf16.gmra.mxu0 %vm321_vm1, %v3555_v10  ;;  %v1947_v7 = vor.u32 %v1946_v61, %v1943_v59  ;;  %v1962_v9 = vrot.slane %v1960_v0, 5  ;;  %v1974_v11 = vshll.u32 %v3160_v60, 16  ;;  %v1967_v13 = vrot.slane %v1965_v5, 4  ;;  %v3168_v55 = vld [vmem:[%s3649_s27 + $0x6c] sm:$0xf] }
  0x6b   : > { %3449 = vmatprep.mubr.msk.bf16.mxu0 %vm321_vm1, %v3556_v50  ;;  %v1939_v12 = vsel %vm3672_vm4, %v1934_v4, %v1938_v52  ;;  %v1970_v14 = vrot.slane %v1968_v6, 5  ;;  %v1978_v15 = vshrl.u32 %v3160_v60, 16  ;;  %v1957_v19 = vor.u32 %v1956_v8, %v1952_v62  ;;  %v3559_v60 = vld [vmem:[%s3649_s27 + $0x90] sm:$0xff]   ;;  %v3171_v8 = vld [vmem:[%s3649_s27 + $0x78] sm:$0xf] }
  0x6c   : > { %v3197_v17 = vcombine.low %v1929_v3, %v1939_v12  ;;  %v1948_v18 = vrot.slane %v1947_v7, 4  ;;  %v1976_v20 = vrot.slane %v1974_v11, 5  ;;  %v1984_v24 = vshll.u32 %v3161_v1, 16  ;;  %v3169_v61 = vld [vmem:[%s3649_s27 + $0x70] sm:$0xf] }
  0x6d   : > { %v1971_v22 = vor.u32 %v1970_v14, %v1967_v13  ;;  %v1980_v23 = vrot.slane %v1978_v15, 4  ;;  %v1989_v26 = vshrl.u32 %v3162_v2, 16  ;;  %v1958_v29 = vrot.slane %v1957_v19, 4  ;;  %v3170_v3 = vld [vmem:[%s3649_s27 + $0x74] sm:$0x1] }
  0x6e   : > { %3472 = vmatmul.mubr.msk.bf16.gmra.mxu1 %vm321_vm1, %v3197_v17  ;;  %v1953_v28 = vsel %vm3672_vm4, %v1948_v18, %v1952_v62  ;;  %v1992_v30 = vshll.u32 %v3162_v2, 16  ;;  %v1998_v31 = vshll.u32 %v3163_v16, 16  ;;  %v1986_v35 = vrot.slane %v1984_v24, 5  ;;  %v3560_v62 = vld [vmem:[%s3649_s27 + $0x9c] sm:$0xff]  }
  0x6f   : > { %v1972_v33 = vrot.slane %v1971_v22, 4  ;;  %v1981_v34 = vor.u32 %v1980_v23, %v1976_v20  ;;  %v1991_v36 = vrot.slane %v1989_v26, 4  ;;  %v1963_v39 = vsel %vm3672_vm4, %v1958_v29, %v1962_v9  ;;  %v3172_v14 = vld [vmem:[%s3649_s27 + $0x7c] sm:$0xf]  ;;  %v3173_v29 = vld [vmem:[%s3649_s27 + $0x80] sm:$0x1] }
  0x70   : > { %v1994_v40 = vrot.slane %v1992_v30, 5  ;;  %v2000_v41 = vrot.slane %v1998_v31, 5  ;;  %v2002_v42 = vshrl.u32 %v3163_v16, 16  ;;  %v3198_v44 = vcombine.low %v1953_v28, %v1963_v39  ;;  %v3175_v39 = vld [vmem:[%s3649_s27 + $0x88] sm:$0xf] }
  0x71   : > { %v1977_v10 = vsel %vm3672_vm4, %v1972_v33, %v1976_v20  ;;  %v1982_v45 = vrot.slane %v1981_v34, 4  ;;  %v2008_v46 = vshll.u32 %v3164_v25, 16  ;;  %v2013_v49 = vshrl.u32 %v3165_v32, 16 }
  0x72   : > { %3450 = vmatmul.mubr.msk.bf16.gmra.mxu0 %vm321_vm1, %v3557_v21  ;;  %v1995_v47 = vor.u32 %v1994_v40, %v1991_v36  ;;  %v2004_v48 = vrot.slane %v2002_v42, 4  ;;  %v2016_v50 = vshll.u32 %v3165_v32, 16  ;;  %3475 = vmatprep.mubr.msk.bf16.mxu1 %vm321_vm1, %v3198_v44  ;;  %v2022_v53 = vshll.u32 %v3166_v38, 16  ;;  %v3174_v32 = vld [vmem:[%s3649_s27 + $0x84] sm:$0xf]  ;;  %v3562_v44 = vld [vmem:[%s3649_s27 + $0xb4] sm:$0xff]  }
  0x73   : > { %3453 = vmatprep.mubr.msk.bf16.mxu0 %vm321_vm1, %v3558_v27  ;;  %v1987_v51 = vsel %vm3672_vm4, %v1982_v45, %v1986_v35  ;;  %v2010_v52 = vrot.slane %v2008_v46, 5  ;;  %v2026_v54 = vshrl.u32 %v3166_v38, 16  ;;  %v2015_v59 = vrot.slane %v2013_v49, 4  ;;  %v3561_v38 = vld [vmem:[%s3649_s27 + $0xa8] sm:$0xff]  }
  0x74   : > { %v3199_v56 = vcombine.low %v1977_v10, %v1987_v51  ;;  %v1996_v57 = vrot.slane %v1995_v47, 4  ;;  %v2005_v58 = vor.u32 %v2004_v48, %v2000_v41  ;;  %v2018_v63 = vrot.slane %v2016_v50, 5  ;;  %v3176_v47 = vld [vmem:[%s3649_s27 + $0x8c] sm:$0x1] }
  0x75   : > { %v2024_v0 = vrot.slane %v2022_v53, 5  ;;  %v2028_v1 = vrot.slane %v2026_v54, 4  ;;  %v2032_v2 = vshll.u32 %v3167_v43, 16  ;;  %v2037_v6 = vshrl.u32 %v3168_v55, 16  ;;  %v3177_v53 = vld [vmem:[%s3649_s27 + $0x90] sm:$0xf] }
  0x76   : > { %3476 = vmatmul.mubr.msk.bf16.gmra.mxu1 %vm321_vm1, %v3199_v56  ;;  %v2001_v4 = vsel %vm3672_vm4, %v1996_v57, %v2000_v41  ;;  %v2006_v5 = vrot.slane %v2005_v58, 4  ;;  %v2040_v7 = vshll.u32 %v3168_v55, 16  ;;  %v2019_v9 = vor.u32 %v2018_v63, %v2015_v59 }
  0x77   : > { %v2029_v11 = vor.u32 %v2028_v1, %v2024_v0  ;;  %v2034_v12 = vrot.slane %v2032_v2, 5  ;;  %v2046_v13 = vshll.u32 %v3169_v61, 16  ;;  %v2039_v16 = vrot.slane %v2037_v6, 4  ;;  %v3179_v6 = vld [vmem:[%s3649_s27 + $0x98] sm:$0x1] }
  0x78   : > { %v2011_v15 = vsel %vm3672_vm4, %v2006_v5, %v2010_v52  ;;  %v2042_v17 = vrot.slane %v2040_v7, 5  ;;  %v2050_v18 = vshrl.u32 %v3169_v61, 16  ;;  %v2020_v20 = vrot.slane %v2019_v9, 4 }
  0x79   : > { %v3200_v19 = vcombine.low %v2001_v4, %v2011_v15  ;;  %v2030_v21 = vrot.slane %v2029_v11, 4  ;;  %v2048_v22 = vrot.slane %v2046_v13, 5  ;;  %v2056_v25 = vshll.u32 %v3170_v3, 16  ;;  %v3563_v13 = vld [vmem:[%s3649_s27 + $0xc0] sm:$0xff]  }
  0x7a   : > { %3454 = vmatmul.mubr.msk.bf16.gmra.mxu0 %vm321_vm1, %v3559_v60  ;;  %v2043_v23 = vor.u32 %v2042_v17, %v2039_v16  ;;  %v2052_v24 = vrot.slane %v2050_v18, 4  ;;  %v2061_v26 = vshrl.u32 %v3171_v8, 16  ;;  %v2025_v27 = vsel %vm3672_vm4, %v2020_v20, %v2024_v0 }
  0x7b   : > { %3457 = vmatprep.mubr.msk.bf16.mxu0 %vm321_vm1, %v3560_v62  ;;  %3479 = vmatprep.mubr.msk.bf16.mxu1 %vm321_vm1, %v3200_v19  ;;  %v2035_v28 = vsel %vm3672_vm4, %v2030_v21, %v2034_v12  ;;  %v2064_v30 = vshll.u32 %v3171_v8, 16  ;;  %v2070_v31 = vshll.u32 %v3172_v14, 16  ;;  %v2058_v36 = vrot.slane %v2056_v25, 5  ;;  %v3178_v62 = vld [vmem:[%s3649_s27 + $0x94] sm:$0xf] }
  0x7c   : > { %v3201_v33 = vcombine.low %v2025_v27, %v2035_v28  ;;  %v2044_v34 = vrot.slane %v2043_v23, 4  ;;  %v2053_v35 = vor.u32 %v2052_v24, %v2048_v22  ;;  %v2063_v40 = vrot.slane %v2061_v26, 4  ;;  %v3181_v19 = vld [vmem:[%s3649_s27 + $0xa0] sm:$0xf]  ;;  %v3182_v27 = vld [vmem:[%s3649_s27 + $0xa4] sm:$0x1] }
  0x7d   : > { %v2066_v41 = vrot.slane %v2064_v30, 5  ;;  %v2072_v42 = vrot.slane %v2070_v31, 5  ;;  %v2074_v43 = vshrl.u32 %v3172_v14, 16  ;;  %v2080_v46 = vshll.u32 %v3173_v29, 16  ;;  %v3180_v14 = vld [vmem:[%s3649_s27 + $0x9c] sm:$0xf] }
  0x7e   : > { %3480 = vmatmul.mubr.msk.bf16.gmra.mxu1 %vm321_vm1, %v3201_v33  ;;  %v2049_v10 = vsel %vm3672_vm4, %v2044_v34, %v2048_v22  ;;  %v2054_v45 = vrot.slane %v2053_v35, 4  ;;  %v2085_v48 = vshrl.u32 %v3174_v32, 16  ;;  %v2088_v51 = vshll.u32 %v3174_v32, 16  ;;  %v3183_v33 = vld [vmem:[%s3649_s27 + $0xa8] sm:$0xf] }
  0x7f   : > { %v2067_v49 = vor.u32 %v2066_v41, %v2063_v40  ;;  %v2076_v50 = vrot.slane %v2074_v43, 4  ;;  %v2094_v52 = vshll.u32 %v3175_v39, 16  ;;  %v2082_v55 = vrot.slane %v2080_v46, 5 }
  0x80   : > { %v2059_v54 = vsel %vm3672_vm4, %v2054_v45, %v2058_v36  ;;  %v2087_v56 = vrot.slane %v2085_v48, 4  ;;  %v2098_v57 = vshrl.u32 %v3175_v39, 16  ;;  %v2090_v61 = vrot.slane %v2088_v51, 5  ;;  %v3184_v39 = vld [vmem:[%s3649_s27 + $0xac] sm:$0xf] }
  0x81   : > { %v3202_v58 = vcombine.low %v2049_v10, %v2059_v54  ;;  %v2068_v59 = vrot.slane %v2067_v49, 4  ;;  %v2077_v60 = vor.u32 %v2076_v50, %v2072_v42  ;;  %v2096_v63 = vrot.slane %v2094_v52, 5  ;;  %v3185_v45 = vld [vmem:[%s3649_s27 + $0xb0] sm:$0x1]  ;;  %v3186_v52 = vld [vmem:[%s3649_s27 + $0xb4] sm:$0xf] }
  0x82   : > { %3458 = vmatmul.mubr.msk.bf16.gmra.mxu0 %vm321_vm1, %v3561_v38  ;;  %v2100_v0 = vrot.slane %v2098_v57, 4  ;;  %v2104_v1 = vshll.u32 %v3176_v47, 16  ;;  %v2109_v2 = vshrl.u32 %v3177_v53, 16  ;;  %v2091_v5 = vor.u32 %v2090_v61, %v2087_v56  ;;  %v3187_v57 = vld [vmem:[%s3649_s27 + $0xb8] sm:$0xf] }
  0x83   : > { %3461 = vmatprep.mubr.msk.bf16.mxu0 %vm321_vm1, %v3562_v44  ;;  %3483 = vmatprep.mubr.msk.bf16.mxu1 %vm321_vm1, %v3202_v58  ;;  %v2073_v3 = vsel %vm3672_vm4, %v2068_v59, %v2072_v42  ;;  %v2078_v4 = vrot.slane %v2077_v60, 4  ;;  %v2112_v7 = vshll.u32 %v3177_v53, 16  ;;  %v2118_v12 = vshll.u32 %v3178_v62, 16 }
  0x84   : > { %v2101_v8 = vor.u32 %v2100_v0, %v2096_v63  ;;  %v2106_v9 = vrot.slane %v2104_v1, 5  ;;  %v2111_v11 = vrot.slane %v2109_v2, 4  ;;  %v2092_v16 = vrot.slane %v2091_v5, 4 }
  0x85   : > { %v2083_v15 = vsel %vm3672_vm4, %v2078_v4, %v2082_v55  ;;  %v2114_v17 = vrot.slane %v2112_v7, 5  ;;  %v2122_v18 = vshrl.u32 %v3178_v62, 16  ;;  %v2120_v22 = vrot.slane %v2118_v12, 5  ;;  %v3188_v4 = vld [vmem:[%s3649_s27 + $0xbc] sm:$0x1] }
  0x86   : > { %v3203_v20 = vcombine.low %v2073_v3, %v2083_v15  ;;  %v2102_v21 = vrot.slane %v2101_v8, 4  ;;  %v2128_v23 = vshll.u32 %v3179_v6, 16  ;;  %v2097_v24 = vsel %vm3672_vm4, %v2092_v16, %v2096_v63  ;;  %v3189_v12 = vld [vmem:[%s3649_s27 + $0xc0] sm:$0xf] }
  0x87   : > { %v2115_v25 = vor.u32 %v2114_v17, %v2111_v11  ;;  %v2124_v26 = vrot.slane %v2122_v18, 4  ;;  %v2133_v28 = vshrl.u32 %v3180_v14, 16  ;;  %v2136_v31 = vshll.u32 %v3180_v14, 16  ;;  %v3190_v17 = vld [vmem:[%s3649_s27 + $0xc4] sm:$0xf] }
  0x88   : > { %3484 = vmatmul.mubr.msk.bf16.gmra.mxu1 %vm321_vm1, %v3203_v20  ;;  %v2107_v29 = vsel %vm3672_vm4, %v2102_v21, %v2106_v9  ;;  %v2130_v30 = vrot.slane %v2128_v23, 5  ;;  %v2142_v32 = vshll.u32 %v3181_v19, 16  ;;  %v2146_v42 = vshrl.u32 %v3181_v19, 16 }
  0x89   : > { %v3204_v34 = vcombine.low %v2097_v24, %v2107_v29  ;;  %v2116_v35 = vrot.slane %v2115_v25, 4  ;;  %v2125_v36 = vor.u32 %v2124_v26, %v2120_v22  ;;  %v2135_v38 = vrot.slane %v2133_v28, 4  ;;  %v3191_v24 = vld [vmem:[%s3649_s27 + $0xc8] sm:$0x1] }
  0x8a   : > { %3462 = vmatmul.mubr.msk.bf16.gmra.mxu0 %vm321_vm1, %v3563_v13  ;;  %v2138_v40 = vrot.slane %v2136_v31, 5  ;;  %v2144_v41 = vrot.slane %v2142_v32, 5  ;;  %v2152_v43 = vshll.u32 %v3182_v27, 16  ;;  %v2157_v46 = vshrl.u32 %v3183_v33, 16 }
  0x8b   : > { %3487 = vmatprep.mubr.msk.bf16.mxu1 %vm321_vm1, %v3204_v34  ;;  %v2121_v44 = vsel %vm3672_vm4, %v2116_v35, %v2120_v22  ;;  %v2126_v10 = vrot.slane %v2125_v36, 4  ;;  %v2160_v47 = vshll.u32 %v3183_v33, 16  ;;  %v2148_v49 = vrot.slane %v2146_v42, 4 }
  0x8c   : > { %v2139_v48 = vor.u32 %v2138_v40, %v2135_v38  ;;  %v2154_v50 = vrot.slane %v2152_v43, 5  ;;  %v2166_v51 = vshll.u32 %v3184_v39, 16  ;;  %v2159_v54 = vrot.slane %v2157_v46, 4 }
  0x8d   : > { %v2131_v53 = vsel %vm3672_vm4, %v2126_v10, %v2130_v30  ;;  %v2162_v55 = vrot.slane %v2160_v47, 5  ;;  %v2170_v56 = vshrl.u32 %v3184_v39, 16  ;;  %v2149_v60 = vor.u32 %v2148_v49, %v2144_v41 }
  0x8e   : > { %v3205_v58 = vcombine.low %v2121_v44, %v2131_v53  ;;  %v2140_v59 = vrot.slane %v2139_v48, 4  ;;  %v2168_v61 = vrot.slane %v2166_v51, 5  ;;  %v2176_v0 = vshll.u32 %v3185_v45, 16 }
  0x8f   : > { %v2163_v62 = vor.u32 %v2162_v55, %v2159_v54  ;;  %v2172_v63 = vrot.slane %v2170_v56, 4  ;;  %v2181_v1 = vshrl.u32 %v3186_v52, 16  ;;  %v2150_v3 = vrot.slane %v2149_v60, 4 }
  0x90   : > { %3488 = vmatmul.mubr.msk.bf16.gmra.mxu1 %vm321_vm1, %v3205_v58  ;;  %v2145_v2 = vsel %vm3672_vm4, %v2140_v59, %v2144_v41  ;;  %v2184_v5 = vshll.u32 %v3186_v52, 16  ;;  %v2190_v6 = vshll.u32 %v3187_v57, 16  ;;  %v2178_v9 = vrot.slane %v2176_v0, 5 }
  0x91   : > { %v2164_v7 = vrot.slane %v2163_v62, 4  ;;  %v2173_v8 = vor.u32 %v2172_v63, %v2168_v61  ;;  %v2183_v11 = vrot.slane %v2181_v1, 4  ;;  %v2155_v13 = vsel %vm3672_vm4, %v2150_v3, %v2154_v50 }
  0x92   : > { %v2186_v14 = vrot.slane %v2184_v5, 5  ;;  %v2192_v15 = vrot.slane %v2190_v6, 5  ;;  %v2194_v16 = vshrl.u32 %v3187_v57, 16  ;;  %v3206_v18 = vcombine.low %v2145_v2, %v2155_v13 }
  0x93   : > { %v2169_v19 = vsel %vm3672_vm4, %v2164_v7, %v2168_v61  ;;  %v2174_v20 = vrot.slane %v2173_v8, 4  ;;  %v2200_v21 = vshll.u32 %v3188_v4, 16  ;;  %v2205_v25 = vshrl.u32 %v3189_v12, 16 }
  0x94   : > { %v2187_v22 = vor.u32 %v2186_v14, %v2183_v11  ;;  %v2196_v23 = vrot.slane %v2194_v16, 4  ;;  %v2208_v26 = vshll.u32 %v3189_v12, 16  ;;  %3491 = vmatprep.mubr.msk.bf16.mxu1 %vm321_vm1, %v3206_v18  ;;  %v2214_v29 = vshll.u32 %v3190_v17, 16 }
  0x95   : > { %v2179_v27 = vsel %vm3672_vm4, %v2174_v20, %v2178_v9  ;;  %v2202_v28 = vrot.slane %v2200_v21, 5  ;;  %v2218_v30 = vshrl.u32 %v3190_v17, 16  ;;  %v2207_v34 = vrot.slane %v2205_v25, 4 }
  0x96   : > { %v3207_v31 = vcombine.low %v2169_v19, %v2179_v27  ;;  %v2188_v32 = vrot.slane %v2187_v22, 4  ;;  %v2197_v33 = vor.u32 %v2196_v23, %v2192_v15  ;;  %v2210_v35 = vrot.slane %v2208_v26, 5 }
  0x97   : > { %v2216_v36 = vrot.slane %v2214_v29, 5  ;;  %v2220_v38 = vrot.slane %v2218_v30, 4  ;;  %v2224_v39 = vshll.u32 %v3191_v24, 16 }
  0x98   : > { %3492 = vmatmul.mubr.msk.bf16.gmra.mxu1 %vm321_vm1, %v3207_v31  ;;  %v2193_v40 = vsel %vm3672_vm4, %v2188_v32, %v2192_v15  ;;  %v2198_v41 = vrot.slane %v2197_v33, 4  ;;  %v2211_v42 = vor.u32 %v2210_v35, %v2207_v34 }
  0x99   : > { %v2221_v43 = vor.u32 %v2220_v38, %v2216_v36  ;;  %v2226_v44 = vrot.slane %v2224_v39, 5 }
  0x9a   : > { %v2203_v10 = vsel %vm3672_vm4, %v2198_v41, %v2202_v28  ;;  %v2212_v46 = vrot.slane %v2211_v42, 4 }
  0x9b   : > { %v3208_v45 = vcombine.low %v2193_v40, %v2203_v10  ;;  %v2222_v47 = vrot.slane %v2221_v43, 4 }
  0x9c   : > { %v2217_v48 = vsel %vm3672_vm4, %v2212_v46, %v2216_v36 }
  0x9d   : > { %3495 = vmatprep.mubr.msk.bf16.mxu1 %vm321_vm1, %v3208_v45  ;;  %v2227_v49 = vsel %vm3672_vm4, %v2222_v47, %v2226_v44 }
  0x9e   : > { %v3209_v50 = vcombine.low %v2217_v48, %v2227_v49 }
  0xa0   : > { %3496 = vmatmul.mubr.msk.bf16.gmra.mxu1 %vm321_vm1, %v3209_v50 }
  0xd2   : > { %v3367_v51 = vpop.f32.mrf.mxu0 }
  0xd3   : > { %538 = vst.msk [vmem:[#allocation2 + $0x10] sm:$0xff] %vm535_vm5, %v3367_v51 }
  0xd4   : > { %v408_v52 = vpop.f32.mrf.mxu0 }
  0xd5   : > { %536 = vst.msk [vmem:[#allocation2] sm:$0xff] %vm535_vm5, %v408_v52 }
  0xd6   : > { %v3368_v53 = vpop.f32.mrf.mxu0 }
  0xd7   : > { %539 = vst.msk [vmem:[#allocation2 + $0x18] sm:$0xff] %vm535_vm5, %v3368_v53 }
  0xd8   : > { %v411_v54 = vpop.f32.mrf.mxu0 }
  0xd9   : > { %537 = vst.msk [vmem:[#allocation2 + $0x8] sm:$0xff] %vm535_vm5, %v411_v54 }
  0xda   : > { %v3371_v55 = vpop.f32.mrf.mxu0  ;;  %v1273_v60 = vld [vmem:[#allocation2 + $0x10] sm:$0xff] }
  0xdb   : > { %542 = vst.msk [vmem:[#allocation2 + $0x30] sm:$0xff] %vm535_vm5, %v3371_v55 }
  0xdc   : > { %v424_v37 = vpop.f32.mrf.mxu0  ;;  %v1271_v0 = vld [vmem:[#allocation2] sm:$0xff] }
  0xdd   : > { %540 = vst.msk [vmem:[#allocation2 + $0x20] sm:$0xff] %vm535_vm5, %v424_v37 }
  0xde   : > { %v3372_v56 = vpop.f32.mrf.mxu0  ;;  %v1274_v4 = vld [vmem:[#allocation2 + $0x18] sm:$0xff] }
  0xdf   : > { %543 = vst.msk [vmem:[#allocation2 + $0x38] sm:$0xff] %vm535_vm5, %v3372_v56 }
  0xe0   : > { %v427_v57 = vpop.f32.mrf.mxu0  ;;  %v1272_v8 = vld [vmem:[#allocation2 + $0x8] sm:$0xff] }
  0xe1   : > { %541 = vst.msk [vmem:[#allocation2 + $0x28] sm:$0xff] %vm535_vm5, %v427_v57  ;;  %v3401_v59 = vpop.f32.mrf.mxu1 }
  0xe2   : > { %v3375_v58 = vpop.f32.mrf.mxu0  ;;  %v1305_v61 = vadd.f32 %v3401_v59, %v1273_v60  ;;  %v1277_v14 = vld [vmem:[#allocation2 + $0x30] sm:$0xff] }
  0xe3   : > { %546 = vst.msk [vmem:[#allocation2 + $0x50] sm:$0xff] %vm535_vm5, %v3375_v58  ;;  %v1144_v63 = vpop.f32.mrf.mxu1 }
  0xe4   : > { %v440_v62 = vpop.f32.mrf.mxu0  ;;  %1337 = vst.msk [vmem:[#allocation2 + $0x10] sm:$0xff] %vm535_vm5, %v1305_v61  ;;  %v1303_v1 = vadd.f32 %v1271_v0, %v1144_v63  ;;  %v1275_v18 = vld [vmem:[#allocation2 + $0x20] sm:$0xff] }
  0xe5   : > { %544 = vst.msk [vmem:[#allocation2 + $0x40] sm:$0xff] %vm535_vm5, %v440_v62  ;;  %v3402_v3 = vpop.f32.mrf.mxu1 }
  0xe6   : > { %v3376_v2 = vpop.f32.mrf.mxu0  ;;  %1335 = vst.msk [vmem:[#allocation2] sm:$0xff] %vm535_vm5, %v1303_v1  ;;  %v1306_v5 = vadd.f32 %v3402_v3, %v1274_v4  ;;  %v1278_v22 = vld [vmem:[#allocation2 + $0x38] sm:$0xff] }
  0xe7   : > { %547 = vst.msk [vmem:[#allocation2 + $0x58] sm:$0xff] %vm535_vm5, %v3376_v2  ;;  %v1147_v7 = vpop.f32.mrf.mxu1 }
  0xe8   : > { %v443_v6 = vpop.f32.mrf.mxu0  ;;  %1338 = vst.msk [vmem:[#allocation2 + $0x18] sm:$0xff] %vm535_vm5, %v1306_v5  ;;  %v1304_v9 = vadd.f32 %v1272_v8, %v1147_v7  ;;  %v1276_v26 = vld [vmem:[#allocation2 + $0x28] sm:$0xff] }
  0xe9   : > { %545 = vst.msk [vmem:[#allocation2 + $0x48] sm:$0xff] %vm535_vm5, %v443_v6 }
  0xea   : > { %v3379_v11 = vpop.f32.mrf.mxu0  ;;  %1336 = vst.msk [vmem:[#allocation2 + $0x8] sm:$0xff] %vm535_vm5, %v1304_v9  ;;  %v1281_v30 = vld [vmem:[#allocation2 + $0x50] sm:$0xff] }
  0xeb   : > { %550 = vst.msk [vmem:[#allocation2 + $0x70] sm:$0xff] %vm535_vm5, %v3379_v11  ;;  %v3405_v13 = vpop.f32.mrf.mxu1 }
  0xec   : > { %v456_v12 = vpop.f32.mrf.mxu0  ;;  %v1309_v15 = vadd.f32 %v3405_v13, %v1277_v14  ;;  %v1279_v34 = vld [vmem:[#allocation2 + $0x40] sm:$0xff] }
  0xed   : > { %548 = vst.msk [vmem:[#allocation2 + $0x60] sm:$0xff] %vm535_vm5, %v456_v12  ;;  %v1160_v17 = vpop.f32.mrf.mxu1 }
  0xee   : > { %v3380_v16 = vpop.f32.mrf.mxu0  ;;  %1341 = vst.msk [vmem:[#allocation2 + $0x30] sm:$0xff] %vm535_vm5, %v1309_v15  ;;  %v1307_v19 = vadd.f32 %v1275_v18, %v1160_v17  ;;  %v1282_v39 = vld [vmem:[#allocation2 + $0x58] sm:$0xff] }
  0xef   : > { %551 = vst.msk [vmem:[#allocation2 + $0x78] sm:$0xff] %vm535_vm5, %v3380_v16  ;;  %v3406_v21 = vpop.f32.mrf.mxu1 }
  0xf0   : > { %v459_v20 = vpop.f32.mrf.mxu0  ;;  %1339 = vst.msk [vmem:[#allocation2 + $0x20] sm:$0xff] %vm535_vm5, %v1307_v19  ;;  %v1310_v23 = vadd.f32 %v3406_v21, %v1278_v22  ;;  %v1280_v43 = vld [vmem:[#allocation2 + $0x48] sm:$0xff] }
  0xf1   : > { %549 = vst.msk [vmem:[#allocation2 + $0x68] sm:$0xff] %vm535_vm5, %v459_v20  ;;  %v1163_v25 = vpop.f32.mrf.mxu1 }
  0xf2   : > { %v3383_v24 = vpop.f32.mrf.mxu0  ;;  %1342 = vst.msk [vmem:[#allocation2 + $0x38] sm:$0xff] %vm535_vm5, %v1310_v23  ;;  %v1308_v27 = vadd.f32 %v1276_v26, %v1163_v25  ;;  %v1285_v46 = vld [vmem:[#allocation2 + $0x70] sm:$0xff] }
  0xf3   : > { %554 = vst.msk [vmem:[#allocation2 + $0x90] sm:$0xff] %vm535_vm5, %v3383_v24  ;;  %v3409_v29 = vpop.f32.mrf.mxu1  ;;  %v1702_v24 = vld [vmem:[#allocation2 + $0x10] sm:$0xff] }
  0xf4   : > { %v472_v28 = vpop.f32.mrf.mxu0  ;;  %1340 = vst.msk [vmem:[#allocation2 + $0x28] sm:$0xff] %vm535_vm5, %v1308_v27  ;;  %v1313_v31 = vadd.f32 %v3409_v29, %v1281_v30  ;;  %v1283_v50 = vld [vmem:[#allocation2 + $0x60] sm:$0xff] }
  0xf5   : > { %552 = vst.msk [vmem:[#allocation2 + $0x80] sm:$0xff] %vm535_vm5, %v472_v28  ;;  %v1176_v33 = vpop.f32.mrf.mxu1  ;;  %v1700_v30 = vld [vmem:[#allocation2] sm:$0xff] }
  0xf6   : > { %v3384_v32 = vpop.f32.mrf.mxu0  ;;  %1345 = vst.msk [vmem:[#allocation2 + $0x50] sm:$0xff] %vm535_vm5, %v1313_v31  ;;  %v1311_v35 = vadd.f32 %v1279_v34, %v1176_v33  ;;  %v1286_v54 = vld [vmem:[#allocation2 + $0x78] sm:$0xff] }
  0xf7   : > { %555 = vst.msk [vmem:[#allocation2 + $0x98] sm:$0xff] %vm535_vm5, %v3384_v32  ;;  %v3410_v38 = vpop.f32.mrf.mxu1 }
  0xf8   : > { %v475_v36 = vpop.f32.mrf.mxu0  ;;  %1343 = vst.msk [vmem:[#allocation2 + $0x40] sm:$0xff] %vm535_vm5, %v1311_v35  ;;  %v1314_v40 = vadd.f32 %v3410_v38, %v1282_v39  ;;  %v1284_v57 = vld [vmem:[#allocation2 + $0x68] sm:$0xff] }
  0xf9   : > { %553 = vst.msk [vmem:[#allocation2 + $0x88] sm:$0xff] %vm535_vm5, %v475_v36  ;;  %v1179_v42 = vpop.f32.mrf.mxu1  ;;  %v1703_v36 = vld [vmem:[#allocation2 + $0x18] sm:$0xff] }
  0xfa   : > { %v3387_v41 = vpop.f32.mrf.mxu0  ;;  %1346 = vst.msk [vmem:[#allocation2 + $0x58] sm:$0xff] %vm535_vm5, %v1314_v40  ;;  %v1312_v44 = vadd.f32 %v1280_v43, %v1179_v42  ;;  %v1289_v61 = vld [vmem:[#allocation2 + $0x90] sm:$0xff]  ;;  %v1701_v43 = vld [vmem:[#allocation2 + $0x8] sm:$0xff] }
  0xfb   : > { %558 = vst.msk [vmem:[#allocation2 + $0xb0] sm:$0xff] %vm535_vm5, %v3387_v41  ;;  %v3413_v45 = vpop.f32.mrf.mxu1 }
  0xfc   : > { %v488_v10 = vpop.f32.mrf.mxu0  ;;  %1344 = vst.msk [vmem:[#allocation2 + $0x48] sm:$0xff] %vm535_vm5, %v1312_v44  ;;  %v1317_v47 = vadd.f32 %v3413_v45, %v1285_v46  ;;  %v1287_v1 = vld [vmem:[#allocation2 + $0x80] sm:$0xff] }
  0xfd   : > { %556 = vst.msk [vmem:[#allocation2 + $0xa0] sm:$0xff] %vm535_vm5, %v488_v10  ;;  %v1192_v49 = vpop.f32.mrf.mxu1 }
  0xfe   : > { %v3388_v48 = vpop.f32.mrf.mxu0  ;;  %1349 = vst.msk [vmem:[#allocation2 + $0x70] sm:$0xff] %vm535_vm5, %v1317_v47  ;;  %v1315_v51 = vadd.f32 %v1283_v50, %v1192_v49  ;;  %v1290_v5 = vld [vmem:[#allocation2 + $0x98] sm:$0xff] }
  0xff   : > { %559 = vst.msk [vmem:[#allocation2 + $0xb8] sm:$0xff] %vm535_vm5, %v3388_v48  ;;  %v3414_v53 = vpop.f32.mrf.mxu1  ;;  %v1706_v48 = vld [vmem:[#allocation2 + $0x30] sm:$0xff] }
 0x100   : > { %v491_v52 = vpop.f32.mrf.mxu0  ;;  %1347 = vst.msk [vmem:[#allocation2 + $0x60] sm:$0xff] %vm535_vm5, %v1315_v51  ;;  %v1318_v55 = vadd.f32 %v3414_v53, %v1286_v54  ;;  %v1288_v9 = vld [vmem:[#allocation2 + $0x88] sm:$0xff]  ;;  %v1704_v54 = vld [vmem:[#allocation2 + $0x20] sm:$0xff] }
 0x101   : > { %557 = vst.msk [vmem:[#allocation2 + $0xa8] sm:$0xff] %vm535_vm5, %v491_v52  ;;  %v1195_v56 = vpop.f32.mrf.mxu1 }
 0x102   : > { %v3391_v37 = vpop.f32.mrf.mxu0  ;;  %1350 = vst.msk [vmem:[#allocation2 + $0x78] sm:$0xff] %vm535_vm5, %v1318_v55  ;;  %v1316_v58 = vadd.f32 %v1284_v57, %v1195_v56  ;;  %v1293_v14 = vld [vmem:[#allocation2 + $0xb0] sm:$0xff] }
 0x103   : > { %562 = vst.msk [vmem:[#allocation2 + $0xd0] sm:$0xff] %vm535_vm5, %v3391_v37 }
 0x104   : > { %v504_v59 = vpop.f32.mrf.mxu0  ;;  %1348 = vst.msk [vmem:[#allocation2 + $0x68] sm:$0xff] %vm535_vm5, %v1316_v58  ;;  %v3417_v60 = vpop.f32.mrf.mxu1  ;;  %v1291_v18 = vld [vmem:[#allocation2 + $0xa0] sm:$0xff] }
 0x105   : > { %560 = vst.msk [vmem:[#allocation2 + $0xc0] sm:$0xff] %vm535_vm5, %v504_v59  ;;  %v1321_v63 = vadd.f32 %v3417_v60, %v1289_v61  ;;  %v1707_v59 = vld [vmem:[#allocation2 + $0x38] sm:$0xff] }
 0x106   : > { %v3392_v62 = vpop.f32.mrf.mxu0  ;;  %v1208_v0 = vpop.f32.mrf.mxu1  ;;  %v1294_v22 = vld [vmem:[#allocation2 + $0xb8] sm:$0xff] }
 0x107   : > { %563 = vst.msk [vmem:[#allocation2 + $0xd8] sm:$0xff] %vm535_vm5, %v3392_v62  ;;  %1353 = vst.msk [vmem:[#allocation2 + $0x90] sm:$0xff] %vm535_vm5, %v1321_v63  ;;  %v1319_v3 = vadd.f32 %v1287_v1, %v1208_v0  ;;  %v1705_v1 = vld [vmem:[#allocation2 + $0x28] sm:$0xff] }
 0x108   : > { %v507_v2 = vpop.f32.mrf.mxu0  ;;  %v3418_v4 = vpop.f32.mrf.mxu1  ;;  %v1292_v28 = vld [vmem:[#allocation2 + $0xa8] sm:$0xff] }
 0x109   : > { %561 = vst.msk [vmem:[#allocation2 + $0xc8] sm:$0xff] %vm535_vm5, %v507_v2  ;;  %1351 = vst.msk [vmem:[#allocation2 + $0x80] sm:$0xff] %vm535_vm5, %v1319_v3  ;;  %v1322_v7 = vadd.f32 %v3418_v4, %v1290_v5 }
 0x10a   : > { %v3395_v6 = vpop.f32.mrf.mxu0  ;;  %v1211_v8 = vpop.f32.mrf.mxu1  ;;  %v1297_v34 = vld [vmem:[#allocation2 + $0xd0] sm:$0xff] }
 0x10b   : > { %566 = vst.msk [vmem:[#allocation2 + $0xf0] sm:$0xff] %vm535_vm5, %v3395_v6  ;;  %1354 = vst.msk [vmem:[#allocation2 + $0x98] sm:$0xff] %vm535_vm5, %v1322_v7  ;;  %v1320_v12 = vadd.f32 %v1288_v9, %v1211_v8  ;;  %v1710_v7 = vld [vmem:[#allocation2 + $0x50] sm:$0xff] }
 0x10c   : > { %v520_v11 = vpop.f32.mrf.mxu0  ;;  %v3421_v13 = vpop.f32.mrf.mxu1  ;;  %v1295_v41 = vld [vmem:[#allocation2 + $0xc0] sm:$0xff] }
 0x10d   : > { %564 = vst.msk [vmem:[#allocation2 + $0xe0] sm:$0xff] %vm535_vm5, %v520_v11  ;;  %1352 = vst.msk [vmem:[#allocation2 + $0x88] sm:$0xff] %vm535_vm5, %v1320_v12  ;;  %v1325_v16 = vadd.f32 %v3421_v13, %v1293_v14  ;;  %v1708_v14 = vld [vmem:[#allocation2 + $0x40] sm:$0xff] }
 0x10e   : > { %v3396_v15 = vpop.f32.mrf.mxu0  ;;  %v1224_v17 = vpop.f32.mrf.mxu1  ;;  %v1298_v46 = vld [vmem:[#allocation2 + $0xd8] sm:$0xff] }
 0x10f   : > { %567 = vst.msk [vmem:[#allocation2 + $0xf8] sm:$0xff] %vm535_vm5, %v3396_v15  ;;  %1357 = vst.msk [vmem:[#allocation2 + $0xb0] sm:$0xff] %vm535_vm5, %v1325_v16  ;;  %v1323_v20 = vadd.f32 %v1291_v18, %v1224_v17 }
 0x110   : > { %v523_v19 = vpop.f32.mrf.mxu0  ;;  %v3422_v21 = vpop.f32.mrf.mxu1  ;;  %v1296_v52 = vld [vmem:[#allocation2 + $0xc8] sm:$0xff] }
 0x111   : > { %565 = vst.msk [vmem:[#allocation2 + $0xe8] sm:$0xff] %vm535_vm5, %v523_v19  ;;  %1355 = vst.msk [vmem:[#allocation2 + $0xa0] sm:$0xff] %vm535_vm5, %v1323_v20  ;;  %v1326_v25 = vadd.f32 %v3422_v21, %v1294_v22  ;;  %v1711_v19 = vld [vmem:[#allocation2 + $0x58] sm:$0xff] }
 0x112   : > { %v3435_v23 = vpop.f32.mrf.mxu0  ;;  %v1227_v27 = vpop.f32.mrf.mxu1  ;;  %v1301_v57 = vld [vmem:[#allocation2 + $0xf0] sm:$0xff] }
 0x113   : > { %v1734_v26 = vadd.f32 %v3435_v23, %v1702_v24  ;;  %1358 = vst.msk [vmem:[#allocation2 + $0xb8] sm:$0xff] %vm535_vm5, %v1326_v25  ;;  %v1324_v31 = vadd.f32 %v1292_v28, %v1227_v27  ;;  %v1709_v24 = vld [vmem:[#allocation2 + $0x48] sm:$0xff] }
 0x114   : > { %v1573_v29 = vpop.f32.mrf.mxu0  ;;  %v3425_v33 = vpop.f32.mrf.mxu1  ;;  %v1299_v63 = vld [vmem:[#allocation2 + $0xe0] sm:$0xff] }
 0x115   : > { %1766 = vst.msk [vmem:[#allocation2 + $0x10] sm:$0xff] %vm535_vm5, %v1734_v26  ;;  %v1732_v32 = vadd.f32 %v1700_v30, %v1573_v29  ;;  %1356 = vst.msk [vmem:[#allocation2 + $0xa8] sm:$0xff] %vm535_vm5, %v1324_v31  ;;  %v1329_v38 = vadd.f32 %v3425_v33, %v1297_v34  ;;  %v1714_v30 = vld [vmem:[#allocation2 + $0x70] sm:$0xff] }
 0x116   : > { %v3436_v35 = vpop.f32.mrf.mxu0  ;;  %v1240_v40 = vpop.f32.mrf.mxu1  ;;  %v1302_v5 = vld [vmem:[#allocation2 + $0xf8] sm:$0xff] }
 0x117   : > { %1764 = vst.msk [vmem:[#allocation2] sm:$0xff] %vm535_vm5, %v1732_v32  ;;  %v1735_v39 = vadd.f32 %v3436_v35, %v1703_v36  ;;  %1361 = vst.msk [vmem:[#allocation2 + $0xd0] sm:$0xff] %vm535_vm5, %v1329_v38  ;;  %v1327_v44 = vadd.f32 %v1295_v41, %v1240_v40  ;;  %v1712_v36 = vld [vmem:[#allocation2 + $0x60] sm:$0xff] }
 0x118   : > { %v1576_v42 = vpop.f32.mrf.mxu0  ;;  %v3426_v45 = vpop.f32.mrf.mxu1  ;;  %v1300_v12 = vld [vmem:[#allocation2 + $0xe8] sm:$0xff] }
 0x119   : > { %1767 = vst.msk [vmem:[#allocation2 + $0x18] sm:$0xff] %vm535_vm5, %v1735_v39  ;;  %v1733_v10 = vadd.f32 %v1701_v43, %v1576_v42  ;;  %1359 = vst.msk [vmem:[#allocation2 + $0xc0] sm:$0xff] %vm535_vm5, %v1327_v44  ;;  %v1330_v49 = vadd.f32 %v3426_v45, %v1298_v46  ;;  %v1715_v43 = vld [vmem:[#allocation2 + $0x78] sm:$0xff]  ;;  %v4067_v45 = vld [vmem:[%s4230_s2] ss:$0 sm:$0xff] }
 0x11a   : > { %v3439_v47 = vpop.f32.mrf.mxu0  ;;  %v1243_v51 = vpop.f32.mrf.mxu1 }
 0x11b   : > { %1765 = vst.msk [vmem:[#allocation2 + $0x8] sm:$0xff] %vm535_vm5, %v1733_v10  ;;  %v1738_v50 = vadd.f32 %v3439_v47, %v1706_v48  ;;  %1362 = vst.msk [vmem:[#allocation2 + $0xd8] sm:$0xff] %vm535_vm5, %v1330_v49  ;;  %v1328_v55 = vadd.f32 %v1296_v52, %v1243_v51  ;;  %v1713_v49 = vld [vmem:[#allocation2 + $0x68] sm:$0xff] }
 0x11c   : > { %v1589_v53 = vpop.f32.mrf.mxu0  ;;  %v3429_v56 = vpop.f32.mrf.mxu1  ;;  %v2498_v17 = vld [vmem:[#allocation2 + $0x10] sm:$0xff] }
 0x11d   : > { %1770 = vst.msk [vmem:[#allocation2 + $0x30] sm:$0xff] %vm535_vm5, %v1738_v50  ;;  %v1736_v37 = vadd.f32 %v1704_v54, %v1589_v53  ;;  %1360 = vst.msk [vmem:[#allocation2 + $0xc8] sm:$0xff] %vm535_vm5, %v1328_v55  ;;  %v1333_v60 = vadd.f32 %v3429_v56, %v1301_v57 }
 0x11e   : > { %v3440_v58 = vpop.f32.mrf.mxu0  ;;  %v1256_v62 = vpop.f32.mrf.mxu1  ;;  %v2496_v22 = vld [vmem:[#allocation2] sm:$0xff] }
 0x11f   : > { %1768 = vst.msk [vmem:[#allocation2 + $0x20] sm:$0xff] %vm535_vm5, %v1736_v37  ;;  %v1739_v61 = vadd.f32 %v3440_v58, %v1707_v59  ;;  %1365 = vst.msk [vmem:[#allocation2 + $0xf0] sm:$0xff] %vm535_vm5, %v1333_v60  ;;  %v1331_v2 = vadd.f32 %v1299_v63, %v1256_v62  ;;  %v1718_v37 = vld [vmem:[#allocation2 + $0x90] sm:$0xff] }
 0x120   : > { %v1592_v0 = vpop.f32.mrf.mxu0  ;;  %v3430_v4 = vpop.f32.mrf.mxu1  ;;  %v2499_v28 = vld [vmem:[#allocation2 + $0x18] sm:$0xff] }
 0x121   : > { %1771 = vst.msk [vmem:[#allocation2 + $0x38] sm:$0xff] %vm535_vm5, %v1739_v61  ;;  %v1737_v3 = vadd.f32 %v1705_v1, %v1592_v0  ;;  %1363 = vst.msk [vmem:[#allocation2 + $0xe0] sm:$0xff] %vm535_vm5, %v1331_v2  ;;  %v1334_v8 = vadd.f32 %v3430_v4, %v1302_v5  ;;  %v1716_v2 = vld [vmem:[#allocation2 + $0x80] sm:$0xff] }
 0x122   : > { %v3443_v6 = vpop.f32.mrf.mxu0  ;;  %v1259_v11 = vpop.f32.mrf.mxu1  ;;  %v2497_v34 = vld [vmem:[#allocation2 + $0x8] sm:$0xff] }
 0x123   : > { %1769 = vst.msk [vmem:[#allocation2 + $0x28] sm:$0xff] %vm535_vm5, %v1737_v3  ;;  %v1742_v9 = vadd.f32 %v3443_v6, %v1710_v7  ;;  %1366 = vst.msk [vmem:[#allocation2 + $0xf8] sm:$0xff] %vm535_vm5, %v1334_v8  ;;  %v1332_v15 = vadd.f32 %v1300_v12, %v1259_v11  ;;  %v1719_v12 = vld [vmem:[#allocation2 + $0x98] sm:$0xff] }
 0x124   : > { %v1605_v13 = vpop.f32.mrf.mxu0  ;;  %v2502_v41 = vld [vmem:[#allocation2 + $0x30] sm:$0xff] }
 0x125   : > { %1774 = vst.msk [vmem:[#allocation2 + $0x50] sm:$0xff] %vm535_vm5, %v1742_v9  ;;  %v1740_v16 = vadd.f32 %v1708_v14, %v1605_v13  ;;  %1364 = vst.msk [vmem:[#allocation2 + $0xe8] sm:$0xff] %vm535_vm5, %v1332_v15 }
 0x126   : > { %v3444_v18 = vpop.f32.mrf.mxu0  ;;  %v3469_v21 = vpop.f32.mrf.mxu1  ;;  %v2500_v47 = vld [vmem:[#allocation2 + $0x20] sm:$0xff] }
 0x127   : > { %1772 = vst.msk [vmem:[#allocation2 + $0x40] sm:$0xff] %vm535_vm5, %v1740_v16  ;;  %v1743_v20 = vadd.f32 %v3444_v18, %v1711_v19  ;;  %v2530_v25 = vadd.f32 %v3469_v21, %v2498_v17 }
 0x128   : > { %v1608_v23 = vpop.f32.mrf.mxu0  ;;  %v2369_v27 = vpop.f32.mrf.mxu1  ;;  %v2503_v54 = vld [vmem:[#allocation2 + $0x38] sm:$0xff] }
 0x129   : > { %1775 = vst.msk [vmem:[#allocation2 + $0x58] sm:$0xff] %vm535_vm5, %v1743_v20  ;;  %v1741_v26 = vadd.f32 %v1709_v24, %v1608_v23  ;;  %2562 = vst.msk [vmem:[#allocation2 + $0x10] sm:$0xff] %vm535_vm5, %v2530_v25  ;;  %v2528_v31 = vadd.f32 %v2496_v22, %v2369_v27  ;;  %v1717_v23 = vld [vmem:[#allocation2 + $0x88] sm:$0xff] }
 0x12a   : > { %v3447_v29 = vpop.f32.mrf.mxu0  ;;  %v3470_v33 = vpop.f32.mrf.mxu1  ;;  %v2501_v1 = vld [vmem:[#allocation2 + $0x28] sm:$0xff] }
 0x12b   : > { %1773 = vst.msk [vmem:[#allocation2 + $0x48] sm:$0xff] %vm535_vm5, %v1741_v26  ;;  %v1746_v32 = vadd.f32 %v3447_v29, %v1714_v30  ;;  %2560 = vst.msk [vmem:[#allocation2] sm:$0xff] %vm535_vm5, %v2528_v31  ;;  %v2531_v38 = vadd.f32 %v3470_v33, %v2499_v28 }
 0x12c   : > { %v1621_v35 = vpop.f32.mrf.mxu0  ;;  %v2372_v40 = vpop.f32.mrf.mxu1  ;;  %v2506_v11 = vld [vmem:[#allocation2 + $0x50] sm:$0xff] }
 0x12d   : > { %1778 = vst.msk [vmem:[#allocation2 + $0x70] sm:$0xff] %vm535_vm5, %v1746_v32  ;;  %v1744_v39 = vadd.f32 %v1712_v36, %v1621_v35  ;;  %2563 = vst.msk [vmem:[#allocation2 + $0x18] sm:$0xff] %vm535_vm5, %v2531_v38  ;;  %v2529_v44 = vadd.f32 %v2497_v34, %v2372_v40  ;;  %v1722_v34 = vld [vmem:[#allocation2 + $0xb0] sm:$0xff] }
 0x12e   : > { %v3448_v42 = vpop.f32.mrf.mxu0  ;;  %v3473_v46 = vpop.f32.mrf.mxu1  ;;  %v2504_v22 = vld [vmem:[#allocation2 + $0x40] sm:$0xff] }
 0x12f   : > { %1776 = vst.msk [vmem:[#allocation2 + $0x60] sm:$0xff] %vm535_vm5, %v1744_v39  ;;  %v1747_v10 = vadd.f32 %v3448_v42, %v1715_v43  ;;  %2561 = vst.msk [vmem:[#allocation2 + $0x8] sm:$0xff] %vm535_vm5, %v2529_v44  ;;  %v2534_v50 = vadd.f32 %v3473_v46, %v2502_v41  ;;  %v1720_v46 = vld [vmem:[#allocation2 + $0xa0] sm:$0xff] }
 0x130   : > { %v1624_v48 = vpop.f32.mrf.mxu0  ;;  %v2594_v52 = vld [vmem:[#allocation2 + $0x10] sm:$0xff]  ;;  %v2385_v53 = vpop.f32.mrf.mxu1  ;;  %v2507_v33 = vld [vmem:[#allocation2 + $0x58] sm:$0xff] }
 0x131   : > { %1779 = vst.msk [vmem:[#allocation2 + $0x78] sm:$0xff] %vm535_vm5, %v1747_v10  ;;  %v1745_v51 = vadd.f32 %v1713_v49, %v1624_v48  ;;  %v2633_v56 = vadd.f32 %v4067_v45, %v2594_v52  ;;  %2566 = vst.msk [vmem:[#allocation2 + $0x30] sm:$0xff] %vm535_vm5, %v2534_v50  ;;  %v2532_v57 = vadd.f32 %v2500_v47, %v2385_v53 }
 0x132   : > { %v3451_v55 = vpop.f32.mrf.mxu0  ;;  %v2592_v59 = vld [vmem:[#allocation2] sm:$0xff]  ;;  %v3474_v60 = vpop.f32.mrf.mxu1  ;;  %v2505_v10 = vld [vmem:[#allocation2 + $0x48] sm:$0xff] }
 0x133   : > { %1777 = vst.msk [vmem:[#allocation2 + $0x68] sm:$0xff] %vm535_vm5, %v1745_v51  ;;  %v1750_v58 = vadd.f32 %v3451_v55, %v1718_v37  ;;  %vm2665_vm6 = vcmp.ge.f32.partialorder %v2633_v56, 0.0  ;;  %v2697_v62 = vmul.f32 0.2, %v2633_v56  ;;  %v2631_v63 = vadd.f32 %v4067_v45, %v2592_v59  ;;  %2564 = vst.msk [vmem:[#allocation2 + $0x20] sm:$0xff] %vm535_vm5, %v2532_v57 }
 0x134   : > { %v1637_v61 = vpop.f32.mrf.mxu0  ;;  %v2535_v0 = vadd.f32 %v3474_v60, %v2503_v54  ;;  %v2595_v3 = vld [vmem:[#allocation2 + $0x18] sm:$0xff]  ;;  %v2388_v4 = vpop.f32.mrf.mxu1  ;;  %v2510_v51 = vld [vmem:[#allocation2 + $0x70] sm:$0xff] }
 0x135   : > { %1782 = vst.msk [vmem:[#allocation2 + $0x90] sm:$0xff] %vm535_vm5, %v1750_v58  ;;  %v1748_v5 = vadd.f32 %v1716_v2, %v1637_v61  ;;  %v2729_v7 = vsel %vm2665_vm6, %v2633_v56, %v2697_v62  ;;  %vm2663_vm8 = vcmp.ge.f32.partialorder %v2631_v63, 0.0  ;;  %v2695_v8 = vmul.f32 0.2, %v2631_v63  ;;  %v1723_v56 = vld [vmem:[#allocation2 + $0xb8] sm:$0xff] }
 0x136   : > { %v3452_v6 = vpop.f32.mrf.mxu0  ;;  %v2634_v9 = vadd.f32 %v4067_v45, %v2595_v3  ;;  %2567 = vst.msk [vmem:[#allocation2 + $0x38] sm:$0xff] %vm535_vm5, %v2535_v0  ;;  %v3265_v13 = vpack.c.bf16 %v2729_v7, %v2729_v7  ;;  %v2593_v14 = vld [vmem:[#allocation2 + $0x8] sm:$0xff]  ;;  %v2533_v15 = vadd.f32 %v2501_v1, %v2388_v4  ;;  %v3477_v16 = vpop.f32.mrf.mxu1  ;;  %v2508_v60 = vld [vmem:[#allocation2 + $0x60] sm:$0xff] }
 0x137   : > { %1780 = vst.msk [vmem:[#allocation2 + $0x80] sm:$0xff] %vm535_vm5, %v1748_v5  ;;  %v1751_v17 = vadd.f32 %v3452_v6, %v1719_v12  ;;  %v2727_v19 = vsel %vm2663_vm8, %v2631_v63, %v2695_v8  ;;  %v2632_v21 = vadd.f32 %v4067_v45, %v2593_v14  ;;  %v2538_v26 = vadd.f32 %v3477_v16, %v2506_v11  ;;  %v1721_v3 = vld [vmem:[#allocation2 + $0xa8] sm:$0xff]  ;;  %v1726_v11 = vld [vmem:[#allocation2 + $0xd0] sm:$0xff] }
 0x138   : > { %v1640_v18 = vpop.f32.mrf.mxu0  ;;  %vm2666_vm9 = vcmp.ge.f32.partialorder %v2634_v9, 0.0  ;;  %v2698_v20 = vmul.f32 0.2, %v2634_v9  ;;  %2890 = vst.msk [vmem:[%s4081_s6 + $0x8] sm:$0xf] %vm2887_vm7, %v3265_v13  ;;  %v3263_v24 = vpack.c.bf16 %v2727_v19, %v2727_v19  ;;  %v2598_v25 = vld [vmem:[#allocation2 + $0x30] sm:$0xff]  ;;  %v2401_v27 = vpop.f32.mrf.mxu1 }
 0x139   : > { %2565 = vst.msk [vmem:[#allocation2 + $0x28] sm:$0xff] %vm535_vm5, %v2533_v15  ;;  %1783 = vst.msk [vmem:[#allocation2 + $0x98] sm:$0xff] %vm535_vm5, %v1751_v17  ;;  %v1749_v28 = vadd.f32 %v1717_v23, %v1640_v18  ;;  %vm2664_vm10 = vcmp.ge.f32.partialorder %v2632_v21, 0.0  ;;  %v2696_v31 = vmul.f32 0.2, %v2632_v21  ;;  %v2637_v32 = vadd.f32 %v4067_v45, %v2598_v25  ;;  %v2511_v7 = vld [vmem:[#allocation2 + $0x78] sm:$0xff] }
 0x13a   : > { %v3455_v29 = vpop.f32.mrf.mxu0  ;;  %v2730_v30 = vsel %vm2666_vm9, %v2634_v9, %v2698_v20  ;;  %2888 = vst.msk [vmem:[%s4081_s6] sm:$0xf] %vm2887_vm7, %v3263_v24  ;;  %v2596_v36 = vld [vmem:[#allocation2 + $0x20] sm:$0xff]  ;;  %v2536_v38 = vadd.f32 %v2504_v22, %v2401_v27  ;;  %v3478_v39 = vpop.f32.mrf.mxu1  ;;  %v2509_v20 = vld [vmem:[#allocation2 + $0x68] sm:$0xff] }
 0x13b   : > { %v3266_v35 = vpack.c.bf16 %v2730_v30, %v2730_v30  ;;  %2570 = vst.msk [vmem:[#allocation2 + $0x50] sm:$0xff] %vm535_vm5, %v2538_v26  ;;  %1781 = vst.msk [vmem:[#allocation2 + $0x88] sm:$0xff] %vm535_vm5, %v1749_v28  ;;  %v1754_v40 = vadd.f32 %v3455_v29, %v1722_v34  ;;  %v2728_v42 = vsel %vm2664_vm10, %v2632_v21, %v2696_v31  ;;  %vm2669_vm11 = vcmp.ge.f32.partialorder %v2637_v32, 0.0  ;;  %v1724_v22 = vld [vmem:[#allocation2 + $0xc0] sm:$0xff]  ;;  %v1727_v31 = vld [vmem:[#allocation2 + $0xd8] sm:$0xff] }
 0x13c   : > { %v1653_v41 = vpop.f32.mrf.mxu0  ;;  %v2701_v43 = vmul.f32 0.2, %v2637_v32  ;;  %v2635_v44 = vadd.f32 %v4067_v45, %v2596_v36  ;;  %v3264_v47 = vpack.c.bf16 %v2728_v42, %v2728_v42  ;;  %2568 = vst.msk [vmem:[#allocation2 + $0x40] sm:$0xff] %vm535_vm5, %v2536_v38  ;;  %v2539_v49 = vadd.f32 %v3478_v39, %v2507_v33  ;;  %v2404_v50 = vpop.f32.mrf.mxu1  ;;  %v1725_v42 = vld [vmem:[#allocation2 + $0xc8] sm:$0xff] }
 0x13d   : > { %2891 = vst.msk [vmem:[%s4081_s6 + $0xc] sm:$0xf] %vm2887_vm7, %v3266_v35  ;;  %v2599_v48 = vld [vmem:[#allocation2 + $0x38] sm:$0xff]  ;;  %v1752_v52 = vadd.f32 %v1720_v46, %v1653_v41  ;;  %v2537_v58 = vadd.f32 %v2505_v10, %v2404_v50 }
 0x13e   : > { %1786 = vst.msk [vmem:[#allocation2 + $0xb0] sm:$0xff] %vm535_vm5, %v1754_v40  ;;  %v3456_v53 = vpop.f32.mrf.mxu0  ;;  %v2733_v54 = vsel %vm2669_vm11, %v2637_v32, %v2701_v43  ;;  %vm2667_vm12 = vcmp.ge.f32.partialorder %v2635_v44, 0.0  ;;  %v2699_v55 = vmul.f32 0.2, %v2635_v44  ;;  %v2638_v37 = vadd.f32 %v4067_v45, %v2599_v48  ;;  %2571 = vst.msk [vmem:[#allocation2 + $0x58] sm:$0xff] %vm535_vm5, %v2539_v49  ;;  %v3481_v59 = vpop.f32.mrf.mxu1  ;;  %v2514_v40 = vld [vmem:[#allocation2 + $0x90] sm:$0xff] }
 0x13f   : > { %2889 = vst.msk [vmem:[%s4081_s6 + $0x4] sm:$0xf] %vm2887_vm7, %v3264_v47  ;;  %v3269_v57 = vpack.c.bf16 %v2733_v54, %v2733_v54  ;;  %v1755_v61 = vadd.f32 %v3456_v53, %v1723_v56  ;;  %v2542_v2 = vadd.f32 %v3481_v59, %v2510_v51 }
 0x140   : > { %1784 = vst.msk [vmem:[#allocation2 + $0xa0] sm:$0xff] %vm535_vm5, %v1752_v52  ;;  %v1656_v62 = vpop.f32.mrf.mxu0  ;;  %v2731_v63 = vsel %vm2667_vm12, %v2635_v44, %v2699_v55  ;;  %vm2670_vm13 = vcmp.ge.f32.partialorder %v2638_v37, 0.0  ;;  %v2702_v0 = vmul.f32 0.2, %v2638_v37  ;;  %v2597_v1 = vld [vmem:[#allocation2 + $0x28] sm:$0xff]  ;;  %2569 = vst.msk [vmem:[#allocation2 + $0x48] sm:$0xff] %vm535_vm5, %v2537_v58  ;;  %v2417_v6 = vpop.f32.mrf.mxu1 }
 0x141   : > { %2894 = vst.msk [vmem:[%s4081_s6 + $0x18] sm:$0xf] %vm2887_vm7, %v3269_v57  ;;  %v3267_v4 = vpack.c.bf16 %v2731_v63, %v2731_v63  ;;  %v2636_v5 = vadd.f32 %v4067_v45, %v2597_v1  ;;  %v1753_v8 = vadd.f32 %v1721_v3, %v1656_v62  ;;  %v2540_v14 = vadd.f32 %v2508_v60, %v2417_v6  ;;  %v1730_v52 = vld [vmem:[#allocation2 + $0xf0] sm:$0xff]  ;;  %v2515_v1 = vld [vmem:[#allocation2 + $0x98] sm:$0xff] }
 0x142   : > { %1787 = vst.msk [vmem:[#allocation2 + $0xb8] sm:$0xff] %vm535_vm5, %v1755_v61  ;;  %v3459_v9 = vpop.f32.mrf.mxu0  ;;  %v2734_v12 = vsel %vm2670_vm13, %v2638_v37, %v2702_v0  ;;  %v2602_v13 = vld [vmem:[#allocation2 + $0x50] sm:$0xff]  ;;  %2574 = vst.msk [vmem:[#allocation2 + $0x70] sm:$0xff] %vm535_vm5, %v2542_v2  ;;  %v3482_v19 = vpop.f32.mrf.mxu1  ;;  %v2512_v37 = vld [vmem:[#allocation2 + $0x80] sm:$0xff] }
 0x143   : > { %v1758_v15 = vadd.f32 %v3459_v9, %v1726_v11  ;;  %2892 = vst.msk [vmem:[%s4081_s6 + $0x10] sm:$0xf] %vm2887_vm7, %v3267_v4  ;;  %v3270_v16 = vpack.c.bf16 %v2734_v12, %v2734_v12  ;;  %vm2668_vm14 = vcmp.ge.f32.partialorder %v2636_v5, 0.0  ;;  %v2700_v17 = vmul.f32 0.2, %v2636_v5  ;;  %v2600_v23 = vld [vmem:[#allocation2 + $0x40] sm:$0xff] }
 0x144   : > { %v2641_v18 = vadd.f32 %v4067_v45, %v2602_v13  ;;  %1785 = vst.msk [vmem:[#allocation2 + $0xa8] sm:$0xff] %vm535_vm5, %v1753_v8  ;;  %v1669_v21 = vpop.f32.mrf.mxu0  ;;  %2572 = vst.msk [vmem:[#allocation2 + $0x60] sm:$0xff] %vm535_vm5, %v2540_v14  ;;  %v2543_v24 = vadd.f32 %v3482_v19, %v2511_v7  ;;  %v2639_v28 = vadd.f32 %v4067_v45, %v2600_v23  ;;  %v2420_v29 = vpop.f32.mrf.mxu1  ;;  %v1728_v2 = vld [vmem:[#allocation2 + $0xe0] sm:$0xff]  ;;  %v2513_v7 = vld [vmem:[#allocation2 + $0x88] sm:$0xff] }
 0x145   : > { %1790 = vst.msk [vmem:[#allocation2 + $0xd0] sm:$0xff] %vm535_vm5, %v1758_v15  ;;  %v1756_v25 = vadd.f32 %v1724_v22, %v1669_v21  ;;  %v2732_v26 = vsel %vm2668_vm14, %v2636_v5, %v2700_v17  ;;  %v2603_v33 = vld [vmem:[#allocation2 + $0x58] sm:$0xff]  ;;  %v2541_v34 = vadd.f32 %v2509_v20, %v2420_v29  ;;  %v2518_v20 = vld [vmem:[#allocation2 + $0xb0] sm:$0xff]  ;;  %v1729_v23 = vld [vmem:[#allocation2 + $0xe8] sm:$0xff] }
 0x146   : > { %2895 = vst.msk [vmem:[%s4081_s6 + $0x1c] sm:$0xf] %vm2887_vm7, %v3270_v16  ;;  %vm2673_vm15 = vcmp.ge.f32.partialorder %v2641_v18, 0.0  ;;  %v2705_v27 = vmul.f32 0.2, %v2641_v18  ;;  %v3460_v30 = vpop.f32.mrf.mxu0  ;;  %v3268_v32 = vpack.c.bf16 %v2732_v26, %v2732_v26  ;;  %vm2671_vm0 = vcmp.ge.f32.partialorder %v2639_v28, 0.0 }
 0x147   : > { %2575 = vst.msk [vmem:[#allocation2 + $0x78] sm:$0xff] %vm535_vm5, %v2543_v24  ;;  %1788 = vst.msk [vmem:[#allocation2 + $0xc0] sm:$0xff] %vm535_vm5, %v1756_v25  ;;  %v1759_v35 = vadd.f32 %v3460_v30, %v1727_v31  ;;  %v2703_v38 = vmul.f32 0.2, %v2639_v28  ;;  %v2642_v39 = vadd.f32 %v4067_v45, %v2603_v33  ;;  %v2601_v44 = vld [vmem:[#allocation2 + $0x48] sm:$0xff]  ;;  %v1731_v14 = vld [vmem:[#allocation2 + $0xf8] sm:$0xff] }
 0x148   : > { %v2737_v36 = vsel %vm2673_vm15, %v2641_v18, %v2705_v27  ;;  %v1672_v41 = vpop.f32.mrf.mxu0  ;;  %2893 = vst.msk [vmem:[%s4081_s6 + $0x14] sm:$0xf] %vm2887_vm7, %v3268_v32  ;;  %v2640_v48 = vadd.f32 %v4067_v45, %v2601_v44  ;;  %v3485_v50 = vpop.f32.mrf.mxu1  ;;  %v2516_v31 = vld [vmem:[#allocation2 + $0xa0] sm:$0xff] }
 0x149   : > { %v3273_v43 = vpack.c.bf16 %v2737_v36, %v2737_v36  ;;  %2573 = vst.msk [vmem:[#allocation2 + $0x68] sm:$0xff] %vm535_vm5, %v2541_v34  ;;  %1791 = vst.msk [vmem:[#allocation2 + $0xd8] sm:$0xff] %vm535_vm5, %v1759_v35  ;;  %v1757_v10 = vadd.f32 %v1725_v42, %v1672_v41  ;;  %v2735_v46 = vsel %vm2671_vm0, %v2639_v28, %v2703_v38  ;;  %vm2674_vm1 = vcmp.ge.f32.partialorder %v2642_v39, 0.0  ;;  %v2606_v49 = vld [vmem:[#allocation2 + $0x70] sm:$0xff]  ;;  %v2519_v38 = vld [vmem:[#allocation2 + $0xb8] sm:$0xff] }
 0x14a   : > { %v2706_v47 = vmul.f32 0.2, %v2642_v39  ;;  %v3463_v51 = vpop.f32.mrf.mxu0  ;;  %v3271_v53 = vpack.c.bf16 %v2735_v46, %v2735_v46  ;;  %v2645_v54 = vadd.f32 %v4067_v45, %v2606_v49  ;;  %v2546_v55 = vadd.f32 %v3485_v50, %v2514_v40  ;;  %v2433_v60 = vpop.f32.mrf.mxu1 }
 0x14b   : > { %2898 = vst.msk [vmem:[%s4081_s6 + $0x28] sm:$0xf] %vm2887_vm7, %v3273_v43  ;;  %v1762_v56 = vadd.f32 %v3463_v51, %v1730_v52  ;;  %vm2672_vm2 = vcmp.ge.f32.partialorder %v2640_v48, 0.0  ;;  %v2704_v58 = vmul.f32 0.2, %v2640_v48  ;;  %v2604_v59 = vld [vmem:[#allocation2 + $0x60] sm:$0xff]  ;;  %v2544_v5 = vadd.f32 %v2512_v37, %v2433_v60 }
 0x14c   : > { %1789 = vst.msk [vmem:[#allocation2 + $0xc8] sm:$0xff] %vm535_vm5, %v1757_v10  ;;  %v2738_v57 = vsel %vm2674_vm1, %v2642_v39, %v2706_v47  ;;  %v1685_v61 = vpop.f32.mrf.mxu0  ;;  %vm2677_vm3 = vcmp.ge.f32.partialorder %v2645_v54, 0.0  ;;  %v2709_v63 = vmul.f32 0.2, %v2645_v54  ;;  %v2643_v0 = vadd.f32 %v4067_v45, %v2604_v59  ;;  %2578 = vst.msk [vmem:[#allocation2 + $0x90] sm:$0xff] %vm535_vm5, %v2546_v55  ;;  %v3486_v6 = vpop.f32.mrf.mxu1  ;;  %v2517_v10 = vld [vmem:[#allocation2 + $0xa8] sm:$0xff] }
 0x14d   : > { %2896 = vst.msk [vmem:[%s4081_s6 + $0x20] sm:$0xf] %vm2887_vm7, %v3271_v53  ;;  %v3274_v62 = vpack.c.bf16 %v2738_v57, %v2738_v57  ;;  %v2736_v3 = vsel %vm2672_vm2, %v2640_v48, %v2704_v58  ;;  %v1760_v8 = vadd.f32 %v1728_v2, %v1685_v61  ;;  %v2547_v18 = vadd.f32 %v3486_v6, %v2515_v1  ;;  %v2522_v51 = vld [vmem:[#allocation2 + $0xd0] sm:$0xff] }
 0x14e   : > { %1794 = vst.msk [vmem:[#allocation2 + $0xf0] sm:$0xff] %vm535_vm5, %v1762_v56  ;;  %v2607_v4 = vld [vmem:[#allocation2 + $0x78] sm:$0xff]  ;;  %v3464_v9 = vpop.f32.mrf.mxu0  ;;  %v3272_v11 = vpack.c.bf16 %v2736_v3, %v2736_v3  ;;  %v2741_v12 = vsel %vm2677_vm3, %v2645_v54, %v2709_v63  ;;  %vm2675_vm4 = vcmp.ge.f32.partialorder %v2643_v0, 0.0  ;;  %v2707_v13 = vmul.f32 0.2, %v2643_v0  ;;  %2576 = vst.msk [vmem:[#allocation2 + $0x80] sm:$0xff] %vm535_vm5, %v2544_v5  ;;  %v2436_v19 = vpop.f32.mrf.mxu1 }
 0x14f   : > { %2899 = vst.msk [vmem:[%s4081_s6 + $0x2c] sm:$0xf] %vm2887_vm7, %v3274_v62  ;;  %v3277_v15 = vpack.c.bf16 %v2741_v12, %v2741_v12  ;;  %v2646_v16 = vadd.f32 %v4067_v45, %v2607_v4  ;;  %v1763_v21 = vadd.f32 %v3464_v9, %v1731_v14  ;;  %v2545_v26 = vadd.f32 %v2513_v7, %v2436_v19  ;;  %v2520_v61 = vld [vmem:[#allocation2 + $0xc0] sm:$0xff] }
 0x150   : > { %v2605_v17 = vld [vmem:[#allocation2 + $0x68] sm:$0xff]  ;;  %1792 = vst.msk [vmem:[#allocation2 + $0xe0] sm:$0xff] %vm535_vm5, %v1760_v8  ;;  %v1688_v22 = vpop.f32.mrf.mxu0  ;;  %v2739_v24 = vsel %vm2675_vm4, %v2643_v0, %v2707_v13  ;;  %2579 = vst.msk [vmem:[#allocation2 + $0x98] sm:$0xff] %vm535_vm5, %v2547_v18  ;;  %v3489_v30 = vpop.f32.mrf.mxu1  ;;  %v2523_v5 = vld [vmem:[#allocation2 + $0xd8] sm:$0xff] }
 0x151   : > { %2897 = vst.msk [vmem:[%s4081_s6 + $0x24] sm:$0xf] %vm2887_vm7, %v3272_v11  ;;  %v2644_v25 = vadd.f32 %v4067_v45, %v2605_v17  ;;  %v1761_v27 = vadd.f32 %v1729_v23, %v1688_v22  ;;  %2902 = vst.msk [vmem:[%s4081_s6 + $0x38] sm:$0xf] %vm2887_vm7, %v3277_v15  ;;  %v3275_v28 = vpack.c.bf16 %v2739_v24, %v2739_v24  ;;  %vm2678_vm6 = vcmp.ge.f32.partialorder %v2646_v16, 0.0 }
 0x152   : > { %v2710_v29 = vmul.f32 0.2, %v2646_v16  ;;  %1795 = vst.msk [vmem:[#allocation2 + $0xf8] sm:$0xff] %vm535_vm5, %v1763_v21  ;;  %2577 = vst.msk [vmem:[#allocation2 + $0x88] sm:$0xff] %vm535_vm5, %v2545_v26  ;;  %v2550_v33 = vadd.f32 %v3489_v30, %v2518_v20  ;;  %v2449_v36 = vpop.f32.mrf.mxu1 }
 0x153   : > { %vm2676_vm8 = vcmp.ge.f32.partialorder %v2644_v25, 0.0  ;;  %v2708_v32 = vmul.f32 0.2, %v2644_v25  ;;  %1793 = vst.msk [vmem:[#allocation2 + $0xe8] sm:$0xff] %vm535_vm5, %v1761_v27  ;;  %v2610_v35 = vld [vmem:[#allocation2 + $0x90] sm:$0xff]  ;;  %v2548_v42 = vadd.f32 %v2516_v31, %v2449_v36  ;;  %v2521_v11 = vld [vmem:[#allocation2 + $0xc8] sm:$0xff] }
 0x154   : > { %2900 = vst.msk [vmem:[%s4081_s6 + $0x30] sm:$0xf] %vm2887_vm7, %v3275_v28  ;;  %v2742_v34 = vsel %vm2678_vm6, %v2646_v16, %v2710_v29  ;;  %v2649_v41 = vadd.f32 %v4067_v45, %v2610_v35  ;;  %v3490_v44 = vpop.f32.mrf.mxu1 }
 0x155   : > { %v3278_v39 = vpack.c.bf16 %v2742_v34, %v2742_v34  ;;  %v2740_v40 = vsel %vm2676_vm8, %v2644_v25, %v2708_v32  ;;  %2582 = vst.msk [vmem:[#allocation2 + $0xb0] sm:$0xff] %vm535_vm5, %v2550_v33  ;;  %v2608_v47 = vld [vmem:[#allocation2 + $0x80] sm:$0xff]  ;;  %2580 = vst.msk [vmem:[#allocation2 + $0xa0] sm:$0xff] %vm535_vm5, %v2548_v42  ;;  %v2551_v48 = vadd.f32 %v3490_v44, %v2519_v38  ;;  %v2526_v20 = vld [vmem:[#allocation2 + $0xf0] sm:$0xff] }
 0x156   : > { %v3276_v43 = vpack.c.bf16 %v2740_v40, %v2740_v40  ;;  %vm2681_vm9 = vcmp.ge.f32.partialorder %v2649_v41, 0.0  ;;  %v2713_v46 = vmul.f32 0.2, %v2649_v41  ;;  %v2647_v49 = vadd.f32 %v4067_v45, %v2608_v47  ;;  %v2452_v50 = vpop.f32.mrf.mxu1 }
 0x157   : > { %2903 = vst.msk [vmem:[%s4081_s6 + $0x3c] sm:$0xf] %vm2887_vm7, %v3278_v39  ;;  %v2611_v53 = vld [vmem:[#allocation2 + $0x98] sm:$0xff]  ;;  %v2549_v54 = vadd.f32 %v2517_v10, %v2452_v50  ;;  %v2524_v31 = vld [vmem:[#allocation2 + $0xe0] sm:$0xff] }
 0x158   : > { %2901 = vst.msk [vmem:[%s4081_s6 + $0x34] sm:$0xf] %vm2887_vm7, %v3276_v43  ;;  %v2745_v52 = vsel %vm2681_vm9, %v2649_v41, %v2713_v46  ;;  %vm2679_vm10 = vcmp.ge.f32.partialorder %v2647_v49, 0.0  ;;  %v2711_v37 = vmul.f32 0.2, %v2647_v49  ;;  %v2650_v56 = vadd.f32 %v4067_v45, %v2611_v53  ;;  %v3493_v58 = vpop.f32.mrf.mxu1 }
 0x159   : > { %2583 = vst.msk [vmem:[#allocation2 + $0xb8] sm:$0xff] %vm535_vm5, %v2551_v48  ;;  %v3281_v55 = vpack.c.bf16 %v2745_v52, %v2745_v52  ;;  %v2609_v57 = vld [vmem:[#allocation2 + $0x88] sm:$0xff]  ;;  %2581 = vst.msk [vmem:[#allocation2 + $0xa8] sm:$0xff] %vm535_vm5, %v2549_v54  ;;  %v2554_v60 = vadd.f32 %v3493_v58, %v2522_v51  ;;  %v2527_v35 = vld [vmem:[#allocation2 + $0xf8] sm:$0xff] }
 0x15a   : > { %v2648_v59 = vadd.f32 %v4067_v45, %v2609_v57  ;;  %v2743_v62 = vsel %vm2679_vm10, %v2647_v49, %v2711_v37  ;;  %vm2682_vm11 = vcmp.ge.f32.partialorder %v2650_v56, 0.0  ;;  %v2714_v63 = vmul.f32 0.2, %v2650_v56  ;;  %v2465_v1 = vpop.f32.mrf.mxu1  ;;  %v2525_v44 = vld [vmem:[#allocation2 + $0xe8] sm:$0xff] }
 0x15b   : > { %2906 = vst.msk [vmem:[%s4081_s6 + $0x48] sm:$0xf] %vm2887_vm7, %v3281_v55  ;;  %v3279_v2 = vpack.c.bf16 %v2743_v62, %v2743_v62  ;;  %v2552_v8 = vadd.f32 %v2520_v61, %v2465_v1 }
 0x15c   : > { %v2614_v0 = vld [vmem:[#allocation2 + $0xb0] sm:$0xff]  ;;  %vm2680_vm12 = vcmp.ge.f32.partialorder %v2648_v59, 0.0  ;;  %v2712_v3 = vmul.f32 0.2, %v2648_v59  ;;  %2586 = vst.msk [vmem:[#allocation2 + $0xd0] sm:$0xff] %vm535_vm5, %v2554_v60  ;;  %v2746_v6 = vsel %vm2682_vm11, %v2650_v56, %v2714_v63  ;;  %v2612_v7 = vld [vmem:[#allocation2 + $0xa0] sm:$0xff]  ;;  %v3494_v9 = vpop.f32.mrf.mxu1 }
 0x15d   : > { %v2653_v4 = vadd.f32 %v4067_v45, %v2614_v0  ;;  %2904 = vst.msk [vmem:[%s4081_s6 + $0x40] sm:$0xf] %vm2887_vm7, %v3279_v2  ;;  %v3282_v12 = vpack.c.bf16 %v2746_v6, %v2746_v6  ;;  %v2651_v16 = vadd.f32 %v4067_v45, %v2612_v7  ;;  %v2555_v18 = vadd.f32 %v3494_v9, %v2523_v5 }
 0x15e   : > { %v2744_v13 = vsel %vm2680_vm12, %v2648_v59, %v2712_v3  ;;  %2584 = vst.msk [vmem:[#allocation2 + $0xc0] sm:$0xff] %vm535_vm5, %v2552_v8  ;;  %v2468_v19 = vpop.f32.mrf.mxu1 }
 0x15f   : > { %vm2685_vm13 = vcmp.ge.f32.partialorder %v2653_v4, 0.0  ;;  %v2717_v14 = vmul.f32 0.2, %v2653_v4  ;;  %v3280_v15 = vpack.c.bf16 %v2744_v13, %v2744_v13  ;;  %2907 = vst.msk [vmem:[%s4081_s6 + $0x4c] sm:$0xf] %vm2887_vm7, %v3282_v12  ;;  %v2553_v23 = vadd.f32 %v2521_v11, %v2468_v19 }
 0x160   : > { %v2615_v17 = vld [vmem:[#allocation2 + $0xb8] sm:$0xff]  ;;  %vm2683_vm14 = vcmp.ge.f32.partialorder %v2651_v16, 0.0  ;;  %v2715_v25 = vmul.f32 0.2, %v2651_v16  ;;  %v2613_v26 = vld [vmem:[#allocation2 + $0xa8] sm:$0xff]  ;;  %2587 = vst.msk [vmem:[#allocation2 + $0xd8] sm:$0xff] %vm535_vm5, %v2555_v18  ;;  %v3497_v27 = vpop.f32.mrf.mxu1 }
 0x161   : > { %v2749_v21 = vsel %vm2685_vm13, %v2653_v4, %v2717_v14  ;;  %v2654_v22 = vadd.f32 %v4067_v45, %v2615_v17  ;;  %2905 = vst.msk [vmem:[%s4081_s6 + $0x44] sm:$0xf] %vm2887_vm7, %v3280_v15  ;;  %v2652_v29 = vadd.f32 %v4067_v45, %v2613_v26  ;;  %v2558_v30 = vadd.f32 %v3497_v27, %v2526_v20 }
 0x162   : > { %v3285_v24 = vpack.c.bf16 %v2749_v21, %v2749_v21  ;;  %2585 = vst.msk [vmem:[#allocation2 + $0xc8] sm:$0xff] %vm535_vm5, %v2553_v23  ;;  %v2747_v32 = vsel %vm2683_vm14, %v2651_v16, %v2715_v25  ;;  %v2481_v34 = vpop.f32.mrf.mxu1 }
 0x163   : > { %vm2686_vm15 = vcmp.ge.f32.partialorder %v2654_v22, 0.0  ;;  %v2718_v28 = vmul.f32 0.2, %v2654_v22  ;;  %v2618_v33 = vld [vmem:[#allocation2 + $0xd0] sm:$0xff]  ;;  %v3283_v36 = vpack.c.bf16 %v2747_v32, %v2747_v32  ;;  %vm2684_vm0 = vcmp.ge.f32.partialorder %v2652_v29, 0.0  ;;  %2590 = vst.msk [vmem:[#allocation2 + $0xf0] sm:$0xff] %vm535_vm5, %v2558_v30 }
 0x164   : > { %2910 = vst.msk [vmem:[%s4081_s6 + $0x58] sm:$0xf] %vm2887_vm7, %v3285_v24  ;;  %v2716_v39 = vmul.f32 0.2, %v2652_v29  ;;  %v2657_v41 = vadd.f32 %v4067_v45, %v2618_v33  ;;  %v2556_v42 = vadd.f32 %v2524_v31, %v2481_v34  ;;  %v3498_v43 = vpop.f32.mrf.mxu1 }
 0x165   : > { %v2750_v38 = vsel %vm2686_vm15, %v2654_v22, %v2718_v28  ;;  %2908 = vst.msk [vmem:[%s4081_s6 + $0x50] sm:$0xf] %vm2887_vm7, %v3283_v36  ;;  %v2616_v46 = vld [vmem:[#allocation2 + $0xc0] sm:$0xff]  ;;  %v2559_v47 = vadd.f32 %v3498_v43, %v2527_v35 }
 0x166   : > { %v3286_v40 = vpack.c.bf16 %v2750_v38, %v2750_v38  ;;  %v2748_v10 = vsel %vm2684_vm0, %v2652_v29, %v2716_v39  ;;  %vm2689_vm1 = vcmp.ge.f32.partialorder %v2657_v41, 0.0  ;;  %v2721_v49 = vmul.f32 0.2, %v2657_v41  ;;  %2588 = vst.msk [vmem:[#allocation2 + $0xe0] sm:$0xff] %vm535_vm5, %v2556_v42  ;;  %v2484_v51 = vpop.f32.mrf.mxu1 }
 0x167   : > { %v3284_v48 = vpack.c.bf16 %v2748_v10, %v2748_v10  ;;  %v2655_v50 = vadd.f32 %v4067_v45, %v2616_v46  ;;  %v2619_v52 = vld [vmem:[#allocation2 + $0xd8] sm:$0xff]  ;;  %2591 = vst.msk [vmem:[#allocation2 + $0xf8] sm:$0xff] %vm535_vm5, %v2559_v47  ;;  %v2557_v53 = vadd.f32 %v2525_v44, %v2484_v51 }
 0x168   : > { %2911 = vst.msk [vmem:[%s4081_s6 + $0x5c] sm:$0xf] %vm2887_vm7, %v3286_v40  ;;  %v2753_v54 = vsel %vm2689_vm1, %v2657_v41, %v2721_v49  ;;  %v2658_v37 = vadd.f32 %v4067_v45, %v2619_v52 }
 0x169   : > { %2909 = vst.msk [vmem:[%s4081_s6 + $0x54] sm:$0xf] %vm2887_vm7, %v3284_v48  ;;  %vm2687_vm2 = vcmp.ge.f32.partialorder %v2655_v50, 0.0  ;;  %v2719_v55 = vmul.f32 0.2, %v2655_v50  ;;  %v2617_v56 = vld [vmem:[#allocation2 + $0xc8] sm:$0xff]  ;;  %v3289_v57 = vpack.c.bf16 %v2753_v54, %v2753_v54 }
 0x16a   : > { %v2656_v58 = vadd.f32 %v4067_v45, %v2617_v56  ;;  %2589 = vst.msk [vmem:[#allocation2 + $0xe8] sm:$0xff] %vm535_vm5, %v2557_v53  ;;  %vm2690_vm3 = vcmp.ge.f32.partialorder %v2658_v37, 0.0  ;;  %v2722_v60 = vmul.f32 0.2, %v2658_v37  ;;  %v2622_v61 = vld [vmem:[#allocation2 + $0xf0] sm:$0xff] }
 0x16b   : > { %v2751_v59 = vsel %vm2687_vm2, %v2655_v50, %v2719_v55  ;;  %2914 = vst.msk [vmem:[%s4081_s6 + $0x68] sm:$0xf] %vm2887_vm7, %v3289_v57  ;;  %v2661_v0 = vadd.f32 %v4067_v45, %v2622_v61 }
 0x16c   : > { %v3287_v62 = vpack.c.bf16 %v2751_v59, %v2751_v59  ;;  %vm2688_vm4 = vcmp.ge.f32.partialorder %v2656_v58, 0.0  ;;  %v2720_v63 = vmul.f32 0.2, %v2656_v58  ;;  %v2754_v1 = vsel %vm2690_vm3, %v2658_v37, %v2722_v60 }
 0x16d   : > { %v3290_v2 = vpack.c.bf16 %v2754_v1, %v2754_v1  ;;  %vm2693_vm6 = vcmp.ge.f32.partialorder %v2661_v0, 0.0  ;;  %v2725_v4 = vmul.f32 0.2, %v2661_v0  ;;  %v2620_v5 = vld [vmem:[#allocation2 + $0xe0] sm:$0xff] }
 0x16e   : > { %2912 = vst.msk [vmem:[%s4081_s6 + $0x60] sm:$0xf] %vm2887_vm7, %v3287_v62  ;;  %v2752_v3 = vsel %vm2688_vm4, %v2656_v58, %v2720_v63  ;;  %v2659_v7 = vadd.f32 %v4067_v45, %v2620_v5  ;;  %v2623_v8 = vld [vmem:[#allocation2 + $0xf8] sm:$0xff] }
 0x16f   : > { %v3288_v6 = vpack.c.bf16 %v2752_v3, %v2752_v3  ;;  %2915 = vst.msk [vmem:[%s4081_s6 + $0x6c] sm:$0xf] %vm2887_vm7, %v3290_v2  ;;  %v2757_v9 = vsel %vm2693_vm6, %v2661_v0, %v2725_v4  ;;  %v2662_v11 = vadd.f32 %v4067_v45, %v2623_v8 }
 0x170   : > { %v3293_v12 = vpack.c.bf16 %v2757_v9, %v2757_v9  ;;  %vm2691_vm5 = vcmp.ge.f32.partialorder %v2659_v7, 0.0  ;;  %v2723_v13 = vmul.f32 0.2, %v2659_v7 }
 0x171   : > { %2913 = vst.msk [vmem:[%s4081_s6 + $0x64] sm:$0xf] %vm2887_vm7, %v3288_v6  ;;  %v2621_v14 = vld [vmem:[#allocation2 + $0xe8] sm:$0xff]  ;;  %vm2694_vm8 = vcmp.ge.f32.partialorder %v2662_v11, 0.0  ;;  %v2726_v15 = vmul.f32 0.2, %v2662_v11 }
 0x172   : > { %v2660_v16 = vadd.f32 %v4067_v45, %v2621_v14  ;;  %2918 = vst.msk [vmem:[%s4081_s6 + $0x78] sm:$0xf] %vm2887_vm7, %v3293_v12  ;;  %v2755_v17 = vsel %vm2691_vm5, %v2659_v7, %v2723_v13 }
 0x173   : > { %v3291_v18 = vpack.c.bf16 %v2755_v17, %v2755_v17  ;;  %v2758_v19 = vsel %vm2694_vm8, %v2662_v11, %v2726_v15 }
 0x174   : > { %vm2692_vm9 = vcmp.ge.f32.partialorder %v2660_v16, 0.0  ;;  %v2724_v20 = vmul.f32 0.2, %v2660_v16  ;;  %v3294_v21 = vpack.c.bf16 %v2758_v19, %v2758_v19 }
 0x175   : > { %2916 = vst.msk [vmem:[%s4081_s6 + $0x70] sm:$0xf] %vm2887_vm7, %v3291_v18 }
 0x176   : > { %v2756_v22 = vsel %vm2692_vm9, %v2660_v16, %v2724_v20  ;;  %2919 = vst.msk [vmem:[%s4081_s6 + $0x7c] sm:$0xf] %vm2887_vm7, %v3294_v21 }
 0x177   : > { %v3292_v23 = vpack.c.bf16 %v2756_v22, %v2756_v22 }
 0x179   : > { %2917 = vst.msk [vmem:[%s4081_s6 + $0x74] sm:$0xf] %vm2887_vm7, %v3292_v23 }
 0x17a PF: > { %s13_s14 = sadd.s32 1, %s3586_s14   ;;  %s4234_s12 = smov %s3582_s13 }
 0x17b   : > { %p10_p5 = scmp.ge.s32.totalorder %s13_s14, 4   ;;  %s4235_s13 = smov %s4237_s15 }
 0x17d   :  { %12 = sbr.rel (!%p10_p5) target bundleno = 2 (0x2), region = 66 }

// kernel: cyclegan_discriminator.10
= control target key start
LH: loop header
LB: loop body
LE: loop exit
PB: predicated region body
PF: predicated region fallthrough
CT: control target
= control target key end

     0   :  { %s581_s12 = smov 0   ;;  %s583_s13 = smov 0   ;;  %s647_s0 = inlined_call_operand.vmem [shape: bf16[2,64,16], index: 0, kind: input, shape index: {}]   ;;  %s648_s1 = inlined_call_operand.vmem [shape: f32[2,1,16], index: 1, kind: input, shape index: {}]   ;;  %s649_s2 = inlined_call_operand.vmem [shape: f32[2,1,16], index: 2, kind: input, shape index: {}]   ;;  %s650_s3 = inlined_call_operand.vmem [shape: bf16[2,64,16], index: 3, kind: output, shape index: {}]  }
   0x1   :  { %s585_s14 = smov 0  }
   0x2 LB: > { %s25_s15 = sadd.s32 1, %s555_s13  ;;  %p467_p0 = scmp.ge.s32.totalorder %s559_s14, 1  ;;  %s559_s14 = sphi %s585_s14, %s13_s14   ;;  %s555_s13 = sphi %s583_s13, %s652_s13   ;;  %s551_s12 = sphi %s581_s12, %s651_s12  }
   0x3   : > { %p27_p1 = scmp.ge.s32.totalorder %s25_s15, 2  ;;  %p174_p2 = scmp.lt.s32.totalorder %s559_s14, 3 }
   0x5   : > { %s654_s15 = smov (%p27_p1, %s25_s15), 0  ;;  %p175_p3 = pnand %p467_p0, %p174_p2 }
   0x6   : > { %p213_p4 = scmp.lt.s32.totalorder (!%p175_p3), %s551_s12, 1 }
   0x7   : > { %178 = sbr.rel (%p175_p3) target bundleno = 59 (0x3b), region = 32 }
   0xc   : > { %s656_s12 = smov (!%p213_p4, %s551_s12), 1  ;;  %v266_v8 = vlaneseq  ;;  %vm349_vm0 = vcmask 125952  }
   0xd   : > { %s224_s18 = scalar_lea.vmem %s648_s1, %s656_s12  ;;  %s227_s21 = scalar_lea.vmem %s649_s2, %s656_s12 }
   0xe   : > { %v238_v0 = vld [vmem:[%s224_s18] sm:$0x1]  ;;  %s482_s22 = sshll.u32 %s656_s12, 5  ;;  %v267_v9 = vshrl.u32 %v266_v8, 7 }
   0xf   : > { %v239_v1 = vmul.f32 0.015625, %v238_v0  ;;  %v240_v2 = vld [vmem:[%s227_s21] sm:$0x1]  ;;  %s220_s25 = scalar_lea.vmem %s647_s0, %s482_s22  ;;  %s620_s28 = scalar_lea.vmem %s650_s3, %s482_s22 }
  0x10   : > { %v241_v3 = vmul.f32 0.015625, %v240_v2  ;;  %v493_v10 = vld [vmem:[%s220_s25] sm:$0xff]   ;;  %v508_v11 = vld [vmem:[%s220_s25 + $0x8] sm:$0xff]   ;;  %v268_v13 = vsub.s32 0, %v267_v9  ;;  %v509_v14 = vld [vmem:[%s220_s25 + $0x10] sm:$0xff]  }
  0x11   : > { %v242_v4 = vmul.f32 %v239_v1, %v239_v1  ;;  %v247_v12 = vsub.f32 0.0, %v239_v1  ;;  %v510_v15 = vld [vmem:[%s220_s25 + $0x18] sm:$0xff]   ;;  %v494_v16 = vunpack.c.l.bf16 %v493_v10  ;;  %v495_v17 = vunpack.c.h.bf16 %v493_v10 }
  0x12   : > { %v498_v18 = vunpack.c.l.bf16 %v508_v11  ;;  %v499_v20 = vunpack.c.h.bf16 %v508_v11  ;;  %v502_v21 = vunpack.c.l.bf16 %v509_v14  ;;  %v503_v22 = vunpack.c.h.bf16 %v509_v14 }
  0x13   : > { %v243_v5 = vsub.f32 %v241_v3, %v242_v4  ;;  %v506_v23 = vunpack.c.l.bf16 %v510_v15  ;;  %v507_v26 = vunpack.c.h.bf16 %v510_v15 }
  0x15   : > { %v244_v6 = vmax.f32 %v243_v5, 0.0 }
  0x17   : > { %v245_v7 = vadd.f32 1e-05, %v244_v6 }
  0x19   : > { %535 = vrsqrt.f32 %v245_v7 }
  0x26   : > { %v536_v19 = vpop.eup %535 }
  0x27   : > { %v248_v24 = vmul.f32 %v536_v19, %v247_v12  ;;  %v269_v25 = vrot.slane %v536_v19, %v268_v13 }
  0x29   : > { %v271_v27 = vmul.f32 %v494_v16, %v269_v25  ;;  %v283_v28 = vrot.slane %v248_v24, %v268_v13  ;;  %v272_v29 = vmul.f32 %v495_v17, %v269_v25  ;;  %v273_v30 = vmul.f32 %v498_v18, %v269_v25 }
  0x2a   : > { %v274_v31 = vmul.f32 %v499_v20, %v269_v25  ;;  %v275_v32 = vmul.f32 %v502_v21, %v269_v25  ;;  %v276_v33 = vmul.f32 %v503_v22, %v269_v25  ;;  %v277_v34 = vmul.f32 %v506_v23, %v269_v25 }
  0x2b   : > { %v285_v35 = vadd.f32 %v283_v28, %v271_v27  ;;  %v286_v36 = vadd.f32 %v283_v28, %v272_v29  ;;  %v287_v37 = vadd.f32 %v283_v28, %v273_v30  ;;  %v278_v38 = vmul.f32 %v507_v26, %v269_v25 }
  0x2c   : > { %v288_v39 = vadd.f32 %v283_v28, %v274_v31  ;;  %v289_v40 = vadd.f32 %v283_v28, %v275_v32  ;;  %v290_v41 = vadd.f32 %v283_v28, %v276_v33  ;;  %v291_v42 = vadd.f32 %v283_v28, %v277_v34 }
  0x2d   : > { %vm293_vm1 = vcmp.ge.f32.partialorder %v285_v35, 0.0  ;;  %v301_v43 = vmul.f32 0.2, %v285_v35  ;;  %vm294_vm2 = vcmp.ge.f32.partialorder %v286_v36, 0.0  ;;  %v302_v44 = vmul.f32 0.2, %v286_v36 }
  0x2e   : > { %vm295_vm3 = vcmp.ge.f32.partialorder %v287_v37, 0.0  ;;  %v303_v45 = vmul.f32 0.2, %v287_v37  ;;  %vm296_vm4 = vcmp.ge.f32.partialorder %v288_v39, 0.0  ;;  %v304_v46 = vmul.f32 0.2, %v288_v39 }
  0x2f   : > { %v309_v47 = vsel %vm293_vm1, %v285_v35, %v301_v43  ;;  %v310_v48 = vsel %vm294_vm2, %v286_v36, %v302_v44  ;;  %vm297_vm5 = vcmp.ge.f32.partialorder %v289_v40, 0.0  ;;  %v305_v49 = vmul.f32 0.2, %v289_v40 }
  0x30   : > { %v484_v50 = vpack.c.bf16 %v309_v47, %v309_v47  ;;  %v485_v51 = vpack.c.bf16 %v310_v48, %v310_v48  ;;  %v311_v52 = vsel %vm295_vm3, %v287_v37, %v303_v45  ;;  %v312_v53 = vsel %vm296_vm4, %v288_v39, %v304_v46 }
  0x31   : > { %v486_v54 = vpack.c.bf16 %v311_v52, %v311_v52  ;;  %v487_v55 = vpack.c.bf16 %v312_v53, %v312_v53  ;;  %v313_v56 = vsel %vm297_vm5, %v289_v40, %v305_v49  ;;  %vm298_vm6 = vcmp.ge.f32.partialorder %v290_v41, 0.0 }
  0x32   : > { %350 = vst.msk [vmem:[%s620_s28] sm:$0xf] %vm349_vm0, %v484_v50  ;;  %351 = vst.msk [vmem:[%s620_s28 + $0x4] sm:$0xf] %vm349_vm0, %v485_v51  ;;  %v488_v57 = vpack.c.bf16 %v313_v56, %v313_v56  ;;  %v306_v58 = vmul.f32 0.2, %v290_v41  ;;  %v292_v60 = vadd.f32 %v283_v28, %v278_v38 }
  0x33   : > { %vm299_vm7 = vcmp.ge.f32.partialorder %v291_v42, 0.0  ;;  %v307_v59 = vmul.f32 0.2, %v291_v42  ;;  %352 = vst.msk [vmem:[%s620_s28 + $0x8] sm:$0xf] %vm349_vm0, %v486_v54 }
  0x34   : > { %353 = vst.msk [vmem:[%s620_s28 + $0xc] sm:$0xf] %vm349_vm0, %v487_v55  ;;  %354 = vst.msk [vmem:[%s620_s28 + $0x10] sm:$0xf] %vm349_vm0, %v488_v57  ;;  %v314_v61 = vsel %vm298_vm6, %v290_v41, %v306_v58  ;;  %vm300_vm8 = vcmp.ge.f32.partialorder %v292_v60, 0.0 }
  0x35   : > { %v315_v62 = vsel %vm299_vm7, %v291_v42, %v307_v59  ;;  %v489_v63 = vpack.c.bf16 %v314_v61, %v314_v61  ;;  %v308_v1 = vmul.f32 0.2, %v292_v60 }
  0x36   : > { %v490_v0 = vpack.c.bf16 %v315_v62, %v315_v62 }
  0x37   : > { %355 = vst.msk [vmem:[%s620_s28 + $0x14] sm:$0xf] %vm349_vm0, %v489_v63  ;;  %v316_v2 = vsel %vm300_vm8, %v292_v60, %v308_v1 }
  0x38   : > { %356 = vst.msk [vmem:[%s620_s28 + $0x18] sm:$0xf] %vm349_vm0, %v490_v0  ;;  %v491_v3 = vpack.c.bf16 %v316_v2, %v316_v2 }
  0x3a   : > { %357 = vst.msk [vmem:[%s620_s28 + $0x1c] sm:$0xf] %vm349_vm0, %v491_v3 }
  0x3b PF: > { %s13_s14 = sadd.s32 1, %s559_s14   ;;  %s651_s12 = smov %s555_s13 }
  0x3c   : > { %p10_p5 = scmp.ge.s32.totalorder %s13_s14, 4   ;;  %s652_s13 = smov %s654_s15 }
  0x3e   :  { %12 = sbr.rel (!%p10_p5) target bundleno = 2 (0x2), region = 68 }

// kernel: cyclegan_discriminator.9
= control target key start
LH: loop header
LB: loop body
LE: loop exit
PB: predicated region body
PF: predicated region fallthrough
CT: control target
= control target key end

     0   :  { %s1602_s18 = smov 0   ;;  %s1604_s19 = smov 0   ;;  %s1860_s0 = inlined_call_operand.vmem [shape: bf16[2,9,9,32], index: 0, kind: input, shape index: {}]   ;;  %s1861_s1 = inlined_call_operand.vmem [shape: bf16[4,32,16], index: 1, kind: input, shape index: {}]   ;;  %s1862_s2 = inlined_call_operand.vmem [shape: f32[1,16], index: 2, kind: input, shape index: {}]   ;;  %s1863_s3 = inlined_call_operand.vmem [shape: bf16[2,64,16], index: 3, kind: output, shape index: {0}]   ;;  %s1864_s4 = inlined_call_operand.vmem [shape: f32[2,1,16], index: 4, kind: output, shape index: {1}]   ;;  %s1865_s5 = inlined_call_operand.vmem [shape: f32[2,1,16], index: 5, kind: output, shape index: {2}]  }
   0x1   :  { %s1606_s20 = smov 0  }
   0x2 LB: > { %s28_s21 = sadd.s32 1, %s1565_s19  ;;  %p1333_p0 = scmp.ge.s32.totalorder %s1569_s20, 1  ;;  %s1569_s20 = sphi %s1606_s20, %s16_s20   ;;  %s1565_s19 = sphi %s1604_s19, %s1869_s19   ;;  %s1561_s18 = sphi %s1602_s18, %s1868_s18  }
   0x3   : > { %p30_p1 = scmp.ge.s32.totalorder %s28_s21, 2  ;;  %p210_p2 = scmp.lt.s32.totalorder %s1569_s20, 3 }
   0x5   : > { %s1871_s21 = smov (%p30_p1, %s28_s21), 0  ;;  %p211_p3 = pnand %p1333_p0, %p210_p2 }
   0x6   : > { %p250_p4 = scmp.lt.s32.totalorder (!%p211_p3), %s1561_s18, 1 }
   0x7   : > { %214 = sbr.rel (%p211_p3) target bundleno = 300 (0x12c), region = 32 }
   0xc   : > { %v1531_v0 = vld [vmem:[%s1861_s1 + $0x8] sm:$0xff]   ;;  %v1532_v1 = vld [vmem:[%s1861_s1] sm:$0xff]   ;;  %s1873_s18 = smov (!%p250_p4, %s1561_s18), 1  ;;  %v1535_v2 = vld [vmem:[%s1861_s1 + $0x18] sm:$0xff]   ;;  %vm317_vm0 = vcmask 261120   ;;  %vm1138_vm4 = vcmask 122880  }
   0xd   : > { %1457 = vmatprep.subr.bf16.mxu0 %v1531_v0  ;;  %v1536_v3 = vld [vmem:[%s1861_s1 + $0x28] sm:$0xff]   ;;  %s1505_s30 = smul.u32 72, %s1873_s18  ;;  %1469 = vmatprep.subr.bf16.mxu1 %v1535_v2  ;;  %v1537_v4 = vld [vmem:[%s1861_s1 + $0x10] sm:$0xff]   ;;  %vm420_vm1 = vsmask.f32 3328  ;;  %v1540_v5 = vld [vmem:[%s1861_s1 + $0x20] sm:$0xff]   ;;  %s1750_s23 = scalar_lea.vmem %s1864_s4, %s1873_s18 }
   0xe   : > { %1458 = vmatpush3.bf16.msra.mxu0 %v1531_v0  ;;  %1470 = vmatpush3.bf16.msra.mxu1 %v1535_v2  ;;  %vm421_vm2 = vsmask.f32 7440  ;;  %v1541_v36 = vld [vmem:[%s1861_s1 + $0x38] sm:$0xff]   ;;  %s1756_s26 = scalar_lea.vmem %s1865_s5, %s1873_s18  ;;  %vm395_vm5 = vcmask 130048   ;;  %s1424_s29 = sshll.u32 %s1873_s18, 5  ;;  %vm1125_vm6 = vcmask 125952  }
   0xf   : > { %1459 = vmatprep.subr.bf16.mxu0 %v1532_v1  ;;  %s1641_s10 = scalar_lea.vmem %s1860_s0, %s1505_s30  ;;  %1471 = vmatprep.subr.bf16.mxu1 %v1537_v4  ;;  %vm1666_vm3 = vmor %vm420_vm1, %vm421_vm2  ;;  %s1800_s7 = scalar_lea.vmem %s1863_s3, %s1424_s29 }
  0x10   : > { %v1533_v6 = vld [vmem:[%s1641_s10] ss:$8 sps:$4 sm:$0xff]   ;;  %v1534_v7 = vld [vmem:[%s1641_s10 + $0x10] ss:$8 sps:$4 sm:$0xff]   ;;  %v405_v10 = vld [vmem:[%s1641_s10 + $0x4] sm:$0x1] }
  0x11   : > { %1461 = vmatprep.mubr.msk.bf16.mxu0 %vm317_vm0, %v1533_v6  ;;  %v1538_v8 = vld [vmem:[%s1641_s10 + $0x20] ss:$8 sps:$4 sm:$0xff]   ;;  %v1539_v12 = vld [vmem:[%s1641_s10 + $0x30] ss:$8 sps:$4 sm:$0xff]   ;;  %v407_v13 = vld [vmem:[%s1641_s10 + $0xc] sm:$0x1] }
  0x12   : > { %1460 = vmatpush3.bf16.msra.mxu0 %v1532_v1  ;;  %1472 = vmatpush3.bf16.msra.mxu1 %v1537_v4  ;;  %v404_v9 = vld [vmem:[%s1641_s10] sm:$0xf]  ;;  %v406_v11 = vld [vmem:[%s1641_s10 + $0x8] sm:$0xf]  ;;  %v433_v16 = vshll.u32 %v405_v10, 16  ;;  %v447_v19 = vshll.u32 %v407_v13, 16 }
  0x13   : > { %1481 = vmatprep.subr.bf16.mxu0 %v1536_v3  ;;  %v424_v14 = vshrl.u32 %v404_v9, 16  ;;  %v427_v15 = vshll.u32 %v404_v9, 16  ;;  %v438_v17 = vshrl.u32 %v406_v11, 16  ;;  %v441_v18 = vshll.u32 %v406_v11, 16  ;;  %v408_v20 = vld [vmem:[%s1641_s10 + $0x10] sm:$0xf]  ;;  %1493 = vmatprep.subr.bf16.mxu1 %v1541_v36 }
  0x14   : > { %v409_v21 = vld [vmem:[%s1641_s10 + $0x14] sm:$0x1]  ;;  %v435_v24 = vrot.slane %v433_v16, 5  ;;  %v410_v26 = vld [vmem:[%s1641_s10 + $0x18] sm:$0xf]  ;;  %v449_v28 = vrot.slane %v447_v19, 5 }
  0x15   : > { %1462 = vmatmul.mubr.msk.bf16.vlgmr.msra.gmra.mxu0 %vm317_vm0, %v1534_v7  ;;  %v426_v22 = vrot.slane %v424_v14, 4  ;;  %v429_v23 = vrot.slane %v427_v15, 5  ;;  %v440_v25 = vrot.slane %v438_v17, 4  ;;  %v443_v27 = vrot.slane %v441_v18, 5  ;;  %v411_v29 = vld [vmem:[%s1641_s10 + $0x1c] sm:$0x1] }
  0x16   : > { %1482 = vmatpush3.bf16.msra.mxu0 %v1536_v3  ;;  %1465 = vmatprep.mubr.msk.bf16.mxu0 %vm317_vm0, %v1538_v8  ;;  %v452_v30 = vshrl.u32 %v408_v20, 16  ;;  %v455_v31 = vshll.u32 %v408_v20, 16  ;;  %v461_v33 = vshll.u32 %v409_v21, 16  ;;  %v466_v34 = vshrl.u32 %v410_v26, 16  ;;  %v1542_v49 = vld [vmem:[%s1641_s10 + $0x8] ss:$8 sps:$4 sm:$0xff]  }
  0x17   : > { %1483 = vmatprep.subr.bf16.mxu0 %v1540_v5  ;;  %v430_v32 = vor.u32 %v429_v23, %v426_v22  ;;  %v469_v35 = vshll.u32 %v410_v26, 16  ;;  %v444_v38 = vor.u32 %v443_v27, %v440_v25  ;;  %v475_v41 = vshll.u32 %v411_v29, 16  ;;  %v412_v52 = vld [vmem:[%s1641_s10 + $0x20] sm:$0xf]  ;;  %v413_v53 = vld [vmem:[%s1641_s10 + $0x24] sm:$0x1] }
  0x18   : > { %v454_v39 = vrot.slane %v452_v30, 4  ;;  %v457_v40 = vrot.slane %v455_v31, 5  ;;  %v463_v43 = vrot.slane %v461_v33, 5  ;;  %v468_v44 = vrot.slane %v466_v34, 4  ;;  %v414_v54 = vld [vmem:[%s1641_s10 + $0x28] sm:$0xf] }
  0x19   : > { %v431_v42 = vrot.slane %v430_v32, 4  ;;  %v471_v45 = vrot.slane %v469_v35, 5  ;;  %v445_v46 = vrot.slane %v444_v38, 4  ;;  %v477_v48 = vrot.slane %v475_v41, 5  ;;  %v415_v57 = vld [vmem:[%s1641_s10 + $0x2c] sm:$0x1] }
  0x1a   : > { %1484 = vmatpush3.bf16.msra.mxu0 %v1540_v5  ;;  %v458_v47 = vor.u32 %v457_v40, %v454_v39  ;;  %v480_v58 = vshrl.u32 %v412_v52, 16  ;;  %v483_v59 = vshll.u32 %v412_v52, 16  ;;  %v489_v62 = vshll.u32 %v413_v53, 16  ;;  %v1543_v7 = vld [vmem:[%s1641_s10 + $0x18] ss:$8 sps:$4 sm:$0xff]   ;;  %v1544_v8 = vld [vmem:[%s1861_s1 + $0x30] sm:$0xff]  }
  0x1b   : > { %v436_v50 = vsel %vm1666_vm3, %v431_v42, %v435_v24  ;;  %v472_v51 = vor.u32 %v471_v45, %v468_v44  ;;  %v450_v55 = vsel %vm1666_vm3, %v445_v46, %v449_v28  ;;  %v494_v63 = vshrl.u32 %v414_v54, 16  ;;  %v416_v13 = vld [vmem:[%s1641_s10 + $0x30] sm:$0xf]  ;;  %v417_v14 = vld [vmem:[%s1641_s10 + $0x34] sm:$0x1] }
  0x1c   : > { %v459_v56 = vrot.slane %v458_v47, 4  ;;  %v1351_v60 = vcombine.low %v436_v50, %v450_v55  ;;  %v482_v1 = vrot.slane %v480_v58, 4  ;;  %v485_v2 = vrot.slane %v483_v59, 5  ;;  %v418_v16 = vld [vmem:[%s1641_s10 + $0x38] sm:$0xf] }
  0x1d   : > { %1466 = vmatmul.mubr.msk.bf16.gmra.mxu0 %vm317_vm0, %v1539_v12  ;;  %v473_v61 = vrot.slane %v472_v51, 4  ;;  %v497_v3 = vshll.u32 %v414_v54, 16  ;;  %v496_v5 = vrot.slane %v494_v63, 4  ;;  %v503_v6 = vshll.u32 %v415_v57, 16  ;;  %v419_v17 = vld [vmem:[%s1641_s10 + $0x3c] sm:$0x1] }
  0x1e   : > { %1485 = vmatprep.mubr.msk.bf16.mxu0 %vm317_vm0, %v1542_v49  ;;  %v464_v0 = vsel %vm1666_vm3, %v459_v56, %v463_v43  ;;  %1473 = vmatprep.mubr.msk.bf16.mxu1 %vm317_vm0, %v1351_v60  ;;  %v486_v10 = vor.u32 %v485_v2, %v482_v1  ;;  %v491_v11 = vrot.slane %v489_v62, 5  ;;  %v508_v18 = vshrl.u32 %v416_v13, 16  ;;  %v1546_v40 = vld [vmem:[%s1641_s10 + $0x38] ss:$8 sps:$4 sm:$0xff]   ;;  %v1383_v41 = vld [vmem:[%s1641_s10 + $0x8] sm:$0xf] }
  0x1f   : > { %v478_v4 = vsel %vm1666_vm3, %v473_v61, %v477_v48  ;;  %v499_v12 = vrot.slane %v497_v3, 5  ;;  %v505_v15 = vrot.slane %v503_v6, 5  ;;  %v511_v21 = vshll.u32 %v416_v13, 16  ;;  %v1384_v42 = vld [vmem:[%s1641_s10 + $0xc] sm:$0x1] }
  0x20   : > { %v1352_v9 = vcombine.low %v464_v0, %v478_v4  ;;  %v487_v19 = vrot.slane %v486_v10, 4  ;;  %v517_v22 = vshll.u32 %v417_v14, 16  ;;  %v510_v23 = vrot.slane %v508_v18, 4  ;;  %v1385_v44 = vld [vmem:[%s1641_s10 + $0x10] sm:$0xf] }
  0x21   : > { %v500_v20 = vor.u32 %v499_v12, %v496_v5  ;;  %v522_v24 = vshrl.u32 %v418_v16, 16  ;;  %v525_v25 = vshll.u32 %v418_v16, 16  ;;  %v531_v26 = vshll.u32 %v419_v17, 16  ;;  %v1386_v45 = vld [vmem:[%s1641_s10 + $0x14] sm:$0x1] }
  0x22   : > { %1474 = vmatmul.mubr.msk.bf16.vlgmr.msra.gmra.mxu1 %vm317_vm0, %v1352_v9  ;;  %v492_v27 = vsel %vm1666_vm3, %v487_v19, %v491_v11  ;;  %v513_v29 = vrot.slane %v511_v21, 5  ;;  %v519_v30 = vrot.slane %v517_v22, 5  ;;  %v829_v46 = vshrl.u32 %v1383_v41, 16  ;;  %v1387_v51 = vld [vmem:[%s1641_s10 + $0x18] sm:$0xf] }
  0x23   : > { %1494 = vmatpush3.bf16.msra.mxu1 %v1541_v36  ;;  %v501_v28 = vrot.slane %v500_v20, 4  ;;  %v524_v31 = vrot.slane %v522_v24, 4  ;;  %v527_v32 = vrot.slane %v525_v25, 5  ;;  %v533_v33 = vrot.slane %v531_v26, 5  ;;  %v1545_v36 = vld [vmem:[%s1641_s10 + $0x28] ss:$8 sps:$4 sm:$0xff]  }
  0x24   : > { %1495 = vmatprep.subr.bf16.mxu1 %v1544_v8  ;;  %v514_v35 = vor.u32 %v513_v29, %v510_v23  ;;  %v832_v48 = vshll.u32 %v1383_v41, 16  ;;  %v838_v49 = vshll.u32 %v1384_v42, 16  ;;  %v843_v50 = vshrl.u32 %v1385_v44, 16  ;;  %v1388_v56 = vld [vmem:[%s1641_s10 + $0x1c] sm:$0x1] }
  0x25   : > { %1486 = vmatmul.mubr.msk.bf16.vlgmr.msra.gmra.mxu0 %vm317_vm0, %v1543_v7  ;;  %v506_v34 = vsel %vm1666_vm3, %v501_v28, %v505_v15  ;;  %v528_v39 = vor.u32 %v527_v32, %v524_v31  ;;  %v831_v53 = vrot.slane %v829_v46, 4  ;;  %v846_v54 = vshll.u32 %v1385_v44, 16  ;;  %v1389_v61 = vld [vmem:[%s1641_s10 + $0x20] sm:$0xf]  ;;  %v1390_v1 = vld [vmem:[%s1641_s10 + $0x24] sm:$0x1] }
  0x26   : > { %v1353_v38 = vcombine.low %v492_v27, %v506_v34  ;;  %v515_v43 = vrot.slane %v514_v35, 4  ;;  %1489 = vmatprep.mubr.msk.bf16.mxu0 %vm317_vm0, %v1545_v36  ;;  %v852_v55 = vshll.u32 %v1386_v45, 16  ;;  %v834_v58 = vrot.slane %v832_v48, 5  ;;  %v1391_v7 = vld [vmem:[%s1641_s10 + $0x28] sm:$0xf] }
  0x27   : > { %1496 = vmatpush3.bf16.msra.mxu1 %v1544_v8  ;;  %v529_v47 = vrot.slane %v528_v39, 4  ;;  %v840_v59 = vrot.slane %v838_v49, 5  ;;  %v845_v60 = vrot.slane %v843_v50, 4  ;;  %v848_v63 = vrot.slane %v846_v54, 5  ;;  %v1392_v12 = vld [vmem:[%s1641_s10 + $0x2c] sm:$0x1] }
  0x28   : > { %1477 = vmatprep.mubr.msk.bf16.mxu1 %vm317_vm0, %v1353_v38  ;;  %v520_v52 = vsel %vm1666_vm3, %v515_v43, %v519_v30  ;;  %v854_v0 = vrot.slane %v852_v55, 5  ;;  %v857_v2 = vshrl.u32 %v1387_v51, 16  ;;  %v835_v3 = vor.u32 %v834_v58, %v831_v53  ;;  %v1393_v17 = vld [vmem:[%s1641_s10 + $0x30] sm:$0xf]  ;;  %v1394_v24 = vld [vmem:[%s1641_s10 + $0x34] sm:$0x1] }
  0x29   : > { %v534_v57 = vsel %vm1666_vm3, %v529_v47, %v533_v33  ;;  %v860_v4 = vshll.u32 %v1387_v51, 16  ;;  %v866_v5 = vshll.u32 %v1388_v56, 16  ;;  %v871_v6 = vshrl.u32 %v1389_v61, 16  ;;  %v1395_v31 = vld [vmem:[%s1641_s10 + $0x38] sm:$0xf] }
  0x2a   : > { %v1354_v62 = vcombine.low %v520_v52, %v534_v57  ;;  %v849_v8 = vor.u32 %v848_v63, %v845_v60  ;;  %v859_v9 = vrot.slane %v857_v2, 4  ;;  %v874_v10 = vshll.u32 %v1389_v61, 16  ;;  %v1396_v35 = vld [vmem:[%s1641_s10 + $0x3c] sm:$0x1]  ;;  %v1397_v43 = vld [vmem:[%s1641_s10 + $0x40] sm:$0xf] }
  0x2b   : > { %v880_v11 = vshll.u32 %v1390_v1, 16  ;;  %v836_v13 = vrot.slane %v835_v3, 4  ;;  %v862_v14 = vrot.slane %v860_v4, 5  ;;  %v868_v15 = vrot.slane %v866_v5, 5  ;;  %v1398_v49 = vld [vmem:[%s1641_s10 + $0x44] sm:$0x1] }
  0x2c   : > { %1478 = vmatmul.mubr.msk.bf16.gmra.mxu1 %vm317_vm0, %v1354_v62  ;;  %v873_v16 = vrot.slane %v871_v6, 4  ;;  %v850_v18 = vrot.slane %v849_v8, 4  ;;  %v876_v19 = vrot.slane %v874_v10, 5  ;;  %v885_v21 = vshrl.u32 %v1391_v7, 16 }
  0x2d   : > { %1490 = vmatmul.mubr.msk.bf16.gmra.mxu0 %vm317_vm0, %v1546_v40  ;;  %v882_v20 = vrot.slane %v880_v11, 5  ;;  %v841_v22 = vsel %vm1666_vm3, %v836_v13, %v840_v59  ;;  %v863_v23 = vor.u32 %v862_v14, %v859_v9  ;;  %v888_v25 = vshll.u32 %v1391_v7, 16 }
  0x2e   : > { %v894_v26 = vshll.u32 %v1392_v12, 16  ;;  %v855_v27 = vsel %vm1666_vm3, %v850_v18, %v854_v0  ;;  %v877_v28 = vor.u32 %v876_v19, %v873_v16  ;;  %v887_v29 = vrot.slane %v885_v21, 4 }
  0x2f   : > { %v899_v30 = vshrl.u32 %v1393_v17, 16  ;;  %v1403_v32 = vcombine.low %v841_v22, %v855_v27  ;;  %v864_v33 = vrot.slane %v863_v23, 4  ;;  %v890_v34 = vrot.slane %v888_v25, 5 }
  0x30   : > { %v878_v36 = vrot.slane %v877_v28, 4  ;;  %v902_v39 = vshll.u32 %v1393_v17, 16  ;;  %v908_v40 = vshll.u32 %v1394_v24, 16  ;;  %v913_v44 = vshrl.u32 %v1395_v31, 16 }
  0x31   : > { %v901_v38 = vrot.slane %v899_v30, 4  ;;  %1497 = vmatprep.mubr.msk.bf16.mxu1 %vm317_vm0, %v1403_v32  ;;  %v869_v41 = vsel %vm1666_vm3, %v864_v33, %v868_v15  ;;  %v891_v42 = vor.u32 %v890_v34, %v887_v29  ;;  %v916_v45 = vshll.u32 %v1395_v31, 16 }
  0x32   : > { %v883_v46 = vsel %vm1666_vm3, %v878_v36, %v882_v20  ;;  %v896_v47 = vrot.slane %v894_v26, 5  ;;  %v904_v48 = vrot.slane %v902_v39, 5  ;;  %v922_v50 = vshll.u32 %v1396_v35, 16 }
  0x33   : > { %v1404_v51 = vcombine.low %v869_v41, %v883_v46  ;;  %v892_v52 = vrot.slane %v891_v42, 4  ;;  %v915_v53 = vrot.slane %v913_v44, 4  ;;  %v918_v54 = vrot.slane %v916_v45, 5 }
  0x34   : > { %v905_v55 = vor.u32 %v904_v48, %v901_v38  ;;  %v910_v56 = vrot.slane %v908_v40, 5  ;;  %v927_v57 = vshrl.u32 %v1397_v43, 16  ;;  %v930_v58 = vshll.u32 %v1397_v43, 16 }
  0x35   : > { %1498 = vmatmul.mubr.msk.bf16.vlgmr.msra.gmra.mxu1 %vm317_vm0, %v1404_v51  ;;  %v919_v59 = vor.u32 %v918_v54, %v915_v53  ;;  %v924_v60 = vrot.slane %v922_v50, 5  ;;  %v936_v61 = vshll.u32 %v1398_v49, 16  ;;  %v897_v62 = vsel %vm1666_vm3, %v892_v52, %v896_v47 }
  0x36   : > { %v906_v63 = vrot.slane %v905_v55, 4  ;;  %v929_v0 = vrot.slane %v927_v57, 4  ;;  %v932_v1 = vrot.slane %v930_v58, 5  ;;  %v1571_v11 = vmov 0.0  }
  0x37   : > { %v920_v2 = vrot.slane %v919_v59, 4  ;;  %v938_v5 = vrot.slane %v936_v61, 5  ;;  %1139 = vst.msk [vmem:[%s1750_s23] sm:$0x1] %vm1138_vm4, %v1571_v11  ;;  %1140 = vst.msk [vmem:[%s1756_s26] sm:$0x1] %vm1138_vm4, %v1571_v11 }
  0x38   : > { %v911_v3 = vsel %vm1666_vm3, %v906_v63, %v910_v56  ;;  %v933_v4 = vor.u32 %v932_v1, %v929_v0 }
  0x39   : > { %v1405_v6 = vcombine.low %v897_v62, %v911_v3  ;;  %v925_v7 = vsel %vm1666_vm3, %v920_v2, %v924_v60 }
  0x3a   : > { %v934_v8 = vrot.slane %v933_v4, 4 }
  0x3b   : > { %1501 = vmatprep.mubr.msk.bf16.mxu1 %vm317_vm0, %v1405_v6 }
  0x3c   : > { %v939_v9 = vsel %vm1666_vm3, %v934_v8, %v938_v5 }
  0x3d   : > { %v1406_v10 = vcombine.low %v925_v7, %v939_v9 }
  0x3f   : > { %1502 = vmatmul.mubr.msk.bf16.gmra.mxu1 %vm317_vm0, %v1406_v10 }
  0xd5   : > { %v1463_v37 = vpop.f32.mrf.mxu0 }
  0xd6   : > { %398 = vst.msk [vmem:[#allocation2 + $0x10] sm:$0xff] %vm395_vm5, %v1463_v37 }
  0xd7   : > { %v364_v12 = vpop.f32.mrf.mxu0 }
  0xd8   : > { %396 = vst.msk [vmem:[#allocation2] sm:$0xff] %vm395_vm5, %v364_v12 }
  0xd9   : > { %v1464_v13 = vpop.f32.mrf.mxu0 }
  0xda   : > { %399 = vst.msk [vmem:[#allocation2 + $0x18] sm:$0xff] %vm395_vm5, %v1464_v13 }
  0xdb   : > { %v367_v14 = vpop.f32.mrf.mxu0 }
  0xdc   : > { %397 = vst.msk [vmem:[#allocation2 + $0x8] sm:$0xff] %vm395_vm5, %v367_v14 }
  0xdd   : > { %v1467_v15 = vpop.f32.mrf.mxu0  ;;  %v643_v19 = vld [vmem:[#allocation2 + $0x10] sm:$0xff] }
  0xde   : > { %402 = vst.msk [vmem:[#allocation2 + $0x30] sm:$0xff] %vm395_vm5, %v1467_v15  ;;  %v1791_v15 = vld [vmem:[%s1862_s2] ss:$0 sm:$0xff] }
  0xdf   : > { %v380_v16 = vpop.f32.mrf.mxu0  ;;  %v641_v24 = vld [vmem:[#allocation2] sm:$0xff] }
  0xe0   : > { %400 = vst.msk [vmem:[#allocation2 + $0x20] sm:$0xff] %vm395_vm5, %v380_v16 }
  0xe1   : > { %v1468_v17 = vpop.f32.mrf.mxu0  ;;  %v644_v27 = vld [vmem:[#allocation2 + $0x18] sm:$0xff] }
  0xe2   : > { %403 = vst.msk [vmem:[#allocation2 + $0x38] sm:$0xff] %vm395_vm5, %v1468_v17  ;;  %v1475_v20 = vpop.f32.mrf.mxu1 }
  0xe3   : > { %v383_v18 = vpop.f32.mrf.mxu0  ;;  %v651_v22 = vadd.f32 %v1475_v20, %v643_v19  ;;  %v642_v31 = vld [vmem:[#allocation2 + $0x8] sm:$0xff] }
  0xe4   : > { %401 = vst.msk [vmem:[#allocation2 + $0x28] sm:$0xff] %vm395_vm5, %v383_v18  ;;  %v610_v23 = vpop.f32.mrf.mxu1 }
  0xe5   : > { %v1487_v21 = vpop.f32.mrf.mxu0  ;;  %659 = vst.msk [vmem:[#allocation2 + $0x10] sm:$0xff] %vm395_vm5, %v651_v22  ;;  %v649_v25 = vadd.f32 %v641_v24, %v610_v23  ;;  %v647_v35 = vld [vmem:[#allocation2 + $0x30] sm:$0xff] }
  0xe6   : > { %v1476_v26 = vpop.f32.mrf.mxu1 }
  0xe7   : > { %v757_v28 = vpop.f32.mrf.mxu0  ;;  %657 = vst.msk [vmem:[#allocation2] sm:$0xff] %vm395_vm5, %v649_v25  ;;  %v652_v29 = vadd.f32 %v1476_v26, %v644_v27  ;;  %v645_v44 = vld [vmem:[#allocation2 + $0x20] sm:$0xff] }
  0xe8   : > { %v613_v30 = vpop.f32.mrf.mxu1 }
  0xe9   : > { %660 = vst.msk [vmem:[#allocation2 + $0x18] sm:$0xff] %vm395_vm5, %v652_v29  ;;  %v650_v32 = vadd.f32 %v642_v31, %v613_v30  ;;  %v1488_v33 = vpop.f32.mrf.mxu0  ;;  %v648_v49 = vld [vmem:[#allocation2 + $0x38] sm:$0xff] }
  0xeb   : > { %658 = vst.msk [vmem:[#allocation2 + $0x8] sm:$0xff] %vm395_vm5, %v650_v32  ;;  %v760_v40 = vpop.f32.mrf.mxu0  ;;  %v646_v55 = vld [vmem:[#allocation2 + $0x28] sm:$0xff] }
  0xec   : > { %v790_v34 = vld [vmem:[#allocation2 + $0x10] sm:$0xff]  ;;  %v1479_v38 = vpop.f32.mrf.mxu1 }
  0xed   : > { %v798_v36 = vadd.f32 %v1487_v21, %v790_v34  ;;  %v655_v41 = vadd.f32 %v1479_v38, %v647_v35  ;;  %v1491_v51 = vpop.f32.mrf.mxu0 }
  0xee   : > { %v788_v39 = vld [vmem:[#allocation2] sm:$0xff]  ;;  %v626_v43 = vpop.f32.mrf.mxu1 }
  0xef   : > { %806 = vst.msk [vmem:[#allocation2 + $0x10] sm:$0xff] %vm395_vm5, %v798_v36  ;;  %v796_v42 = vadd.f32 %v788_v39, %v757_v28  ;;  %663 = vst.msk [vmem:[#allocation2 + $0x30] sm:$0xff] %vm395_vm5, %v655_v41  ;;  %v653_v46 = vadd.f32 %v645_v44, %v626_v43  ;;  %v773_v57 = vpop.f32.mrf.mxu0 }
  0xf0   : > { %v791_v45 = vld [vmem:[#allocation2 + $0x18] sm:$0xff]  ;;  %v1480_v48 = vpop.f32.mrf.mxu1 }
  0xf1   : > { %804 = vst.msk [vmem:[#allocation2] sm:$0xff] %vm395_vm5, %v796_v42  ;;  %v799_v47 = vadd.f32 %v1488_v33, %v791_v45  ;;  %661 = vst.msk [vmem:[#allocation2 + $0x20] sm:$0xff] %vm395_vm5, %v653_v46  ;;  %v656_v52 = vadd.f32 %v1480_v48, %v648_v49  ;;  %v1492_v1 = vpop.f32.mrf.mxu0 }
  0xf2   : > { %v789_v50 = vld [vmem:[#allocation2 + $0x8] sm:$0xff]  ;;  %v629_v54 = vpop.f32.mrf.mxu1 }
  0xf3   : > { %807 = vst.msk [vmem:[#allocation2 + $0x18] sm:$0xff] %vm395_vm5, %v799_v47  ;;  %v797_v53 = vadd.f32 %v789_v50, %v760_v40  ;;  %664 = vst.msk [vmem:[#allocation2 + $0x38] sm:$0xff] %vm395_vm5, %v656_v52  ;;  %v654_v56 = vadd.f32 %v646_v55, %v629_v54  ;;  %v776_v11 = vpop.f32.mrf.mxu0 }
  0xf5   : > { %805 = vst.msk [vmem:[#allocation2 + $0x8] sm:$0xff] %vm395_vm5, %v797_v53  ;;  %662 = vst.msk [vmem:[#allocation2 + $0x28] sm:$0xff] %vm395_vm5, %v654_v56  ;;  %v1499_v61 = vpop.f32.mrf.mxu1 }
  0xf6   : > { %v1048_v58 = vld [vmem:[#allocation2 + $0x10] sm:$0xff] }
  0xf7   : > { %v794_v59 = vld [vmem:[#allocation2 + $0x30] sm:$0xff]  ;;  %v1056_v63 = vadd.f32 %v1499_v61, %v1048_v58  ;;  %v1015_v3 = vpop.f32.mrf.mxu1 }
  0xf8   : > { %v802_v60 = vadd.f32 %v1491_v51, %v794_v59  ;;  %v1046_v62 = vld [vmem:[#allocation2] sm:$0xff] }
  0xf9   : > { %v792_v0 = vld [vmem:[#allocation2 + $0x20] sm:$0xff]  ;;  %1064 = vst.msk [vmem:[#allocation2 + $0x10] sm:$0xff] %vm395_vm5, %v1056_v63  ;;  %v1054_v5 = vadd.f32 %v1046_v62, %v1015_v3  ;;  %v1500_v8 = vpop.f32.mrf.mxu1 }
  0xfa   : > { %810 = vst.msk [vmem:[#allocation2 + $0x30] sm:$0xff] %vm395_vm5, %v802_v60  ;;  %v800_v2 = vadd.f32 %v792_v0, %v773_v57  ;;  %v1049_v4 = vld [vmem:[#allocation2 + $0x18] sm:$0xff] }
  0xfb   : > { %v795_v6 = vld [vmem:[#allocation2 + $0x38] sm:$0xff]  ;;  %1062 = vst.msk [vmem:[#allocation2] sm:$0xff] %vm395_vm5, %v1054_v5  ;;  %v1057_v10 = vadd.f32 %v1500_v8, %v1049_v4  ;;  %v1018_v13 = vpop.f32.mrf.mxu1 }
  0xfc   : > { %808 = vst.msk [vmem:[#allocation2 + $0x20] sm:$0xff] %vm395_vm5, %v800_v2  ;;  %v803_v7 = vadd.f32 %v1492_v1, %v795_v6  ;;  %v1047_v9 = vld [vmem:[#allocation2 + $0x8] sm:$0xff] }
  0xfd   : > { %v793_v37 = vld [vmem:[#allocation2 + $0x28] sm:$0xff]  ;;  %1065 = vst.msk [vmem:[#allocation2 + $0x18] sm:$0xff] %vm395_vm5, %v1057_v10  ;;  %v1055_v14 = vadd.f32 %v1047_v9, %v1018_v13 }
  0xfe   : > { %811 = vst.msk [vmem:[#allocation2 + $0x38] sm:$0xff] %vm395_vm5, %v803_v7  ;;  %v801_v12 = vadd.f32 %v793_v37, %v776_v11 }
  0xff   : > { %1063 = vst.msk [vmem:[#allocation2 + $0x8] sm:$0xff] %vm395_vm5, %v1055_v14  ;;  %v1503_v18 = vpop.f32.mrf.mxu1 }
 0x100   : > { %809 = vst.msk [vmem:[#allocation2 + $0x28] sm:$0xff] %vm395_vm5, %v801_v12  ;;  %v1072_v17 = vld [vmem:[#allocation2 + $0x10] sm:$0xff] }
 0x101   : > { %v1052_v16 = vld [vmem:[#allocation2 + $0x30] sm:$0xff]  ;;  %v1087_v19 = vadd.f32 %v1791_v15, %v1072_v17  ;;  %v1031_v23 = vpop.f32.mrf.mxu1 }
 0x102   : > { %v1060_v20 = vadd.f32 %v1503_v18, %v1052_v16  ;;  %v1070_v22 = vld [vmem:[#allocation2] sm:$0xff] }
 0x103   : > { %v1050_v21 = vld [vmem:[#allocation2 + $0x20] sm:$0xff]  ;;  %v1427_v24 = vpack.c.bf16 %v1087_v19, %v1087_v19  ;;  %v1085_v25 = vadd.f32 %v1791_v15, %v1070_v22  ;;  %v1504_v29 = vpop.f32.mrf.mxu1  ;;  %v1169_v40 = vmul.f32 %v1087_v19, %v1087_v19  ;;  %v1145_v46 = vsel %vm395_vm5, %v1087_v19, 0.0 }
 0x104   : > { %1068 = vst.msk [vmem:[#allocation2 + $0x30] sm:$0xff] %vm395_vm5, %v1060_v20  ;;  %v1073_v27 = vld [vmem:[#allocation2 + $0x18] sm:$0xff]  ;;  %v1058_v28 = vadd.f32 %v1050_v21, %v1031_v23 }
 0x105   : > { %v1053_v26 = vld [vmem:[#allocation2 + $0x38] sm:$0xff]  ;;  %1128 = vst.msk [vmem:[%s1800_s7 + $0x8] sm:$0xf] %vm1125_vm6, %v1427_v24  ;;  %v1425_v30 = vpack.c.bf16 %v1085_v25, %v1085_v25  ;;  %v1088_v32 = vadd.f32 %v1791_v15, %v1073_v27  ;;  %v1034_v35 = vpop.f32.mrf.mxu1  ;;  %v1167_v36 = vmul.f32 %v1085_v25, %v1085_v25  ;;  %v1142_v42 = vsel %vm395_vm5, %v1085_v25, 0.0 }
 0x106   : > { %v1071_v33 = vld [vmem:[#allocation2 + $0x8] sm:$0xff]  ;;  %1066 = vst.msk [vmem:[#allocation2 + $0x20] sm:$0xff] %vm395_vm5, %v1058_v28  ;;  %v1061_v34 = vadd.f32 %v1504_v29, %v1053_v26  ;;  %v1178_v55 = vsel %vm395_vm5, %v1169_v40, 0.0 }
 0x107   : > { %v1051_v31 = vld [vmem:[#allocation2 + $0x28] sm:$0xff]  ;;  %1126 = vst.msk [vmem:[%s1800_s7] sm:$0xf] %vm1125_vm6, %v1425_v30  ;;  %v1086_v38 = vadd.f32 %v1791_v15, %v1071_v33  ;;  %v1428_v41 = vpack.c.bf16 %v1088_v32, %v1088_v32  ;;  %v1175_v49 = vsel %vm395_vm5, %v1167_v36, 0.0  ;;  %v1170_v50 = vmul.f32 %v1088_v32, %v1088_v32 }
 0x108   : > { %v1059_v39 = vadd.f32 %v1051_v31, %v1034_v35  ;;  %1069 = vst.msk [vmem:[#allocation2 + $0x38] sm:$0xff] %vm395_vm5, %v1061_v34  ;;  %v1147_v56 = vsel %vm395_vm5, %v1088_v32, 0.0  ;;  %v1141_v35 = vld [vmem:[%s1750_s23] sm:$0x1] }
 0x109   : > { %v1426_v43 = vpack.c.bf16 %v1086_v38, %v1086_v38  ;;  %v1143_v44 = vsel %vm395_vm5, %v1086_v38, 0.0  ;;  %v1168_v45 = vmul.f32 %v1086_v38, %v1086_v38  ;;  %1129 = vst.msk [vmem:[%s1800_s7 + $0xc] sm:$0xf] %vm1125_vm6, %v1428_v41  ;;  %v1180_v62 = vsel %vm395_vm5, %v1170_v50, 0.0 }
 0x10a   : > { %1067 = vst.msk [vmem:[#allocation2 + $0x28] sm:$0xff] %vm395_vm5, %v1059_v39  ;;  %v1144_v47 = vadd.f32 %v1143_v44, %v1142_v42  ;;  %v1166_v39 = vld [vmem:[%s1756_s26] sm:$0x1] }
 0x10b   : > { %v1076_v48 = vld [vmem:[#allocation2 + $0x30] sm:$0xff]  ;;  %1127 = vst.msk [vmem:[%s1800_s7 + $0x4] sm:$0xf] %vm1125_vm6, %v1426_v43  ;;  %v1176_v51 = vsel %vm395_vm5, %v1168_v45, 0.0 }
 0x10c   : > { %v1091_v52 = vadd.f32 %v1791_v15, %v1076_v48  ;;  %v1146_v53 = vadd.f32 %v1145_v46, %v1144_v47  ;;  %v1177_v54 = vadd.f32 %v1176_v51, %v1175_v49 }
 0x10d   : > { %v1074_v58 = vld [vmem:[#allocation2 + $0x20] sm:$0xff] }
 0x10e   : > { %v1431_v57 = vpack.c.bf16 %v1091_v52, %v1091_v52  ;;  %v1179_v59 = vadd.f32 %v1178_v55, %v1177_v54  ;;  %v1089_v60 = vadd.f32 %v1791_v15, %v1074_v58  ;;  %v1148_v61 = vadd.f32 %v1147_v56, %v1146_v53 }
 0x10f   : > { %v1077_v63 = vld [vmem:[#allocation2 + $0x38] sm:$0xff]  ;;  %v1173_v11 = vmul.f32 %v1091_v52, %v1091_v52  ;;  %v1153_v16 = vsel %vm395_vm5, %v1091_v52, 0.0 }
 0x110   : > { %1132 = vst.msk [vmem:[%s1800_s7 + $0x18] sm:$0xf] %vm1125_vm6, %v1431_v57  ;;  %v1429_v0 = vpack.c.bf16 %v1089_v60, %v1089_v60  ;;  %v1149_v1 = vsel %vm395_vm5, %v1089_v60, 0.0  ;;  %v1171_v2 = vmul.f32 %v1089_v60, %v1089_v60  ;;  %v1181_v3 = vadd.f32 %v1180_v62, %v1179_v59 }
 0x111   : > { %v1075_v4 = vld [vmem:[#allocation2 + $0x28] sm:$0xff]  ;;  %v1150_v5 = vadd.f32 %v1149_v1, %v1148_v61  ;;  %v1092_v6 = vadd.f32 %v1791_v15, %v1077_v63  ;;  %v1186_v20 = vsel %vm395_vm5, %v1173_v11, 0.0 }
 0x112   : > { %v1090_v7 = vadd.f32 %v1791_v15, %v1075_v4  ;;  %1130 = vst.msk [vmem:[%s1800_s7 + $0x10] sm:$0xf] %vm1125_vm6, %v1429_v0  ;;  %v1182_v8 = vsel %vm395_vm5, %v1171_v2, 0.0 }
 0x113   : > { %v1183_v9 = vadd.f32 %v1182_v8, %v1181_v3  ;;  %v1432_v10 = vpack.c.bf16 %v1092_v6, %v1092_v6  ;;  %v1174_v17 = vmul.f32 %v1092_v6, %v1092_v6  ;;  %v1155_v21 = vsel %vm395_vm5, %v1092_v6, 0.0 }
 0x114   : > { %v1430_v37 = vpack.c.bf16 %v1090_v7, %v1090_v7  ;;  %v1151_v12 = vsel %vm395_vm5, %v1090_v7, 0.0  ;;  %v1172_v13 = vmul.f32 %v1090_v7, %v1090_v7 }
 0x115   : > { %1133 = vst.msk [vmem:[%s1800_s7 + $0x1c] sm:$0xf] %vm1125_vm6, %v1432_v10  ;;  %v1152_v14 = vadd.f32 %v1151_v12, %v1150_v5  ;;  %v1188_v24 = vsel %vm395_vm5, %v1174_v17, 0.0 }
 0x116   : > { %1131 = vst.msk [vmem:[%s1800_s7 + $0x14] sm:$0xf] %vm1125_vm6, %v1430_v37  ;;  %v1184_v15 = vsel %vm395_vm5, %v1172_v13, 0.0 }
 0x117   : > { %v1154_v18 = vadd.f32 %v1153_v16, %v1152_v14  ;;  %v1185_v19 = vadd.f32 %v1184_v15, %v1183_v9 }
 0x119   : > { %v1156_v22 = vadd.f32 %v1155_v21, %v1154_v18  ;;  %v1187_v23 = vadd.f32 %v1186_v20, %v1185_v19 }
 0x11b   : > { %v1157_v25 = vrot.slane %v1156_v22, 4  ;;  %v1189_v26 = vadd.f32 %v1188_v24, %v1187_v23 }
 0x11d   : > { %v1158_v27 = vadd.f32 %v1157_v25, %v1156_v22  ;;  %v1190_v28 = vrot.slane %v1189_v26, 4 }
 0x11f   : > { %v1159_v29 = vrot.slane %v1158_v27, 2  ;;  %v1191_v30 = vadd.f32 %v1190_v28, %v1189_v26 }
 0x121   : > { %v1160_v31 = vadd.f32 %v1159_v29, %v1158_v27  ;;  %v1192_v32 = vrot.slane %v1191_v30, 2 }
 0x123   : > { %v1161_v33 = vrot.slane %v1160_v31, 1  ;;  %v1193_v34 = vadd.f32 %v1192_v32, %v1191_v30 }
 0x125   : > { %v1162_v36 = vadd.f32 %v1161_v33, %v1160_v31  ;;  %v1194_v38 = vrot.slane %v1193_v34, 1 }
 0x127   : > { %v1163_v40 = vadd.f32 %v1162_v36, %v1141_v35  ;;  %v1195_v41 = vadd.f32 %v1194_v38, %v1193_v34 }
 0x129   : > { %1165 = vst.msk [vmem:[%s1750_s23] sm:$0x1] %vm1138_vm4, %v1163_v40  ;;  %v1196_v42 = vadd.f32 %v1195_v41, %v1166_v39 }
 0x12b   : > { %1197 = vst.msk [vmem:[%s1756_s26] sm:$0x1] %vm1138_vm4, %v1196_v42 }
 0x12c PF: > { %s16_s20 = sadd.s32 1, %s1569_s20   ;;  %s1868_s18 = smov %s1565_s19 }
 0x12d   : > { %p13_p5 = scmp.ge.s32.totalorder %s16_s20, 4   ;;  %s1869_s19 = smov %s1871_s21 }
 0x12f   :  { %15 = sbr.rel (!%p13_p5) target bundleno = 2 (0x2), region = 94 }

// kernel: cyclegan_discriminator.12
= control target key start
LH: loop header
LB: loop body
LE: loop exit
PB: predicated region body
PF: predicated region fallthrough
CT: control target
= control target key end

     0   :  { %s482_s12 = smov 0   ;;  %s484_s13 = smov 0   ;;  %s526_s0 = inlined_call_operand.vmem [shape: bf16[2,16,32], index: 0, kind: input, shape index: {}]   ;;  %s527_s1 = inlined_call_operand.vmem [shape: f32[2,1,32], index: 1, kind: input, shape index: {}]   ;;  %s528_s2 = inlined_call_operand.vmem [shape: f32[2,1,32], index: 2, kind: input, shape index: {}]   ;;  %s529_s3 = inlined_call_operand.vmem [shape: bf16[2,16,32], index: 3, kind: output, shape index: {}]  }
   0x1   :  { %s486_s14 = smov 0  }
   0x2 LB: > { %s25_s15 = sadd.s32 1, %s456_s13  ;;  %p395_p0 = scmp.ge.s32.totalorder %s460_s14, 1  ;;  %s460_s14 = sphi %s486_s14, %s13_s14   ;;  %s456_s13 = sphi %s484_s13, %s531_s13   ;;  %s452_s12 = sphi %s482_s12, %s530_s12  }
   0x3   : > { %p27_p1 = scmp.ge.s32.totalorder %s25_s15, 2  ;;  %p174_p2 = scmp.lt.s32.totalorder %s460_s14, 3 }
   0x5   : > { %s533_s15 = smov (%p27_p1, %s25_s15), 0  ;;  %p175_p3 = pnand %p395_p0, %p174_p2 }
   0x6   : > { %p213_p4 = scmp.lt.s32.totalorder (!%p175_p3), %s452_s12, 1 }
   0x7   : > { %178 = sbr.rel (%p175_p3) target bundleno = 51 (0x33), region = 32 }
   0xc   : > { %s535_s12 = smov (!%p213_p4, %s452_s12), 1  ;;  %v254_v8 = vlaneseq  ;;  %vm283_vm2 = vcmask 257024  }
   0xd   : > { %s224_s18 = scalar_lea.vmem %s527_s1, %s535_s12  ;;  %s227_s21 = scalar_lea.vmem %s528_s2, %s535_s12 }
   0xe   : > { %v238_v0 = vld [vmem:[%s224_s18] sm:$0x1]  ;;  %s404_s22 = sshll.u32 %s535_s12, 3  ;;  %v255_v9 = vshrl.u32 %v254_v8, 7 }
   0xf   : > { %v239_v1 = vmul.f32 0.0625, %v238_v0  ;;  %v240_v2 = vld [vmem:[%s227_s21] sm:$0x1]  ;;  %s220_s25 = scalar_lea.vmem %s526_s0, %s404_s22  ;;  %s236_s28 = scalar_lea.vmem %s529_s3, %s404_s22 }
  0x10   : > { %v241_v3 = vmul.f32 0.0625, %v240_v2  ;;  %v409_v10 = vld [vmem:[%s220_s25] sm:$0xff]   ;;  %v256_v12 = vsub.s32 0, %v255_v9 }
  0x11   : > { %v242_v4 = vmul.f32 %v239_v1, %v239_v1  ;;  %v247_v11 = vsub.f32 0.0, %v239_v1  ;;  %v410_v13 = vunpack.c.l.bf16 %v409_v10  ;;  %v411_v14 = vunpack.c.h.bf16 %v409_v10 }
  0x13   : > { %v243_v5 = vsub.f32 %v241_v3, %v242_v4 }
  0x15   : > { %v244_v6 = vmax.f32 %v243_v5, 0.0 }
  0x17   : > { %v245_v7 = vadd.f32 1e-05, %v244_v6 }
  0x19   : > { %436 = vrsqrt.f32 %v245_v7 }
  0x26   : > { %v437_v15 = vpop.eup %436 }
  0x27   : > { %v248_v16 = vmul.f32 %v437_v15, %v247_v11  ;;  %v257_v17 = vrot.slane %v437_v15, %v256_v12 }
  0x29   : > { %v259_v18 = vmul.f32 %v410_v13, %v257_v17  ;;  %v260_v19 = vmul.f32 %v411_v14, %v257_v17  ;;  %v265_v20 = vrot.slane %v248_v16, %v256_v12 }
  0x2b   : > { %v267_v21 = vadd.f32 %v265_v20, %v259_v18  ;;  %v268_v22 = vadd.f32 %v265_v20, %v260_v19 }
  0x2d   : > { %vm269_vm0 = vcmp.ge.f32.partialorder %v267_v21, 0.0  ;;  %v271_v23 = vmul.f32 0.2, %v267_v21  ;;  %vm270_vm1 = vcmp.ge.f32.partialorder %v268_v22, 0.0  ;;  %v272_v24 = vmul.f32 0.2, %v268_v22 }
  0x2f   : > { %v273_v25 = vsel %vm269_vm0, %v267_v21, %v271_v23  ;;  %v274_v26 = vsel %vm270_vm1, %v268_v22, %v272_v24 }
  0x30   : > { %v406_v27 = vpack.c.bf16 %v273_v25, %v273_v25  ;;  %v407_v28 = vpack.c.bf16 %v274_v26, %v274_v26 }
  0x32   : > { %284 = vst.msk [vmem:[%s236_s28] sm:$0xf] %vm283_vm2, %v406_v27  ;;  %285 = vst.msk [vmem:[%s236_s28 + $0x4] sm:$0xf] %vm283_vm2, %v407_v28 }
  0x33 PF: > { %s13_s14 = sadd.s32 1, %s460_s14   ;;  %s530_s12 = smov %s456_s13 }
  0x34   : > { %p10_p5 = scmp.ge.s32.totalorder %s13_s14, 4   ;;  %s531_s13 = smov %s533_s15 }
  0x36   :  { %12 = sbr.rel (!%p10_p5) target bundleno = 2 (0x2), region = 68 }

// kernel: cyclegan_discriminator.11
= control target key start
LH: loop header
LB: loop body
LE: loop exit
PB: predicated region body
PF: predicated region fallthrough
CT: control target
= control target key end

     0   :  { %s1326_s18 = smov 0   ;;  %s1328_s19 = smov 0   ;;  %s1516_s0 = inlined_call_operand.vmem [shape: bf16[2,5,5,64], index: 0, kind: input, shape index: {}]   ;;  %s1517_s1 = inlined_call_operand.vmem [shape: bf16[4,64,32], index: 1, kind: input, shape index: {}]   ;;  %s1518_s2 = inlined_call_operand.vmem [shape: f32[1,32], index: 2, kind: input, shape index: {}]   ;;  %s1519_s3 = inlined_call_operand.vmem [shape: bf16[2,16,32], index: 3, kind: output, shape index: {0}]   ;;  %s1520_s4 = inlined_call_operand.vmem [shape: f32[2,1,32], index: 4, kind: output, shape index: {1}]   ;;  %s1521_s5 = inlined_call_operand.vmem [shape: f32[2,1,32], index: 5, kind: output, shape index: {2}]  }
   0x1   :  { %s1330_s20 = smov 0  }
   0x2 LB: > { %s28_s21 = sadd.s32 1, %s1287_s19  ;;  %p1077_p0 = scmp.ge.s32.totalorder %s1291_s20, 1  ;;  %s1291_s20 = sphi %s1330_s20, %s16_s20   ;;  %s1287_s19 = sphi %s1328_s19, %s1527_s19   ;;  %s1283_s18 = sphi %s1326_s18, %s1526_s18  }
   0x3   : > { %p30_p1 = scmp.ge.s32.totalorder %s28_s21, 2  ;;  %p210_p2 = scmp.lt.s32.totalorder %s1291_s20, 3 }
   0x5   : > { %s1529_s21 = smov (%p30_p1, %s28_s21), 0  ;;  %p211_p3 = pnand %p1077_p0, %p210_p2 }
   0x6   : > { %p250_p4 = scmp.lt.s32.totalorder (!%p211_p3), %s1283_s18, 1 }
   0x7   : > { %214 = sbr.rel (%p211_p3) target bundleno = 289 (0x121), region = 32 }
   0xc   : > { %v1245_v0 = vld [vmem:[%s1517_s1 + $0x18] sm:$0xff]   ;;  %v1293_v1 = vmov 0.0   ;;  %v1246_v2 = vld [vmem:[%s1517_s1 + $0x10] sm:$0xff]   ;;  %vm1294_vm0 = vmmov 0   ;;  %s1531_s18 = smov (!%p250_p4, %s1283_s18), 1  ;;  %v294_v5 = vlaneseq  ;;  %v1248_v6 = vld [vmem:[%s1517_s1 + $0x8] sm:$0xff]  }
   0xd   : > { %1169 = vmatprep.subr.bf16.mxu0 %v1293_v1  ;;  %1181 = vmatprep.subr.bf16.mxu1 %v1293_v1  ;;  %v1247_v3 = vld [vmem:[%s1517_s1 + $0x38] sm:$0xff]   ;;  %v1249_v4 = vld [vmem:[%s1517_s1 + $0x30] sm:$0xff]   ;;  %s1217_s7 = smul.u32 20, %s1531_s18  ;;  %v1250_v7 = vld [vmem:[%s1517_s1] sm:$0xff]   ;;  %v1295_v9 = vmov 1983009808   ;;  %s1474_s17 = scalar_lea.vmem %s1521_s5, %s1531_s18 }
   0xe   : > { %1170 = vmatpush3.bf16.msra.mxu0 %v1245_v0  ;;  %1177 = vmatprep.mubr.msk.bf16.mxu0 %vm1294_vm0, %v1293_v1  ;;  %v1251_v8 = vld [vmem:[%s1517_s1 + $0x28] sm:$0xff]   ;;  %v292_v10 = vunpack.c.l.s4 %v1295_v9  ;;  %v295_v11 = vshrl.u32 %v294_v5, 7  ;;  %vm330_vm1 = vcmask 523264   ;;  %v1255_v15 = vld [vmem:[%s1517_s1 + $0x20] sm:$0xff]   ;;  %vm418_vm2 = vsmask.f32 1280 }
   0xf   : > { %1171 = vmatprep.subr.bf16.mxu0 %v1293_v1  ;;  %1189 = vmatprep.mubr.msk.bf16.mxu1 %vm1294_vm0, %v1293_v1  ;;  %s1380_s14 = scalar_lea.vmem %s1516_s0, %s1217_s7  ;;  %v1254_v20 = vld [vmem:[%s1517_s1 + $0x58] sm:$0xff]   ;;  %vm419_vm3 = vsmask.f32 3336  ;;  %vm421_vm5 = vsmask.f32 5392  ;;  %v1256_v45 = vld [vmem:[%s1517_s1 + $0x50] sm:$0xff]  }
  0x10   : > { %1182 = vmatpush3.bf16.msra.mxu1 %v1247_v3  ;;  %v1265_v12 = vld.sshfl [vmem:[%s1380_s14] sm:$0xf pattern:$0x76325410]  ;;  %v293_v14 = vunpack.c.0.s8 %v292_v10  ;;  %vm420_vm4 = vmor %vm418_vm2, %vm419_vm3  ;;  %vm423_vm6 = vsmask.f32 7448 }
  0x11   : > { %1183 = vmatprep.subr.bf16.mxu1 %v1293_v1  ;;  %v1266_v13 = vld.sshfl [vmem:[%s1380_s14 + $0x8] sm:$0xf pattern:$0x76325410]  ;;  %vm1400_vm7 = vmor %vm420_vm4, %vm421_vm5  ;;  %v1264_v32 = vld [vmem:[%s1517_s1 + $0x60] sm:$0xff]   ;;  %vm912_vm9 = vcmask 253952  }
  0x12   : > { %1172 = vmatpush3.bf16.msra.mxu0 %v1246_v2  ;;  %v1086_v16 = vld.sshfl [vmem:[%s1380_s14] sm:$0x13 pattern:$0x76325410]  ;;  %v1390_v17 = vsub.s32 %v293_v14, %v295_v11  ;;  %v305_v28 = vcombine.low %v1265_v12, %v1266_v13  ;;  %vm1415_vm8 = vmor %vm1400_vm7, %vm423_vm6  ;;  %v1258_v59 = vld [vmem:[%s1517_s1 + $0x48] sm:$0xff]   ;;  %vm375_vm10 = vcmask 261120  }
  0x13   : > { %1173 = vmatprep.subr.bf16.mxu0 %v1293_v1  ;;  %v1087_v18 = vld.sshfl [vmem:[%s1380_s14 + $0x4] sm:$0x13 pattern:$0x76325410]  ;;  %v393_v19 = vcombine.high %v1086_v16, %v1086_v16  ;;  %v426_v26 = vshrl.u32 %v1086_v16, 16  ;;  %v429_v27 = vshll.u32 %v1086_v16, 16 }
  0x14   : > { %1184 = vmatpush3.bf16.msra.mxu1 %v1249_v4  ;;  %v1088_v21 = vld.sshfl [vmem:[%s1380_s14 + $0x8] sm:$0x13 pattern:$0x76325410]  ;;  %v401_v22 = vcombine.high %v1087_v18, %v1087_v18  ;;  %v440_v30 = vshrl.u32 %v1087_v18, 16  ;;  %v443_v31 = vshll.u32 %v1087_v18, 16 }
  0x15   : > { %1185 = vmatprep.subr.bf16.mxu1 %v1293_v1  ;;  %v1089_v23 = vld.sshfl [vmem:[%s1380_s14 + $0xc] sm:$0x13 pattern:$0x76325410]  ;;  %v409_v24 = vcombine.high %v1088_v21, %v1088_v21  ;;  %v435_v29 = vshll.u32 %v393_v19, 16  ;;  %v428_v33 = vrot.slane %v426_v26, 6 }
  0x16   : > { %1174 = vmatpush3.bf16.msra.mxu0 %v1248_v6  ;;  %v417_v25 = vcombine.high %v1089_v23, %v1089_v23  ;;  %v431_v34 = vrot.slane %v429_v27, 7  ;;  %v449_v35 = vshll.u32 %v401_v22, 16  ;;  %v454_v36 = vshrl.u32 %v1088_v21, 16  ;;  %v1260_v4 = vld [vmem:[%s1517_s1 + $0x40] sm:$0xff]   ;;  %v1257_v19 = vld [vmem:[%s1517_s1 + $0x78] sm:$0xff]   ;;  %s1146_s24 = sshll.u32 %s1531_s18, 3 }
  0x17   : > { %1175 = vmatprep.subr.bf16.mxu0 %v1293_v1  ;;  %v437_v37 = vrot.slane %v435_v29, 7  ;;  %v442_v38 = vrot.slane %v440_v30, 6  ;;  %v445_v39 = vrot.slane %v443_v31, 7  ;;  %v457_v40 = vshll.u32 %v1088_v21, 16  ;;  %v1261_v29 = vld [vmem:[%s1517_s1 + $0x68] sm:$0xff]   ;;  %s264_s27 = scalar_lea.vmem %s1519_s3, %s1146_s24 }
  0x18   : > { %1186 = vmatpush3.bf16.msra.mxu1 %v1251_v8  ;;  %v432_v41 = vor.u32 %v431_v34, %v428_v33  ;;  %v451_v42 = vrot.slane %v449_v35, 7  ;;  %v456_v43 = vrot.slane %v454_v36, 6  ;;  %v463_v44 = vshll.u32 %v409_v24, 16  ;;  %v1259_v24 = vld [vmem:[%s1517_s1 + $0x70] sm:$0xff]   ;;  %914 = vst.msk [vmem:[%s1474_s17] sm:$0x1] %vm912_vm9, %v1293_v1 }
  0x19   : > { %1187 = vmatprep.subr.bf16.mxu1 %v1293_v1  ;;  %v446_v47 = vor.u32 %v445_v39, %v442_v38  ;;  %v459_v48 = vrot.slane %v457_v40, 7  ;;  %v468_v49 = vshrl.u32 %v1089_v23, 16  ;;  %v471_v50 = vshll.u32 %v1089_v23, 16 }
  0x1a   : > { %1176 = vmatpush3.bf16.msra.mxu0 %v1250_v7  ;;  %v433_v51 = vrot.slane %v432_v41, 2  ;;  %v465_v52 = vrot.slane %v463_v44, 7  ;;  %v477_v53 = vshll.u32 %v417_v25, 16  ;;  %vm905_vm11 = vcmask 257024  }
  0x1b   : > { %1193 = vmatprep.subr.bf16.mxu0 %v1293_v1  ;;  %v447_v54 = vrot.slane %v446_v47, 2  ;;  %v460_v55 = vor.u32 %v459_v48, %v456_v43  ;;  %v470_v56 = vrot.slane %v468_v49, 6  ;;  %v473_v57 = vrot.slane %v471_v50, 7 }
  0x1c   : > { %1188 = vmatpush3.bf16.msra.mxu1 %v1255_v15  ;;  %v438_v58 = vsel %vm1415_vm8, %v433_v51, %v437_v37  ;;  %v479_v63 = vrot.slane %v477_v53, 7  ;;  %v1267_v5 = vld.sshfl [vmem:[%s1380_s14 + $0x4] sm:$0xf pattern:$0x76325410] }
  0x1d   : > { %1205 = vmatprep.subr.bf16.mxu1 %v1293_v1  ;;  %1178 = vmatmul.mubr.msk.bf16.vlgmr.msra.gmra.mxu0 %vm330_vm1, %v305_v28  ;;  %v452_v60 = vsel %vm1415_vm8, %v447_v54, %v451_v42  ;;  %v461_v61 = vrot.slane %v460_v55, 2  ;;  %v474_v62 = vor.u32 %v473_v57, %v470_v56  ;;  %v1268_v6 = vld.sshfl [vmem:[%s1380_s14 + $0xc] sm:$0xf pattern:$0x76325410] }
  0x1e   : > { %1194 = vmatpush3.bf16.msra.mxu0 %v1254_v20  ;;  %1201 = vmatprep.mubr.msk.bf16.mxu0 %vm1294_vm0, %v1293_v1  ;;  %v490_v0 = vcombine.low %v438_v58, %v452_v60  ;;  %v1127_v9 = vld.sshfl [vmem:[%s1380_s14 + $0x10] sm:$0x13 pattern:$0x76325410]  ;;  %v615_v15 = vcombine.low %v1267_v5, %v1268_v6  ;;  %s1468_s14 = scalar_lea.vmem %s1520_s4, %s1531_s18 }
  0x1f   : > { %1195 = vmatprep.subr.bf16.mxu0 %v1293_v1  ;;  %v466_v2 = vsel %vm1415_vm8, %v461_v61, %v465_v52  ;;  %v475_v3 = vrot.slane %v474_v62, 2  ;;  %v729_v11 = vcombine.high %v1127_v9, %v1127_v9  ;;  %v773_v12 = vshrl.u32 %v1127_v9, 16  ;;  %913 = vst.msk [vmem:[%s1468_s14] sm:$0x1] %vm912_vm9, %v1293_v1 }
  0x20   : > { %v498_v8 = vrot.slane %v490_v0, %v1390_v17  ;;  %v776_v13 = vshll.u32 %v1127_v9, 16  ;;  %v795_v27 = vcombine.low %v452_v60, %v466_v2  ;;  %v1141_v60 = vld [vmem:[%s1518_s2] ss:$0 sm:$0xff] }
  0x21   : > { %v480_v7 = vsel %vm1415_vm8, %v475_v3, %v479_v63  ;;  %v775_v16 = vrot.slane %v773_v12, 6  ;;  %v782_v18 = vshll.u32 %v729_v11, 16 }
  0x22   : > { %1196 = vmatpush3.bf16.msra.mxu0 %v1256_v45  ;;  %v491_v10 = vcombine.low %v466_v2, %v480_v7  ;;  %v778_v20 = vrot.slane %v776_v13, 7  ;;  %v803_v30 = vrot.slane %v795_v27, %v1390_v17 }
  0x23   : > { %1197 = vmatprep.subr.bf16.mxu0 %v1293_v1  ;;  %v784_v23 = vrot.slane %v782_v18, 7 }
  0x24   : > { %v505_v14 = vrot.slane %v491_v10, %v1390_v17  ;;  %v779_v22 = vor.u32 %v778_v20, %v775_v16 }
  0x26   : > { %1198 = vmatpush3.bf16.msra.mxu0 %v1258_v59  ;;  %v506_v21 = vcombine.low %v498_v8, %v505_v14  ;;  %v780_v25 = vrot.slane %v779_v22, 2  ;;  %v915_v22 = vld [vmem:[%s1468_s14] sm:$0x1] }
  0x27   : > { %1199 = vmatprep.subr.bf16.mxu0 %v1293_v1 }
  0x28   : > { %1190 = vmatmul.mubr.msk.bf16.vlgmr.msra.gmra.mxu1 %vm330_vm1, %v506_v21  ;;  %v785_v26 = vsel %vm1415_vm8, %v780_v25, %v784_v23  ;;  %v928_v25 = vld [vmem:[%s1474_s17] sm:$0x1] }
  0x29   : > { %1206 = vmatpush3.bf16.msra.mxu1 %v1257_v19  ;;  %1213 = vmatprep.mubr.msk.bf16.mxu1 %vm1294_vm0, %v1293_v1  ;;  %v796_v28 = vcombine.low %v480_v7, %v785_v26 }
  0x2a   : > { %1200 = vmatpush3.bf16.msra.mxu0 %v1260_v4  ;;  %1207 = vmatprep.subr.bf16.mxu1 %v1293_v1 }
  0x2b   : > { %v810_v31 = vrot.slane %v796_v28, %v1390_v17 }
  0x2d   : > { %1202 = vmatmul.mubr.msk.bf16.vlgmr.msra.gmra.mxu0 %vm330_vm1, %v615_v15  ;;  %1208 = vmatpush3.bf16.msra.mxu1 %v1259_v24  ;;  %v811_v33 = vcombine.low %v803_v30, %v810_v31 }
  0x2e   : > { %1209 = vmatprep.subr.bf16.mxu1 %v1293_v1 }
  0x31   : > { %1210 = vmatpush3.bf16.msra.mxu1 %v1261_v29 }
  0x32   : > { %1211 = vmatprep.subr.bf16.mxu1 %v1293_v1 }
  0x35   : > { %1212 = vmatpush3.bf16.msra.mxu1 %v1264_v32 }
  0x38   : > { %1214 = vmatmul.mubr.msk.bf16.vlgmr.msra.gmra.mxu1 %vm330_vm1, %v811_v33 }
  0xdd   : > { %v368_v17 = vpop.f32.mrf.mxu0 }
  0xde   : > { %376 = vst.msk [vmem:[#allocation2] sm:$0xff] %vm375_vm10, %v368_v17 }
  0xdf   : > { %v1179_v34 = vpop.f32.mrf.mxu0 }
  0xe1   : > { %v371_v35 = vpop.f32.mrf.mxu0 }
  0xe2   : > { %377 = vst.msk [vmem:[#allocation2 + $0x8] sm:$0xff] %vm375_vm10, %v371_v35 }
  0xe3   : > { %v1180_v36 = vpop.f32.mrf.mxu0 }
  0xe5   : > { %v575_v37 = vld [vmem:[#allocation2] sm:$0xff] }
  0xe8   : > { %v568_v39 = vpop.f32.mrf.mxu1 }
  0xe9   : > { %v577_v40 = vadd.f32 %v575_v37, %v568_v39  ;;  %v576_v43 = vld [vmem:[#allocation2 + $0x8] sm:$0xff] }
  0xea   : > { %v1191_v42 = vpop.f32.mrf.mxu1 }
  0xeb   : > { %579 = vst.msk [vmem:[#allocation2] sm:$0xff] %vm375_vm10, %v577_v40 }
  0xec   : > { %v571_v1 = vpop.f32.mrf.mxu1 }
  0xed   : > { %v677_v38 = vpop.f32.mrf.mxu0  ;;  %v578_v45 = vadd.f32 %v576_v43, %v571_v1 }
  0xee   : > { %v1192_v47 = vpop.f32.mrf.mxu1 }
  0xef   : > { %v1203_v41 = vpop.f32.mrf.mxu0  ;;  %580 = vst.msk [vmem:[#allocation2 + $0x8] sm:$0xff] %vm375_vm10, %v578_v45 }
  0xf1   : > { %v680_v44 = vpop.f32.mrf.mxu0 }
  0xf2   : > { %v684_v48 = vld [vmem:[#allocation2] sm:$0xff] }
  0xf3   : > { %v1204_v46 = vpop.f32.mrf.mxu0  ;;  %v686_v49 = vadd.f32 %v684_v48, %v677_v38 }
  0xf5   : > { %688 = vst.msk [vmem:[#allocation2] sm:$0xff] %vm375_vm10, %v686_v49 }
  0xf6   : > { %v685_v50 = vld [vmem:[#allocation2 + $0x8] sm:$0xff] }
  0xf7   : > { %v687_v51 = vadd.f32 %v685_v50, %v680_v44 }
  0xf8   : > { %v873_v52 = vpop.f32.mrf.mxu1 }
  0xf9   : > { %689 = vst.msk [vmem:[#allocation2 + $0x8] sm:$0xff] %vm375_vm10, %v687_v51 }
  0xfa   : > { %v1215_v53 = vpop.f32.mrf.mxu1 }
  0xfc   : > { %v880_v54 = vld [vmem:[#allocation2] sm:$0xff]  ;;  %v876_v55 = vpop.f32.mrf.mxu1 }
  0xfd   : > { %v882_v56 = vadd.f32 %v880_v54, %v873_v52 }
  0xfe   : > { %v1216_v57 = vpop.f32.mrf.mxu1 }
  0xff   : > { %884 = vst.msk [vmem:[#allocation2] sm:$0xff] %vm375_vm10, %v882_v56 }
 0x100   : > { %v881_v58 = vld [vmem:[#allocation2 + $0x8] sm:$0xff] }
 0x101   : > { %v883_v59 = vadd.f32 %v881_v58, %v876_v55 }
 0x103   : > { %885 = vst.msk [vmem:[#allocation2 + $0x8] sm:$0xff] %vm375_vm10, %v883_v59 }
 0x106   : > { %v886_v61 = vld [vmem:[#allocation2] sm:$0xff] }
 0x107   : > { %v895_v62 = vadd.f32 %v1141_v60, %v886_v61 }
 0x109   : > { %v1147_v63 = vpack.c.bf16 %v895_v62, %v895_v62  ;;  %v929_v2 = vmul.f32 %v895_v62, %v895_v62  ;;  %v916_v4 = vsel %vm375_vm10, %v895_v62, 0.0 }
 0x10a   : > { %v887_v0 = vld [vmem:[#allocation2 + $0x8] sm:$0xff] }
 0x10b   : > { %906 = vst.msk [vmem:[%s264_s27] sm:$0xf] %vm905_vm11, %v1147_v63  ;;  %v896_v3 = vadd.f32 %v1141_v60, %v887_v0  ;;  %v931_v9 = vsel %vm375_vm10, %v929_v2, 0.0 }
 0x10d   : > { %v1148_v5 = vpack.c.bf16 %v896_v3, %v896_v3  ;;  %v917_v6 = vsel %vm375_vm10, %v896_v3, 0.0  ;;  %v930_v7 = vmul.f32 %v896_v3, %v896_v3 }
 0x10e   : > { %v918_v8 = vadd.f32 %v917_v6, %v916_v4 }
 0x10f   : > { %907 = vst.msk [vmem:[%s264_s27 + $0x4] sm:$0xf] %vm905_vm11, %v1148_v5  ;;  %v932_v10 = vsel %vm375_vm10, %v930_v7, 0.0 }
 0x110   : > { %v919_v11 = vrot.slane %v918_v8, 4  ;;  %v933_v12 = vadd.f32 %v932_v10, %v931_v9 }
 0x112   : > { %v920_v13 = vadd.f32 %v919_v11, %v918_v8  ;;  %v934_v14 = vrot.slane %v933_v12, 4 }
 0x114   : > { %v921_v15 = vrot.slane %v920_v13, 2  ;;  %v935_v16 = vadd.f32 %v934_v14, %v933_v12 }
 0x116   : > { %v922_v18 = vadd.f32 %v921_v15, %v920_v13  ;;  %v936_v19 = vrot.slane %v935_v16, 2 }
 0x118   : > { %v923_v20 = vrot.slane %v922_v18, 1  ;;  %v937_v21 = vadd.f32 %v936_v19, %v935_v16 }
 0x11a   : > { %v924_v23 = vadd.f32 %v923_v20, %v922_v18  ;;  %v938_v24 = vrot.slane %v937_v21, 1 }
 0x11c   : > { %v925_v26 = vadd.f32 %v924_v23, %v915_v22  ;;  %v939_v27 = vadd.f32 %v938_v24, %v937_v21 }
 0x11e   : > { %927 = vst.msk [vmem:[%s1468_s14] sm:$0x1] %vm912_vm9, %v925_v26  ;;  %v940_v28 = vadd.f32 %v939_v27, %v928_v25 }
 0x120   : > { %941 = vst.msk [vmem:[%s1474_s17] sm:$0x1] %vm912_vm9, %v940_v28 }
 0x121 PF: > { %s16_s20 = sadd.s32 1, %s1291_s20   ;;  %s1526_s18 = smov %s1287_s19 }
 0x122   : > { %p13_p5 = scmp.ge.s32.totalorder %s16_s20, 4   ;;  %s1527_s19 = smov %s1529_s21 }
 0x124   :  { %15 = sbr.rel (!%p13_p5) target bundleno = 2 (0x2), region = 94 }

// kernel: cyclegan_discriminator.14
= control target key start
LH: loop header
LB: loop body
LE: loop exit
PB: predicated region body
PF: predicated region fallthrough
CT: control target
= control target key end

     0   :  { %s483_s12 = smov 0   ;;  %s485_s13 = smov 0   ;;  %s527_s0 = inlined_call_operand.vmem [shape: bf16[2,9,64], index: 0, kind: input, shape index: {}]   ;;  %s528_s1 = inlined_call_operand.vmem [shape: f32[2,1,64], index: 1, kind: input, shape index: {}]   ;;  %s529_s2 = inlined_call_operand.vmem [shape: f32[2,1,64], index: 2, kind: input, shape index: {}]   ;;  %s530_s3 = inlined_call_operand.vmem [shape: bf16[2,9,64], index: 3, kind: output, shape index: {}]  }
   0x1   :  { %s487_s14 = smov 0  }
   0x2 LB: > { %s25_s15 = sadd.s32 1, %s457_s13  ;;  %p400_p0 = scmp.ge.s32.totalorder %s461_s14, 1  ;;  %s461_s14 = sphi %s487_s14, %s13_s14   ;;  %s457_s13 = sphi %s485_s13, %s532_s13   ;;  %s453_s12 = sphi %s483_s12, %s531_s12  }
   0x3   : > { %p27_p1 = scmp.ge.s32.totalorder %s25_s15, 2  ;;  %p174_p2 = scmp.lt.s32.totalorder %s461_s14, 3 }
   0x5   : > { %s534_s15 = smov (%p27_p1, %s25_s15), 0  ;;  %p175_p3 = pnand %p400_p0, %p174_p2 }
   0x6   : > { %p213_p4 = scmp.lt.s32.totalorder (!%p175_p3), %s453_s12, 1 }
   0x7   : > { %178 = sbr.rel (%p175_p3) target bundleno = 52 (0x34), region = 32 }
   0xc   : > { %s536_s12 = smov (!%p213_p4, %s453_s12), 1  ;;  %v254_v8 = vlaneseq  ;;  %vm285_vm0 = vcmask 516096   ;;  %vm286_vm1 = vsmask.f32 256  ;;  %vm283_vm4 = vcmask 519168  }
   0xd   : > { %s224_s18 = scalar_lea.vmem %s528_s1, %s536_s12  ;;  %s227_s21 = scalar_lea.vmem %s529_s2, %s536_s12  ;;  %vm287_vm5 = vmand %vm285_vm0, %vm286_vm1 }
   0xe   : > { %v238_v0 = vld [vmem:[%s224_s18] sm:$0x1]  ;;  %s409_s22 = sshll.u32 %s536_s12, 3  ;;  %v255_v9 = vshrl.u32 %v254_v8, 7 }
   0xf   : > { %v239_v1 = vmul.f32 0.11111111, %v238_v0  ;;  %v240_v2 = vld [vmem:[%s227_s21] sm:$0x1]  ;;  %s220_s25 = scalar_lea.vmem %s527_s0, %s409_s22  ;;  %s236_s28 = scalar_lea.vmem %s530_s3, %s409_s22 }
  0x10   : > { %v241_v3 = vmul.f32 0.11111111, %v240_v2  ;;  %v249_v10 = vld [vmem:[%s220_s25] sm:$0xf]  ;;  %v250_v11 = vld [vmem:[%s220_s25 + $0x4] sm:$0x1] }
  0x11   : > { %v242_v4 = vmul.f32 %v239_v1, %v239_v1  ;;  %v247_v12 = vsub.f32 0.0, %v239_v1  ;;  %v256_v13 = vsub.s32 0, %v255_v9  ;;  %v251_v14 = vunpack.c.l.bf16 %v249_v10  ;;  %v288_v28 = vld [vmem:[%s236_s28 + $0x4] sm:$0x1] }
  0x12   : > { %v252_v15 = vunpack.c.l.bf16 %v250_v11 }
  0x13   : > { %v243_v5 = vsub.f32 %v241_v3, %v242_v4 }
  0x15   : > { %v244_v6 = vmax.f32 %v243_v5, 0.0 }
  0x17   : > { %v245_v7 = vadd.f32 1e-05, %v244_v6 }
  0x19   : > { %437 = vrsqrt.f32 %v245_v7 }
  0x26   : > { %v438_v16 = vpop.eup %437 }
  0x27   : > { %v248_v17 = vmul.f32 %v438_v16, %v247_v12  ;;  %v257_v18 = vrot.slane %v438_v16, %v256_v13 }
  0x29   : > { %v259_v19 = vmul.f32 %v257_v18, %v251_v14  ;;  %v260_v20 = vmul.f32 %v257_v18, %v252_v15  ;;  %v265_v21 = vrot.slane %v248_v17, %v256_v13 }
  0x2b   : > { %v267_v22 = vadd.f32 %v265_v21, %v259_v19  ;;  %v268_v23 = vadd.f32 %v265_v21, %v260_v20 }
  0x2d   : > { %vm269_vm2 = vcmp.ge.f32.partialorder %v267_v22, 0.0  ;;  %v271_v24 = vmul.f32 0.2, %v267_v22  ;;  %vm270_vm3 = vcmp.ge.f32.partialorder %v268_v23, 0.0  ;;  %v272_v25 = vmul.f32 0.2, %v268_v23 }
  0x2f   : > { %v273_v26 = vsel %vm269_vm2, %v267_v22, %v271_v24  ;;  %v274_v27 = vsel %vm270_vm3, %v268_v23, %v272_v25 }
  0x30   : > { %v411_v29 = vpack.c.bf16 %v273_v26, %v273_v26  ;;  %v412_v30 = vpack.c.bf16 %v274_v27, %v274_v27 }
  0x32   : > { %284 = vst.msk [vmem:[%s236_s28] sm:$0xf] %vm283_vm4, %v411_v29  ;;  %v289_v31 = vsel %vm287_vm5, %v412_v30, %v288_v28 }
  0x33   : > { %290 = vst [vmem:[%s236_s28 + $0x4] sm:$0x1] %v289_v31 }
  0x34 PF: > { %s13_s14 = sadd.s32 1, %s461_s14   ;;  %s531_s12 = smov %s457_s13 }
  0x35   : > { %p10_p5 = scmp.ge.s32.totalorder %s13_s14, 4   ;;  %s532_s13 = smov %s534_s15 }
  0x37   :  { %12 = sbr.rel (!%p10_p5) target bundleno = 2 (0x2), region = 68 }

// kernel: cyclegan_discriminator.13
= control target key start
LH: loop header
LB: loop body
LE: loop exit
PB: predicated region body
PF: predicated region fallthrough
CT: control target
= control target key end

     0   :  { %s4093_s18 = smov 0   ;;  %s4095_s19 = smov 0   ;;  %s4671_s0 = inlined_call_operand.vmem [shape: bf16[2,6,6,32], index: 0, kind: input, shape index: {}]   ;;  %s4672_s1 = inlined_call_operand.vmem [shape: bf16[16,32,64], index: 1, kind: input, shape index: {}]   ;;  %s4673_s2 = inlined_call_operand.vmem [shape: f32[1,64], index: 2, kind: input, shape index: {}]   ;;  %s4674_s3 = inlined_call_operand.vmem [shape: bf16[2,9,64], index: 3, kind: output, shape index: {0}]   ;;  %s4675_s4 = inlined_call_operand.vmem [shape: f32[2,1,64], index: 4, kind: output, shape index: {1}]   ;;  %s4676_s5 = inlined_call_operand.vmem [shape: f32[2,1,64], index: 5, kind: output, shape index: {2}]  }
   0x1   :  { %s4097_s20 = smov 0  }
   0x2 LB: > { %s28_s21 = sadd.s32 1, %s4054_s19  ;;  %p3564_p0 = scmp.ge.s32.totalorder %s4058_s20, 1  ;;  %s4058_s20 = sphi %s4097_s20, %s16_s20   ;;  %s4054_s19 = sphi %s4095_s19, %s4678_s19   ;;  %s4050_s18 = sphi %s4093_s18, %s4677_s18  }
   0x3   : > { %p30_p1 = scmp.ge.s32.totalorder %s28_s21, 2  ;;  %p210_p2 = scmp.lt.s32.totalorder %s4058_s20, 3 }
   0x5   : > { %s4680_s21 = smov (%p30_p1, %s28_s21), 0  ;;  %p211_p3 = pnand %p3564_p0, %p210_p2 }
   0x6   : > { %p250_p4 = scmp.lt.s32.totalorder (!%p211_p3), %s4050_s18, 1 }
   0x7   : > { %214 = sbr.rel (%p211_p3) target bundleno = 413 (0x19d), region = 32 }
   0xc   : > { %v4004_v0 = vld [vmem:[%s4672_s1 + $0x8] sm:$0xff]   ;;  %v4060_v1 = vmov 0.0   ;;  %v4005_v2 = vld [vmem:[%s4672_s1 + $0x18] sm:$0xff]   ;;  %v290_v3 = vlaneseq  ;;  %v4006_v4 = vld [vmem:[%s4672_s1] sm:$0xff]   ;;  %vm4061_vm0 = vmmov 0   ;;  %s4682_s18 = smov (!%p250_p4, %s4050_s18), 1 }
   0xd   : > { %3848 = vmatprep.subr.bf16.mxu0 %v4060_v1  ;;  %3856 = vmatprep.subr.bf16.mxu1 %v4060_v1  ;;  %v4007_v5 = vld [vmem:[%s4672_s1 + $0x10] sm:$0xff]   ;;  %v4062_v6 = vmov 1966171168   ;;  %s3976_s30 = smul.u32 24, %s4682_s18  ;;  %vm414_vm1 = vcmask 261120   ;;  %vm459_vm2 = vcmask 523264   ;;  %s4607_s9 = scalar_lea.vmem %s4676_s5, %s4682_s18 }
   0xe   : > { %3849 = vmatpush3.bf16.msra.mxu0 %v4004_v0  ;;  %3852 = vmatprep.mubr.msk.bf16.mxu0 %vm4061_vm0, %v4060_v1  ;;  %v288_v7 = vunpack.c.l.s4 %v4062_v6  ;;  %v291_v8 = vshrl.u32 %v290_v3, 7  ;;  %v4008_v3 = vld [vmem:[%s4672_s1 + $0x28] sm:$0xff]   ;;  %vm461_vm3 = vcmask 516096   ;;  %s3797_s12 = sshll.u32 %s4682_s18, 3  ;;  %vm3389_vm4 = vcmask 519168  }
   0xf   : > { %3857 = vmatpush3.bf16.msra.mxu1 %v4005_v2  ;;  %3850 = vmatprep.subr.bf16.mxu0 %v4060_v1  ;;  %s4138_s8 = scalar_lea.vmem %s4671_s0, %s3976_s30  ;;  %s4601_s30 = scalar_lea.vmem %s4675_s4, %s4682_s18  ;;  %3402 = vst.msk [vmem:[%s4607_s9] sm:$0x1] %vm461_vm3, %v4060_v1  ;;  %vm3392_vm5 = vsmask.f32 256 }
  0x10   : > { %3858 = vmatprep.subr.bf16.mxu1 %v4060_v1  ;;  %3860 = vmatprep.mubr.msk.bf16.mxu1 %vm4061_vm0, %v4060_v1  ;;  %v289_v9 = vunpack.c.0.s8 %v288_v7  ;;  %v3568_v10 = vld.sshfl [vmem:[%s4138_s8] sm:$0x11 pattern:$0x75316420]  ;;  %3401 = vst.msk [vmem:[%s4601_s30] sm:$0x1] %vm461_vm3, %v4060_v1  ;;  %vm3393_vm6 = vmand %vm461_vm3, %vm3392_vm5 }
  0x11   : > { %v3569_v12 = vld.sshfl [vmem:[%s4138_s8 + $0x4] sm:$0x11 pattern:$0x75316420]  ;;  %v286_v13 = vcombine.high %v3568_v10, %v3568_v10 }
  0x12   : > { %3851 = vmatpush3.bf16.msra.mxu0 %v4006_v4  ;;  %v4142_v11 = vsub.s32 %v289_v9, %v291_v8  ;;  %v3570_v14 = vld.sshfl [vmem:[%s4138_s8 + $0x8] sm:$0x11 pattern:$0x75316420]  ;;  %v308_v16 = vcombine.high %v3569_v12, %v3569_v12 }
  0x13   : > { %3859 = vmatpush3.bf16.msra.mxu1 %v4007_v5  ;;  %3864 = vmatprep.subr.bf16.mxu0 %v4060_v1  ;;  %v330_v19 = vcombine.high %v3570_v14, %v3570_v14  ;;  %v3588_v21 = vld.sshfl [vmem:[%s4138_s8] sm:$0x12 pattern:$0x75316420] }
  0x14   : > { %3872 = vmatprep.subr.bf16.mxu1 %v4060_v1  ;;  %v293_v15 = vrot.slane %v3568_v10, %v4142_v11  ;;  %v4148_v17 = vrot.slane %v3569_v12, %v4142_v11  ;;  %v300_v18 = vrot.slane %v286_v13, %v4142_v11  ;;  %v4152_v20 = vrot.slane %v3570_v14, %v4142_v11  ;;  %v3589_v30 = vld.sshfl [vmem:[%s4138_s8 + $0x4] sm:$0x12 pattern:$0x75316420] }
  0x15   : > { %v4156_v22 = vrot.slane %v308_v16, %v4142_v11  ;;  %v668_v25 = vcombine.high %v3588_v21, %v3588_v21  ;;  %v4160_v26 = vrot.slane %v330_v19, %v4142_v11  ;;  %v3590_v33 = vld.sshfl [vmem:[%s4138_s8 + $0x8] sm:$0x12 pattern:$0x75316420]  ;;  %v675_v34 = vrot.slane %v3588_v21, %v4142_v11  ;;  %v4010_v19 = vld [vmem:[%s4672_s1 + $0x38] sm:$0xff]  }
  0x16   : > { %v349_v23 = vunpack.i.h.s16 %v4148_v17  ;;  %v535_v24 = vunpack.i.h.s16 %v293_v15  ;;  %v3571_v27 = vpack.i.b16 %v4148_v17, %v300_v18  ;;  %v537_v28 = vunpack.i.h.s16 %v300_v18  ;;  %v3617_v6 = vld.sshfl [vmem:[%s4138_s8 + $0xc] sm:$0x11 pattern:$0x75316420] }
  0x17   : > { %v541_v29 = vunpack.i.h.s16 %v4152_v20  ;;  %v682_v35 = vrot.slane %v668_v25, %v4142_v11  ;;  %v353_v36 = vunpack.i.l.s16 %v4160_v26  ;;  %v543_v38 = vunpack.i.h.s16 %v4160_v26  ;;  %v4009_v25 = vld [vmem:[%s4672_s1 + $0x20] sm:$0xff]  }
  0x18   : > { %v4166_v31 = vpack.i.b16 %v4156_v22, %v349_v23  ;;  %v3583_v32 = vpack.i.b16 %v300_v18, %v535_v24  ;;  %v363_v37 = vcombine.low %v293_v15, %v3571_v27  ;;  %v550_v39 = vpack.i.b16 %v349_v23, %v537_v28 }
  0x19   : > { %v4178_v41 = vpack.i.b16 %v4160_v26, %v541_v29  ;;  %v683_v42 = vcombine.high %v675_v34, %v675_v34  ;;  %v691_v43 = vcombine.high %v3589_v30, %v3589_v30  ;;  %v385_v45 = vrot.slane %v353_v36, %v4142_v11 }
  0x1a   : > { %v364_v40 = vcombine.low %v4166_v31, %v4152_v20  ;;  %v371_v44 = vrot.slane %v363_v37, %v4142_v11  ;;  %v554_v46 = vcombine.low %v3583_v32, %v550_v39  ;;  %v576_v47 = vrot.slane %v543_v38, %v4142_v11 }
  0x1b   : > { %v555_v49 = vcombine.low %v4156_v22, %v4178_v41  ;;  %v698_v50 = vrot.slane %v3589_v30, %v4142_v11  ;;  %v4190_v51 = vrot.slane %v691_v43, %v4142_v11  ;;  %v400_v52 = vrot.slane %v385_v45, %v4142_v11  ;;  %v4011_v43 = vld [vmem:[%s4672_s1 + $0x30] sm:$0xff]  }
  0x1c   : > { %v378_v48 = vrot.slane %v364_v40, %v4142_v11  ;;  %v562_v53 = vrot.slane %v554_v46, %v4142_v11  ;;  %v591_v54 = vrot.slane %v576_v47, %v4142_v11  ;;  %v714_v55 = vcombine.high %v3590_v33, %v3590_v33 }
  0x1d   : > { %v569_v57 = vrot.slane %v555_v49, %v4142_v11  ;;  %v4196_v58 = vcombine.high %v698_v50, %v698_v50  ;;  %v721_v59 = vrot.slane %v3590_v33, %v4142_v11  ;;  %v734_v61 = vunpack.i.h.s16 %v4190_v51 }
  0x1e   : > { %v386_v56 = vcombine.low %v371_v44, %v378_v48  ;;  %v4200_v60 = vrot.slane %v714_v55, %v4142_v11  ;;  %v3595_v62 = vpack.i.b16 %v4190_v51, %v683_v42  ;;  %v925_v63 = vunpack.i.h.s16 %v682_v35 }
  0x1f   : > { %v577_v2 = vcombine.low %v562_v53, %v569_v57  ;;  %v4208_v4 = vcombine.high %v721_v59, %v721_v59  ;;  %v927_v5 = vunpack.i.h.s16 %v683_v42  ;;  %v4212_v7 = vpack.i.b16 %v4196_v58, %v734_v61 }
  0x20   : > { %v393_v0 = vrot.slane %v386_v56, %v4142_v11  ;;  %v749_v8 = vcombine.low %v682_v35, %v3595_v62  ;;  %v931_v9 = vunpack.i.h.s16 %v4200_v60  ;;  %v3607_v10 = vpack.i.b16 %v683_v42, %v925_v63  ;;  %v3647_v35 = vld.sshfl [vmem:[%s4138_s8 + $0xc] sm:$0x12 pattern:$0x75316420] }
  0x21   : > { %v584_v13 = vrot.slane %v577_v2, %v4142_v11  ;;  %v738_v14 = vunpack.i.l.s16 %v4208_v4  ;;  %v933_v15 = vunpack.i.h.s16 %v4208_v4  ;;  %v750_v16 = vcombine.low %v4212_v7, %v4200_v60  ;;  %v4014_v2 = vld [vmem:[%s4672_s1 + $0x58] sm:$0xff]  }
  0x22   : > { %v401_v12 = vcombine.low %v393_v0, %v400_v52  ;;  %v757_v18 = vrot.slane %v749_v8, %v4142_v11  ;;  %v940_v21 = vpack.i.b16 %v734_v61, %v927_v5  ;;  %v4227_v23 = vpack.i.b16 %v4208_v4, %v931_v9  ;;  %v4012_v52 = vld [vmem:[%s4672_s1 + $0x48] sm:$0xff]  }
  0x23   : > { %v592_v24 = vcombine.low %v584_v13, %v591_v54  ;;  %v771_v27 = vrot.slane %v738_v14, %v4142_v11  ;;  %v966_v28 = vrot.slane %v933_v15, %v4142_v11  ;;  %v1103_v30 = vcombine.high %v3617_v6, %v3617_v6 }
  0x24   : > { %3853 = vmatmul.mubr.msk.bf16.vlgmr.msra.gmra.mxu0 %vm414_vm1, %v401_v12  ;;  %v764_v32 = vrot.slane %v750_v16, %v4142_v11  ;;  %v944_v33 = vcombine.low %v3607_v10, %v940_v21  ;;  %v945_v34 = vcombine.low %v4196_v58, %v4227_v23  ;;  %v4248_v39 = vrot.slane %v3617_v6, %v4142_v11  ;;  %v4013_v10 = vld [vmem:[%s4672_s1 + $0x40] sm:$0xff]  }
  0x25   : > { %3865 = vmatpush3.bf16.msra.mxu0 %v4008_v3  ;;  %3868 = vmatprep.mubr.msk.bf16.mxu0 %vm4061_vm0, %v4060_v1  ;;  %v786_v36 = vrot.slane %v771_v27, %v4142_v11  ;;  %v981_v37 = vrot.slane %v966_v28, %v4142_v11  ;;  %v1312_v40 = vunpack.i.h.s16 %v4156_v22  ;;  %v4260_v46 = vrot.slane %v1103_v30, %v4142_v11 }
  0x26   : > { %3861 = vmatmul.mubr.msk.bf16.vlgmr.msra.gmra.mxu1 %vm414_vm1, %v592_v24  ;;  %3866 = vmatprep.subr.bf16.mxu0 %v4060_v1  ;;  %v772_v42 = vcombine.low %v757_v18, %v764_v32  ;;  %v952_v44 = vrot.slane %v944_v33, %v4142_v11  ;;  %v959_v45 = vrot.slane %v945_v34, %v4142_v11  ;;  %v1316_v48 = vunpack.i.h.s16 %v4248_v39  ;;  %v3677_v34 = vld.sshfl [vmem:[%s4138_s8 + $0x10] sm:$0x11 pattern:$0x75316420] }
  0x27   : > { %3873 = vmatpush3.bf16.msra.mxu1 %v4010_v19  ;;  %3876 = vmatprep.mubr.msk.bf16.mxu1 %vm4061_vm0, %v4060_v1  ;;  %v3622_v47 = vpack.i.b16 %v4152_v20, %v4156_v22  ;;  %v1325_v53 = vpack.i.b16 %v541_v29, %v1312_v40  ;;  %v1489_v54 = vcombine.high %v3647_v35, %v3647_v35  ;;  %v1126_v55 = vunpack.i.l.s16 %v4260_v46 }
  0x28   : > { %3874 = vmatprep.subr.bf16.mxu1 %v4060_v1  ;;  %v779_v49 = vrot.slane %v772_v42, %v4142_v11  ;;  %v967_v50 = vcombine.low %v952_v44, %v959_v45  ;;  %v1138_v56 = vcombine.low %v4178_v41, %v4248_v39  ;;  %v1318_v57 = vunpack.i.h.s16 %v4260_v46 }
  0x29   : > { %3867 = vmatpush3.bf16.msra.mxu0 %v4009_v25  ;;  %v1137_v22 = vcombine.low %v4148_v17, %v3622_v47  ;;  %v4281_v29 = vpack.i.b16 %v4260_v46, %v1316_v48  ;;  %v1329_v62 = vcombine.low %v4166_v31, %v1325_v53  ;;  %v1159_v0 = vrot.slane %v1126_v55, %v4142_v11  ;;  %v4015_v25 = vld [vmem:[%s4672_s1 + $0x50] sm:$0xff]   ;;  %v4018_v47 = vld [vmem:[%s4672_s1 + $0x78] sm:$0xff]   ;;  %v4017_v55 = vld [vmem:[%s4672_s1 + $0x60] sm:$0xff]  }
  0x2a   : > { %3880 = vmatprep.subr.bf16.mxu0 %v4060_v1  ;;  %v787_v59 = vcombine.low %v779_v49, %v786_v36  ;;  %v974_v61 = vrot.slane %v967_v50, %v4142_v11  ;;  %v1152_v17 = vrot.slane %v1138_v56, %v4142_v11  ;;  %v1351_v3 = vrot.slane %v1318_v57, %v4142_v11  ;;  %v4016_v36 = vld [vmem:[%s4672_s1 + $0x68] sm:$0xff]  }
  0x2b   : > { %3875 = vmatpush3.bf16.msra.mxu1 %v4011_v43  ;;  %v1145_v63 = vrot.slane %v1137_v22, %v4142_v11  ;;  %v1330_v31 = vcombine.low %v4160_v26, %v4281_v29  ;;  %v1337_v6 = vrot.slane %v1329_v62, %v4142_v11  ;;  %v1496_v8 = vrot.slane %v3647_v35, %v4142_v11 }
  0x2c   : > { %3888 = vmatprep.subr.bf16.mxu1 %v4060_v1  ;;  %3869 = vmatmul.mubr.msk.bf16.vlgmr.msra.gmra.mxu0 %vm414_vm1, %v787_v59  ;;  %v982_v5 = vcombine.low %v974_v61, %v981_v37  ;;  %v1174_v13 = vrot.slane %v1159_v0, %v4142_v11  ;;  %v1366_v14 = vrot.slane %v1351_v3, %v4142_v11  ;;  %v1702_v21 = vunpack.i.h.s16 %v4196_v58 }
  0x2d   : > { %3881 = vmatpush3.bf16.msra.mxu0 %v4012_v52  ;;  %3884 = vmatprep.mubr.msk.bf16.mxu0 %vm4061_vm0, %v4060_v1  ;;  %v1160_v12 = vcombine.low %v1145_v63, %v1152_v17  ;;  %v1344_v16 = vrot.slane %v1330_v31, %v4142_v11  ;;  %v4310_v18 = vrot.slane %v1489_v54, %v4142_v11  ;;  %v4019_v17 = vld [vmem:[%s4672_s1 + $0x70] sm:$0xff]  }
  0x2e   : > { %3877 = vmatmul.mubr.msk.bf16.vlgmr.msra.gmra.mxu1 %vm414_vm1, %v982_v5  ;;  %3882 = vmatprep.subr.bf16.mxu0 %v4060_v1  ;;  %v4312_v19 = vcombine.high %v1496_v8, %v1496_v8  ;;  %v3652_v27 = vpack.i.b16 %v4200_v60, %v4196_v58  ;;  %v1715_v40 = vpack.i.b16 %v931_v9, %v1702_v21 }
  0x2f   : > { %v1167_v24 = vrot.slane %v1160_v12, %v4142_v11  ;;  %3889 = vmatpush3.bf16.msra.mxu1 %v4014_v2  ;;  %3892 = vmatprep.mubr.msk.bf16.mxu1 %vm4061_vm0, %v4060_v1  ;;  %v1352_v28 = vcombine.low %v1337_v6, %v1344_v16  ;;  %v1706_v32 = vunpack.i.h.s16 %v4310_v18  ;;  %v1525_v58 = vcombine.low %v4227_v23, %v4310_v18  ;;  %v3707_v6 = vld.sshfl [vmem:[%s4138_s8 + $0x10] sm:$0x12 pattern:$0x75316420] }
  0x30   : > { %3890 = vmatprep.subr.bf16.mxu1 %v4060_v1  ;;  %v1513_v30 = vunpack.i.l.s16 %v4312_v19  ;;  %v1708_v33 = vunpack.i.h.s16 %v4312_v19  ;;  %v1524_v37 = vcombine.low %v4190_v51, %v3652_v27  ;;  %v1719_v49 = vcombine.low %v4212_v7, %v1715_v40  ;;  %v4022_v27 = vld [vmem:[%s4672_s1 + $0x98] sm:$0xff]  }
  0x31   : > { %3883 = vmatpush3.bf16.msra.mxu0 %v4013_v10  ;;  %v1175_v35 = vcombine.low %v1167_v24, %v1174_v13  ;;  %v1359_v42 = vrot.slane %v1352_v28, %v4142_v11  ;;  %v4342_v44 = vpack.i.b16 %v4312_v19, %v1706_v32  ;;  %v1539_v9 = vrot.slane %v1525_v58, %v4142_v11  ;;  %v4020_v10 = vld [vmem:[%s4672_s1 + $0x88] sm:$0xff]  }
  0x32   : > { %3896 = vmatprep.subr.bf16.mxu0 %v4060_v1  ;;  %v1546_v43 = vrot.slane %v1513_v30, %v4142_v11  ;;  %v1741_v51 = vrot.slane %v1708_v33, %v4142_v11  ;;  %v1532_v45 = vrot.slane %v1524_v37, %v4142_v11  ;;  %v1878_v50 = vcombine.high %v3677_v34, %v3677_v34 }
  0x33   : > { %3891 = vmatpush3.bf16.msra.mxu1 %v4015_v25  ;;  %v1367_v52 = vcombine.low %v1359_v42, %v1366_v14  ;;  %v1720_v54 = vcombine.low %v4208_v4, %v4342_v44  ;;  %v1727_v22 = vrot.slane %v1719_v49, %v4142_v11  ;;  %v4369_v61 = vrot.slane %v3677_v34, %v4142_v11  ;;  %v4021_v34 = vld [vmem:[%s4672_s1 + $0x80] sm:$0xff]   ;;  %v3737_v49 = vld.sshfl [vmem:[%s4138_s8 + $0x14] sm:$0x11 pattern:$0x75316420] }
  0x34   : > { %3885 = vmatmul.mubr.msk.bf16.vlgmr.msra.gmra.mxu0 %vm414_vm1, %v1175_v35  ;;  %v1561_v53 = vrot.slane %v1546_v43, %v4142_v11  ;;  %3904 = vmatprep.subr.bf16.mxu1 %v4060_v1  ;;  %v1547_v7 = vcombine.low %v1532_v45, %v1539_v9  ;;  %v1756_v56 = vrot.slane %v1741_v51, %v4142_v11  ;;  %v4023_v43 = vld [vmem:[%s4672_s1 + $0x90] sm:$0xff]  }
  0x35   : > { %3897 = vmatpush3.bf16.msra.mxu0 %v4016_v36  ;;  %3900 = vmatprep.mubr.msk.bf16.mxu0 %vm4061_vm0, %v4060_v1  ;;  %v1734_v59 = vrot.slane %v1720_v54, %v4142_v11  ;;  %v4372_v62 = vrot.slane %v1878_v50, %v4142_v11  ;;  %v3682_v0 = vpack.i.b16 %v4248_v39, %v4160_v26  ;;  %v2091_v5 = vunpack.i.h.s16 %v4369_v61 }
  0x36   : > { %3893 = vmatmul.mubr.msk.bf16.vlgmr.msra.gmra.mxu1 %vm414_vm1, %v1367_v52  ;;  %3898 = vmatprep.subr.bf16.mxu0 %v4060_v1  ;;  %v1554_v63 = vrot.slane %v1547_v7, %v4142_v11  ;;  %v1913_v13 = vcombine.low %v4281_v29, %v4369_v61  ;;  %v2100_v21 = vpack.i.b16 %v1316_v48, %v543_v38 }
  0x37   : > { %3905 = vmatpush3.bf16.msra.mxu1 %v4018_v47  ;;  %3908 = vmatprep.mubr.msk.bf16.mxu1 %vm4061_vm0, %v4060_v1  ;;  %v1742_v2 = vcombine.low %v1727_v22, %v1734_v59  ;;  %v1901_v3 = vunpack.i.l.s16 %v4372_v62  ;;  %v2093_v31 = vunpack.i.h.s16 %v4372_v62  ;;  %v1912_v12 = vcombine.low %v4152_v20, %v3682_v0  ;;  %v4026_v0 = vld [vmem:[%s4672_s1 + $0xb8] sm:$0xff]  }
  0x38   : > { %3906 = vmatprep.subr.bf16.mxu1 %v4060_v1  ;;  %v1562_v8 = vcombine.low %v1554_v63, %v1561_v53  ;;  %v4403_v24 = vpack.i.b16 %v4372_v62, %v2091_v5  ;;  %v1927_v25 = vrot.slane %v1913_v13, %v4142_v11  ;;  %v2264_v26 = vcombine.high %v3707_v6, %v3707_v6  ;;  %v4024_v53 = vld [vmem:[%s4672_s1 + $0xa8] sm:$0xff]  }
  0x39   : > { %3899 = vmatpush3.bf16.msra.mxu0 %v4017_v55  ;;  %v1749_v14 = vrot.slane %v1742_v2, %v4142_v11  ;;  %v1934_v16 = vrot.slane %v1901_v3, %v4142_v11  ;;  %v1920_v20 = vrot.slane %v1912_v12, %v4142_v11  ;;  %v2126_v28 = vrot.slane %v2093_v31, %v4142_v11 }
  0x3a   : > { %3912 = vmatprep.subr.bf16.mxu0 %v4060_v1  ;;  %v2104_v30 = vcombine.low %v4178_v41, %v2100_v21  ;;  %v2105_v36 = vcombine.low %v4260_v46, %v4403_v24  ;;  %v2271_v58 = vrot.slane %v3707_v6, %v4142_v11  ;;  %v4428_v40 = vrot.slane %v2264_v26, %v4142_v11 }
  0x3b   : > { %3907 = vmatpush3.bf16.msra.mxu1 %v4019_v17  ;;  %v1757_v38 = vcombine.low %v1749_v14, %v1756_v56  ;;  %v1949_v48 = vrot.slane %v1934_v16, %v4142_v11  ;;  %v1935_v35 = vcombine.low %v1920_v20, %v1927_v25  ;;  %v2141_v37 = vrot.slane %v2126_v28, %v4142_v11  ;;  %v4027_v25 = vld [vmem:[%s4672_s1 + $0xb0] sm:$0xff]   ;;  %v4028_v28 = vld [vmem:[%s4672_s1 + $0xc8] sm:$0xff]  }
  0x3c   : > { %3901 = vmatmul.mubr.msk.bf16.vlgmr.msra.gmra.mxu0 %vm414_vm1, %v1562_v8  ;;  %3920 = vmatprep.subr.bf16.mxu1 %v4060_v1  ;;  %v2112_v41 = vrot.slane %v2104_v30, %v4142_v11  ;;  %v2119_v51 = vrot.slane %v2105_v36, %v4142_v11  ;;  %v3712_v45 = vpack.i.b16 %v4310_v18, %v4208_v4  ;;  %v2481_v47 = vunpack.i.h.s16 %v4428_v40 }
  0x3d   : > { %3913 = vmatpush3.bf16.msra.mxu0 %v4020_v10  ;;  %3916 = vmatprep.mubr.msk.bf16.mxu0 %vm4061_vm0, %v4060_v1  ;;  %v1942_v42 = vrot.slane %v1935_v35, %v4142_v11  ;;  %v4440_v9 = vcombine.high %v2271_v58, %v2271_v58  ;;  %v2490_v55 = vpack.i.b16 %v1706_v32, %v933_v15 }
  0x3e   : > { %3909 = vmatmul.mubr.msk.bf16.vlgmr.msra.gmra.mxu1 %vm414_vm1, %v1757_v38  ;;  %3914 = vmatprep.subr.bf16.mxu0 %v4060_v1  ;;  %v2127_v52 = vcombine.low %v2112_v41, %v2119_v51  ;;  %v2299_v54 = vcombine.low %v4200_v60, %v3712_v45  ;;  %v2300_v22 = vcombine.low %v4342_v44, %v4428_v40 }
  0x3f   : > { %3921 = vmatpush3.bf16.msra.mxu1 %v4022_v27  ;;  %3924 = vmatprep.mubr.msk.bf16.mxu1 %vm4061_vm0, %v4060_v1  ;;  %v1950_v50 = vcombine.low %v1942_v42, %v1949_v48  ;;  %v2288_v7 = vunpack.i.l.s16 %v4440_v9  ;;  %v2483_v56 = vunpack.i.h.s16 %v4440_v9  ;;  %v4460_v59 = vpack.i.b16 %v4440_v9, %v2481_v47  ;;  %v3767_v42 = vld.sshfl [vmem:[%s4138_s8 + $0x14] sm:$0x12 pattern:$0x75316420]  ;;  %s264_s8 = scalar_lea.vmem %s4674_s3, %s3797_s12 }
  0x40   : > { %3922 = vmatprep.subr.bf16.mxu1 %v4060_v1  ;;  %v2134_v60 = vrot.slane %v2127_v52, %v4142_v11  ;;  %v2307_v4 = vrot.slane %v2299_v54, %v4142_v11  ;;  %v2494_v15 = vcombine.low %v4227_v23, %v2490_v55  ;;  %v2653_v32 = vcombine.high %v3737_v49, %v3737_v49  ;;  %v4025_v23 = vld [vmem:[%s4672_s1 + $0xa0] sm:$0xff]  }
  0x41   : > { %3915 = vmatpush3.bf16.msra.mxu0 %v4021_v34  ;;  %v2314_v63 = vrot.slane %v2300_v22, %v4142_v11  ;;  %v2321_v17 = vrot.slane %v2288_v7, %v4142_v11  ;;  %v2495_v2 = vcombine.low %v4312_v19, %v4460_v59  ;;  %v2516_v6 = vrot.slane %v2483_v56, %v4142_v11  ;;  %v4031_v7 = vld [vmem:[%s4672_s1 + $0xd0] sm:$0xff]  }
  0x42   : > { %3928 = vmatprep.subr.bf16.mxu0 %v4060_v1  ;;  %v2142_v3 = vcombine.low %v2134_v60, %v2141_v37  ;;  %v2502_v31 = vrot.slane %v2494_v15, %v4142_v11  ;;  %v2660_v13 = vrot.slane %v3737_v49, %v4142_v11  ;;  %v2667_v16 = vrot.slane %v2653_v32, %v4142_v11  ;;  %v4032_v60 = vld [vmem:[%s4672_s1 + $0xe8] sm:$0xff]  }
  0x43   : > { %3923 = vmatpush3.bf16.msra.mxu1 %v4023_v43  ;;  %v2322_v8 = vcombine.low %v2307_v4, %v2314_v63  ;;  %v2336_v10 = vrot.slane %v2321_v17, %v4142_v11  ;;  %v2509_v12 = vrot.slane %v2495_v2, %v4142_v11  ;;  %v2531_v14 = vrot.slane %v2516_v6, %v4142_v11  ;;  %v4030_v43 = vld [vmem:[%s4672_s1 + $0xd8] sm:$0xff]  }
  0x44   : > { %3917 = vmatmul.mubr.msk.bf16.vlgmr.msra.gmra.mxu0 %vm414_vm1, %v1950_v50  ;;  %3936 = vmatprep.subr.bf16.mxu1 %v4060_v1  ;;  %v3742_v21 = vpack.i.b16 %v4369_v61, %v4260_v46  ;;  %v2676_v26 = vunpack.i.l.s16 %v2667_v16  ;;  %v2688_v48 = vcombine.low %v4403_v24, %v2660_v13  ;;  %v2866_v30 = vunpack.i.h.s16 %v2660_v13  ;;  %v4029_v46 = vld [vmem:[%s4672_s1 + $0xc0] sm:$0xff]  }
  0x45   : > { %3929 = vmatpush3.bf16.msra.mxu0 %v4024_v53  ;;  %3932 = vmatprep.mubr.msk.bf16.mxu0 %vm4061_vm0, %v4060_v1  ;;  %v2329_v20 = vrot.slane %v2322_v8, %v4142_v11  ;;  %v2517_v27 = vcombine.low %v2502_v31, %v2509_v12  ;;  %v2868_v36 = vunpack.i.h.s16 %v2667_v16  ;;  %v3039_v52 = vcombine.high %v3767_v42, %v3767_v42 }
  0x46   : > { %3930 = vmatprep.subr.bf16.mxu0 %v4060_v1  ;;  %3925 = vmatmul.mubr.msk.bf16.vlgmr.msra.gmra.mxu1 %vm414_vm1, %v2142_v3  ;;  %v2687_v38 = vcombine.low %v4248_v39, %v3742_v21  ;;  %v2702_v41 = vrot.slane %v2688_v48, %v4142_v11  ;;  %v2709_v58 = vrot.slane %v2676_v26, %v4142_v11  ;;  %v4035_v21 = vld [vmem:[%s4672_s1 + $0xf0] sm:$0xff]  }
  0x47   : > { %3937 = vmatpush3.bf16.msra.mxu1 %v4026_v0  ;;  %3940 = vmatprep.mubr.msk.bf16.mxu1 %vm4061_vm0, %v4060_v1  ;;  %v2337_v34 = vcombine.low %v2329_v20, %v2336_v10  ;;  %v2524_v35 = vrot.slane %v2517_v27, %v4142_v11  ;;  %v2875_v39 = vpack.i.b16 %v2091_v5, %v1318_v57 }
  0x48   : > { %3938 = vmatprep.subr.bf16.mxu1 %v4060_v1  ;;  %v2695_v37 = vrot.slane %v2687_v38, %v4142_v11  ;;  %v3758_v51 = vpack.i.b16 %v2667_v16, %v2866_v30  ;;  %v2901_v45 = vrot.slane %v2868_v36, %v4142_v11  ;;  %v2724_v61 = vrot.slane %v2709_v58, %v4142_v11 }
  0x49   : > { %3931 = vmatpush3.bf16.msra.mxu0 %v4025_v23  ;;  %v2532_v24 = vcombine.low %v2524_v35, %v2531_v14  ;;  %v2879_v5 = vcombine.low %v4281_v29, %v2875_v39  ;;  %v3046_v55 = vrot.slane %v3767_v42, %v4142_v11  ;;  %v3772_v29 = vpack.i.b16 %v4428_v40, %v4312_v19 }
  0x4a   : > { %3944 = vmatprep.subr.bf16.mxu0 %v4060_v1  ;;  %v2710_v57 = vcombine.low %v2695_v37, %v2702_v41  ;;  %v2880_v49 = vcombine.low %v4372_v62, %v3758_v51  ;;  %v2916_v50 = vrot.slane %v2901_v45, %v4142_v11  ;;  %v3053_v22 = vrot.slane %v3039_v52, %v4142_v11 }
  0x4b   : > { %3939 = vmatpush3.bf16.msra.mxu1 %v4027_v25  ;;  %v2887_v54 = vrot.slane %v2879_v5, %v4142_v11  ;;  %v3054_v4 = vcombine.high %v3046_v55, %v3046_v55  ;;  %v3074_v15 = vcombine.low %v4310_v18, %v3772_v29  ;;  %v3265_v23 = vpack.i.b16 %v2481_v47, %v1708_v33  ;;  %v4034_v33 = vld [vmem:[%s4672_s1 + $0xf8] sm:$0xff]  }
  0x4c   : > { %3933 = vmatmul.mubr.msk.bf16.vlgmr.msra.gmra.mxu0 %vm414_vm1, %v2337_v34  ;;  %3952 = vmatprep.subr.bf16.mxu1 %v4060_v1  ;;  %v2717_v53 = vrot.slane %v2710_v57, %v4142_v11  ;;  %v2894_v62 = vrot.slane %v2880_v49, %v4142_v11  ;;  %v3075_v63 = vcombine.low %v4460_v59, %v3053_v22  ;;  %v3256_v17 = vunpack.i.h.s16 %v3053_v22  ;;  %v4033_v59 = vld [vmem:[%s4672_s1 + $0xe0] sm:$0xff]  }
  0x4d   : > { %3945 = vmatpush3.bf16.msra.mxu0 %v4028_v28  ;;  %3948 = vmatprep.mubr.msk.bf16.mxu0 %vm4061_vm0, %v4060_v1  ;;  %v3063_v0 = vunpack.i.l.s16 %v3054_v4  ;;  %v3082_v2 = vrot.slane %v3074_v15, %v4142_v11  ;;  %v3258_v3 = vunpack.i.h.s16 %v3054_v4  ;;  %v3269_v40 = vcombine.low %v4342_v44, %v3265_v23 }
  0x4e   : > { %3946 = vmatprep.subr.bf16.mxu0 %v4060_v1  ;;  %3941 = vmatmul.mubr.msk.bf16.vlgmr.msra.gmra.mxu1 %vm414_vm1, %v2532_v24  ;;  %v2725_v56 = vcombine.low %v2717_v53, %v2724_v61  ;;  %v2902_v32 = vcombine.low %v2887_v54, %v2894_v62  ;;  %v3089_v31 = vrot.slane %v3075_v63, %v4142_v11 }
  0x4f   : > { %3953 = vmatpush3.bf16.msra.mxu1 %v4030_v43  ;;  %3956 = vmatprep.mubr.msk.bf16.mxu1 %vm4061_vm0, %v4060_v1  ;;  %v3788_v6 = vpack.i.b16 %v3054_v4, %v3256_v17  ;;  %v3096_v19 = vrot.slane %v3063_v0, %v4142_v11  ;;  %v3291_v47 = vrot.slane %v3258_v3, %v4142_v11 }
  0x50   : > { %3954 = vmatprep.subr.bf16.mxu1 %v4060_v1  ;;  %v2909_v18 = vrot.slane %v2902_v32, %v4142_v11  ;;  %v3097_v10 = vcombine.low %v3082_v2, %v3089_v31  ;;  %v3277_v14 = vrot.slane %v3269_v40, %v4142_v11 }
  0x51   : > { %3947 = vmatpush3.bf16.msra.mxu0 %v4029_v46  ;;  %v3270_v12 = vcombine.low %v4440_v9, %v3788_v6  ;;  %v3111_v13 = vrot.slane %v3096_v19, %v4142_v11  ;;  %v3306_v25 = vrot.slane %v3291_v47, %v4142_v11 }
  0x52   : > { %3960 = vmatprep.subr.bf16.mxu0 %v4060_v1  ;;  %v2917_v8 = vcombine.low %v2909_v18, %v2916_v50  ;;  %v3104_v16 = vrot.slane %v3097_v10, %v4142_v11 }
  0x53   : > { %3955 = vmatpush3.bf16.msra.mxu1 %v4031_v7  ;;  %v3284_v44 = vrot.slane %v3270_v12, %v4142_v11 }
  0x54   : > { %3949 = vmatmul.mubr.msk.bf16.vlgmr.msra.gmra.mxu0 %vm414_vm1, %v2725_v56  ;;  %3968 = vmatprep.subr.bf16.mxu1 %v4060_v1  ;;  %v3112_v20 = vcombine.low %v3104_v16, %v3111_v13 }
  0x55   : > { %3961 = vmatpush3.bf16.msra.mxu0 %v4032_v60  ;;  %3964 = vmatprep.mubr.msk.bf16.mxu0 %vm4061_vm0, %v4060_v1  ;;  %v3292_v9 = vcombine.low %v3277_v14, %v3284_v44 }
  0x56   : > { %3962 = vmatprep.subr.bf16.mxu0 %v4060_v1  ;;  %3957 = vmatmul.mubr.msk.bf16.vlgmr.msra.gmra.mxu1 %vm414_vm1, %v2917_v8 }
  0x57   : > { %3969 = vmatpush3.bf16.msra.mxu1 %v4034_v33  ;;  %3972 = vmatprep.mubr.msk.bf16.mxu1 %vm4061_vm0, %v4060_v1  ;;  %v3299_v27 = vrot.slane %v3292_v9, %v4142_v11 }
  0x58   : > { %3970 = vmatprep.subr.bf16.mxu1 %v4060_v1 }
  0x59   : > { %3963 = vmatpush3.bf16.msra.mxu0 %v4033_v59  ;;  %v3307_v28 = vcombine.low %v3299_v27, %v3306_v25 }
  0x5b   : > { %3971 = vmatpush3.bf16.msra.mxu1 %v4035_v21 }
  0x5c   : > { %3965 = vmatmul.mubr.msk.bf16.vlgmr.msra.gmra.mxu0 %vm414_vm1, %v3112_v20 }
  0x5e   : > { %3973 = vmatmul.mubr.msk.bf16.vlgmr.msra.gmra.mxu1 %vm414_vm1, %v3307_v28 }
  0xe4   : > { %v452_v26 = vpop.f32.mrf.mxu0 }
  0xe5   : > { %460 = vst.msk [vmem:[#allocation2] sm:$0xff] %vm459_vm2, %v452_v26 }
  0xe6   : > { %v3854_v38 = vpop.f32.mrf.mxu0  ;;  %v642_v48 = vpop.f32.mrf.mxu1 }
  0xe8   : > { %v455_v30 = vpop.f32.mrf.mxu0  ;;  %v3862_v34 = vpop.f32.mrf.mxu1 }
  0xe9   : > { %462 = vst.msk [vmem:[#allocation2 + $0x8] sm:$0x1] %vm461_vm3, %v455_v30 }
  0xea   : > { %v3855_v35 = vpop.f32.mrf.mxu0  ;;  %v645_v36 = vpop.f32.mrf.mxu1 }
  0xec   : > { %v649_v37 = vld [vmem:[#allocation2] sm:$0xff]  ;;  %v3863_v41 = vpop.f32.mrf.mxu1  ;;  %v837_v58 = vpop.f32.mrf.mxu0 }
  0xed   : > { %v651_v11 = vadd.f32 %v649_v37, %v642_v48 }
  0xee   : > { %v3870_v39 = vpop.f32.mrf.mxu0  ;;  %v1032_v42 = vpop.f32.mrf.mxu1 }
  0xef   : > { %653 = vst.msk [vmem:[#allocation2] sm:$0xff] %vm459_vm2, %v651_v11 }
  0xf0   : > { %v650_v24 = vld [vmem:[#allocation2 + $0x8] sm:$0x1]  ;;  %v840_v51 = vpop.f32.mrf.mxu0  ;;  %v3878_v45 = vpop.f32.mrf.mxu1 }
  0xf1   : > { %v652_v43 = vadd.f32 %v650_v24, %v645_v36 }
  0xf2   : > { %v3871_v46 = vpop.f32.mrf.mxu0  ;;  %v1035_v57 = vpop.f32.mrf.mxu1 }
  0xf3   : > { %654 = vst.msk [vmem:[#allocation2 + $0x8] sm:$0x1] %vm461_vm3, %v652_v43 }
  0xf4   : > { %v3879_v61 = vpop.f32.mrf.mxu1  ;;  %v1225_v5 = vpop.f32.mrf.mxu0 }
  0xf6   : > { %v844_v49 = vld [vmem:[#allocation2] sm:$0xff]  ;;  %v3886_v52 = vpop.f32.mrf.mxu0  ;;  %v1417_v53 = vpop.f32.mrf.mxu1 }
  0xf7   : > { %v846_v50 = vadd.f32 %v844_v49, %v837_v58 }
  0xf8   : > { %v1228_v54 = vpop.f32.mrf.mxu0  ;;  %v3894_v55 = vpop.f32.mrf.mxu1 }
  0xf9   : > { %848 = vst.msk [vmem:[#allocation2] sm:$0xff] %vm459_vm2, %v846_v50 }
  0xfa   : > { %v845_v29 = vld [vmem:[#allocation2 + $0x8] sm:$0x1]  ;;  %v3887_v62 = vpop.f32.mrf.mxu0  ;;  %v1420_v22 = vpop.f32.mrf.mxu1 }
  0xfb   : > { %v847_v7 = vadd.f32 %v845_v29, %v840_v51 }
  0xfc   : > { %v3895_v56 = vpop.f32.mrf.mxu1  ;;  %v1612_v60 = vpop.f32.mrf.mxu0 }
  0xfd   : > { %849 = vst.msk [vmem:[#allocation2 + $0x8] sm:$0x1] %vm461_vm3, %v847_v7 }
  0xfe   : > { %v3902_v4 = vpop.f32.mrf.mxu0  ;;  %v4591_v15 = vpop.f32.mrf.mxu1 }
 0x100   : > { %v1039_v32 = vld [vmem:[#allocation2] sm:$0xff]  ;;  %v1615_v17 = vpop.f32.mrf.mxu0  ;;  %v3910_v0 = vpop.f32.mrf.mxu1 }
 0x101   : > { %v1041_v63 = vadd.f32 %v1039_v32, %v1032_v42 }
 0x102   : > { %v3903_v2 = vpop.f32.mrf.mxu0  ;;  %v4594_v3 = vpop.f32.mrf.mxu1 }
 0x103   : > { %1043 = vst.msk [vmem:[#allocation2] sm:$0xff] %vm459_vm2, %v1041_v63 }
 0x104   : > { %v1040_v23 = vld [vmem:[#allocation2 + $0x8] sm:$0x1]  ;;  %v3911_v31 = vpop.f32.mrf.mxu1  ;;  %v2000_v6 = vpop.f32.mrf.mxu0 }
 0x105   : > { %v1042_v18 = vadd.f32 %v1040_v23, %v1035_v57 }
 0x106   : > { %v3918_v59 = vpop.f32.mrf.mxu0  ;;  %v4609_v19 = vpop.f32.mrf.mxu1 }
 0x107   : > { %1044 = vst.msk [vmem:[#allocation2 + $0x8] sm:$0x1] %vm461_vm3, %v1042_v18 }
 0x108   : > { %v2003_v33 = vpop.f32.mrf.mxu0  ;;  %v3926_v47 = vpop.f32.mrf.mxu1 }
 0x10a   : > { %v1232_v40 = vld [vmem:[#allocation2] sm:$0xff]  ;;  %v3919_v10 = vpop.f32.mrf.mxu0  ;;  %v2195_v12 = vpop.f32.mrf.mxu1 }
 0x10b   : > { %v1234_v8 = vadd.f32 %v1232_v40, %v1225_v5 }
 0x10c   : > { %v2387_v13 = vpop.f32.mrf.mxu0  ;;  %v3927_v16 = vpop.f32.mrf.mxu1 }
 0x10d   : > { %1236 = vst.msk [vmem:[#allocation2] sm:$0xff] %vm459_vm2, %v1234_v8 }
 0x10e   : > { %v1233_v14 = vld [vmem:[#allocation2 + $0x8] sm:$0x1]  ;;  %v3934_v21 = vpop.f32.mrf.mxu0  ;;  %v2582_v20 = vpop.f32.mrf.mxu1 }
 0x10f   : > { %v1235_v44 = vadd.f32 %v1233_v14, %v1228_v54 }
 0x110   : > { %v2390_v9 = vpop.f32.mrf.mxu0  ;;  %v3942_v25 = vpop.f32.mrf.mxu1 }
 0x111   : > { %1237 = vst.msk [vmem:[#allocation2 + $0x8] sm:$0x1] %vm461_vm3, %v1235_v44  ;;  %v3792_v25 = vld [vmem:[%s4673_s2] ss:$0 sm:$0xff] }
 0x112   : > { %v3935_v27 = vpop.f32.mrf.mxu0  ;;  %v2585_v28 = vpop.f32.mrf.mxu1 }
 0x114   : > { %v1424_v1 = vld [vmem:[#allocation2] sm:$0xff]  ;;  %v2775_v38 = vpop.f32.mrf.mxu0  ;;  %v3943_v48 = vpop.f32.mrf.mxu1 }
 0x115   : > { %v1426_v26 = vadd.f32 %v1424_v1, %v1417_v53 }
 0x116   : > { %v3950_v30 = vpop.f32.mrf.mxu0  ;;  %v2967_v37 = vpop.f32.mrf.mxu1 }
 0x117   : > { %1428 = vst.msk [vmem:[#allocation2] sm:$0xff] %vm459_vm2, %v1426_v26  ;;  %v3394_v30 = vld [vmem:[%s264_s8 + $0x4] sm:$0x1] }
 0x118   : > { %v1425_v34 = vld [vmem:[#allocation2 + $0x8] sm:$0x1]  ;;  %v2778_v36 = vpop.f32.mrf.mxu0  ;;  %v3958_v11 = vpop.f32.mrf.mxu1 }
 0x119   : > { %v1427_v35 = vadd.f32 %v1425_v34, %v1420_v22 }
 0x11a   : > { %v3951_v41 = vpop.f32.mrf.mxu0  ;;  %v2970_v58 = vpop.f32.mrf.mxu1 }
 0x11b   : > { %1429 = vst.msk [vmem:[#allocation2 + $0x8] sm:$0x1] %vm461_vm3, %v1427_v35 }
 0x11c   : > { %v3162_v39 = vpop.f32.mrf.mxu0  ;;  %v3959_v43 = vpop.f32.mrf.mxu1 }
 0x11e   : > { %v1619_v42 = vld [vmem:[#allocation2] sm:$0xff]  ;;  %v3966_v51 = vpop.f32.mrf.mxu0  ;;  %v3357_v46 = vpop.f32.mrf.mxu1 }
 0x11f   : > { %v1621_v24 = vadd.f32 %v1619_v42, %v1612_v60 }
 0x120   : > { %v3165_v45 = vpop.f32.mrf.mxu0  ;;  %v3974_v49 = vpop.f32.mrf.mxu1 }
 0x121   : > { %1623 = vst.msk [vmem:[#allocation2] sm:$0xff] %vm459_vm2, %v1621_v24 }
 0x122   : > { %v1620_v57 = vld [vmem:[#allocation2 + $0x8] sm:$0x1]  ;;  %v3967_v5 = vpop.f32.mrf.mxu0  ;;  %v3360_v50 = vpop.f32.mrf.mxu1 }
 0x123   : > { %v1622_v61 = vadd.f32 %v1620_v57, %v1615_v17 }
 0x124   : > { %v3975_v52 = vpop.f32.mrf.mxu1 }
 0x125   : > { %1624 = vst.msk [vmem:[#allocation2 + $0x8] sm:$0x1] %vm461_vm3, %v1622_v61 }
 0x128   : > { %v1814_v53 = vld [vmem:[#allocation2] sm:$0xff] }
 0x129   : > { %v1816_v54 = vadd.f32 %v1814_v53, %v4591_v15 }
 0x12b   : > { %1818 = vst.msk [vmem:[#allocation2] sm:$0xff] %vm459_vm2, %v1816_v54  ;;  %v3415_v54 = vld [vmem:[%s4607_s9] sm:$0x1] }
 0x12c   : > { %v1815_v55 = vld [vmem:[#allocation2 + $0x8] sm:$0x1] }
 0x12d   : > { %v1817_v29 = vadd.f32 %v1815_v55, %v4594_v3 }
 0x12f   : > { %1819 = vst.msk [vmem:[#allocation2 + $0x8] sm:$0x1] %vm461_vm3, %v1817_v29 }
 0x132   : > { %v2007_v7 = vld [vmem:[#allocation2] sm:$0xff] }
 0x133   : > { %v2009_v62 = vadd.f32 %v2007_v7, %v2000_v6 }
 0x135   : > { %2011 = vst.msk [vmem:[#allocation2] sm:$0xff] %vm459_vm2, %v2009_v62 }
 0x136   : > { %v2008_v22 = vld [vmem:[#allocation2 + $0x8] sm:$0x1] }
 0x137   : > { %v2010_v56 = vadd.f32 %v2008_v22, %v2003_v33 }
 0x139   : > { %2012 = vst.msk [vmem:[#allocation2 + $0x8] sm:$0x1] %vm461_vm3, %v2010_v56 }
 0x13c   : > { %v2199_v60 = vld [vmem:[#allocation2] sm:$0xff] }
 0x13d   : > { %v2201_v4 = vadd.f32 %v2199_v60, %v4609_v19 }
 0x13f   : > { %2203 = vst.msk [vmem:[#allocation2] sm:$0xff] %vm459_vm2, %v2201_v4 }
 0x140   : > { %v2200_v15 = vld [vmem:[#allocation2 + $0x8] sm:$0x1] }
 0x141   : > { %v2202_v32 = vadd.f32 %v2200_v15, %v2195_v12 }
 0x143   : > { %2204 = vst.msk [vmem:[#allocation2 + $0x8] sm:$0x1] %vm461_vm3, %v2202_v32 }
 0x146   : > { %v2394_v63 = vld [vmem:[#allocation2] sm:$0xff] }
 0x147   : > { %v2396_v17 = vadd.f32 %v2394_v63, %v2387_v13 }
 0x149   : > { %2398 = vst.msk [vmem:[#allocation2] sm:$0xff] %vm459_vm2, %v2396_v17 }
 0x14a   : > { %v2395_v0 = vld [vmem:[#allocation2 + $0x8] sm:$0x1] }
 0x14b   : > { %v2397_v2 = vadd.f32 %v2395_v0, %v2390_v9 }
 0x14d   : > { %2399 = vst.msk [vmem:[#allocation2 + $0x8] sm:$0x1] %vm461_vm3, %v2397_v2 }
 0x150   : > { %v2589_v3 = vld [vmem:[#allocation2] sm:$0xff] }
 0x151   : > { %v2591_v23 = vadd.f32 %v2589_v3, %v2582_v20 }
 0x153   : > { %2593 = vst.msk [vmem:[#allocation2] sm:$0xff] %vm459_vm2, %v2591_v23 }
 0x154   : > { %v2590_v18 = vld [vmem:[#allocation2 + $0x8] sm:$0x1] }
 0x155   : > { %v2592_v31 = vadd.f32 %v2590_v18, %v2585_v28 }
 0x157   : > { %2594 = vst.msk [vmem:[#allocation2 + $0x8] sm:$0x1] %vm461_vm3, %v2592_v31 }
 0x15a   : > { %v2782_v6 = vld [vmem:[#allocation2] sm:$0xff] }
 0x15b   : > { %v2784_v59 = vadd.f32 %v2782_v6, %v2775_v38 }
 0x15d   : > { %2786 = vst.msk [vmem:[#allocation2] sm:$0xff] %vm459_vm2, %v2784_v59 }
 0x15e   : > { %v2783_v19 = vld [vmem:[#allocation2 + $0x8] sm:$0x1] }
 0x15f   : > { %v2785_v33 = vadd.f32 %v2783_v19, %v2778_v36 }
 0x161   : > { %2787 = vst.msk [vmem:[#allocation2 + $0x8] sm:$0x1] %vm461_vm3, %v2785_v33 }
 0x164   : > { %v2974_v40 = vld [vmem:[#allocation2] sm:$0xff] }
 0x165   : > { %v2976_v47 = vadd.f32 %v2974_v40, %v2967_v37 }
 0x167   : > { %2978 = vst.msk [vmem:[#allocation2] sm:$0xff] %vm459_vm2, %v2976_v47 }
 0x168   : > { %v2975_v8 = vld [vmem:[#allocation2 + $0x8] sm:$0x1] }
 0x169   : > { %v2977_v10 = vadd.f32 %v2975_v8, %v2970_v58 }
 0x16b   : > { %2979 = vst.msk [vmem:[#allocation2 + $0x8] sm:$0x1] %vm461_vm3, %v2977_v10 }
 0x16e   : > { %v3169_v12 = vld [vmem:[#allocation2] sm:$0xff] }
 0x16f   : > { %v3171_v13 = vadd.f32 %v3169_v12, %v3162_v39 }
 0x171   : > { %3173 = vst.msk [vmem:[#allocation2] sm:$0xff] %vm459_vm2, %v3171_v13 }
 0x172   : > { %v3170_v14 = vld [vmem:[#allocation2 + $0x8] sm:$0x1] }
 0x173   : > { %v3172_v16 = vadd.f32 %v3170_v14, %v3165_v45 }
 0x175   : > { %3174 = vst.msk [vmem:[#allocation2 + $0x8] sm:$0x1] %vm461_vm3, %v3172_v16 }
 0x178   : > { %v3364_v44 = vld [vmem:[#allocation2] sm:$0xff] }
 0x179   : > { %v3366_v21 = vadd.f32 %v3364_v44, %v3357_v46 }
 0x17b   : > { %3368 = vst.msk [vmem:[#allocation2] sm:$0xff] %vm459_vm2, %v3366_v21 }
 0x17c   : > { %v3365_v20 = vld [vmem:[#allocation2 + $0x8] sm:$0x1] }
 0x17d   : > { %v3367_v9 = vadd.f32 %v3365_v20, %v3360_v50  ;;  %v3403_v50 = vld [vmem:[%s4601_s30] sm:$0x1] }
 0x17f   : > { %3369 = vst.msk [vmem:[#allocation2 + $0x8] sm:$0x1] %vm461_vm3, %v3367_v9 }
 0x182   : > { %v3370_v27 = vld [vmem:[#allocation2] sm:$0xff] }
 0x183   : > { %v3379_v1 = vadd.f32 %v3792_v25, %v3370_v27 }
 0x185   : > { %v3798_v28 = vpack.c.bf16 %v3379_v1, %v3379_v1  ;;  %v3416_v38 = vmul.f32 %v3379_v1, %v3379_v1  ;;  %v3404_v34 = vsel %vm459_vm2, %v3379_v1, 0.0 }
 0x186   : > { %v3371_v26 = vld [vmem:[#allocation2 + $0x8] sm:$0x1] }
 0x187   : > { %3390 = vst.msk [vmem:[%s264_s8] sm:$0xf] %vm3389_vm4, %v3798_v28  ;;  %v3380_v48 = vadd.f32 %v3792_v25, %v3371_v26  ;;  %v3418_v11 = vsel %vm459_vm2, %v3416_v38, 0.0 }
 0x189   : > { %v3799_v35 = vpack.c.bf16 %v3380_v48, %v3380_v48  ;;  %v3405_v36 = vsel %vm461_vm3, %v3380_v48, 0.0  ;;  %v3417_v37 = vmul.f32 %v3380_v48, %v3380_v48 }
 0x18a   : > { %v3406_v41 = vadd.f32 %v3405_v36, %v3404_v34 }
 0x18b   : > { %v3395_v58 = vsel %vm3393_vm6, %v3799_v35, %v3394_v30  ;;  %v3419_v39 = vsel %vm461_vm3, %v3417_v37, 0.0 }
 0x18c   : > { %3396 = vst [vmem:[%s264_s8 + $0x4] sm:$0x1] %v3395_v58  ;;  %v3407_v42 = vrot.slane %v3406_v41, 4  ;;  %v3420_v24 = vadd.f32 %v3419_v39, %v3418_v11 }
 0x18e   : > { %v3408_v43 = vadd.f32 %v3407_v42, %v3406_v41  ;;  %v3421_v51 = vrot.slane %v3420_v24, 4 }
 0x190   : > { %v3409_v45 = vrot.slane %v3408_v43, 2  ;;  %v3422_v46 = vadd.f32 %v3421_v51, %v3420_v24 }
 0x192   : > { %v3410_v57 = vadd.f32 %v3409_v45, %v3408_v43  ;;  %v3423_v61 = vrot.slane %v3422_v46, 2 }
 0x194   : > { %v3411_v5 = vrot.slane %v3410_v57, 1  ;;  %v3424_v49 = vadd.f32 %v3423_v61, %v3422_v46 }
 0x196   : > { %v3412_v52 = vadd.f32 %v3411_v5, %v3410_v57  ;;  %v3425_v53 = vrot.slane %v3424_v49, 1 }
 0x198   : > { %v3413_v55 = vadd.f32 %v3412_v52, %v3403_v50  ;;  %v3426_v29 = vadd.f32 %v3425_v53, %v3424_v49 }
 0x19a   : > { %3414 = vst.msk [vmem:[%s4601_s30] sm:$0x1] %vm461_vm3, %v3413_v55  ;;  %v3427_v7 = vadd.f32 %v3426_v29, %v3415_v54 }
 0x19c   : > { %3428 = vst.msk [vmem:[%s4607_s9] sm:$0x1] %vm461_vm3, %v3427_v7 }
 0x19d PF: > { %s16_s20 = sadd.s32 1, %s4058_s20   ;;  %s4677_s18 = smov %s4054_s19 }
 0x19e   : > { %p13_p5 = scmp.ge.s32.totalorder %s16_s20, 4   ;;  %s4678_s19 = smov %s4680_s21 }
 0x1a0   :  { %15 = sbr.rel (!%p13_p5) target bundleno = 2 (0x2), region = 108 }

// kernel: cyclegan_discriminator.15
= control target key start
LH: loop header
LB: loop body
LE: loop exit
PB: predicated region body
PF: predicated region fallthrough
CT: control target
= control target key end

     0   :  { %s3168_s12 = smov 0   ;;  %s3170_s13 = smov 0   ;;  %s3677_s0 = inlined_call_operand.vmem [shape: bf16[2,5,5,64], index: 0, kind: input, shape index: {}]   ;;  %s3678_s1 = inlined_call_operand.vmem [shape: bf16[16,64,8], index: 1, kind: input, shape index: {}]   ;;  %s3679_s2 = inlined_call_operand.vmem [shape: f32[1,8], index: 2, kind: input, shape index: {}]   ;;  %s3680_s3 = inlined_call_operand.vmem [shape: f32[2,1,8], index: 3, kind: output, shape index: {}]  }
   0x1   :  { %s3172_s14 = smov 0  }
   0x2 LB: > { %s25_s15 = sadd.s32 1, %s3139_s13  ;;  %p2481_p0 = scmp.ge.s32.totalorder %s3143_s14, 1  ;;  %s3143_s14 = sphi %s3172_s14, %s13_s14   ;;  %s3139_s13 = sphi %s3170_s13, %s3684_s13   ;;  %s3135_s12 = sphi %s3168_s12, %s3683_s12  }
   0x3   : > { %p27_p1 = scmp.ge.s32.totalorder %s25_s15, 2  ;;  %p153_p2 = scmp.lt.s32.totalorder %s3143_s14, 3 }
   0x5   : > { %s3686_s15 = smov (%p27_p1, %s25_s15), 0  ;;  %p154_p3 = pnand %p2481_p0, %p153_p2 }
   0x6   : > { %p177_p4 = scmp.lt.s32.totalorder (!%p154_p3), %s3135_s12, 1 }
   0x7   : > { %157 = sbr.rel (%p154_p3) target bundleno = 408 (0x198), region = 32 }
   0xc   : > { %v3049_v0 = vld [vmem:[%s3678_s1 + $0x18] sm:$0xff]   ;;  %v3145_v1 = vmov 0.0   ;;  %v3051_v3 = vld [vmem:[%s3678_s1 + $0x10] sm:$0xff]   ;;  %vm3146_vm0 = vmmov 0   ;;  %s3688_s12 = smov (!%p177_p4, %s3135_s12), 1  ;;  %v203_v5 = vlaneseq  ;;  %v3053_v6 = vld [vmem:[%s3678_s1 + $0x8] sm:$0xff]  }
   0xd   : > { %2829 = vmatprep.subr.bf16.mxu0 %v3145_v1  ;;  %2841 = vmatprep.subr.bf16.mxu1 %v3145_v1  ;;  %v3050_v2 = vld [vmem:[%s3678_s1 + $0x38] sm:$0xff]   ;;  %v3052_v4 = vld [vmem:[%s3678_s1 + $0x30] sm:$0xff]   ;;  %v3054_v7 = vld [vmem:[%s3678_s1 + $0x28] sm:$0xff]   ;;  %s3021_s28 = smul.u32 20, %s3688_s12  ;;  %v3147_v9 = vmov 1966171168   ;;  %s3640_s16 = scalar_lea.vmem %s3680_s3, %s3688_s12 }
   0xe   : > { %2830 = vmatpush3.bf16.msra.mxu0 %v3049_v0  ;;  %2837 = vmatprep.mubr.msk.bf16.mxu0 %vm3146_vm0, %v3145_v1  ;;  %v3055_v8 = vld [vmem:[%s3678_s1] sm:$0xff]   ;;  %v201_v10 = vunpack.c.l.s4 %v3147_v9  ;;  %v204_v11 = vshrl.u32 %v203_v5, 7  ;;  %vm238_vm1 = vcmask 523264   ;;  %vm332_vm2 = vsmask.f32 256  ;;  %v3058_v20 = vld [vmem:[%s3678_s1 + $0x58] sm:$0xff]  }
   0xf   : > { %2831 = vmatprep.subr.bf16.mxu0 %v3145_v1  ;;  %2842 = vmatpush3.bf16.msra.mxu1 %v3050_v2  ;;  %s3223_s6 = scalar_lea.vmem %s3677_s0, %s3021_s28  ;;  %v3057_v12 = vld [vmem:[%s3678_s1 + $0x20] sm:$0xff]   ;;  %vm333_vm3 = vsmask.f32 1284  ;;  %vm335_vm4 = vsmask.f32 2312  ;;  %v3059_v31 = vld [vmem:[%s3678_s1 + $0x50] sm:$0xff]  }
  0x10   : > { %2843 = vmatprep.subr.bf16.mxu1 %v3145_v1  ;;  %2849 = vmatprep.mubr.msk.bf16.mxu1 %vm3146_vm0, %v3145_v1  ;;  %v3117_v13 = vld.sshfl [vmem:[%s3223_s6] sm:$0x5 pattern:$0x75316420]  ;;  %v202_v14 = vunpack.c.0.s8 %v201_v10  ;;  %vm334_vm5 = vmor %vm332_vm2, %vm333_vm3  ;;  %vm337_vm6 = vsmask.f32 3340 }
  0x11   : > { %v2488_v15 = vld.sshfl [vmem:[%s3223_s6] sm:$0x11 pattern:$0x75316420]  ;;  %vm339_vm7 = vsmask.f32 4368  ;;  %vm336_vm9 = vmor %vm334_vm5, %vm335_vm4 }
  0x12   : > { %2832 = vmatpush3.bf16.msra.mxu0 %v3051_v3  ;;  %v2489_v16 = vld.sshfl [vmem:[%s3223_s6 + $0x4] sm:$0x11 pattern:$0x75316420]  ;;  %v295_v17 = vcombine.high %v2488_v15, %v2488_v15  ;;  %v3233_v18 = vsub.s32 %v202_v14, %v204_v11  ;;  %vm341_vm8 = vsmask.f32 5396  ;;  %vm338_vm10 = vmor %vm336_vm9, %vm337_vm6 }
  0x13   : > { %2833 = vmatprep.subr.bf16.mxu0 %v3145_v1  ;;  %2844 = vmatpush3.bf16.msra.mxu1 %v3052_v4  ;;  %v317_v19 = vcombine.high %v2489_v16, %v2489_v16  ;;  %vm343_vm11 = vsmask.f32 6424  ;;  %vm345_vm12 = vsmask.f32 7452  ;;  %vm340_vm13 = vmor %vm338_vm10, %vm339_vm7  ;;  %v3060_v37 = vld [vmem:[%s3678_s1 + $0x78] sm:$0xff]   ;;  %v3061_v38 = vld [vmem:[%s3678_s1 + $0x48] sm:$0xff]  }
  0x14   : > { %2845 = vmatprep.subr.bf16.mxu1 %v3145_v1  ;;  %v302_v21 = vrot.slane %v2488_v15, %v3233_v18  ;;  %v309_v22 = vrot.slane %v295_v17, %v3233_v18  ;;  %v324_v23 = vrot.slane %v2489_v16, %v3233_v18  ;;  %v213_v25 = vrot.slane %v3117_v13, %v3233_v18  ;;  %vm342_vm14 = vmor %vm340_vm13, %vm341_vm8  ;;  %v2505_v35 = vld.sshfl [vmem:[%s3223_s6] sm:$0x10 pattern:$0x75316420]  ;;  %v3062_v46 = vld [vmem:[%s3678_s1 + $0x70] sm:$0xff]  }
  0x15   : > { %v331_v24 = vrot.slane %v317_v19, %v3233_v18  ;;  %vm344_vm15 = vmor %vm342_vm14, %vm343_vm11  ;;  %v2506_v39 = vld.sshfl [vmem:[%s3223_s6 + $0x4] sm:$0x10 pattern:$0x75316420]  ;;  %v470_v40 = vcombine.high %v2505_v35, %v2505_v35  ;;  %v3064_v59 = vld [vmem:[%s3678_s1 + $0x68] sm:$0xff]  }
  0x16   : > { %2834 = vmatpush3.bf16.msra.mxu0 %v3053_v6  ;;  %v348_v26 = vshrl.u32 %v302_v21, 16  ;;  %v353_v27 = vshll.u32 %v309_v22, 16  ;;  %v357_v28 = vshrl.u32 %v324_v23, 16  ;;  %vm3247_vm2 = vmor %vm344_vm15, %vm345_vm12  ;;  %v485_v41 = vcombine.high %v2506_v39, %v2506_v39  ;;  %v3063_v47 = vld [vmem:[%s3678_s1 + $0x40] sm:$0xff]   ;;  %v3065_v60 = vld [vmem:[%s3678_s1 + $0x98] sm:$0xff]  }
  0x17   : > { %2835 = vmatprep.subr.bf16.mxu0 %v3145_v1  ;;  %2846 = vmatpush3.bf16.msra.mxu1 %v3054_v7  ;;  %v362_v29 = vshll.u32 %v331_v24, 16  ;;  %v477_v43 = vrot.slane %v470_v40, %v3233_v18  ;;  %v2520_v45 = vld.sshfl [vmem:[%s3223_s6] sm:$0x12 pattern:$0x75316420]  ;;  %v3067_v5 = vld [vmem:[%s3678_s1 + $0x90] sm:$0xff]  }
  0x18   : > { %2847 = vmatprep.subr.bf16.mxu1 %v3145_v1  ;;  %v355_v32 = vsel %vm3247_vm2, %v348_v26, %v353_v27  ;;  %v3277_v44 = vrot.slane %v485_v41, %v3233_v18  ;;  %v2521_v48 = vld.sshfl [vmem:[%s3223_s6 + $0x4] sm:$0x12 pattern:$0x75316420]  ;;  %v598_v49 = vcombine.high %v2520_v45, %v2520_v45  ;;  %v605_v50 = vrot.slane %v2520_v45, %v3233_v18  ;;  %v3068_v14 = vld [vmem:[%s3678_s1 + $0x88] sm:$0xff]   ;;  %v3069_v16 = vld [vmem:[%s3678_s1 + $0xb8] sm:$0xff]  }
  0x19   : > { %v3260_v33 = vsel %vm3247_vm2, %v357_v28, %v362_v29  ;;  %v621_v52 = vcombine.high %v2521_v48, %v2521_v48  ;;  %v628_v53 = vrot.slane %v2521_v48, %v3233_v18  ;;  %v3066_v7 = vld [vmem:[%s3678_s1 + $0x60] sm:$0xff]   ;;  %v3071_v22 = vld [vmem:[%s3678_s1 + $0xb0] sm:$0xff]   ;;  %v2591_v24 = vld.sshfl [vmem:[%s3223_s6 + $0x8] sm:$0x12 pattern:$0x75316420] }
  0x1a   : > { %2836 = vmatpush3.bf16.msra.mxu0 %v3055_v8  ;;  %v374_v34 = vcombine.low %v355_v32, %v3260_v33  ;;  %v502_v51 = vcombine.low %v477_v43, %v3277_v44  ;;  %v612_v54 = vrot.slane %v598_v49, %v3233_v18  ;;  %v613_v55 = vcombine.high %v605_v50, %v605_v50  ;;  %v2555_v8 = vld.sshfl [vmem:[%s3223_s6 + $0x8] sm:$0x11 pattern:$0x75316420]  ;;  %v3070_v21 = vld [vmem:[%s3678_s1 + $0x80] sm:$0xff]   ;;  %v3074_v27 = vld [vmem:[%s3678_s1 + $0xd8] sm:$0xff]  }
  0x1b   : > { %2848 = vmatpush3.bf16.msra.mxu1 %v3057_v12  ;;  %2853 = vmatprep.subr.bf16.mxu0 %v3145_v1  ;;  %v635_v57 = vrot.slane %v621_v52, %v3233_v18  ;;  %v636_v58 = vcombine.high %v628_v53, %v628_v53  ;;  %v881_v10 = vcombine.high %v2555_v8, %v2555_v8  ;;  %v3118_v12 = vld.sshfl [vmem:[%s3223_s6 + $0x4] sm:$0x5 pattern:$0x75316420]  ;;  %v3076_v35 = vld [vmem:[%s3678_s1 + $0xd0] sm:$0xff]  }
  0x1c   : > { %2865 = vmatprep.subr.bf16.mxu1 %v3145_v1  ;;  %v381_v36 = vrot.slane %v374_v34, %v3233_v18  ;;  %v509_v56 = vrot.slane %v502_v51, %v3233_v18  ;;  %v638_v61 = vshrl.u32 %v612_v54, 16  ;;  %v643_v62 = vshll.u32 %v613_v55, 16  ;;  %v3073_v29 = vld [vmem:[%s3678_s1 + $0xa8] sm:$0xff]   ;;  %v3075_v34 = vld [vmem:[%s3678_s1 + $0xa0] sm:$0xff]   ;;  %v3080_v48 = vld [vmem:[%s3678_s1 + $0xf0] sm:$0xff]  }
  0x1d   : > { %2838 = vmatmul.mubr.msk.bf16.vlgmr.msra.gmra.mxu0 %vm238_vm1, %v213_v25  ;;  %v647_v0 = vshrl.u32 %v635_v57, 16  ;;  %v652_v2 = vshll.u32 %v636_v58, 16  ;;  %v888_v11 = vrot.slane %v2555_v8, %v3233_v18  ;;  %v895_v15 = vrot.slane %v881_v10, %v3233_v18  ;;  %v3077_v41 = vld [vmem:[%s3678_s1 + $0xc8] sm:$0xff]   ;;  %v3082_v51 = vld [vmem:[%s3678_s1 + $0x118] sm:$0xff]   ;;  %v3084_v55 = vld [vmem:[%s3678_s1 + $0x110] sm:$0xff]  }
  0x1e   : > { %2854 = vmatpush3.bf16.msra.mxu0 %v3058_v20  ;;  %2861 = vmatprep.mubr.msk.bf16.mxu0 %vm3146_vm0, %v3145_v1  ;;  %v388_v42 = vrot.slane %v381_v36, %v3233_v18  ;;  %v516_v63 = vrot.slane %v509_v56, %v3233_v18  ;;  %v645_v3 = vsel %vm3247_vm2, %v638_v61, %v643_v62  ;;  %v2574_v20 = vld.sshfl [vmem:[%s3223_s6 + $0x8] sm:$0x10 pattern:$0x75316420]  ;;  %v3083_v57 = vld [vmem:[%s3678_s1 + $0xe0] sm:$0xff]   ;;  %v3091_v10 = vld [vmem:[%s3678_s1 + $0x158] sm:$0xff]  }
  0x1f   : > { %2855 = vmatprep.subr.bf16.mxu0 %v3145_v1  ;;  %v3312_v4 = vsel %vm3247_vm2, %v647_v0, %v652_v2  ;;  %v906_v17 = vshrl.u32 %v888_v11, 16  ;;  %v911_v19 = vshll.u32 %v895_v15, 16  ;;  %v777_v25 = vrot.slane %v3118_v12, %v3233_v18  ;;  %v3081_v53 = vld [vmem:[%s3678_s1 + $0xe8] sm:$0xff]  }
  0x20   : > { %2850 = vmatmul.mubr.msk.bf16.vlgmr.msra.gmra.mxu1 %vm238_vm1, %v388_v42  ;;  %v664_v6 = vcombine.low %v645_v3, %v3312_v4  ;;  %v1034_v26 = vcombine.high %v2574_v20, %v2574_v20  ;;  %v1177_v32 = vrot.slane %v2591_v24, %v3233_v18  ;;  %v3078_v42 = vld [vmem:[%s3678_s1 + $0xf8] sm:$0xff]   ;;  %v3119_v61 = vld.sshfl [vmem:[%s3223_s6 + $0x8] sm:$0x5 pattern:$0x75316420] }
  0x21   : > { %2866 = vmatpush3.bf16.msra.mxu1 %v3060_v37  ;;  %2873 = vmatprep.mubr.msk.bf16.mxu1 %vm3146_vm0, %v3145_v1  ;;  %v3350_v23 = vsel %vm3247_vm2, %v906_v17, %v911_v19  ;;  %v2644_v3 = vld.sshfl [vmem:[%s3223_s6 + $0xc] sm:$0x10 pattern:$0x75316420]  ;;  %v1326_v8 = vrot.slane %v3119_v61, %v3233_v18  ;;  %v3092_v19 = vld [vmem:[%s3678_s1 + $0x120] sm:$0xff]  }
  0x22   : > { %2856 = vmatpush3.bf16.msra.mxu0 %v3059_v31  ;;  %2867 = vmatprep.subr.bf16.mxu1 %v3145_v1  ;;  %v671_v9 = vrot.slane %v664_v6, %v3233_v18  ;;  %v923_v28 = vcombine.low %v3260_v33, %v3350_v23  ;;  %v1170_v31 = vcombine.high %v2591_v24, %v2591_v24  ;;  %v3088_v6 = vld [vmem:[%s3678_s1 + $0x130] sm:$0xff]   ;;  %v3090_v12 = vld [vmem:[%s3678_s1 + $0x128] sm:$0xff]  }
  0x23   : > { %2857 = vmatprep.subr.bf16.mxu0 %v3145_v1  ;;  %v3373_v33 = vrot.slane %v1034_v26, %v3233_v18  ;;  %v3094_v24 = vld [vmem:[%s3678_s1 + $0x148] sm:$0xff]  }
  0x24   : > { %v678_v13 = vrot.slane %v671_v9, %v3233_v18  ;;  %v930_v36 = vrot.slane %v923_v28, %v3233_v18  ;;  %v1184_v37 = vrot.slane %v1170_v31, %v3233_v18  ;;  %v1583_v9 = vcombine.high %v2644_v3, %v2644_v3  ;;  %v3097_v31 = vld [vmem:[%s3678_s1 + $0x170] sm:$0xff]  }
  0x25   : > { %2868 = vmatpush3.bf16.msra.mxu1 %v3062_v46  ;;  %v1051_v39 = vcombine.low %v3277_v44, %v3373_v33  ;;  %v3079_v46 = vld [vmem:[%s3678_s1 + $0xc0] sm:$0xff]  }
  0x26   : > { %2858 = vmatpush3.bf16.msra.mxu0 %v3061_v38  ;;  %2869 = vmatprep.subr.bf16.mxu1 %v3145_v1  ;;  %v1185_v38 = vcombine.high %v1177_v32, %v1177_v32  ;;  %v937_v40 = vrot.slane %v930_v36, %v3233_v18  ;;  %v1196_v43 = vshrl.u32 %v1184_v37, 16  ;;  %v3478_v15 = vrot.slane %v1583_v9, %v3233_v18  ;;  %v3098_v37 = vld [vmem:[%s3678_s1 + $0x168] sm:$0xff]  }
  0x27   : > { %2859 = vmatprep.subr.bf16.mxu0 %v3145_v1  ;;  %v1058_v44 = vrot.slane %v1051_v39, %v3233_v18  ;;  %v3101_v39 = vld [vmem:[%s3678_s1 + $0x190] sm:$0xff]  }
  0x28   : > { %v1201_v45 = vshll.u32 %v1185_v38, 16 }
  0x29   : > { %2870 = vmatpush3.bf16.msra.mxu1 %v3064_v59  ;;  %v1065_v50 = vrot.slane %v1058_v44, %v3233_v18 }
  0x2a   : > { %2860 = vmatpush3.bf16.msra.mxu0 %v3063_v47  ;;  %2871 = vmatprep.subr.bf16.mxu1 %v3145_v1  ;;  %v2625_v47 = vld.sshfl [vmem:[%s3223_s6 + $0xc] sm:$0x11 pattern:$0x75316420]  ;;  %v3407_v49 = vsel %vm3247_vm2, %v1196_v43, %v1201_v45 }
  0x2b   : > { %2877 = vmatprep.subr.bf16.mxu0 %v3145_v1  ;;  %v1213_v52 = vcombine.low %v3312_v4, %v3407_v49  ;;  %v1430_v54 = vcombine.high %v2625_v47, %v2625_v47  ;;  %v1437_v58 = vrot.slane %v2625_v47, %v3233_v18  ;;  %v3087_v4 = vld [vmem:[%s3678_s1 + $0x100] sm:$0xff]   ;;  %v3120_v45 = vld.sshfl [vmem:[%s3223_s6 + $0xc] sm:$0x5 pattern:$0x75316420]  ;;  %v3103_v47 = vld [vmem:[%s3678_s1 + $0x1b8] sm:$0xff]  }
  0x2d   : > { %2862 = vmatmul.mubr.msk.bf16.vlgmr.msra.gmra.mxu0 %vm238_vm1, %v516_v63  ;;  %2872 = vmatpush3.bf16.msra.mxu1 %v3066_v7  ;;  %v1220_v56 = vrot.slane %v1213_v52, %v3233_v18  ;;  %v1444_v59 = vrot.slane %v1430_v54, %v3233_v18  ;;  %v3086_v63 = vld [vmem:[%s3678_s1 + $0x138] sm:$0xff]   ;;  %v1455_v0 = vshrl.u32 %v1437_v58, 16  ;;  %v3105_v52 = vld [vmem:[%s3678_s1 + $0x1b0] sm:$0xff]  }
  0x2e   : > { %2878 = vmatpush3.bf16.msra.mxu0 %v3065_v60  ;;  %2885 = vmatprep.mubr.msk.bf16.mxu0 %vm3146_vm0, %v3145_v1  ;;  %v3085_v60 = vld [vmem:[%s3678_s1 + $0x108] sm:$0xff]   ;;  %v2731_v54 = vld.sshfl [vmem:[%s3223_s6 + $0x10] sm:$0x12 pattern:$0x75316420] }
  0x2f   : > { %2879 = vmatprep.subr.bf16.mxu0 %v3145_v1  ;;  %2889 = vmatprep.subr.bf16.mxu1 %v3145_v1  ;;  %v1227_v62 = vrot.slane %v1220_v56, %v3233_v18  ;;  %v1460_v2 = vshll.u32 %v1444_v59, 16  ;;  %v3107_v59 = vld [vmem:[%s3678_s1 + $0x1a8] sm:$0xff]   ;;  %v2275_v61 = vrot.slane %v2731_v54, %v3233_v18 }
  0x30   : > { %2874 = vmatmul.mubr.msk.bf16.vlgmr.msra.gmra.mxu1 %vm238_vm1, %v678_v13 }
  0x31   : > { %2890 = vmatpush3.bf16.msra.mxu1 %v3069_v16  ;;  %2897 = vmatprep.mubr.msk.bf16.mxu1 %vm3146_vm0, %v3145_v1  ;;  %v3459_v7 = vsel %vm3247_vm2, %v1455_v0, %v1460_v2  ;;  %v3093_v16 = vld [vmem:[%s3678_s1 + $0x150] sm:$0xff]   ;;  %v3109_v2 = vld [vmem:[%s3678_s1 + $0x1a0] sm:$0xff]  }
  0x32   : > { %2880 = vmatpush3.bf16.msra.mxu0 %v3067_v5  ;;  %2891 = vmatprep.subr.bf16.mxu1 %v3145_v1  ;;  %v2661_v5 = vld.sshfl [vmem:[%s3223_s6 + $0xc] sm:$0x12 pattern:$0x75316420]  ;;  %v1472_v11 = vcombine.low %v3350_v23, %v3459_v7 }
  0x33   : > { %2881 = vmatprep.subr.bf16.mxu0 %v3145_v1  ;;  %v1719_v13 = vcombine.high %v2661_v5, %v2661_v5 }
  0x34   : > { %v1479_v17 = vrot.slane %v1472_v11, %v3233_v18 }
  0x35   : > { %2892 = vmatpush3.bf16.msra.mxu1 %v3071_v22  ;;  %v1733_v20 = vrot.slane %v1719_v13, %v3233_v18  ;;  %v1600_v22 = vcombine.low %v3373_v33, %v3478_v15  ;;  %v3114_v13 = vld [vmem:[%s3678_s1 + $0x1f0] sm:$0xff]  }
  0x36   : > { %2882 = vmatpush3.bf16.msra.mxu0 %v3068_v14  ;;  %2893 = vmatprep.subr.bf16.mxu1 %v3145_v1  ;;  %v1726_v14 = vrot.slane %v2661_v5, %v3233_v18  ;;  %v1486_v23 = vrot.slane %v1479_v17, %v3233_v18  ;;  %v3115_v17 = vld [vmem:[%s3678_s1 + $0x1e8] sm:$0xff]  }
  0x37   : > { %2883 = vmatprep.subr.bf16.mxu0 %v3145_v1  ;;  %v1745_v26 = vshrl.u32 %v1733_v20, 16  ;;  %v1607_v28 = vrot.slane %v1600_v22, %v3233_v18 }
  0x39   : > { %2894 = vmatpush3.bf16.msra.mxu1 %v3073_v29  ;;  %v3096_v29 = vld [vmem:[%s3678_s1 + $0x140] sm:$0xff]   ;;  %v1614_v33 = vrot.slane %v1607_v28, %v3233_v18 }
  0x3a   : > { %2884 = vmatpush3.bf16.msra.mxu0 %v3070_v21  ;;  %2895 = vmatprep.subr.bf16.mxu1 %v3145_v1  ;;  %v1734_v21 = vcombine.high %v1726_v14, %v1726_v14 }
  0x3b   : > { %2901 = vmatprep.subr.bf16.mxu0 %v3145_v1 }
  0x3d   : > { %2886 = vmatmul.mubr.msk.bf16.vlgmr.msra.gmra.mxu0 %vm238_vm1, %v777_v25  ;;  %2896 = vmatpush3.bf16.msra.mxu1 %v3075_v34  ;;  %v3095_v25 = vld [vmem:[%s3678_s1 + $0x178] sm:$0xff]   ;;  %v2695_v34 = vld.sshfl [vmem:[%s3223_s6 + $0x10] sm:$0x11 pattern:$0x75316420] }
  0x3e   : > { %2902 = vmatpush3.bf16.msra.mxu0 %v3074_v27  ;;  %2909 = vmatprep.mubr.msk.bf16.mxu0 %vm3146_vm0, %v3145_v1  ;;  %v1750_v27 = vshll.u32 %v1734_v21, 16  ;;  %v1979_v38 = vcombine.high %v2695_v34, %v2695_v34 }
  0x3f   : > { %2903 = vmatprep.subr.bf16.mxu0 %v3145_v1  ;;  %2913 = vmatprep.subr.bf16.mxu1 %v3145_v1 }
  0x40   : > { %2898 = vmatmul.mubr.msk.bf16.vlgmr.msra.gmra.mxu1 %vm238_vm1, %v937_v40  ;;  %v3514_v32 = vsel %vm3247_vm2, %v1745_v26, %v1750_v27  ;;  %v1993_v43 = vrot.slane %v1979_v38, %v3233_v18 }
  0x41   : > { %2914 = vmatpush3.bf16.msra.mxu1 %v3078_v42  ;;  %2921 = vmatprep.mubr.msk.bf16.mxu1 %vm3146_vm0, %v3145_v1  ;;  %v1762_v36 = vcombine.low %v3407_v49, %v3514_v32  ;;  %v1986_v42 = vrot.slane %v2695_v34, %v3233_v18 }
  0x42   : > { %2904 = vmatpush3.bf16.msra.mxu0 %v3076_v35  ;;  %2915 = vmatprep.subr.bf16.mxu1 %v3145_v1  ;;  %v3099_v35 = vld [vmem:[%s3678_s1 + $0x198] sm:$0xff]   ;;  %v2009_v49 = vshll.u32 %v1993_v43, 16 }
  0x43   : > { %2905 = vmatprep.subr.bf16.mxu0 %v3145_v1  ;;  %v1769_v40 = vrot.slane %v1762_v36, %v3233_v18 }
  0x45   : > { %2916 = vmatpush3.bf16.msra.mxu1 %v3080_v48  ;;  %v1776_v44 = vrot.slane %v1769_v40, %v3233_v18  ;;  %v2004_v48 = vshrl.u32 %v1986_v42, 16 }
  0x46   : > { %2906 = vmatpush3.bf16.msra.mxu0 %v3077_v41  ;;  %2917 = vmatprep.subr.bf16.mxu1 %v3145_v1  ;;  %v3100_v41 = vld [vmem:[%s3678_s1 + $0x160] sm:$0xff]  }
  0x47   : > { %2907 = vmatprep.subr.bf16.mxu0 %v3145_v1 }
  0x49   : > { %2918 = vmatpush3.bf16.msra.mxu1 %v3081_v53  ;;  %v2011_v53 = vsel %vm3247_vm2, %v2004_v48, %v2009_v49 }
  0x4a   : > { %2908 = vmatpush3.bf16.msra.mxu0 %v3079_v46  ;;  %2919 = vmatprep.subr.bf16.mxu1 %v3145_v1  ;;  %v3102_v46 = vld [vmem:[%s3678_s1 + $0x188] sm:$0xff]   ;;  %v2021_v58 = vcombine.low %v3459_v7, %v2011_v53 }
  0x4b   : > { %2925 = vmatprep.subr.bf16.mxu0 %v3145_v1  ;;  %v3111_v7 = vld [vmem:[%s3678_s1 + $0x1c8] sm:$0xff]  }
  0x4c   : > { %v2028_v0 = vrot.slane %v2021_v58, %v3233_v18 }
  0x4d   : > { %2910 = vmatmul.mubr.msk.bf16.vlgmr.msra.gmra.mxu0 %vm238_vm1, %v1065_v50  ;;  %2920 = vmatpush3.bf16.msra.mxu1 %v3083_v57  ;;  %v3104_v50 = vld [vmem:[%s3678_s1 + $0x180] sm:$0xff]   ;;  %v3108_v57 = vld [vmem:[%s3678_s1 + $0x1d8] sm:$0xff]  }
  0x4e   : > { %2926 = vmatpush3.bf16.msra.mxu0 %v3082_v51  ;;  %2933 = vmatprep.mubr.msk.bf16.mxu0 %vm3146_vm0, %v3145_v1  ;;  %v2714_v51 = vld.sshfl [vmem:[%s3223_s6 + $0x10] sm:$0x10 pattern:$0x75316420] }
  0x4f   : > { %2927 = vmatprep.subr.bf16.mxu0 %v3145_v1  ;;  %2937 = vmatprep.subr.bf16.mxu1 %v3145_v1  ;;  %v2132_v56 = vcombine.high %v2714_v51, %v2714_v51 }
  0x50   : > { %2922 = vmatmul.mubr.msk.bf16.vlgmr.msra.gmra.mxu1 %vm238_vm1, %v1227_v62 }
  0x51   : > { %2938 = vmatpush3.bf16.msra.mxu1 %v3086_v63  ;;  %2945 = vmatprep.mubr.msk.bf16.mxu1 %vm3146_vm0, %v3145_v1  ;;  %v2139_v62 = vrot.slane %v2132_v56, %v3233_v18  ;;  %v3110_v63 = vld [vmem:[%s3678_s1 + $0x1d0] sm:$0xff]  }
  0x52   : > { %2928 = vmatpush3.bf16.msra.mxu0 %v3084_v55  ;;  %2939 = vmatprep.subr.bf16.mxu1 %v3145_v1  ;;  %v1875_v55 = vrot.slane %v3120_v45, %v3233_v18 }
  0x53   : > { %2929 = vmatprep.subr.bf16.mxu0 %v3145_v1  ;;  %v2149_v5 = vcombine.low %v3478_v15, %v2139_v62 }
  0x55   : > { %2940 = vmatpush3.bf16.msra.mxu1 %v3088_v6  ;;  %v2035_v6 = vrot.slane %v2028_v0, %v3233_v18  ;;  %v2156_v11 = vrot.slane %v2149_v5, %v3233_v18 }
  0x56   : > { %2930 = vmatpush3.bf16.msra.mxu0 %v3085_v60  ;;  %2941 = vmatprep.subr.bf16.mxu1 %v3145_v1  ;;  %v2268_v60 = vcombine.high %v2731_v54, %v2731_v54 }
  0x57   : > { %2931 = vmatprep.subr.bf16.mxu0 %v3145_v1  ;;  %v2163_v15 = vrot.slane %v2156_v11, %v3233_v18 }
  0x58   : > { %v2282_v3 = vrot.slane %v2268_v60, %v3233_v18 }
  0x59   : > { %2942 = vmatpush3.bf16.msra.mxu1 %v3090_v12  ;;  %v3113_v12 = vld [vmem:[%s3678_s1 + $0x1c0] sm:$0xff]  }
  0x5a   : > { %2932 = vmatpush3.bf16.msra.mxu0 %v3087_v4  ;;  %2943 = vmatprep.subr.bf16.mxu1 %v3145_v1  ;;  %v2283_v4 = vcombine.high %v2275_v61, %v2275_v61  ;;  %v2294_v9 = vshrl.u32 %v2282_v3, 16 }
  0x5b   : > { %2949 = vmatprep.subr.bf16.mxu0 %v3145_v1 }
  0x5d   : > { %2934 = vmatmul.mubr.msk.bf16.vlgmr.msra.gmra.mxu0 %vm238_vm1, %v1326_v8  ;;  %2944 = vmatpush3.bf16.msra.mxu1 %v3092_v19  ;;  %v3112_v8 = vld [vmem:[%s3678_s1 + $0x1f8] sm:$0xff]   ;;  %v3116_v19 = vld [vmem:[%s3678_s1 + $0x1e0] sm:$0xff]  }
  0x5e   : > { %2950 = vmatpush3.bf16.msra.mxu0 %v3091_v10  ;;  %2957 = vmatprep.mubr.msk.bf16.mxu0 %vm3146_vm0, %v3145_v1  ;;  %v2299_v10 = vshll.u32 %v2283_v4, 16 }
  0x5f   : > { %2951 = vmatprep.subr.bf16.mxu0 %v3145_v1  ;;  %2961 = vmatprep.subr.bf16.mxu1 %v3145_v1 }
  0x60   : > { %2946 = vmatmul.mubr.msk.bf16.vlgmr.msra.gmra.mxu1 %vm238_vm1, %v1486_v23  ;;  %v2301_v14 = vsel %vm3247_vm2, %v2294_v9, %v2299_v10 }
  0x61   : > { %2962 = vmatpush3.bf16.msra.mxu1 %v3095_v25  ;;  %2969 = vmatprep.mubr.msk.bf16.mxu1 %vm3146_vm0, %v3145_v1 }
  0x62   : > { %2952 = vmatpush3.bf16.msra.mxu0 %v3093_v16  ;;  %2963 = vmatprep.subr.bf16.mxu1 %v3145_v1  ;;  %v2311_v16 = vcombine.low %v3514_v32, %v2301_v14 }
  0x63   : > { %2953 = vmatprep.subr.bf16.mxu0 %v3145_v1 }
  0x64   : > { %v2318_v30 = vrot.slane %v2311_v16, %v3233_v18 }
  0x65   : > { %2964 = vmatpush3.bf16.msra.mxu1 %v3097_v31 }
  0x66   : > { %2954 = vmatpush3.bf16.msra.mxu0 %v3094_v24  ;;  %2965 = vmatprep.subr.bf16.mxu1 %v3145_v1  ;;  %v2325_v20 = vrot.slane %v2318_v30, %v3233_v18 }
  0x67   : > { %2955 = vmatprep.subr.bf16.mxu0 %v3145_v1 }
  0x69   : > { %2966 = vmatpush3.bf16.msra.mxu1 %v3098_v37 }
  0x6a   : > { %2956 = vmatpush3.bf16.msra.mxu0 %v3096_v29  ;;  %2967 = vmatprep.subr.bf16.mxu1 %v3145_v1 }
  0x6b   : > { %2973 = vmatprep.subr.bf16.mxu0 %v3145_v1 }
  0x6d   : > { %2958 = vmatmul.mubr.msk.bf16.vlgmr.msra.gmra.mxu0 %vm238_vm1, %v1614_v33  ;;  %2968 = vmatpush3.bf16.msra.mxu1 %v3100_v41 }
  0x6e   : > { %2974 = vmatpush3.bf16.msra.mxu0 %v3099_v35  ;;  %2981 = vmatprep.mubr.msk.bf16.mxu0 %vm3146_vm0, %v3145_v1 }
  0x6f   : > { %2975 = vmatprep.subr.bf16.mxu0 %v3145_v1  ;;  %2985 = vmatprep.subr.bf16.mxu1 %v3145_v1 }
  0x70   : > { %2970 = vmatmul.mubr.msk.bf16.vlgmr.msra.gmra.mxu1 %vm238_vm1, %v1776_v44 }
  0x71   : > { %2986 = vmatpush3.bf16.msra.mxu1 %v3103_v47  ;;  %2993 = vmatprep.mubr.msk.bf16.mxu1 %vm3146_vm0, %v3145_v1 }
  0x72   : > { %2976 = vmatpush3.bf16.msra.mxu0 %v3101_v39  ;;  %2987 = vmatprep.subr.bf16.mxu1 %v3145_v1 }
  0x73   : > { %2977 = vmatprep.subr.bf16.mxu0 %v3145_v1 }
  0x75   : > { %2988 = vmatpush3.bf16.msra.mxu1 %v3105_v52 }
  0x76   : > { %2978 = vmatpush3.bf16.msra.mxu0 %v3102_v46  ;;  %2989 = vmatprep.subr.bf16.mxu1 %v3145_v1 }
  0x77   : > { %2979 = vmatprep.subr.bf16.mxu0 %v3145_v1 }
  0x79   : > { %2990 = vmatpush3.bf16.msra.mxu1 %v3107_v59 }
  0x7a   : > { %2980 = vmatpush3.bf16.msra.mxu0 %v3104_v50  ;;  %2991 = vmatprep.subr.bf16.mxu1 %v3145_v1 }
  0x7b   : > { %2997 = vmatprep.subr.bf16.mxu0 %v3145_v1 }
  0x7d   : > { %2982 = vmatmul.mubr.msk.bf16.vlgmr.msra.gmra.mxu0 %vm238_vm1, %v1875_v55  ;;  %2992 = vmatpush3.bf16.msra.mxu1 %v3109_v2 }
  0x7e   : > { %2998 = vmatpush3.bf16.msra.mxu0 %v3108_v57  ;;  %3005 = vmatprep.mubr.msk.bf16.mxu0 %vm3146_vm0, %v3145_v1 }
  0x7f   : > { %2999 = vmatprep.subr.bf16.mxu0 %v3145_v1  ;;  %3009 = vmatprep.subr.bf16.mxu1 %v3145_v1 }
  0x80   : > { %2994 = vmatmul.mubr.msk.bf16.vlgmr.msra.gmra.mxu1 %vm238_vm1, %v2035_v6 }
  0x81   : > { %3010 = vmatpush3.bf16.msra.mxu1 %v3112_v8  ;;  %3017 = vmatprep.mubr.msk.bf16.mxu1 %vm3146_vm0, %v3145_v1  ;;  %vm282_vm0 = vcmask 60416  }
  0x82   : > { %3000 = vmatpush3.bf16.msra.mxu0 %v3110_v63  ;;  %3011 = vmatprep.subr.bf16.mxu1 %v3145_v1 }
  0x83   : > { %3001 = vmatprep.subr.bf16.mxu0 %v3145_v1 }
  0x85   : > { %3012 = vmatpush3.bf16.msra.mxu1 %v3114_v13 }
  0x86   : > { %3002 = vmatpush3.bf16.msra.mxu0 %v3111_v7  ;;  %3013 = vmatprep.subr.bf16.mxu1 %v3145_v1 }
  0x87   : > { %3003 = vmatprep.subr.bf16.mxu0 %v3145_v1 }
  0x89   : > { %3014 = vmatpush3.bf16.msra.mxu1 %v3115_v17 }
  0x8a   : > { %3004 = vmatpush3.bf16.msra.mxu0 %v3113_v12  ;;  %3015 = vmatprep.subr.bf16.mxu1 %v3145_v1 }
  0x8d   : > { %3006 = vmatmul.mubr.msk.bf16.vlgmr.msra.gmra.mxu0 %vm238_vm1, %v2163_v15  ;;  %3016 = vmatpush3.bf16.msra.mxu1 %v3116_v19 }
  0x90   : > { %3018 = vmatmul.mubr.msk.bf16.vlgmr.msra.gmra.mxu1 %vm238_vm1, %v2325_v20  ;;  %vm2400_vm1 = vcmask 57344  }
  0x91   : > { %2401 = vst.msk [vmem:[%s3640_s16] sm:$0x1] %vm2400_vm1, %v3145_v1 }
  0xdd   : > { %v276_v21 = vpop.f32.mrf.mxu0 }
  0xde   : > { %283 = vst.msk [vmem:[#allocation2] sm:$0xf] %vm282_vm0, %v276_v21 }
  0xdf   : > { %v2839_v22 = vpop.f32.mrf.mxu0 }
  0xe0   : > { %v450_v26 = vpop.f32.mrf.mxu1 }
  0xe1   : > { %v279_v23 = vpop.f32.mrf.mxu0 }
  0xe2   : > { %v2851_v28 = vpop.f32.mrf.mxu1 }
  0xe3   : > { %v2840_v24 = vpop.f32.mrf.mxu0 }
  0xe4   : > { %v453_v29 = vpop.f32.mrf.mxu1 }
  0xe5   : > { %v456_v25 = vld [vmem:[#allocation2] sm:$0xf] }
  0xe6   : > { %v457_v27 = vadd.f32 %v456_v25, %v450_v26  ;;  %v2852_v31 = vpop.f32.mrf.mxu1 }
  0xe8   : > { %458 = vst.msk [vmem:[#allocation2] sm:$0xf] %vm282_vm0, %v457_v27 }
  0xed   : > { %v578_v18 = vpop.f32.mrf.mxu0 }
  0xef   : > { %v2863_v32 = vpop.f32.mrf.mxu0  ;;  %v584_v34 = vld [vmem:[#allocation2] sm:$0xf] }
  0xf0   : > { %v585_v33 = vadd.f32 %v584_v34, %v578_v18  ;;  %v740_v37 = vpop.f32.mrf.mxu1 }
  0xf1   : > { %v581_v35 = vpop.f32.mrf.mxu0 }
  0xf2   : > { %586 = vst.msk [vmem:[#allocation2] sm:$0xf] %vm282_vm0, %v585_v33  ;;  %v2875_v38 = vpop.f32.mrf.mxu1 }
  0xf3   : > { %v2864_v36 = vpop.f32.mrf.mxu0 }
  0xf4   : > { %v743_v40 = vpop.f32.mrf.mxu1 }
  0xf6   : > { %v2876_v42 = vpop.f32.mrf.mxu1 }
  0xf9   : > { %v746_v39 = vld [vmem:[#allocation2] sm:$0xf] }
  0xfa   : > { %v747_v41 = vadd.f32 %v746_v39, %v740_v37 }
  0xfc   : > { %748 = vst.msk [vmem:[#allocation2] sm:$0xf] %vm282_vm0, %v747_v41 }
  0xfd   : > { %v839_v43 = vpop.f32.mrf.mxu0 }
  0xff   : > { %v2887_v45 = vpop.f32.mrf.mxu0 }
 0x100   : > { %v999_v49 = vpop.f32.mrf.mxu1 }
 0x101   : > { %v842_v44 = vpop.f32.mrf.mxu0 }
 0x102   : > { %v2899_v50 = vpop.f32.mrf.mxu1 }
 0x103   : > { %v2888_v46 = vpop.f32.mrf.mxu0  ;;  %v845_v47 = vld [vmem:[#allocation2] sm:$0xf] }
 0x104   : > { %v846_v48 = vadd.f32 %v845_v47, %v839_v43  ;;  %v1002_v51 = vpop.f32.mrf.mxu1 }
 0x106   : > { %847 = vst.msk [vmem:[#allocation2] sm:$0xf] %vm282_vm0, %v846_v48  ;;  %v2900_v52 = vpop.f32.mrf.mxu1 }
 0x10d   : > { %v1127_v1 = vpop.f32.mrf.mxu0  ;;  %v1005_v53 = vld [vmem:[#allocation2] sm:$0xf] }
 0x10e   : > { %v1006_v54 = vadd.f32 %v1005_v53, %v999_v49 }
 0x10f   : > { %v2911_v55 = vpop.f32.mrf.mxu0 }
 0x110   : > { %1007 = vst.msk [vmem:[#allocation2] sm:$0xf] %vm282_vm0, %v1006_v54  ;;  %v1289_v58 = vpop.f32.mrf.mxu1 }
 0x111   : > { %v1130_v56 = vpop.f32.mrf.mxu0 }
 0x112   : > { %v2923_v60 = vpop.f32.mrf.mxu1 }
 0x113   : > { %v2912_v57 = vpop.f32.mrf.mxu0 }
 0x114   : > { %v1292_v62 = vpop.f32.mrf.mxu1  ;;  %v2402_v57 = vld [vmem:[%s3640_s16] sm:$0x1] }
 0x116   : > { %v2924_v63 = vpop.f32.mrf.mxu1 }
 0x117   : > { %v1133_v59 = vld [vmem:[#allocation2] sm:$0xf] }
 0x118   : > { %v1134_v61 = vadd.f32 %v1133_v59, %v1127_v1 }
 0x11a   : > { %1135 = vst.msk [vmem:[#allocation2] sm:$0xf] %vm282_vm0, %v1134_v61  ;;  %v2419_v61 = vld [vmem:[%s3679_s2] sm:$0x1] }
 0x11d   : > { %v1388_v0 = vpop.f32.mrf.mxu0 }
 0x11f   : > { %v2935_v2 = vpop.f32.mrf.mxu0 }
 0x120   : > { %v1548_v7 = vpop.f32.mrf.mxu1 }
 0x121   : > { %v1391_v3 = vpop.f32.mrf.mxu0  ;;  %v1295_v4 = vld [vmem:[#allocation2] sm:$0xf] }
 0x122   : > { %v1296_v5 = vadd.f32 %v1295_v4, %v1289_v58  ;;  %v2947_v8 = vpop.f32.mrf.mxu1 }
 0x123   : > { %v2936_v6 = vpop.f32.mrf.mxu0 }
 0x124   : > { %1297 = vst.msk [vmem:[#allocation2] sm:$0xf] %vm282_vm0, %v1296_v5  ;;  %v1551_v9 = vpop.f32.mrf.mxu1 }
 0x126   : > { %v2948_v11 = vpop.f32.mrf.mxu1 }
 0x12b   : > { %v1394_v10 = vld [vmem:[#allocation2] sm:$0xf] }
 0x12c   : > { %v1395_v12 = vadd.f32 %v1394_v10, %v1388_v0 }
 0x12d   : > { %v1676_v13 = vpop.f32.mrf.mxu0 }
 0x12e   : > { %1396 = vst.msk [vmem:[#allocation2] sm:$0xf] %vm282_vm0, %v1395_v12 }
 0x12f   : > { %v2959_v14 = vpop.f32.mrf.mxu0 }
 0x130   : > { %v1838_v30 = vpop.f32.mrf.mxu1 }
 0x131   : > { %v1679_v15 = vpop.f32.mrf.mxu0 }
 0x132   : > { %v2971_v20 = vpop.f32.mrf.mxu1 }
 0x133   : > { %v2960_v16 = vpop.f32.mrf.mxu0 }
 0x134   : > { %v1841_v21 = vpop.f32.mrf.mxu1 }
 0x135   : > { %v1554_v17 = vld [vmem:[#allocation2] sm:$0xf] }
 0x136   : > { %v1555_v19 = vadd.f32 %v1554_v17, %v1548_v7  ;;  %v2972_v22 = vpop.f32.mrf.mxu1 }
 0x138   : > { %1556 = vst.msk [vmem:[#allocation2] sm:$0xf] %vm282_vm0, %v1555_v19 }
 0x13d   : > { %v1937_v23 = vpop.f32.mrf.mxu0 }
 0x13f   : > { %v2983_v24 = vpop.f32.mrf.mxu0  ;;  %v1682_v25 = vld [vmem:[#allocation2] sm:$0xf] }
 0x140   : > { %v1683_v26 = vadd.f32 %v1682_v25, %v1676_v13  ;;  %v2097_v29 = vpop.f32.mrf.mxu1 }
 0x141   : > { %v1940_v27 = vpop.f32.mrf.mxu0 }
 0x142   : > { %1684 = vst.msk [vmem:[#allocation2] sm:$0xf] %vm282_vm0, %v1683_v26  ;;  %v2995_v31 = vpop.f32.mrf.mxu1 }
 0x143   : > { %v2984_v28 = vpop.f32.mrf.mxu0 }
 0x144   : > { %v2100_v32 = vpop.f32.mrf.mxu1 }
 0x146   : > { %v2996_v33 = vpop.f32.mrf.mxu1 }
 0x149   : > { %v1844_v18 = vld [vmem:[#allocation2] sm:$0xf] }
 0x14a   : > { %v1845_v34 = vadd.f32 %v1844_v18, %v1838_v30 }
 0x14c   : > { %1846 = vst.msk [vmem:[#allocation2] sm:$0xf] %vm282_vm0, %v1845_v34 }
 0x14d   : > { %v2225_v35 = vpop.f32.mrf.mxu0 }
 0x14f   : > { %v3007_v36 = vpop.f32.mrf.mxu0 }
 0x150   : > { %v2387_v41 = vpop.f32.mrf.mxu1 }
 0x151   : > { %v2228_v37 = vpop.f32.mrf.mxu0 }
 0x152   : > { %v3019_v42 = vpop.f32.mrf.mxu1 }
 0x153   : > { %v3008_v38 = vpop.f32.mrf.mxu0  ;;  %v1943_v39 = vld [vmem:[#allocation2] sm:$0xf] }
 0x154   : > { %v1944_v40 = vadd.f32 %v1943_v39, %v1937_v23  ;;  %v2390_v43 = vpop.f32.mrf.mxu1 }
 0x156   : > { %1945 = vst.msk [vmem:[#allocation2] sm:$0xf] %vm282_vm0, %v1944_v40  ;;  %v3020_v45 = vpop.f32.mrf.mxu1 }
 0x15d   : > { %v2103_v44 = vld [vmem:[#allocation2] sm:$0xf] }
 0x15e   : > { %v2104_v46 = vadd.f32 %v2103_v44, %v2097_v29 }
 0x160   : > { %2105 = vst.msk [vmem:[#allocation2] sm:$0xf] %vm282_vm0, %v2104_v46 }
 0x167   : > { %v2231_v47 = vld [vmem:[#allocation2] sm:$0xf] }
 0x168   : > { %v2232_v48 = vadd.f32 %v2231_v47, %v2225_v35 }
 0x16a   : > { %2233 = vst.msk [vmem:[#allocation2] sm:$0xf] %vm282_vm0, %v2232_v48 }
 0x171   : > { %v2393_v49 = vld [vmem:[#allocation2] sm:$0xf] }
 0x172   : > { %v2394_v50 = vadd.f32 %v2393_v49, %v2387_v41 }
 0x174   : > { %2395 = vst.msk [vmem:[#allocation2] sm:$0xf] %vm282_vm0, %v2394_v50 }
 0x17b   : > { %v2403_v51 = vld [vmem:[#allocation2] sm:$0xf] }
 0x17c   : > { %v2404_v52 = vsel %vm282_vm0, %v2403_v51, 0.0 }
 0x17d   : > { %v2405_v1 = vrot.slane %v2404_v52, 4 }
 0x17f   : > { %v2406_v53 = vadd.f32 %v2405_v1, %v2404_v52 }
 0x181   : > { %v2407_v54 = vrot.slane %v2406_v53, 2 }
 0x183   : > { %v2408_v55 = vadd.f32 %v2407_v54, %v2406_v53 }
 0x185   : > { %v2409_v56 = vrot.slane %v2408_v55, 1 }
 0x187   : > { %v2410_v58 = vadd.f32 %v2409_v56, %v2408_v55 }
 0x189   : > { %v2411_v59 = vadd.f32 %v2410_v58, %v2402_v57 }
 0x18b   : > { %2413 = vst.msk [vmem:[%s3640_s16] sm:$0x1] %vm2400_vm1, %v2411_v59 }
 0x192   : > { %v2417_v60 = vld [vmem:[%s3640_s16] sm:$0x1] }
 0x193   : > { %v2418_v62 = vmul.f32 0.25, %v2417_v60 }
 0x195   : > { %v2420_v63 = vadd.f32 %v2419_v61, %v2418_v62 }
 0x197   : > { %2421 = vst.msk [vmem:[%s3640_s16] sm:$0x1] %vm2400_vm1, %v2420_v63 }
 0x198 PF: > { %s13_s14 = sadd.s32 1, %s3143_s14   ;;  %s3683_s12 = smov %s3139_s13 }
 0x199   : > { %p10_p5 = scmp.ge.s32.totalorder %s13_s14, 4   ;;  %s3684_s13 = smov %s3686_s15 }
 0x19b   :  { %12 = sbr.rel (!%p10_p5) target bundleno = 2 (0x2), region = 88 }

</bundles_post_ra>
